<compile_context>
chip_gen: v6e
topology: v6e:2x2x1
jax: 0.10.0
libtpu: 0.0.40
codegen_flags: <defaults>
</compile_context>

<pallas_src>
import functools

import jax
import jax.numpy as jnp
import numpy as np
from jax.experimental import pallas as pl
from jax.experimental.pallas import tpu as pltpu

WEIGHT_DTYPE = jnp.float32   # set to jnp.bfloat16 on v6e/v7x for 2x weight DMA + MXU rate
MAX_IMAGES_PER_STEP = 8      # conv batch block; ~1 MiB VMEM per extra image at 16x16x128


# ----------------------------------------------------------------------------
# Kernel 1: fused conv1+bn1+relu -> conv2+bn2+relu for a block of BB images.
# Layout: channels on sublanes, pixel positions on lanes (lane-dense).
# ----------------------------------------------------------------------------
def fused_conv_kernel(p1_ref, mask_ref, w1t_ref, b1_ref, w2t_ref, b2_ref,
                      o_ref, *, W, HW, BB):
    # p1_ref:   (9, BB*HW)     conv1 im2col patches, taps on sublanes
    # mask_ref: (9, 1, BB*HW)  0/1 validity per tap (SAME-padding border)
    # w1t_ref:  (C1, 9)        conv1 weight^T, BN1 scale folded in
    # b1_ref:   (C1, 1)        folded BN1 bias (column -> lane broadcast)
    # w2t_ref:  (9, C2, C1)    conv2 weight^T per tap, BN2 scale folded in
    # b2_ref:   (C2, 1)        folded BN2 bias
    # o_ref:    (BB, C2, HW)   output block (per-image CHW layout)
    L = BB * HW

    # conv1 + bn1 + relu: one (C1, 9) @ (9, BB*HW) matmul.
    h1 = jnp.dot(w1t_ref[...], p1_ref[...], preferred_element_type=jnp.float32)
    h1 = jnp.maximum(h1 + b1_ref[...], 0.0)                       # (C1, L)

    # conv2 + bn2 + relu: 9 accumulated (C2, C1) @ (C1, L) matmuls over
    # lane-rolled, boundary-masked views of h1.  roll convention matches
    # jnp.roll: result[:, i] = x[:, (i - shift) % L], so shift = -delta.
    wdt = w2t_ref.dtype
    h2 = None
    for ky in range(3):
        for kx in range(3):
            tap = ky * 3 + kx
            delta = (ky - 1) * W + (kx - 1)
            src = h1 if delta == 0 else pltpu.roll(h1, shift=(-delta) % L, axis=1)
            if not (ky == 1 and kx == 1):        # center tap's mask is all ones
                src = src * mask_ref[tap]        # (1, L) sublane-broadcast mask
            contrib = jnp.dot(w2t_ref[tap], src.astype(wdt),
                              preferred_element_type=jnp.float32)  # (C2, L)
            h2 = contrib if h2 is None else h2 + contrib
    h2 = jnp.maximum(h2 + b2_ref[...], 0.0)

    # Per-image writeback; lane offsets b*HW are multiples of 128.
    for b in range(BB):
        o_ref[b] = h2[:, b * HW:(b + 1) * HW]


def conv_stack(p1, masks, w1t, b1c, w2t, b2c, H, W, BB, B_pad):
    HW = H * W
    C1 = w1t.shape[0]
    C2 = w2t.shape[1]
    L = BB * HW
    assert B_pad % BB == 0
    assert BB == B_pad or L % 128 == 0, "batch block must form a lane-aligned tile"
    kern = functools.partial(fused_conv_kernel, W=W, HW=HW, BB=BB)
    return pl.pallas_call(
        kern,
        out_shape=jax.ShapeDtypeStruct((B_pad, C2, HW), jnp.float32),
        grid_spec=pltpu.PrefetchScalarGridSpec(
            num_scalar_prefetch=0,
            grid=(B_pad // BB,),
            in_specs=[
                pl.BlockSpec((9, L), lambda i: (0, i)),
                pl.BlockSpec((9, 1, L), lambda i: (0, 0, 0)),
                pl.BlockSpec((C1, 9), lambda i: (0, 0)),
                pl.BlockSpec((C1, 1), lambda i: (0, 0)),
                pl.BlockSpec((9, C2, C1), lambda i: (0, 0, 0)),
                pl.BlockSpec((C2, 1), lambda i: (0, 0)),
            ],
            out_specs=pl.BlockSpec((BB, C2, HW), lambda i: (i, 0, 0)),
        ),
        compiler_params=pltpu.CompilerParams(dimension_semantics=("parallel",)),
    )(p1, masks, w1t, b1c, w2t, b2c)


# ----------------------------------------------------------------------------
# Kernel 2: classifier  y = x @ W^T + b  with lane-dense (N, K) weight tiles,
# K-tiled reduction (VMEM accumulator) and a parallel batch-block axis.
# ----------------------------------------------------------------------------
def linear_kernel(x_ref, wt_ref, b_ref, o_ref, acc_ref):
    k = pl.program_id(1)

    @pl.when(k == 0)
    def _():
        acc_ref[...] = jnp.zeros_like(acc_ref)

    acc_ref[...] += jax.lax.dot_general(
        x_ref[...].astype(wt_ref.dtype), wt_ref[...],
        dimension_numbers=(((1,), (1,)), ((), ())),   # contract last dims: x @ W^T
        preferred_element_type=jnp.float32)

    @pl.when(k == pl.num_programs(1) - 1)
    def _():
        o_ref[...] = acc_ref[...] + b_ref[...]


def _largest_divisor_tile(K):
    for c in (8192, 4096, 2048, 1024, 512, 256, 128):
        if K % c == 0:
            return c
    return K


def linear_ktiled(x, wt, b_row, bb):
    B, K = x.shape
    N = wt.shape[0]
    tk = _largest_divisor_tile(K)
    assert B % bb == 0
    return pl.pallas_call(
        linear_kernel,
        out_shape=jax.ShapeDtypeStruct((B, N), jnp.float32),
        grid_spec=pltpu.PrefetchScalarGridSpec(
            num_scalar_prefetch=0,
            grid=(B // bb, K // tk),
            in_specs=[
                pl.BlockSpec((bb, tk), lambda i, k: (i, k)),
                pl.BlockSpec((N, tk), lambda i, k: (0, k)),
                pl.BlockSpec((1, N), lambda i, k: (0, 0)),
            ],
            out_specs=pl.BlockSpec((bb, N), lambda i, k: (i, 0)),
            scratch_shapes=[pltpu.VMEM((bb, N), jnp.float32)],
        ),
        compiler_params=pltpu.CompilerParams(
            dimension_semantics=("parallel", "arbitrary")),
    )(x, wt, b_row)


# ----------------------------------------------------------------------------
# Parameter prep (trace-time): fold eval-mode BN into conv weights, transpose
# weights into the kernel's channel-on-sublane layout.
# ----------------------------------------------------------------------------
def prepare_params(raw, eps=1e-5):
    s1 = raw["g1"] / jnp.sqrt(raw["v1"] + eps)
    b1 = raw["be1"] + s1 * (raw["cb1"] - raw["m1"])
    s2 = raw["g2"] / jnp.sqrt(raw["v2"] + eps)
    b2 = raw["be2"] + s2 * (raw["cb2"] - raw["m2"])

    C1 = raw["w1"].shape[-1]
    C2 = raw["w2"].shape[-1]
    # weights stored HWIO; fold per-output-channel BN scale, then transpose so
    # output channels sit on sublanes.
    w1t = (raw["w1"] * s1).reshape(9, C1).T                              # (C1, 9)
    w2t = jnp.transpose((raw["w2"] * s2).reshape(9, -1, C2), (0, 2, 1))  # (9, C2, C1)
    w2t = w2t.astype(WEIGHT_DTYPE)

    # classifier: torch CHW-flatten order == the kernel's (B, C2, HW) flatten,
    # so no permutation; store transposed (N, K) for lane-dense K-tile DMA.
    wct = raw["wc"].T.astype(WEIGHT_DTYPE)                               # (N, K)
    return dict(w1t=w1t, b1c=b1.reshape(C1, 1),
                w2t=w2t, b2c=b2.reshape(C2, 1),
                wct=wct, bc_row=raw["bc"].reshape(1, -1))


def im2col_taps_T(x_bhw, H, W):
    """(B, H, W) single-channel images -> (9, B*H*W) SAME-padded 3x3 taps."""
    B = x_bhw.shape[0]
    xp = jnp.pad(x_bhw, ((0, 0), (1, 1), (1, 1)))
    rows = [xp[:, ky:ky + H, kx:kx + W].reshape(B * H * W)
            for ky in range(3) for kx in range(3)]
    return jnp.stack(rows, axis=0)


def make_tap_masks(H, W, BB):
    """(9, 1, BB*H*W) 0/1 masks marking in-bounds neighbours per 3x3 tap."""
    p = np.arange(H * W)
    h, w = p // W, p % W
    m = np.zeros((9, H * W), np.float32)
    for ky in range(3):
        for kx in range(3):
            ok = ((h + ky - 1 >= 0) & (h + ky - 1 < H) &
                  (w + kx - 1 >= 0) & (w + kx - 1 < W))
            m[ky * 3 + kx] = ok.astype(np.float32)
    return jnp.asarray(np.tile(m, (1, BB)).reshape(9, 1, BB * H * W))


def convnet_forward(x_nchw, params):
    B, _, H, W = x_nchw.shape
    HW = H * W
    C2 = params["w2t"].shape[1]

    BB = min(B, MAX_IMAGES_PER_STEP)
    B_pad = ((B + BB - 1) // BB) * BB

    x = x_nchw[:, 0, :, :].astype(jnp.float32)                  # (B, H, W), 1 channel
    if B_pad != B:
        x = jnp.pad(x, ((0, B_pad - B), (0, 0), (0, 0)))

    p1 = im2col_taps_T(x, H, W)                                 # (9, B_pad*HW), lane-dense
    masks = make_tap_masks(H, W, BB)                            # (9, 1, BB*HW)

    h2 = conv_stack(p1, masks, params["w1t"], params["b1c"],
                    params["w2t"], params["b2c"], H, W, BB, B_pad)  # (B_pad, C2, HW)
    feat = h2.reshape(B_pad, C2 * HW)                           # free reshape, CHW order
    logits = linear_ktiled(feat, params["wct"], params["bc_row"], BB)
    return logits[:B]


# ----------------------------------------------------------------------------
# Pure-JAX reference (lax conv, explicit BN) for correctness checking.
# ----------------------------------------------------------------------------
def reference_forward(x_nchw, raw, eps=1e-5):
    x = jnp.transpose(x_nchw, (0, 2, 3, 1)).astype(jnp.float32)

    def block(h, w, cb, gamma, beta, mean, var):
        y = jax.lax.conv_general_dilated(
            h, w, window_strides=(1, 1), padding="SAME",
            dimension_numbers=("NHWC", "HWIO", "NHWC")) + cb
        y = (y - mean) / jnp.sqrt(var + eps) * gamma + beta
        return jnp.maximum(y, 0.0)

    h1 = block(x, raw["w1"], raw["cb1"], raw["g1"], raw["be1"], raw["m1"], raw["v1"])
    h2 = block(h1, raw["w2"], raw["cb2"], raw["g2"], raw["be2"], raw["m2"], raw["v2"])
    feat = jnp.transpose(h2, (0, 3, 1, 2)).reshape(x_nchw.shape[0], -1)
    return feat @ raw["wc"] + raw["bc"]


if __name__ == "__main__":
    B, H, W, n_classes = 2, 16, 16, 10
    key = jax.random.PRNGKey(0)
    ks = jax.random.split(key, 16)

    # conv1: 1 -> 64, conv2: 64 -> 128 (weights stored HWIO)
    w1 = 0.1 * jax.random.normal(ks[0], (3, 3, 1, 64), jnp.float32)
    cb1 = 0.1 * jax.random.normal(ks[1], (64,), jnp.float32)
    g1 = 1.0 + 0.1 * jax.random.normal(ks[2], (64,), jnp.float32)
    be1 = 0.1 * jax.random.normal(ks[3], (64,), jnp.float32)
    m1 = 0.1 * jax.random.normal(ks[4], (64,), jnp.float32)
    v1 = 1.0 + 0.1 * jnp.abs(jax.random.normal(ks[5], (64,), jnp.float32))

    w2 = 0.05 * jax.random.normal(ks[6], (3, 3, 64, 128), jnp.float32)
    cb2 = 0.1 * jax.random.normal(ks[7], (128,), jnp.float32)
    g2 = 1.0 + 0.1 * jax.random.normal(ks[8], (128,), jnp.float32)
    be2 = 0.1 * jax.random.normal(ks[9], (128,), jnp.float32)
    m2 = 0.1 * jax.random.normal(ks[10], (128,), jnp.float32)
    v2 = 1.0 + 0.1 * jnp.abs(jax.random.normal(ks[11], (128,), jnp.float32))

    # classifier: (H*W*128) -> n_classes, torch CHW-flatten order, (K, N)
    wc = 0.01 * jax.random.normal(ks[12], (H * W * 128, n_classes), jnp.float32)
    bc = 0.01 * jax.random.normal(ks[13], (n_classes,), jnp.float32)

    raw = dict(w1=w1, cb1=cb1, g1=g1, be1=be1, m1=m1, v1=v1,
               w2=w2, cb2=cb2, g2=g2, be2=be2, m2=m2, v2=v2,
               wc=wc, bc=bc)
    params = prepare_params(raw)

    # input: NCHW, 1 channel (as required by Conv2d(1, 64, ...))
    x = jax.random.normal(ks[14], (B, 1, H, W), jnp.float32)

    fwd = jax.jit(convnet_forward)
    out = jax.block_until_ready(fwd(x, params))
    ref = jax.block_until_ready(reference_forward(x, raw))

    assert out.shape == (B, n_classes)
    assert jnp.allclose(out, ref, atol=2e-3, rtol=2e-3), (
        f"max abs err {jnp.max(jnp.abs(out - ref))}")
    print("KERNEL_OK")
</pallas_src>

<mosaic_0001>
module attributes {stable_mosaic.version = 11 : i64} {
  func.func @fused_conv_kernel(%arg0: i32, %arg1: memref<9x512xf32, #tpu.memory_space<vmem>>, %arg2: memref<9x1x512xf32, #tpu.memory_space<vmem>>, %arg3: memref<64x9xf32, #tpu.memory_space<vmem>>, %arg4: memref<64x1xf32, #tpu.memory_space<vmem>>, %arg5: memref<9x128x64xf32, #tpu.memory_space<vmem>>, %arg6: memref<128x1xf32, #tpu.memory_space<vmem>>, %arg7: memref<2x128x256xf32, #tpu.memory_space<vmem>>) attributes {dimension_semantics = [#tpu.dimension_semantics<parallel>], iteration_bounds = array<i64: 1>, scalar_prefetch = 0 : i64, scratch_operands = 0 : i64, tpu.core_type = #tpu.core_type<tc>, window_params = [{transform_indices = @transform_0, window_bounds = array<i64: 9, 512>}, {pipeline_mode = #tpu.pipeline_mode<synchronous>, transform_indices = @transform_1, window_bounds = array<i64: 9, 1, 512>}, {pipeline_mode = #tpu.pipeline_mode<synchronous>, transform_indices = @transform_2, window_bounds = array<i64: 64, 9>}, {pipeline_mode = #tpu.pipeline_mode<synchronous>, transform_indices = @transform_3, window_bounds = array<i64: 64, 1>}, {pipeline_mode = #tpu.pipeline_mode<synchronous>, transform_indices = @transform_4, window_bounds = array<i64: 9, 128, 64>}, {pipeline_mode = #tpu.pipeline_mode<synchronous>, transform_indices = @transform_5, window_bounds = array<i64: 128, 1>}, {transform_indices = @transform_6, window_bounds = array<i64: 2, 128, 256>}]} {
    %c0 = arith.constant 0 : index
    %c0_0 = arith.constant 0 : index
    %0 = vector.load %arg3[%c0, %c0_0] : memref<64x9xf32, #tpu.memory_space<vmem>>, vector<64x9xf32>
    %c0_1 = arith.constant 0 : index
    %c0_2 = arith.constant 0 : index
    %1 = vector.load %arg1[%c0_1, %c0_2] : memref<9x512xf32, #tpu.memory_space<vmem>>, vector<9x512xf32>
    %cst = arith.constant dense<0.000000e+00> : vector<64x512xf32>
    %2 = tpu.matmul %0, %1, %cst {dimension_numbers = #tpu.dot_dimension_numbers<[1], [0], [0], [1], [0, 0, 1, 1], [], []>} : vector<64x9xf32>, vector<9x512xf32>, vector<64x512xf32> -> vector<64x512xf32>
    %c0_3 = arith.constant 0 : index
    %c0_4 = arith.constant 0 : index
    %3 = vector.load %arg4[%c0_3, %c0_4] : memref<64x1xf32, #tpu.memory_space<vmem>>, vector<64x1xf32>
    %4 = vector.broadcast %3 : vector<64x1xf32> to vector<64x512xf32>
    %5 = arith.addf %2, %4 : vector<64x512xf32>
    %cst_5 = arith.constant 0.000000e+00 : f32
    %6 = vector.broadcast %cst_5 : f32 to vector<64x512xf32>
    %7 = arith.maximumf %5, %6 : vector<64x512xf32>
    %c17_i32 = arith.constant 17 : i32
    %8 = tpu.dynamic_rotate %7 by %c17_i32 dim 1 : vector<64x512xf32>, i32 -> vector<64x512xf32>
    %c0_6 = arith.constant 0 : index
    %c0_7 = arith.constant 0 : index
    %c0_8 = arith.constant 0 : index
    %9 = vector.load %arg2[%c0_6, %c0_7, %c0_8] : memref<9x1x512xf32, #tpu.memory_space<vmem>>, vector<1x1x512xf32>
    %10 = vector.shape_cast %9 : vector<1x1x512xf32> to vector<1x512xf32>
    %11 = vector.broadcast %10 : vector<1x512xf32> to vector<64x512xf32>
    %12 = arith.mulf %8, %11 : vector<64x512xf32>
    %c0_9 = arith.constant 0 : index
    %c0_10 = arith.constant 0 : index
    %c0_11 = arith.constant 0 : index
    %13 = vector.load %arg5[%c0_9, %c0_10, %c0_11] : memref<9x128x64xf32, #tpu.memory_space<vmem>>, vector<1x128x64xf32>
    %14 = vector.shape_cast %13 : vector<1x128x64xf32> to vector<128x64xf32>
    %cst_12 = arith.constant dense<0.000000e+00> : vector<128x512xf32>
    %15 = tpu.matmul %14, %12, %cst_12 {dimension_numbers = #tpu.dot_dimension_numbers<[1], [0], [0], [1], [0, 0, 1, 1], [], []>} : vector<128x64xf32>, vector<64x512xf32>, vector<128x512xf32> -> vector<128x512xf32>
    %c16_i32 = arith.constant 16 : i32
    %16 = tpu.dynamic_rotate %7 by %c16_i32 dim 1 : vector<64x512xf32>, i32 -> vector<64x512xf32>
    %c1 = arith.constant 1 : index
    %c0_13 = arith.constant 0 : index
    %c0_14 = arith.constant 0 : index
    %17 = vector.load %arg2[%c1, %c0_13, %c0_14] : memref<9x1x512xf32, #tpu.memory_space<vmem>>, vector<1x1x512xf32>
    %18 = vector.shape_cast %17 : vector<1x1x512xf32> to vector<1x512xf32>
    %19 = vector.broadcast %18 : vector<1x512xf32> to vector<64x512xf32>
    %20 = arith.mulf %16, %19 : vector<64x512xf32>
    %c1_15 = arith.constant 1 : index
    %c0_16 = arith.constant 0 : index
    %c0_17 = arith.constant 0 : index
    %21 = vector.load %arg5[%c1_15, %c0_16, %c0_17] : memref<9x128x64xf32, #tpu.memory_space<vmem>>, vector<1x128x64xf32>
    %22 = vector.shape_cast %21 : vector<1x128x64xf32> to vector<128x64xf32>
    %cst_18 = arith.constant dense<0.000000e+00> : vector<128x512xf32>
    %23 = tpu.matmul %22, %20, %cst_18 {dimension_numbers = #tpu.dot_dimension_numbers<[1], [0], [0], [1], [0, 0, 1, 1], [], []>} : vector<128x64xf32>, vector<64x512xf32>, vector<128x512xf32> -> vector<128x512xf32>
    %24 = arith.addf %15, %23 : vector<128x512xf32>
    %c15_i32 = arith.constant 15 : i32
    %25 = tpu.dynamic_rotate %7 by %c15_i32 dim 1 : vector<64x512xf32>, i32 -> vector<64x512xf32>
    %c2 = arith.constant 2 : index
    %c0_19 = arith.constant 0 : index
    %c0_20 = arith.constant 0 : index
    %26 = vector.load %arg2[%c2, %c0_19, %c0_20] : memref<9x1x512xf32, #tpu.memory_space<vmem>>, vector<1x1x512xf32>
    %27 = vector.shape_cast %26 : vector<1x1x512xf32> to vector<1x512xf32>
    %28 = vector.broadcast %27 : vector<1x512xf32> to vector<64x512xf32>
    %29 = arith.mulf %25, %28 : vector<64x512xf32>
    %c2_21 = arith.constant 2 : index
    %c0_22 = arith.constant 0 : index
    %c0_23 = arith.constant 0 : index
    %30 = vector.load %arg5[%c2_21, %c0_22, %c0_23] : memref<9x128x64xf32, #tpu.memory_space<vmem>>, vector<1x128x64xf32>
    %31 = vector.shape_cast %30 : vector<1x128x64xf32> to vector<128x64xf32>
    %cst_24 = arith.constant dense<0.000000e+00> : vector<128x512xf32>
    %32 = tpu.matmul %31, %29, %cst_24 {dimension_numbers = #tpu.dot_dimension_numbers<[1], [0], [0], [1], [0, 0, 1, 1], [], []>} : vector<128x64xf32>, vector<64x512xf32>, vector<128x512xf32> -> vector<128x512xf32>
    %33 = arith.addf %24, %32 : vector<128x512xf32>
    %c1_i32 = arith.constant 1 : i32
    %34 = tpu.dynamic_rotate %7 by %c1_i32 dim 1 : vector<64x512xf32>, i32 -> vector<64x512xf32>
    %c3 = arith.constant 3 : index
    %c0_25 = arith.constant 0 : index
    %c0_26 = arith.constant 0 : index
    %35 = vector.load %arg2[%c3, %c0_25, %c0_26] : memref<9x1x512xf32, #tpu.memory_space<vmem>>, vector<1x1x512xf32>
    %36 = vector.shape_cast %35 : vector<1x1x512xf32> to vector<1x512xf32>
    %37 = vector.broadcast %36 : vector<1x512xf32> to vector<64x512xf32>
    %38 = arith.mulf %34, %37 : vector<64x512xf32>
    %c3_27 = arith.constant 3 : index
    %c0_28 = arith.constant 0 : index
    %c0_29 = arith.constant 0 : index
    %39 = vector.load %arg5[%c3_27, %c0_28, %c0_29] : memref<9x128x64xf32, #tpu.memory_space<vmem>>, vector<1x128x64xf32>
    %40 = vector.shape_cast %39 : vector<1x128x64xf32> to vector<128x64xf32>
    %cst_30 = arith.constant dense<0.000000e+00> : vector<128x512xf32>
    %41 = tpu.matmul %40, %38, %cst_30 {dimension_numbers = #tpu.dot_dimension_numbers<[1], [0], [0], [1], [0, 0, 1, 1], [], []>} : vector<128x64xf32>, vector<64x512xf32>, vector<128x512xf32> -> vector<128x512xf32>
    %42 = arith.addf %33, %41 : vector<128x512xf32>
    %c4 = arith.constant 4 : index
    %c0_31 = arith.constant 0 : index
    %c0_32 = arith.constant 0 : index
    %43 = vector.load %arg5[%c4, %c0_31, %c0_32] : memref<9x128x64xf32, #tpu.memory_space<vmem>>, vector<1x128x64xf32>
    %44 = vector.shape_cast %43 : vector<1x128x64xf32> to vector<128x64xf32>
    %cst_33 = arith.constant dense<0.000000e+00> : vector<128x512xf32>
    %45 = tpu.matmul %44, %7, %cst_33 {dimension_numbers = #tpu.dot_dimension_numbers<[1], [0], [0], [1], [0, 0, 1, 1], [], []>} : vector<128x64xf32>, vector<64x512xf32>, vector<128x512xf32> -> vector<128x512xf32>
    %46 = arith.addf %42, %45 : vector<128x512xf32>
    %c511_i32 = arith.constant 511 : i32
    %47 = tpu.dynamic_rotate %7 by %c511_i32 dim 1 : vector<64x512xf32>, i32 -> vector<64x512xf32>
    %c5 = arith.constant 5 : index
    %c0_34 = arith.constant 0 : index
    %c0_35 = arith.constant 0 : index
    %48 = vector.load %arg2[%c5, %c0_34, %c0_35] : memref<9x1x512xf32, #tpu.memory_space<vmem>>, vector<1x1x512xf32>
    %49 = vector.shape_cast %48 : vector<1x1x512xf32> to vector<1x512xf32>
    %50 = vector.broadcast %49 : vector<1x512xf32> to vector<64x512xf32>
    %51 = arith.mulf %47, %50 : vector<64x512xf32>
    %c5_36 = arith.constant 5 : index
    %c0_37 = arith.constant 0 : index
    %c0_38 = arith.constant 0 : index
    %52 = vector.load %arg5[%c5_36, %c0_37, %c0_38] : memref<9x128x64xf32, #tpu.memory_space<vmem>>, vector<1x128x64xf32>
    %53 = vector.shape_cast %52 : vector<1x128x64xf32> to vector<128x64xf32>
    %cst_39 = arith.constant dense<0.000000e+00> : vector<128x512xf32>
    %54 = tpu.matmul %53, %51, %cst_39 {dimension_numbers = #tpu.dot_dimension_numbers<[1], [0], [0], [1], [0, 0, 1, 1], [], []>} : vector<128x64xf32>, vector<64x512xf32>, vector<128x512xf32> -> vector<128x512xf32>
    %55 = arith.addf %46, %54 : vector<128x512xf32>
    %c497_i32 = arith.constant 497 : i32
    %56 = tpu.dynamic_rotate %7 by %c497_i32 dim 1 : vector<64x512xf32>, i32 -> vector<64x512xf32>
    %c6 = arith.constant 6 : index
    %c0_40 = arith.constant 0 : index
    %c0_41 = arith.constant 0 : index
    %57 = vector.load %arg2[%c6, %c0_40, %c0_41] : memref<9x1x512xf32, #tpu.memory_space<vmem>>, vector<1x1x512xf32>
    %58 = vector.shape_cast %57 : vector<1x1x512xf32> to vector<1x512xf32>
    %59 = vector.broadcast %58 : vector<1x512xf32> to vector<64x512xf32>
    %60 = arith.mulf %56, %59 : vector<64x512xf32>
    %c6_42 = arith.constant 6 : index
    %c0_43 = arith.constant 0 : index
    %c0_44 = arith.constant 0 : index
    %61 = vector.load %arg5[%c6_42, %c0_43, %c0_44] : memref<9x128x64xf32, #tpu.memory_space<vmem>>, vector<1x128x64xf32>
    %62 = vector.shape_cast %61 : vector<1x128x64xf32> to vector<128x64xf32>
    %cst_45 = arith.constant dense<0.000000e+00> : vector<128x512xf32>
    %63 = tpu.matmul %62, %60, %cst_45 {dimension_numbers = #tpu.dot_dimension_numbers<[1], [0], [0], [1], [0, 0, 1, 1], [], []>} : vector<128x64xf32>, vector<64x512xf32>, vector<128x512xf32> -> vector<128x512xf32>
    %64 = arith.addf %55, %63 : vector<128x512xf32>
    %c496_i32 = arith.constant 496 : i32
    %65 = tpu.dynamic_rotate %7 by %c496_i32 dim 1 : vector<64x512xf32>, i32 -> vector<64x512xf32>
    %c7 = arith.constant 7 : index
    %c0_46 = arith.constant 0 : index
    %c0_47 = arith.constant 0 : index
    %66 = vector.load %arg2[%c7, %c0_46, %c0_47] : memref<9x1x512xf32, #tpu.memory_space<vmem>>, vector<1x1x512xf32>
    %67 = vector.shape_cast %66 : vector<1x1x512xf32> to vector<1x512xf32>
    %68 = vector.broadcast %67 : vector<1x512xf32> to vector<64x512xf32>
    %69 = arith.mulf %65, %68 : vector<64x512xf32>
    %c7_48 = arith.constant 7 : index
    %c0_49 = arith.constant 0 : index
    %c0_50 = arith.constant 0 : index
    %70 = vector.load %arg5[%c7_48, %c0_49, %c0_50] : memref<9x128x64xf32, #tpu.memory_space<vmem>>, vector<1x128x64xf32>
    %71 = vector.shape_cast %70 : vector<1x128x64xf32> to vector<128x64xf32>
    %cst_51 = arith.constant dense<0.000000e+00> : vector<128x512xf32>
    %72 = tpu.matmul %71, %69, %cst_51 {dimension_numbers = #tpu.dot_dimension_numbers<[1], [0], [0], [1], [0, 0, 1, 1], [], []>} : vector<128x64xf32>, vector<64x512xf32>, vector<128x512xf32> -> vector<128x512xf32>
    %73 = arith.addf %64, %72 : vector<128x512xf32>
    %c495_i32 = arith.constant 495 : i32
    %74 = tpu.dynamic_rotate %7 by %c495_i32 dim 1 : vector<64x512xf32>, i32 -> vector<64x512xf32>
    %c8 = arith.constant 8 : index
    %c0_52 = arith.constant 0 : index
    %c0_53 = arith.constant 0 : index
    %75 = vector.load %arg2[%c8, %c0_52, %c0_53] : memref<9x1x512xf32, #tpu.memory_space<vmem>>, vector<1x1x512xf32>
    %76 = vector.shape_cast %75 : vector<1x1x512xf32> to vector<1x512xf32>
    %77 = vector.broadcast %76 : vector<1x512xf32> to vector<64x512xf32>
    %78 = arith.mulf %74, %77 : vector<64x512xf32>
    %c8_54 = arith.constant 8 : index
    %c0_55 = arith.constant 0 : index
    %c0_56 = arith.constant 0 : index
    %79 = vector.load %arg5[%c8_54, %c0_55, %c0_56] : memref<9x128x64xf32, #tpu.memory_space<vmem>>, vector<1x128x64xf32>
    %80 = vector.shape_cast %79 : vector<1x128x64xf32> to vector<128x64xf32>
    %cst_57 = arith.constant dense<0.000000e+00> : vector<128x512xf32>
    %81 = tpu.matmul %80, %78, %cst_57 {dimension_numbers = #tpu.dot_dimension_numbers<[1], [0], [0], [1], [0, 0, 1, 1], [], []>} : vector<128x64xf32>, vector<64x512xf32>, vector<128x512xf32> -> vector<128x512xf32>
    %82 = arith.addf %73, %81 : vector<128x512xf32>
    %c0_58 = arith.constant 0 : index
    %c0_59 = arith.constant 0 : index
    %83 = vector.load %arg6[%c0_58, %c0_59] : memref<128x1xf32, #tpu.memory_space<vmem>>, vector<128x1xf32>
    %84 = vector.broadcast %83 : vector<128x1xf32> to vector<128x512xf32>
    %85 = arith.addf %82, %84 : vector<128x512xf32>
    %cst_60 = arith.constant 0.000000e+00 : f32
    %86 = vector.broadcast %cst_60 : f32 to vector<128x512xf32>
    %87 = arith.maximumf %85, %86 : vector<128x512xf32>
    %88 = vector.extract_strided_slice %87 {offsets = [0, 0], sizes = [128, 256], strides = [1, 1]} : vector<128x512xf32> to vector<128x256xf32>
    %c0_61 = arith.constant 0 : index
    %c0_62 = arith.constant 0 : index
    %c0_63 = arith.constant 0 : index
    %89 = vector.load %arg7[%c0_61, %c0_62, %c0_63] : memref<2x128x256xf32, #tpu.memory_space<vmem>>, vector<1x128x256xf32>
    %90 = vector.shape_cast %89 : vector<1x128x256xf32> to vector<128x256xf32>
    %91 = vector.shape_cast %88 : vector<128x256xf32> to vector<1x128x256xf32>
    tpu.vector_store %arg7[%c0_61, %c0_62, %c0_63], %91 {strides = array<i32>} : memref<2x128x256xf32, #tpu.memory_space<vmem>>, vector<1x128x256xf32>,
    %92 = vector.extract_strided_slice %87 {offsets = [0, 256], sizes = [128, 256], strides = [1, 1]} : vector<128x512xf32> to vector<128x256xf32>
    %c1_64 = arith.constant 1 : index
    %c0_65 = arith.constant 0 : index
    %c0_66 = arith.constant 0 : index
    %93 = vector.load %arg7[%c1_64, %c0_65, %c0_66] : memref<2x128x256xf32, #tpu.memory_space<vmem>>, vector<1x128x256xf32>
    %94 = vector.shape_cast %93 : vector<1x128x256xf32> to vector<128x256xf32>
    %95 = vector.shape_cast %92 : vector<128x256xf32> to vector<1x128x256xf32>
    tpu.vector_store %arg7[%c1_64, %c0_65, %c0_66], %95 {strides = array<i32>} : memref<2x128x256xf32, #tpu.memory_space<vmem>>, vector<1x128x256xf32>,
    return
  }
  func.func @transform_0(%arg0: i32) -> (i32, i32) {
    %c0_i32 = arith.constant 0 : i32
    %c0_i32_0 = arith.constant 0 : i32
    return %c0_i32, %arg0 : i32, i32
  }
  func.func @transform_1(%arg0: i32) -> (i32, i32, i32) {
    %c0_i32 = arith.constant 0 : i32
    %c0_i32_0 = arith.constant 0 : i32
    %c0_i32_1 = arith.constant 0 : i32
    %c0_i32_2 = arith.constant 0 : i32
    return %c0_i32, %c0_i32_0, %c0_i32_1 : i32, i32, i32
  }
  func.func @transform_2(%arg0: i32) -> (i32, i32) {
    %c0_i32 = arith.constant 0 : i32
    %c0_i32_0 = arith.constant 0 : i32
    %c0_i32_1 = arith.constant 0 : i32
    return %c0_i32, %c0_i32_0 : i32, i32
  }
  func.func @transform_3(%arg0: i32) -> (i32, i32) {
    %c0_i32 = arith.constant 0 : i32
    %c0_i32_0 = arith.constant 0 : i32
    %c0_i32_1 = arith.constant 0 : i32
    return %c0_i32, %c0_i32_0 : i32, i32
  }
  func.func @transform_4(%arg0: i32) -> (i32, i32, i32) {
    %c0_i32 = arith.constant 0 : i32
    %c0_i32_0 = arith.constant 0 : i32
    %c0_i32_1 = arith.constant 0 : i32
    %c0_i32_2 = arith.constant 0 : i32
    return %c0_i32, %c0_i32_0, %c0_i32_1 : i32, i32, i32
  }
  func.func @transform_5(%arg0: i32) -> (i32, i32) {
    %c0_i32 = arith.constant 0 : i32
    %c0_i32_0 = arith.constant 0 : i32
    %c0_i32_1 = arith.constant 0 : i32
    return %c0_i32, %c0_i32_0 : i32, i32
  }
  func.func @transform_6(%arg0: i32) -> (i32, i32, i32) {
    %c0_i32 = arith.constant 0 : i32
    %c0_i32_0 = arith.constant 0 : i32
    %c0_i32_1 = arith.constant 0 : i32
    return %arg0, %c0_i32, %c0_i32_0 : i32, i32, i32
  }
}

module attributes {stable_mosaic.version = 11 : i64} {
  func.func @linear_kernel(%arg0: i32, %arg1: i32, %arg2: memref<2x8192xf32, #tpu.memory_space<vmem>>, %arg3: memref<10x8192xf32, #tpu.memory_space<vmem>>, %arg4: memref<1x10xf32, #tpu.memory_space<vmem>>, %arg5: memref<2x10xf32, #tpu.memory_space<vmem>>, %arg6: memref<2x10xf32, #tpu.memory_space<vmem>>) attributes {dimension_semantics = [#tpu.dimension_semantics<parallel>, #tpu.dimension_semantics<arbitrary>], iteration_bounds = array<i64: 1, 4>, scalar_prefetch = 0 : i64, scratch_operands = 1 : i64, tpu.core_type = #tpu.core_type<tc>, window_params = [{transform_indices = @transform_0, window_bounds = array<i64: 2, 8192>}, {transform_indices = @transform_1, window_bounds = array<i64: 10, 8192>}, {pipeline_mode = #tpu.pipeline_mode<synchronous>, transform_indices = @transform_2, window_bounds = array<i64: 1, 10>}, {transform_indices = @transform_3, window_bounds = array<i64: 2, 10>}]} {
    %c0_i32 = arith.constant 0 : i32
    %0 = arith.cmpi eq, %arg1, %c0_i32 : i32
    %1 = arith.extui %0 : i1 to i32
    %c0_i32_0 = arith.constant 0 : i32
    %2 = arith.cmpi ne, %1, %c0_i32_0 : i32
    scf.if %2 {
      %cst_9 = arith.constant 0.000000e+00 : f32
      %12 = vector.broadcast %cst_9 : f32 to vector<2x10xf32>
      %c0_10 = arith.constant 0 : index
      %c0_11 = arith.constant 0 : index
      %13 = vector.load %arg6[%c0_10, %c0_11] : memref<2x10xf32, #tpu.memory_space<vmem>>, vector<2x10xf32>
      tpu.vector_store %arg6[%c0_10, %c0_11], %12 {strides = array<i32>} : memref<2x10xf32, #tpu.memory_space<vmem>>, vector<2x10xf32>,
    } else {
    }
    %c0 = arith.constant 0 : index
    %c0_1 = arith.constant 0 : index
    %3 = vector.load %arg6[%c0, %c0_1] : memref<2x10xf32, #tpu.memory_space<vmem>>, vector<2x10xf32>
    %c0_2 = arith.constant 0 : index
    %c0_3 = arith.constant 0 : index
    %4 = vector.load %arg2[%c0_2, %c0_3] : memref<2x8192xf32, #tpu.memory_space<vmem>>, vector<2x8192xf32>
    %c0_4 = arith.constant 0 : index
    %c0_5 = arith.constant 0 : index
    %5 = vector.load %arg3[%c0_4, %c0_5] : memref<10x8192xf32, #tpu.memory_space<vmem>>, vector<10x8192xf32>
    %cst = arith.constant dense<0.000000e+00> : vector<2x10xf32>
    %6 = tpu.matmul %4, %5, %cst {dimension_numbers = #tpu.dot_dimension_numbers<[1], [1], [0], [0], [0, 0, 1, 0], [], []>} : vector<2x8192xf32>, vector<10x8192xf32>, vector<2x10xf32> -> vector<2x10xf32>
    %7 = arith.addf %3, %6 : vector<2x10xf32>
    %c0_6 = arith.constant 0 : index
    %c0_7 = arith.constant 0 : index
    %8 = vector.load %arg6[%c0_6, %c0_7] : memref<2x10xf32, #tpu.memory_space<vmem>>, vector<2x10xf32>
    tpu.vector_store %arg6[%c0_6, %c0_7], %7 {strides = array<i32>} : memref<2x10xf32, #tpu.memory_space<vmem>>, vector<2x10xf32>,
    %c3_i32 = arith.constant 3 : i32
    %9 = arith.cmpi eq, %arg1, %c3_i32 : i32
    %10 = arith.extui %9 : i1 to i32
    %c0_i32_8 = arith.constant 0 : i32
    %11 = arith.cmpi ne, %10, %c0_i32_8 : i32
    scf.if %11 {
      %c0_9 = arith.constant 0 : index
      %c0_10 = arith.constant 0 : index
      %12 = vector.load %arg6[%c0_9, %c0_10] : memref<2x10xf32, #tpu.memory_space<vmem>>, vector<2x10xf32>
      %c0_11 = arith.constant 0 : index
      %c0_12 = arith.constant 0 : index
      %13 = vector.load %arg4[%c0_11, %c0_12] : memref<1x10xf32, #tpu.memory_space<vmem>>, vector<1x10xf32>
      %14 = vector.broadcast %13 : vector<1x10xf32> to vector<2x10xf32>
      %15 = arith.addf %12, %14 : vector<2x10xf32>
      %c0_13 = arith.constant 0 : index
      %c0_14 = arith.constant 0 : index
      %16 = vector.load %arg5[%c0_13, %c0_14] : memref<2x10xf32, #tpu.memory_space<vmem>>, vector<2x10xf32>
      tpu.vector_store %arg5[%c0_13, %c0_14], %15 {strides = array<i32>} : memref<2x10xf32, #tpu.memory_space<vmem>>, vector<2x10xf32>,
    } else {
    }
    return
  }
  func.func @transform_0(%arg0: i32, %arg1: i32) -> (i32, i32) {
    %c0_i32 = arith.constant 0 : i32
    return %arg0, %arg1 : i32, i32
  }
  func.func @transform_1(%arg0: i32, %arg1: i32) -> (i32, i32) {
    %c0_i32 = arith.constant 0 : i32
    %c0_i32_0 = arith.constant 0 : i32
    return %c0_i32, %arg1 : i32, i32
  }
  func.func @transform_2(%arg0: i32, %arg1: i32) -> (i32, i32) {
    %c0_i32 = arith.constant 0 : i32
    %c0_i32_0 = arith.constant 0 : i32
    %c0_i32_1 = arith.constant 0 : i32
    return %c0_i32, %c0_i32_0 : i32, i32
  }
  func.func @transform_3(%arg0: i32, %arg1: i32) -> (i32, i32) {
    %c0_i32 = arith.constant 0 : i32
    %c0_i32_0 = arith.constant 0 : i32
    return %arg0, %c0_i32 : i32, i32
  }
}

</mosaic_0001>

<bundles_post_ra>
// kernel: convnet_forward.3
= control target key start
LH: loop header
LB: loop body
LE: loop exit
PB: predicated region body
PF: predicated region fallthrough
CT: control target
= control target key end

     0   :  { %8 = vsyncpa [#allocation5], 0  ;;  %s3502_s12 = smov 0   ;;  %s3504_s13 = smov 0   ;;  %s4032_s0 = inlined_call_operand.vmem [shape: f32[2,32768], index: 0, kind: input, shape index: {}]   ;;  %s4033_s1 = inlined_call_operand.vmem [shape: f32[10,32768], index: 1, kind: input, shape index: {}]   ;;  %s4034_s2 = inlined_call_operand.vmem [shape: f32[1,10], index: 2, kind: input, shape index: {}]   ;;  %s4035_s3 = inlined_call_operand.hbm [shape: f32[2,10], index: 3, kind: output, shape index: {}]  }
   0x1   :  { %s3506_s14 = smov 0   ;;  %s3508_s15 = smov 0  }
   0x2   :  { %s3510_s16 = smov 0  }
   0x3 LB: > { %s3328_s17 = sadd.s32 4294967295, %s3477_s16   ;;  %s23_s18 = sadd.s32 1, %s3473_s15  ;;  %s3477_s16 = sphi %s3510_s16, %s14_s16   ;;  %s3473_s15 = sphi %s3508_s15, %s4040_s15   ;;  %s3469_s14 = sphi %s3506_s14, %s4039_s14   ;;  %s3465_s13 = sphi %s3504_s13, %s4038_s13   ;;  %s3461_s12 = sphi %s3502_s12, %s4037_s12  }
   0x4   : > { %p24_p0 = scmp.ge.s32.totalorder %s23_s18, 4  ;;  %p68_p1 = scmp.ne.s32.totalorder %s3465_s13, %s3461_s12 }
   0x5   : > { %p69_p2 = scmp.eq.s32.totalorder %s3477_s16, 0  ;;  %s61_s20 = sadd.s32 1, %s3465_s13 }
   0x6   : > { %s4042_s18 = smov (%p24_p0, %s23_s18), 0  ;;  %p3330_p5 = scmp.ge.s32.totalorder %s3477_s16, 4 }
   0x7   : > { %p70_p3 = por %p69_p2, %p68_p1  ;;  %s58_s19 = ssub.s32 %s3473_s15, %s4042_s18 }
   0x8   : > { %p59_p4 = scmp.eq.s32.totalorder %s58_s19, 0  ;;  %144 = sbr.rel (%p3330_p5) target bundleno = 81 (0x51), region = 20 }
   0xa   : > { %s3538_s21 = scalar_select %p59_p4, %s3465_s13, %s61_s20  }
   0xd   : > { %160 = sbr.rel (!%p70_p3) target bundleno = 81 (0x51), region = 28  ;;  %s162_s22 = sand.u32 (%p70_p3), 1, %s3465_s13  }
   0xe   : > { %s3345_s23 = sshll.u32 (%p70_p3), %s3473_s15, 9  ;;  %s3331_s24 = sshll.u32 (%p70_p3), %s162_s22, 10 }
   0xf   : > { %s3546_s27 = scalar_lea.vmem (%p70_p3), %s4033_s1, %s3345_s23  ;;  %s3551_s28 = scalar_lea.vmem (%p70_p3), [#allocation3], %s3331_s24 }
  0x10   : > { %v180_v0 = vld [vmem:[%s3546_s27] sm:$0xff] (%p70_p3)  ;;  %v182_v1 = vld [vmem:[%s3546_s27 + $0x8] sm:$0xff] (%p70_p3)  ;;  %v184_v2 = vld [vmem:[%s3546_s27 + $0x10] sm:$0xff] (%p70_p3) }
  0x11   : > { %181 = vst [vmem:[%s3551_s28] sm:$0xff] (%p70_p3), %v180_v0  ;;  %183 = vst [vmem:[%s3551_s28 + $0x8] sm:$0xff] (%p70_p3), %v182_v1  ;;  %v186_v3 = vld [vmem:[%s3546_s27 + $0x18] sm:$0xff] (%p70_p3)  ;;  %v188_v4 = vld [vmem:[%s3546_s27 + $0x20] sm:$0xff] (%p70_p3) }
  0x12   : > { %185 = vst [vmem:[%s3551_s28 + $0x10] sm:$0xff] %v184_v2  ;;  %v190_v5 = vld [vmem:[%s3546_s27 + $0x28] sm:$0xff]  ;;  %187 = vst [vmem:[%s3551_s28 + $0x18] sm:$0xff] %v186_v3  ;;  %v192_v6 = vld [vmem:[%s3546_s27 + $0x30] sm:$0xff] }
  0x13   : > { %189 = vst [vmem:[%s3551_s28 + $0x20] sm:$0xff] %v188_v4  ;;  %191 = vst [vmem:[%s3551_s28 + $0x28] sm:$0xff] %v190_v5  ;;  %v194_v7 = vld [vmem:[%s3546_s27 + $0x38] sm:$0xff]  ;;  %v196_v8 = vld [vmem:[%s3546_s27 + $0x40] sm:$0xff] }
  0x14   : > { %193 = vst [vmem:[%s3551_s28 + $0x30] sm:$0xff] %v192_v6  ;;  %195 = vst [vmem:[%s3551_s28 + $0x38] sm:$0xff] %v194_v7  ;;  %v198_v9 = vld [vmem:[%s3546_s27 + $0x48] sm:$0xff]  ;;  %v200_v10 = vld [vmem:[%s3546_s27 + $0x50] sm:$0xff] }
  0x15   : > { %197 = vst [vmem:[%s3551_s28 + $0x40] sm:$0xff] %v196_v8  ;;  %v202_v11 = vld [vmem:[%s3546_s27 + $0x58] sm:$0xff]  ;;  %199 = vst [vmem:[%s3551_s28 + $0x48] sm:$0xff] %v198_v9  ;;  %v204_v12 = vld [vmem:[%s3546_s27 + $0x60] sm:$0xff] }
  0x16   : > { %201 = vst [vmem:[%s3551_s28 + $0x50] sm:$0xff] %v200_v10  ;;  %203 = vst [vmem:[%s3551_s28 + $0x58] sm:$0xff] %v202_v11  ;;  %v206_v13 = vld [vmem:[%s3546_s27 + $0x68] sm:$0xff]  ;;  %v208_v14 = vld [vmem:[%s3546_s27 + $0x70] sm:$0xff] }
  0x17   : > { %205 = vst [vmem:[%s3551_s28 + $0x60] sm:$0xff] %v204_v12  ;;  %207 = vst [vmem:[%s3551_s28 + $0x68] sm:$0xff] %v206_v13  ;;  %v210_v15 = vld [vmem:[%s3546_s27 + $0x78] sm:$0xff]  ;;  %v212_v16 = vld [vmem:[%s3546_s27 + $0x80] sm:$0xff] }
  0x18   : > { %209 = vst [vmem:[%s3551_s28 + $0x70] sm:$0xff] %v208_v14  ;;  %v214_v17 = vld [vmem:[%s3546_s27 + $0x88] sm:$0xff]  ;;  %211 = vst [vmem:[%s3551_s28 + $0x78] sm:$0xff] %v210_v15  ;;  %v216_v18 = vld [vmem:[%s3546_s27 + $0x90] sm:$0xff] }
  0x19   : > { %213 = vst [vmem:[%s3551_s28 + $0x80] sm:$0xff] %v212_v16  ;;  %215 = vst [vmem:[%s3551_s28 + $0x88] sm:$0xff] %v214_v17  ;;  %v218_v19 = vld [vmem:[%s3546_s27 + $0x98] sm:$0xff]  ;;  %v220_v20 = vld [vmem:[%s3546_s27 + $0xa0] sm:$0xff] }
  0x1a   : > { %217 = vst [vmem:[%s3551_s28 + $0x90] sm:$0xff] %v216_v18  ;;  %219 = vst [vmem:[%s3551_s28 + $0x98] sm:$0xff] %v218_v19  ;;  %v222_v21 = vld [vmem:[%s3546_s27 + $0xa8] sm:$0xff]  ;;  %v224_v22 = vld [vmem:[%s3546_s27 + $0xb0] sm:$0xff] }
  0x1b   : > { %221 = vst [vmem:[%s3551_s28 + $0xa0] sm:$0xff] %v220_v20  ;;  %v226_v23 = vld [vmem:[%s3546_s27 + $0xb8] sm:$0xff]  ;;  %223 = vst [vmem:[%s3551_s28 + $0xa8] sm:$0xff] %v222_v21  ;;  %v228_v24 = vld [vmem:[%s3546_s27 + $0xc0] sm:$0xff] }
  0x1c   : > { %225 = vst [vmem:[%s3551_s28 + $0xb0] sm:$0xff] %v224_v22  ;;  %227 = vst [vmem:[%s3551_s28 + $0xb8] sm:$0xff] %v226_v23  ;;  %v230_v25 = vld [vmem:[%s3546_s27 + $0xc8] sm:$0xff]  ;;  %v232_v26 = vld [vmem:[%s3546_s27 + $0xd0] sm:$0xff] }
  0x1d   : > { %229 = vst [vmem:[%s3551_s28 + $0xc0] sm:$0xff] %v228_v24  ;;  %231 = vst [vmem:[%s3551_s28 + $0xc8] sm:$0xff] %v230_v25  ;;  %v234_v27 = vld [vmem:[%s3546_s27 + $0xd8] sm:$0xff]  ;;  %v236_v28 = vld [vmem:[%s3546_s27 + $0xe0] sm:$0xff] }
  0x1e   : > { %233 = vst [vmem:[%s3551_s28 + $0xd0] sm:$0xff] %v232_v26  ;;  %v238_v29 = vld [vmem:[%s3546_s27 + $0xe8] sm:$0xff]  ;;  %235 = vst [vmem:[%s3551_s28 + $0xd8] sm:$0xff] %v234_v27  ;;  %v240_v30 = vld [vmem:[%s3546_s27 + $0xf0] sm:$0xff] }
  0x1f   : > { %237 = vst [vmem:[%s3551_s28 + $0xe0] sm:$0xff] %v236_v28  ;;  %239 = vst [vmem:[%s3551_s28 + $0xe8] sm:$0xff] %v238_v29  ;;  %v242_v31 = vld [vmem:[%s3546_s27 + $0xf8] sm:$0xff]  ;;  %v244_v32 = vld [vmem:[%s3546_s27 + $0x100] sm:$0xff] }
  0x20   : > { %241 = vst [vmem:[%s3551_s28 + $0xf0] sm:$0xff] %v240_v30  ;;  %243 = vst [vmem:[%s3551_s28 + $0xf8] sm:$0xff] %v242_v31  ;;  %v246_v33 = vld [vmem:[%s3546_s27 + $0x108] sm:$0xff]  ;;  %v248_v34 = vld [vmem:[%s3546_s27 + $0x110] sm:$0xff] }
  0x21   : > { %245 = vst [vmem:[%s3551_s28 + $0x100] sm:$0xff] %v244_v32  ;;  %v250_v35 = vld [vmem:[%s3546_s27 + $0x118] sm:$0xff]  ;;  %247 = vst [vmem:[%s3551_s28 + $0x108] sm:$0xff] %v246_v33  ;;  %v252_v36 = vld [vmem:[%s3546_s27 + $0x120] sm:$0xff] }
  0x22   : > { %249 = vst [vmem:[%s3551_s28 + $0x110] sm:$0xff] %v248_v34  ;;  %251 = vst [vmem:[%s3551_s28 + $0x118] sm:$0xff] %v250_v35  ;;  %v254_v37 = vld [vmem:[%s3546_s27 + $0x128] sm:$0xff]  ;;  %v256_v38 = vld [vmem:[%s3546_s27 + $0x130] sm:$0xff] }
  0x23   : > { %253 = vst [vmem:[%s3551_s28 + $0x120] sm:$0xff] %v252_v36  ;;  %255 = vst [vmem:[%s3551_s28 + $0x128] sm:$0xff] %v254_v37  ;;  %v258_v39 = vld [vmem:[%s3546_s27 + $0x138] sm:$0xff]  ;;  %v260_v40 = vld [vmem:[%s3546_s27 + $0x140] sm:$0xff] }
  0x24   : > { %257 = vst [vmem:[%s3551_s28 + $0x130] sm:$0xff] %v256_v38  ;;  %v262_v41 = vld [vmem:[%s3546_s27 + $0x148] sm:$0xff]  ;;  %259 = vst [vmem:[%s3551_s28 + $0x138] sm:$0xff] %v258_v39  ;;  %v264_v42 = vld [vmem:[%s3546_s27 + $0x150] sm:$0xff] }
  0x25   : > { %261 = vst [vmem:[%s3551_s28 + $0x140] sm:$0xff] %v260_v40  ;;  %263 = vst [vmem:[%s3551_s28 + $0x148] sm:$0xff] %v262_v41  ;;  %v266_v43 = vld [vmem:[%s3546_s27 + $0x158] sm:$0xff]  ;;  %v268_v44 = vld [vmem:[%s3546_s27 + $0x160] sm:$0xff] }
  0x26   : > { %265 = vst [vmem:[%s3551_s28 + $0x150] sm:$0xff] %v264_v42  ;;  %267 = vst [vmem:[%s3551_s28 + $0x158] sm:$0xff] %v266_v43  ;;  %v270_v45 = vld [vmem:[%s3546_s27 + $0x168] sm:$0xff]  ;;  %v272_v46 = vld [vmem:[%s3546_s27 + $0x170] sm:$0xff] }
  0x27   : > { %269 = vst [vmem:[%s3551_s28 + $0x160] sm:$0xff] %v268_v44  ;;  %v274_v47 = vld [vmem:[%s3546_s27 + $0x178] sm:$0xff]  ;;  %271 = vst [vmem:[%s3551_s28 + $0x168] sm:$0xff] %v270_v45  ;;  %v276_v48 = vld [vmem:[%s3546_s27 + $0x180] sm:$0xff] }
  0x28   : > { %273 = vst [vmem:[%s3551_s28 + $0x170] sm:$0xff] %v272_v46  ;;  %275 = vst [vmem:[%s3551_s28 + $0x178] sm:$0xff] %v274_v47  ;;  %v278_v49 = vld [vmem:[%s3546_s27 + $0x188] sm:$0xff]  ;;  %v280_v50 = vld [vmem:[%s3546_s27 + $0x190] sm:$0xff] }
  0x29   : > { %277 = vst [vmem:[%s3551_s28 + $0x180] sm:$0xff] %v276_v48  ;;  %279 = vst [vmem:[%s3551_s28 + $0x188] sm:$0xff] %v278_v49  ;;  %v282_v51 = vld [vmem:[%s3546_s27 + $0x198] sm:$0xff]  ;;  %v284_v52 = vld [vmem:[%s3546_s27 + $0x1a0] sm:$0xff] }
  0x2a   : > { %281 = vst [vmem:[%s3551_s28 + $0x190] sm:$0xff] %v280_v50  ;;  %v286_v53 = vld [vmem:[%s3546_s27 + $0x1a8] sm:$0xff]  ;;  %283 = vst [vmem:[%s3551_s28 + $0x198] sm:$0xff] %v282_v51  ;;  %v288_v54 = vld [vmem:[%s3546_s27 + $0x1b0] sm:$0xff] }
  0x2b   : > { %285 = vst [vmem:[%s3551_s28 + $0x1a0] sm:$0xff] %v284_v52  ;;  %287 = vst [vmem:[%s3551_s28 + $0x1a8] sm:$0xff] %v286_v53  ;;  %v290_v55 = vld [vmem:[%s3546_s27 + $0x1b8] sm:$0xff]  ;;  %v292_v56 = vld [vmem:[%s3546_s27 + $0x1c0] sm:$0xff] }
  0x2c   : > { %289 = vst [vmem:[%s3551_s28 + $0x1b0] sm:$0xff] %v288_v54  ;;  %291 = vst [vmem:[%s3551_s28 + $0x1b8] sm:$0xff] %v290_v55  ;;  %v294_v57 = vld [vmem:[%s3546_s27 + $0x1c8] sm:$0xff]  ;;  %v296_v58 = vld [vmem:[%s3546_s27 + $0x1d0] sm:$0xff] }
  0x2d   : > { %293 = vst [vmem:[%s3551_s28 + $0x1c0] sm:$0xff] %v292_v56  ;;  %v298_v59 = vld [vmem:[%s3546_s27 + $0x1d8] sm:$0xff]  ;;  %295 = vst [vmem:[%s3551_s28 + $0x1c8] sm:$0xff] %v294_v57  ;;  %v300_v60 = vld [vmem:[%s3546_s27 + $0x1e0] sm:$0xff] }
  0x2e   : > { %297 = vst [vmem:[%s3551_s28 + $0x1d0] sm:$0xff] %v296_v58  ;;  %299 = vst [vmem:[%s3551_s28 + $0x1d8] sm:$0xff] %v298_v59  ;;  %v302_v61 = vld [vmem:[%s3546_s27 + $0x1e8] sm:$0xff]  ;;  %v304_v62 = vld [vmem:[%s3546_s27 + $0x1f0] sm:$0xff] }
  0x2f   : > { %301 = vst [vmem:[%s3551_s28 + $0x1e0] sm:$0xff] %v300_v60  ;;  %303 = vst [vmem:[%s3551_s28 + $0x1e8] sm:$0xff] %v302_v61  ;;  %v306_v63 = vld [vmem:[%s3546_s27 + $0x1f8] sm:$0xff]  ;;  %v308_v0 = vld [vmem:[%s3546_s27 + $0x800] sm:$0xff] }
  0x30   : > { %305 = vst [vmem:[%s3551_s28 + $0x1f0] sm:$0xff] %v304_v62  ;;  %v310_v1 = vld [vmem:[%s3546_s27 + $0x808] sm:$0xff]  ;;  %307 = vst [vmem:[%s3551_s28 + $0x1f8] sm:$0xff] %v306_v63  ;;  %v312_v2 = vld [vmem:[%s3546_s27 + $0x810] sm:$0xff] }
  0x31   : > { %309 = vst [vmem:[%s3551_s28 + $0x200] sm:$0xff] %v308_v0  ;;  %311 = vst [vmem:[%s3551_s28 + $0x208] sm:$0xff] %v310_v1  ;;  %v314_v3 = vld [vmem:[%s3546_s27 + $0x818] sm:$0xff]  ;;  %v316_v4 = vld [vmem:[%s3546_s27 + $0x820] sm:$0xff] }
  0x32   : > { %313 = vst [vmem:[%s3551_s28 + $0x210] sm:$0xff] %v312_v2  ;;  %315 = vst [vmem:[%s3551_s28 + $0x218] sm:$0xff] %v314_v3  ;;  %v318_v5 = vld [vmem:[%s3546_s27 + $0x828] sm:$0xff]  ;;  %v320_v6 = vld [vmem:[%s3546_s27 + $0x830] sm:$0xff] }
  0x33   : > { %317 = vst [vmem:[%s3551_s28 + $0x220] sm:$0xff] %v316_v4  ;;  %v322_v7 = vld [vmem:[%s3546_s27 + $0x838] sm:$0xff]  ;;  %319 = vst [vmem:[%s3551_s28 + $0x228] sm:$0xff] %v318_v5  ;;  %v324_v8 = vld [vmem:[%s3546_s27 + $0x840] sm:$0xff] }
  0x34   : > { %321 = vst [vmem:[%s3551_s28 + $0x230] sm:$0xff] %v320_v6  ;;  %323 = vst [vmem:[%s3551_s28 + $0x238] sm:$0xff] %v322_v7  ;;  %v326_v9 = vld [vmem:[%s3546_s27 + $0x848] sm:$0xff]  ;;  %v328_v10 = vld [vmem:[%s3546_s27 + $0x850] sm:$0xff] }
  0x35   : > { %325 = vst [vmem:[%s3551_s28 + $0x240] sm:$0xff] %v324_v8  ;;  %327 = vst [vmem:[%s3551_s28 + $0x248] sm:$0xff] %v326_v9  ;;  %v330_v11 = vld [vmem:[%s3546_s27 + $0x858] sm:$0xff]  ;;  %v332_v12 = vld [vmem:[%s3546_s27 + $0x860] sm:$0xff] }
  0x36   : > { %329 = vst [vmem:[%s3551_s28 + $0x250] sm:$0xff] %v328_v10  ;;  %v334_v13 = vld [vmem:[%s3546_s27 + $0x868] sm:$0xff]  ;;  %331 = vst [vmem:[%s3551_s28 + $0x258] sm:$0xff] %v330_v11  ;;  %v336_v14 = vld [vmem:[%s3546_s27 + $0x870] sm:$0xff] }
  0x37   : > { %333 = vst [vmem:[%s3551_s28 + $0x260] sm:$0xff] %v332_v12  ;;  %335 = vst [vmem:[%s3551_s28 + $0x268] sm:$0xff] %v334_v13  ;;  %v338_v15 = vld [vmem:[%s3546_s27 + $0x878] sm:$0xff]  ;;  %v340_v16 = vld [vmem:[%s3546_s27 + $0x880] sm:$0xff] }
  0x38   : > { %337 = vst [vmem:[%s3551_s28 + $0x270] sm:$0xff] %v336_v14  ;;  %339 = vst [vmem:[%s3551_s28 + $0x278] sm:$0xff] %v338_v15  ;;  %v342_v17 = vld [vmem:[%s3546_s27 + $0x888] sm:$0xff]  ;;  %v344_v18 = vld [vmem:[%s3546_s27 + $0x890] sm:$0xff] }
  0x39   : > { %341 = vst [vmem:[%s3551_s28 + $0x280] sm:$0xff] %v340_v16  ;;  %v346_v19 = vld [vmem:[%s3546_s27 + $0x898] sm:$0xff]  ;;  %343 = vst [vmem:[%s3551_s28 + $0x288] sm:$0xff] %v342_v17  ;;  %v348_v20 = vld [vmem:[%s3546_s27 + $0x8a0] sm:$0xff] }
  0x3a   : > { %345 = vst [vmem:[%s3551_s28 + $0x290] sm:$0xff] %v344_v18  ;;  %347 = vst [vmem:[%s3551_s28 + $0x298] sm:$0xff] %v346_v19  ;;  %v350_v21 = vld [vmem:[%s3546_s27 + $0x8a8] sm:$0xff]  ;;  %v352_v22 = vld [vmem:[%s3546_s27 + $0x8b0] sm:$0xff] }
  0x3b   : > { %349 = vst [vmem:[%s3551_s28 + $0x2a0] sm:$0xff] %v348_v20  ;;  %351 = vst [vmem:[%s3551_s28 + $0x2a8] sm:$0xff] %v350_v21  ;;  %v354_v23 = vld [vmem:[%s3546_s27 + $0x8b8] sm:$0xff]  ;;  %v356_v24 = vld [vmem:[%s3546_s27 + $0x8c0] sm:$0xff] }
  0x3c   : > { %353 = vst [vmem:[%s3551_s28 + $0x2b0] sm:$0xff] %v352_v22  ;;  %v358_v25 = vld [vmem:[%s3546_s27 + $0x8c8] sm:$0xff]  ;;  %355 = vst [vmem:[%s3551_s28 + $0x2b8] sm:$0xff] %v354_v23  ;;  %v360_v26 = vld [vmem:[%s3546_s27 + $0x8d0] sm:$0xff] }
  0x3d   : > { %357 = vst [vmem:[%s3551_s28 + $0x2c0] sm:$0xff] %v356_v24  ;;  %359 = vst [vmem:[%s3551_s28 + $0x2c8] sm:$0xff] %v358_v25  ;;  %v362_v27 = vld [vmem:[%s3546_s27 + $0x8d8] sm:$0xff]  ;;  %v364_v28 = vld [vmem:[%s3546_s27 + $0x8e0] sm:$0xff] }
  0x3e   : > { %361 = vst [vmem:[%s3551_s28 + $0x2d0] sm:$0xff] %v360_v26  ;;  %363 = vst [vmem:[%s3551_s28 + $0x2d8] sm:$0xff] %v362_v27  ;;  %v366_v29 = vld [vmem:[%s3546_s27 + $0x8e8] sm:$0xff]  ;;  %v368_v30 = vld [vmem:[%s3546_s27 + $0x8f0] sm:$0xff] }
  0x3f   : > { %365 = vst [vmem:[%s3551_s28 + $0x2e0] sm:$0xff] %v364_v28  ;;  %v370_v31 = vld [vmem:[%s3546_s27 + $0x8f8] sm:$0xff]  ;;  %367 = vst [vmem:[%s3551_s28 + $0x2e8] sm:$0xff] %v366_v29  ;;  %v372_v32 = vld [vmem:[%s3546_s27 + $0x900] sm:$0xff] }
  0x40   : > { %369 = vst [vmem:[%s3551_s28 + $0x2f0] sm:$0xff] %v368_v30  ;;  %371 = vst [vmem:[%s3551_s28 + $0x2f8] sm:$0xff] %v370_v31  ;;  %v374_v33 = vld [vmem:[%s3546_s27 + $0x908] sm:$0xff]  ;;  %v376_v34 = vld [vmem:[%s3546_s27 + $0x910] sm:$0xff] }
  0x41   : > { %373 = vst [vmem:[%s3551_s28 + $0x300] sm:$0xff] %v372_v32  ;;  %375 = vst [vmem:[%s3551_s28 + $0x308] sm:$0xff] %v374_v33  ;;  %v378_v35 = vld [vmem:[%s3546_s27 + $0x918] sm:$0xff]  ;;  %v380_v36 = vld [vmem:[%s3546_s27 + $0x920] sm:$0xff] }
  0x42   : > { %377 = vst [vmem:[%s3551_s28 + $0x310] sm:$0xff] %v376_v34  ;;  %v382_v37 = vld [vmem:[%s3546_s27 + $0x928] sm:$0xff]  ;;  %379 = vst [vmem:[%s3551_s28 + $0x318] sm:$0xff] %v378_v35  ;;  %v384_v38 = vld [vmem:[%s3546_s27 + $0x930] sm:$0xff] }
  0x43   : > { %381 = vst [vmem:[%s3551_s28 + $0x320] sm:$0xff] %v380_v36  ;;  %383 = vst [vmem:[%s3551_s28 + $0x328] sm:$0xff] %v382_v37  ;;  %v386_v39 = vld [vmem:[%s3546_s27 + $0x938] sm:$0xff]  ;;  %v388_v40 = vld [vmem:[%s3546_s27 + $0x940] sm:$0xff] }
  0x44   : > { %385 = vst [vmem:[%s3551_s28 + $0x330] sm:$0xff] %v384_v38  ;;  %387 = vst [vmem:[%s3551_s28 + $0x338] sm:$0xff] %v386_v39  ;;  %v390_v41 = vld [vmem:[%s3546_s27 + $0x948] sm:$0xff]  ;;  %v392_v42 = vld [vmem:[%s3546_s27 + $0x950] sm:$0xff] }
  0x45   : > { %389 = vst [vmem:[%s3551_s28 + $0x340] sm:$0xff] %v388_v40  ;;  %v394_v43 = vld [vmem:[%s3546_s27 + $0x958] sm:$0xff]  ;;  %391 = vst [vmem:[%s3551_s28 + $0x348] sm:$0xff] %v390_v41  ;;  %v396_v44 = vld [vmem:[%s3546_s27 + $0x960] sm:$0xff] }
  0x46   : > { %393 = vst [vmem:[%s3551_s28 + $0x350] sm:$0xff] %v392_v42  ;;  %395 = vst [vmem:[%s3551_s28 + $0x358] sm:$0xff] %v394_v43  ;;  %v398_v45 = vld [vmem:[%s3546_s27 + $0x968] sm:$0xff]  ;;  %v400_v46 = vld [vmem:[%s3546_s27 + $0x970] sm:$0xff] }
  0x47   : > { %397 = vst [vmem:[%s3551_s28 + $0x360] sm:$0xff] %v396_v44  ;;  %399 = vst [vmem:[%s3551_s28 + $0x368] sm:$0xff] %v398_v45  ;;  %v402_v47 = vld [vmem:[%s3546_s27 + $0x978] sm:$0xff]  ;;  %v404_v48 = vld [vmem:[%s3546_s27 + $0x980] sm:$0xff] }
  0x48   : > { %401 = vst [vmem:[%s3551_s28 + $0x370] sm:$0xff] %v400_v46  ;;  %v406_v49 = vld [vmem:[%s3546_s27 + $0x988] sm:$0xff]  ;;  %403 = vst [vmem:[%s3551_s28 + $0x378] sm:$0xff] %v402_v47  ;;  %v408_v50 = vld [vmem:[%s3546_s27 + $0x990] sm:$0xff] }
  0x49   : > { %405 = vst [vmem:[%s3551_s28 + $0x380] sm:$0xff] %v404_v48  ;;  %407 = vst [vmem:[%s3551_s28 + $0x388] sm:$0xff] %v406_v49  ;;  %v410_v51 = vld [vmem:[%s3546_s27 + $0x998] sm:$0xff]  ;;  %v412_v52 = vld [vmem:[%s3546_s27 + $0x9a0] sm:$0xff] }
  0x4a   : > { %409 = vst [vmem:[%s3551_s28 + $0x390] sm:$0xff] %v408_v50  ;;  %411 = vst [vmem:[%s3551_s28 + $0x398] sm:$0xff] %v410_v51  ;;  %v414_v53 = vld [vmem:[%s3546_s27 + $0x9a8] sm:$0xff]  ;;  %v416_v54 = vld [vmem:[%s3546_s27 + $0x9b0] sm:$0xff] }
  0x4b   : > { %413 = vst [vmem:[%s3551_s28 + $0x3a0] sm:$0xff] %v412_v52  ;;  %v418_v55 = vld [vmem:[%s3546_s27 + $0x9b8] sm:$0xff]  ;;  %415 = vst [vmem:[%s3551_s28 + $0x3a8] sm:$0xff] %v414_v53  ;;  %v420_v56 = vld [vmem:[%s3546_s27 + $0x9c0] sm:$0xff] }
  0x4c   : > { %417 = vst [vmem:[%s3551_s28 + $0x3b0] sm:$0xff] %v416_v54  ;;  %419 = vst [vmem:[%s3551_s28 + $0x3b8] sm:$0xff] %v418_v55  ;;  %v422_v57 = vld [vmem:[%s3546_s27 + $0x9c8] sm:$0xff]  ;;  %v424_v58 = vld [vmem:[%s3546_s27 + $0x9d0] sm:$0xff] }
  0x4d   : > { %421 = vst [vmem:[%s3551_s28 + $0x3c0] sm:$0xff] %v420_v56  ;;  %423 = vst [vmem:[%s3551_s28 + $0x3c8] sm:$0xff] %v422_v57  ;;  %v426_v59 = vld [vmem:[%s3546_s27 + $0x9d8] sm:$0xff]  ;;  %v428_v60 = vld [vmem:[%s3546_s27 + $0x9e0] sm:$0xff] }
  0x4e   : > { %425 = vst [vmem:[%s3551_s28 + $0x3d0] sm:$0xff] %v424_v58  ;;  %v430_v61 = vld [vmem:[%s3546_s27 + $0x9e8] sm:$0xff]  ;;  %427 = vst [vmem:[%s3551_s28 + $0x3d8] sm:$0xff] %v426_v59  ;;  %v432_v62 = vld [vmem:[%s3546_s27 + $0x9f0] sm:$0xff] }
  0x4f   : > { %429 = vst [vmem:[%s3551_s28 + $0x3e0] sm:$0xff] %v428_v60  ;;  %431 = vst [vmem:[%s3551_s28 + $0x3e8] sm:$0xff] %v430_v61  ;;  %v434_v63 = vld [vmem:[%s3546_s27 + $0x9f8] sm:$0xff] }
  0x50   : > { %433 = vst [vmem:[%s3551_s28 + $0x3f0] sm:$0xff] %v432_v62  ;;  %435 = vst [vmem:[%s3551_s28 + $0x3f8] sm:$0xff] %v434_v63 }
  0x51 PF: > { %p3334_p6 = scmp.ge.s32.totalorder %s3477_s16, 1  ;;  %p440_p7 = scmp.lt.s32.totalorder %s3477_s16, 5 }
  0x53   : > { %p441_p8 = pnand %p3334_p6, %p440_p7 }
  0x54   : > { %s447_s29 = sand.u32 (!%p441_p8), 1, %s3461_s12   ;;  %s3336_s30 = sshll.u32 (!%p441_p8), %s3469_s14, 6 }
  0x55   : > { %444 = sbr.rel (%p441_p8) target bundleno = 455 (0x1c7), region = 51  ;;  %s3335_s4 = sshll.u32 (!%p441_p8), %s447_s29, 10 }
  0x56   : > { %p477_p9 = scmp.lt.s32.totalorder (!%p441_p8), %s3336_s30, 255  ;;  %s3815_s9 = scalar_lea.vmem (!%p441_p8), [#allocation3], %s3335_s4 }
  0x57   : > { %p3338_p10 = scmp.ne.s32.totalorder (!%p441_p8), %s3469_s14, 0 }
  0x5a   : > { %s4044_s30 = smov (!%p477_p9, %s3336_s30), 255  ;;  %488 = sbr.rel (%p3338_p10) target bundleno = 97 (0x61), region = 59 }
  0x5b   : > { %s3337_s5 = sshll.u32 %s4044_s30, 1 }
  0x5c   : > { %s3813_s8 = scalar_lea.vmem %s4032_s0, %s3337_s5 }
  0x5f   : > { %vm489_vm0 = vcmask 74752   ;;  %v3479_v0 = vmov 0.0  }
  0x60   : > { %490 = vst.msk [vmem:[#allocation2] sm:$0x3] %vm489_vm0, %v3479_v0 }
  0x61 PF: > { %v573_v1 = vld [vmem:[%s3815_s9 + $0x208] sm:$0x3]  ;;  %v575_v2 = vld [vmem:[%s3815_s9 + $0x218] sm:$0x3]  ;;  %v572_v3 = vld [vmem:[%s3815_s9 + $0x200] sm:$0x3]  ;;  %v656_v4 = vlaneseq }
  0x62   : > { %1016 = vmatprep.subr.mxu0 %v573_v1  ;;  %1086 = vmatprep.subr.mxu1 %v575_v2  ;;  %v574_v5 = vld [vmem:[%s3815_s9 + $0x210] sm:$0x3]  ;;  %v509_v6 = vld [vmem:[%s3815_s9 + $0x8] sm:$0xff]  ;;  %v511_v7 = vld [vmem:[%s3815_s9 + $0x18] sm:$0xff]  ;;  %v3480_v9 = vmov 1983009808  }
  0x63   : > { %1017 = vmatpush1.xpose.msra.mxu0 %v572_v3  ;;  %1087 = vmatpush1.xpose.msra.mxu1 %v574_v5  ;;  %v492_v8 = vld [vmem:[%s3813_s8] sm:$0xff]  ;;  %v654_v10 = vunpack.c.l.s4 %v3480_v9  ;;  %v657_v11 = vshrl.u32 %v656_v4, 7  ;;  %v510_v13 = vld [vmem:[%s3815_s9 + $0x10] sm:$0xff]  ;;  %v577_v16 = vld [vmem:[%s3815_s9 + $0x228] sm:$0x3]  ;;  %vm3229_vm1 = vcmask 74752  }
  0x64   : > { %1018 = vmatprep.subr.mxu0 %v509_v6  ;;  %1088 = vmatprep.subr.mxu1 %v511_v7  ;;  %v508_v12 = vld [vmem:[%s3815_s9] sm:$0xff]  ;;  %v652_v15 = vcombine.high %v492_v8, %v492_v8  ;;  %v579_v17 = vld [vmem:[%s3815_s9 + $0x238] sm:$0x3]  ;;  %v494_v25 = vld [vmem:[%s3813_s8 + $0x10] sm:$0xff]  ;;  %p3339_p11 = scmp.ne.s32.totalorder %s3469_s14, 3 }
  0x65   : > { %v655_v14 = vunpack.c.0.s8 %v654_v10  ;;  %v493_v18 = vld [vmem:[%s3813_s8 + $0x8] sm:$0xff]  ;;  %v576_v28 = vld [vmem:[%s3815_s9 + $0x220] sm:$0x3]  ;;  %v578_v29 = vld [vmem:[%s3815_s9 + $0x230] sm:$0x3]  ;;  %v686_v34 = vcombine.high %v494_v25, %v494_v25 }
  0x66   : > { %v669_v20 = vcombine.high %v493_v18, %v493_v18  ;;  %v513_v30 = vld [vmem:[%s3815_s9 + $0x28] sm:$0xff]  ;;  %v515_v31 = vld [vmem:[%s3815_s9 + $0x38] sm:$0xff]  ;;  %v512_v35 = vld [vmem:[%s3815_s9 + $0x20] sm:$0xff] }
  0x67   : > { %1019 = vmatpush1.xpose.msra.mxu0 %v508_v12  ;;  %1089 = vmatpush1.xpose.msra.mxu1 %v510_v13  ;;  %v3830_v19 = vsub.s32 %v655_v14, %v657_v11  ;;  %v514_v36 = vld [vmem:[%s3815_s9 + $0x30] sm:$0xff]  ;;  %v581_v37 = vld [vmem:[%s3815_s9 + $0x248] sm:$0x3]  ;;  %v583_v38 = vld [vmem:[%s3815_s9 + $0x258] sm:$0x3] }
  0x68   : > { %1156 = vmatprep.subr.mxu0 %v577_v16  ;;  %1226 = vmatprep.subr.mxu1 %v579_v17  ;;  %v495_v41 = vld [vmem:[%s3813_s8 + $0x18] sm:$0xff]  ;;  %v580_v42 = vld [vmem:[%s3815_s9 + $0x240] sm:$0x3]  ;;  %v582_v43 = vld [vmem:[%s3815_s9 + $0x250] sm:$0x3] }
  0x69   : > { %v659_v21 = vrot.slane %v492_v8, %v3830_v19  ;;  %v666_v22 = vrot.slane %v652_v15, %v3830_v19  ;;  %v676_v23 = vrot.slane %v493_v18, %v3830_v19  ;;  %v683_v24 = vrot.slane %v669_v20, %v3830_v19  ;;  %v517_v44 = vld [vmem:[%s3815_s9 + $0x48] sm:$0xff]  ;;  %v519_v45 = vld [vmem:[%s3815_s9 + $0x58] sm:$0xff]  ;;  %v516_v49 = vld [vmem:[%s3815_s9 + $0x40] sm:$0xff] }
  0x6a   : > { %v693_v39 = vrot.slane %v494_v25, %v3830_v19  ;;  %v700_v40 = vrot.slane %v686_v34, %v3830_v19  ;;  %v703_v48 = vcombine.high %v495_v41, %v495_v41  ;;  %v518_v50 = vld [vmem:[%s3815_s9 + $0x50] sm:$0xff]  ;;  %v585_v51 = vld [vmem:[%s3815_s9 + $0x268] sm:$0x3]  ;;  %v587_v52 = vld [vmem:[%s3815_s9 + $0x278] sm:$0x3]  ;;  %v710_v53 = vrot.slane %v495_v41, %v3830_v19 }
  0x6b   : > { %v667_v26 = vcombine.high %v659_v21, %v659_v21  ;;  %v668_v27 = vcombine.high %v666_v22, %v666_v22  ;;  %v684_v32 = vcombine.high %v676_v23, %v676_v23  ;;  %v685_v33 = vcombine.high %v683_v24, %v683_v24  ;;  %v496_v55 = vld [vmem:[%s3813_s8 + $0x20] sm:$0xff]  ;;  %v586_v57 = vld [vmem:[%s3815_s9 + $0x270] sm:$0x3]  ;;  %v521_v58 = vld [vmem:[%s3815_s9 + $0x68] sm:$0xff] }
  0x6c   : > { %v701_v46 = vcombine.high %v693_v39, %v693_v39  ;;  %v702_v47 = vcombine.high %v700_v40, %v700_v40  ;;  %v717_v54 = vrot.slane %v703_v48, %v3830_v19  ;;  %v584_v56 = vld [vmem:[%s3815_s9 + $0x260] sm:$0x3]  ;;  %v523_v59 = vld [vmem:[%s3815_s9 + $0x78] sm:$0xff]  ;;  %v718_v60 = vcombine.high %v710_v53, %v710_v53  ;;  %v522_v0 = vld [vmem:[%s3815_s9 + $0x70] sm:$0xff] }
  0x6d   : > { %1052 = vmatprep.mubr.f32.mxu0 %v667_v26  ;;  %1122 = vmatprep.mubr.f32.mxu1 %v668_v27  ;;  %v720_v62 = vcombine.high %v496_v55, %v496_v55  ;;  %v520_v63 = vld [vmem:[%s3815_s9 + $0x60] sm:$0xff]  ;;  %v589_v1 = vld [vmem:[%s3815_s9 + $0x288] sm:$0x3]  ;;  %v591_v2 = vld [vmem:[%s3815_s9 + $0x298] sm:$0x3]  ;;  %v727_v3 = vrot.slane %v496_v55, %v3830_v19 }
  0x6e   : > { %1053 = vmatmul.mubr.f32.vlgmr.msra.gmra.mxu0 %v659_v21  ;;  %1123 = vmatmul.mubr.f32.vlgmr.msra.gmra.mxu1 %v666_v22  ;;  %v719_v61 = vcombine.high %v717_v54, %v717_v54  ;;  %v497_v5 = vld [vmem:[%s3813_s8 + $0x28] sm:$0xff]  ;;  %v588_v6 = vld [vmem:[%s3815_s9 + $0x280] sm:$0x3]  ;;  %v590_v7 = vld [vmem:[%s3815_s9 + $0x290] sm:$0x3] }
  0x6f   : > { %1157 = vmatpush1.xpose.msra.mxu0 %v576_v28  ;;  %1227 = vmatpush1.xpose.msra.mxu1 %v578_v29  ;;  %v734_v4 = vrot.slane %v720_v62, %v3830_v19  ;;  %v525_v8 = vld [vmem:[%s3815_s9 + $0x88] sm:$0xff]  ;;  %v527_v9 = vld [vmem:[%s3815_s9 + $0x98] sm:$0xff]  ;;  %v735_v10 = vcombine.high %v727_v3, %v727_v3  ;;  %v737_v12 = vcombine.high %v497_v5, %v497_v5  ;;  %v524_v13 = vld [vmem:[%s3815_s9 + $0x80] sm:$0xff] }
  0x70   : > { %1158 = vmatprep.subr.mxu0 %v513_v30  ;;  %1228 = vmatprep.subr.mxu1 %v515_v31  ;;  %v526_v14 = vld [vmem:[%s3815_s9 + $0x90] sm:$0xff]  ;;  %v593_v15 = vld [vmem:[%s3815_s9 + $0x2a8] sm:$0x3]  ;;  %v595_v16 = vld [vmem:[%s3815_s9 + $0x2b8] sm:$0x3]  ;;  %v744_v17 = vrot.slane %v497_v5, %v3830_v19 }
  0x71   : > { %1192 = vmatprep.mubr.f32.mxu0 %v684_v32  ;;  %1262 = vmatprep.mubr.f32.mxu1 %v685_v33  ;;  %v736_v11 = vcombine.high %v734_v4, %v734_v4  ;;  %v751_v18 = vrot.slane %v737_v12, %v3830_v19  ;;  %v498_v20 = vld [vmem:[%s3813_s8 + $0x30] sm:$0xff]  ;;  %v592_v21 = vld [vmem:[%s3815_s9 + $0x2a0] sm:$0x3]  ;;  %v597_v30 = vld [vmem:[%s3815_s9 + $0x2c8] sm:$0x3] }
  0x72   : > { %v594_v22 = vld [vmem:[%s3815_s9 + $0x2b0] sm:$0x3]  ;;  %v752_v25 = vcombine.high %v744_v17, %v744_v17  ;;  %v754_v27 = vcombine.high %v498_v20, %v498_v20  ;;  %v528_v28 = vld [vmem:[%s3815_s9 + $0xa0] sm:$0xff]  ;;  %v599_v31 = vld [vmem:[%s3815_s9 + $0x2d8] sm:$0x3]  ;;  %v761_v32 = vrot.slane %v498_v20, %v3830_v19 }
  0x73   : > { %1159 = vmatpush1.xpose.msra.mxu0 %v512_v35  ;;  %1229 = vmatpush1.xpose.msra.mxu1 %v514_v36  ;;  %v753_v26 = vcombine.high %v751_v18, %v751_v18  ;;  %v530_v29 = vld [vmem:[%s3815_s9 + $0xb0] sm:$0xff]  ;;  %v596_v35 = vld [vmem:[%s3815_s9 + $0x2c0] sm:$0x3]  ;;  %v501_v62 = vld [vmem:[%s3813_s8 + $0x48] sm:$0xff] }
  0x74   : > { %1296 = vmatprep.subr.mxu0 %v581_v37  ;;  %1366 = vmatprep.subr.mxu1 %v583_v38  ;;  %v768_v33 = vrot.slane %v754_v27, %v3830_v19  ;;  %v499_v34 = vld [vmem:[%s3813_s8 + $0x38] sm:$0xff]  ;;  %v598_v36 = vld [vmem:[%s3815_s9 + $0x2d0] sm:$0x3]  ;;  %v533_v37 = vld [vmem:[%s3815_s9 + $0xc8] sm:$0xff]  ;;  %v805_v5 = vcombine.high %v501_v62, %v501_v62 }
  0x75   : > { %v535_v38 = vld [vmem:[%s3815_s9 + $0xd8] sm:$0xff]  ;;  %v771_v41 = vcombine.high %v499_v34, %v499_v34  ;;  %v502_v12 = vld [vmem:[%s3813_s8 + $0x50] sm:$0xff] }
  0x76   : > { %1193 = vmatmul.mubr.f32.vlgmr.msra.gmra.mxu0 %v676_v23  ;;  %1263 = vmatmul.mubr.f32.vlgmr.msra.gmra.mxu1 %v683_v24  ;;  %v529_v23 = vld [vmem:[%s3815_s9 + $0xa8] sm:$0xff]  ;;  %v531_v24 = vld [vmem:[%s3815_s9 + $0xb8] sm:$0xff]  ;;  %v822_v20 = vcombine.high %v502_v12, %v502_v12 }
  0x77   : > { %1297 = vmatpush1.xpose.msra.mxu0 %v580_v42  ;;  %1367 = vmatpush1.xpose.msra.mxu1 %v582_v43  ;;  %v532_v42 = vld [vmem:[%s3815_s9 + $0xc0] sm:$0xff]  ;;  %v534_v43 = vld [vmem:[%s3815_s9 + $0xd0] sm:$0xff] }
  0x78   : > { %1298 = vmatprep.subr.mxu0 %v517_v44  ;;  %1368 = vmatprep.subr.mxu1 %v519_v45  ;;  %v601_v44 = vld [vmem:[%s3815_s9 + $0x2e8] sm:$0x3]  ;;  %v603_v45 = vld [vmem:[%s3815_s9 + $0x2f8] sm:$0x3]  ;;  %v500_v48 = vld [vmem:[%s3813_s8 + $0x40] sm:$0xff] }
  0x79   : > { %1332 = vmatprep.mubr.f32.mxu0 %v701_v46  ;;  %1402 = vmatprep.mubr.f32.mxu1 %v702_v47  ;;  %v778_v46 = vrot.slane %v499_v34, %v3830_v19  ;;  %v785_v47 = vrot.slane %v771_v41, %v3830_v19  ;;  %v788_v55 = vcombine.high %v500_v48, %v500_v48  ;;  %v503_v27 = vld [vmem:[%s3813_s8 + $0x58] sm:$0xff]  ;;  %v504_v41 = vld [vmem:[%s3813_s8 + $0x60] sm:$0xff] }
  0x7a   : > { %v839_v34 = vcombine.high %v503_v27, %v503_v27 }
  0x7b   : > { %1299 = vmatpush1.xpose.msra.mxu0 %v516_v49  ;;  %1369 = vmatpush1.xpose.msra.mxu1 %v518_v50  ;;  %v600_v49 = vld [vmem:[%s3815_s9 + $0x2e0] sm:$0x3]  ;;  %v602_v50 = vld [vmem:[%s3815_s9 + $0x2f0] sm:$0x3] }
  0x7c   : > { %1436 = vmatprep.subr.mxu0 %v585_v51  ;;  %1506 = vmatprep.subr.mxu1 %v587_v52  ;;  %v537_v51 = vld [vmem:[%s3815_s9 + $0xe8] sm:$0xff]  ;;  %v539_v52 = vld [vmem:[%s3815_s9 + $0xf8] sm:$0xff] }
  0x7e   : > { %1333 = vmatmul.mubr.f32.vlgmr.msra.gmra.mxu0 %v693_v39  ;;  %1403 = vmatmul.mubr.f32.vlgmr.msra.gmra.mxu1 %v700_v40  ;;  %v769_v39 = vcombine.high %v761_v32, %v761_v32  ;;  %v770_v40 = vcombine.high %v768_v33, %v768_v33 }
  0x7f   : > { %1437 = vmatpush1.xpose.msra.mxu0 %v584_v56  ;;  %1507 = vmatpush1.xpose.msra.mxu1 %v586_v57  ;;  %v536_v56 = vld [vmem:[%s3815_s9 + $0xe0] sm:$0xff]  ;;  %v538_v57 = vld [vmem:[%s3815_s9 + $0xf0] sm:$0xff] }
  0x80   : > { %1438 = vmatprep.subr.mxu0 %v521_v58  ;;  %1508 = vmatprep.subr.mxu1 %v523_v59  ;;  %v605_v58 = vld [vmem:[%s3815_s9 + $0x308] sm:$0x3]  ;;  %v607_v59 = vld [vmem:[%s3815_s9 + $0x318] sm:$0x3] }
  0x81   : > { %1472 = vmatprep.mubr.f32.mxu0 %v718_v60  ;;  %1542 = vmatprep.mubr.f32.mxu1 %v719_v61  ;;  %v795_v60 = vrot.slane %v500_v48, %v3830_v19  ;;  %v802_v61 = vrot.slane %v788_v55, %v3830_v19  ;;  %v856_v48 = vcombine.high %v504_v41, %v504_v41  ;;  %v505_v55 = vld [vmem:[%s3813_s8 + $0x68] sm:$0xff] }
  0x83   : > { %1439 = vmatpush1.xpose.msra.mxu0 %v520_v63  ;;  %1509 = vmatpush1.xpose.msra.mxu1 %v522_v0  ;;  %v604_v63 = vld [vmem:[%s3815_s9 + $0x300] sm:$0x3]  ;;  %v606_v0 = vld [vmem:[%s3815_s9 + $0x310] sm:$0x3] }
  0x84   : > { %1576 = vmatprep.subr.mxu0 %v589_v1  ;;  %1646 = vmatprep.subr.mxu1 %v591_v2  ;;  %v541_v1 = vld [vmem:[%s3815_s9 + $0x108] sm:$0xff]  ;;  %v543_v2 = vld [vmem:[%s3815_s9 + $0x118] sm:$0xff] }
  0x86   : > { %1473 = vmatmul.mubr.f32.vlgmr.msra.gmra.mxu0 %v710_v53  ;;  %1543 = vmatmul.mubr.f32.vlgmr.msra.gmra.mxu1 %v717_v54  ;;  %v786_v53 = vcombine.high %v778_v46, %v778_v46  ;;  %v787_v54 = vcombine.high %v785_v47, %v785_v47 }
  0x87   : > { %1577 = vmatpush1.xpose.msra.mxu0 %v588_v6  ;;  %1647 = vmatpush1.xpose.msra.mxu1 %v590_v7  ;;  %v540_v6 = vld [vmem:[%s3815_s9 + $0x100] sm:$0xff]  ;;  %v542_v7 = vld [vmem:[%s3815_s9 + $0x110] sm:$0xff] }
  0x88   : > { %1578 = vmatprep.subr.mxu0 %v525_v8  ;;  %1648 = vmatprep.subr.mxu1 %v527_v9  ;;  %v609_v8 = vld [vmem:[%s3815_s9 + $0x328] sm:$0x3]  ;;  %v611_v9 = vld [vmem:[%s3815_s9 + $0x338] sm:$0x3] }
  0x89   : > { %1612 = vmatprep.mubr.f32.mxu0 %v735_v10  ;;  %1682 = vmatprep.mubr.f32.mxu1 %v736_v11  ;;  %v812_v10 = vrot.slane %v501_v62, %v3830_v19  ;;  %v819_v11 = vrot.slane %v805_v5, %v3830_v19  ;;  %v873_v62 = vcombine.high %v505_v55, %v505_v55  ;;  %v506_v5 = vld [vmem:[%s3813_s8 + $0x70] sm:$0xff] }
  0x8b   : > { %1579 = vmatpush1.xpose.msra.mxu0 %v524_v13  ;;  %1649 = vmatpush1.xpose.msra.mxu1 %v526_v14  ;;  %v608_v13 = vld [vmem:[%s3815_s9 + $0x320] sm:$0x3]  ;;  %v610_v14 = vld [vmem:[%s3815_s9 + $0x330] sm:$0x3] }
  0x8c   : > { %1716 = vmatprep.subr.mxu0 %v593_v15  ;;  %1786 = vmatprep.subr.mxu1 %v595_v16  ;;  %v545_v15 = vld [vmem:[%s3815_s9 + $0x128] sm:$0xff]  ;;  %v547_v16 = vld [vmem:[%s3815_s9 + $0x138] sm:$0xff] }
  0x8e   : > { %1613 = vmatmul.mubr.f32.vlgmr.msra.gmra.mxu0 %v727_v3  ;;  %1683 = vmatmul.mubr.f32.vlgmr.msra.gmra.mxu1 %v734_v4  ;;  %v803_v3 = vcombine.high %v795_v60, %v795_v60  ;;  %v804_v4 = vcombine.high %v802_v61, %v802_v61 }
  0x8f   : > { %1717 = vmatpush1.xpose.msra.mxu0 %v592_v21  ;;  %1787 = vmatpush1.xpose.msra.mxu1 %v594_v22  ;;  %v544_v21 = vld [vmem:[%s3815_s9 + $0x120] sm:$0xff]  ;;  %v546_v22 = vld [vmem:[%s3815_s9 + $0x130] sm:$0xff] }
  0x90   : > { %1718 = vmatprep.subr.mxu0 %v529_v23  ;;  %1788 = vmatprep.subr.mxu1 %v531_v24  ;;  %v613_v23 = vld [vmem:[%s3815_s9 + $0x348] sm:$0x3]  ;;  %v615_v24 = vld [vmem:[%s3815_s9 + $0x358] sm:$0x3] }
  0x91   : > { %1752 = vmatprep.mubr.f32.mxu0 %v752_v25  ;;  %1822 = vmatprep.mubr.f32.mxu1 %v753_v26  ;;  %v829_v25 = vrot.slane %v502_v12, %v3830_v19  ;;  %v836_v26 = vrot.slane %v822_v20, %v3830_v19  ;;  %v890_v12 = vcombine.high %v506_v5, %v506_v5  ;;  %v507_v20 = vld [vmem:[%s3813_s8 + $0x78] sm:$0xff] }
  0x93   : > { %1719 = vmatpush1.xpose.msra.mxu0 %v528_v28  ;;  %1789 = vmatpush1.xpose.msra.mxu1 %v530_v29  ;;  %v612_v28 = vld [vmem:[%s3815_s9 + $0x340] sm:$0x3]  ;;  %v614_v29 = vld [vmem:[%s3815_s9 + $0x350] sm:$0x3] }
  0x94   : > { %1856 = vmatprep.subr.mxu0 %v597_v30  ;;  %1926 = vmatprep.subr.mxu1 %v599_v31  ;;  %v549_v30 = vld [vmem:[%s3815_s9 + $0x148] sm:$0xff]  ;;  %v551_v31 = vld [vmem:[%s3815_s9 + $0x158] sm:$0xff] }
  0x96   : > { %1753 = vmatmul.mubr.f32.vlgmr.msra.gmra.mxu0 %v744_v17  ;;  %1823 = vmatmul.mubr.f32.vlgmr.msra.gmra.mxu1 %v751_v18  ;;  %v820_v17 = vcombine.high %v812_v10, %v812_v10  ;;  %v821_v18 = vcombine.high %v819_v11, %v819_v11 }
  0x97   : > { %1857 = vmatpush1.xpose.msra.mxu0 %v596_v35  ;;  %1927 = vmatpush1.xpose.msra.mxu1 %v598_v36  ;;  %v548_v35 = vld [vmem:[%s3815_s9 + $0x140] sm:$0xff]  ;;  %v550_v36 = vld [vmem:[%s3815_s9 + $0x150] sm:$0xff] }
  0x98   : > { %1858 = vmatprep.subr.mxu0 %v533_v37  ;;  %1928 = vmatprep.subr.mxu1 %v535_v38  ;;  %v617_v37 = vld [vmem:[%s3815_s9 + $0x368] sm:$0x3]  ;;  %v619_v38 = vld [vmem:[%s3815_s9 + $0x378] sm:$0x3] }
  0x99   : > { %1892 = vmatprep.mubr.f32.mxu0 %v769_v39  ;;  %1962 = vmatprep.mubr.f32.mxu1 %v770_v40  ;;  %v846_v39 = vrot.slane %v503_v27, %v3830_v19  ;;  %v853_v40 = vrot.slane %v839_v34, %v3830_v19  ;;  %v907_v27 = vcombine.high %v507_v20, %v507_v20  ;;  %v632_v34 = vld [vmem:[%s3815_s9 + $0x3e0] sm:$0x3] }
  0x9b   : > { %1859 = vmatpush1.xpose.msra.mxu0 %v532_v42  ;;  %1929 = vmatpush1.xpose.msra.mxu1 %v534_v43  ;;  %v616_v42 = vld [vmem:[%s3815_s9 + $0x360] sm:$0x3]  ;;  %v618_v43 = vld [vmem:[%s3815_s9 + $0x370] sm:$0x3] }
  0x9c   : > { %1996 = vmatprep.subr.mxu0 %v601_v44  ;;  %2066 = vmatprep.subr.mxu1 %v603_v45  ;;  %v553_v44 = vld [vmem:[%s3815_s9 + $0x168] sm:$0xff]  ;;  %v555_v45 = vld [vmem:[%s3815_s9 + $0x178] sm:$0xff] }
  0x9e   : > { %1893 = vmatmul.mubr.f32.vlgmr.msra.gmra.mxu0 %v761_v32  ;;  %1963 = vmatmul.mubr.f32.vlgmr.msra.gmra.mxu1 %v768_v33  ;;  %v837_v32 = vcombine.high %v829_v25, %v829_v25  ;;  %v838_v33 = vcombine.high %v836_v26, %v836_v26 }
  0x9f   : > { %1997 = vmatpush1.xpose.msra.mxu0 %v600_v49  ;;  %2067 = vmatpush1.xpose.msra.mxu1 %v602_v50  ;;  %v552_v49 = vld [vmem:[%s3815_s9 + $0x160] sm:$0xff]  ;;  %v554_v50 = vld [vmem:[%s3815_s9 + $0x170] sm:$0xff] }
  0xa0   : > { %1998 = vmatprep.subr.mxu0 %v537_v51  ;;  %2068 = vmatprep.subr.mxu1 %v539_v52  ;;  %v621_v51 = vld [vmem:[%s3815_s9 + $0x388] sm:$0x3]  ;;  %v623_v52 = vld [vmem:[%s3815_s9 + $0x398] sm:$0x3] }
  0xa1   : > { %2032 = vmatprep.mubr.f32.mxu0 %v786_v53  ;;  %2102 = vmatprep.mubr.f32.mxu1 %v787_v54  ;;  %v863_v53 = vrot.slane %v504_v41, %v3830_v19  ;;  %v870_v54 = vrot.slane %v856_v48, %v3830_v19 }
  0xa3   : > { %1999 = vmatpush1.xpose.msra.mxu0 %v536_v56  ;;  %2069 = vmatpush1.xpose.msra.mxu1 %v538_v57  ;;  %v620_v56 = vld [vmem:[%s3815_s9 + $0x380] sm:$0x3]  ;;  %v622_v57 = vld [vmem:[%s3815_s9 + $0x390] sm:$0x3] }
  0xa4   : > { %2136 = vmatprep.subr.mxu0 %v605_v58  ;;  %2206 = vmatprep.subr.mxu1 %v607_v59  ;;  %v557_v58 = vld [vmem:[%s3815_s9 + $0x188] sm:$0xff]  ;;  %v559_v59 = vld [vmem:[%s3815_s9 + $0x198] sm:$0xff] }
  0xa6   : > { %2033 = vmatmul.mubr.f32.vlgmr.msra.gmra.mxu0 %v778_v46  ;;  %2103 = vmatmul.mubr.f32.vlgmr.msra.gmra.mxu1 %v785_v47  ;;  %v854_v46 = vcombine.high %v846_v39, %v846_v39  ;;  %v855_v47 = vcombine.high %v853_v40, %v853_v40 }
  0xa7   : > { %2137 = vmatpush1.xpose.msra.mxu0 %v604_v63  ;;  %2207 = vmatpush1.xpose.msra.mxu1 %v606_v0  ;;  %v556_v63 = vld [vmem:[%s3815_s9 + $0x180] sm:$0xff]  ;;  %v558_v0 = vld [vmem:[%s3815_s9 + $0x190] sm:$0xff] }
  0xa8   : > { %2138 = vmatprep.subr.mxu0 %v541_v1  ;;  %2208 = vmatprep.subr.mxu1 %v543_v2  ;;  %v625_v1 = vld [vmem:[%s3815_s9 + $0x3a8] sm:$0x3]  ;;  %v627_v2 = vld [vmem:[%s3815_s9 + $0x3b8] sm:$0x3] }
  0xa9   : > { %2172 = vmatprep.mubr.f32.mxu0 %v803_v3  ;;  %2242 = vmatprep.mubr.f32.mxu1 %v804_v4  ;;  %v880_v3 = vrot.slane %v505_v55, %v3830_v19  ;;  %v887_v4 = vrot.slane %v873_v62, %v3830_v19 }
  0xab   : > { %2139 = vmatpush1.xpose.msra.mxu0 %v540_v6  ;;  %2209 = vmatpush1.xpose.msra.mxu1 %v542_v7  ;;  %v624_v6 = vld [vmem:[%s3815_s9 + $0x3a0] sm:$0x3]  ;;  %v626_v7 = vld [vmem:[%s3815_s9 + $0x3b0] sm:$0x3] }
  0xac   : > { %2276 = vmatprep.subr.mxu0 %v609_v8  ;;  %2346 = vmatprep.subr.mxu1 %v611_v9  ;;  %v561_v8 = vld [vmem:[%s3815_s9 + $0x1a8] sm:$0xff]  ;;  %v563_v9 = vld [vmem:[%s3815_s9 + $0x1b8] sm:$0xff] }
  0xae   : > { %2173 = vmatmul.mubr.f32.vlgmr.msra.gmra.mxu0 %v795_v60  ;;  %2243 = vmatmul.mubr.f32.vlgmr.msra.gmra.mxu1 %v802_v61  ;;  %v871_v60 = vcombine.high %v863_v53, %v863_v53  ;;  %v872_v61 = vcombine.high %v870_v54, %v870_v54 }
  0xaf   : > { %2277 = vmatpush1.xpose.msra.mxu0 %v608_v13  ;;  %2347 = vmatpush1.xpose.msra.mxu1 %v610_v14  ;;  %v560_v13 = vld [vmem:[%s3815_s9 + $0x1a0] sm:$0xff]  ;;  %v562_v14 = vld [vmem:[%s3815_s9 + $0x1b0] sm:$0xff] }
  0xb0   : > { %2278 = vmatprep.subr.mxu0 %v545_v15  ;;  %2348 = vmatprep.subr.mxu1 %v547_v16  ;;  %v629_v15 = vld [vmem:[%s3815_s9 + $0x3c8] sm:$0x3]  ;;  %v631_v16 = vld [vmem:[%s3815_s9 + $0x3d8] sm:$0x3] }
  0xb1   : > { %2312 = vmatprep.mubr.f32.mxu0 %v820_v17  ;;  %2382 = vmatprep.mubr.f32.mxu1 %v821_v18  ;;  %v897_v17 = vrot.slane %v506_v5, %v3830_v19  ;;  %v904_v18 = vrot.slane %v890_v12, %v3830_v19 }
  0xb3   : > { %2279 = vmatpush1.xpose.msra.mxu0 %v544_v21  ;;  %2349 = vmatpush1.xpose.msra.mxu1 %v546_v22  ;;  %v628_v21 = vld [vmem:[%s3815_s9 + $0x3c0] sm:$0x3]  ;;  %v630_v22 = vld [vmem:[%s3815_s9 + $0x3d0] sm:$0x3] }
  0xb4   : > { %2416 = vmatprep.subr.mxu0 %v613_v23  ;;  %2486 = vmatprep.subr.mxu1 %v615_v24  ;;  %v565_v23 = vld [vmem:[%s3815_s9 + $0x1c8] sm:$0xff]  ;;  %v567_v24 = vld [vmem:[%s3815_s9 + $0x1d8] sm:$0xff] }
  0xb6   : > { %2313 = vmatmul.mubr.f32.vlgmr.msra.gmra.mxu0 %v812_v10  ;;  %2383 = vmatmul.mubr.f32.vlgmr.msra.gmra.mxu1 %v819_v11  ;;  %v888_v10 = vcombine.high %v880_v3, %v880_v3  ;;  %v889_v11 = vcombine.high %v887_v4, %v887_v4 }
  0xb7   : > { %2417 = vmatpush1.xpose.msra.mxu0 %v612_v28  ;;  %2487 = vmatpush1.xpose.msra.mxu1 %v614_v29  ;;  %v564_v28 = vld [vmem:[%s3815_s9 + $0x1c0] sm:$0xff]  ;;  %v566_v29 = vld [vmem:[%s3815_s9 + $0x1d0] sm:$0xff] }
  0xb8   : > { %2418 = vmatprep.subr.mxu0 %v549_v30  ;;  %2488 = vmatprep.subr.mxu1 %v551_v31  ;;  %v633_v30 = vld [vmem:[%s3815_s9 + $0x3e8] sm:$0x3]  ;;  %v635_v31 = vld [vmem:[%s3815_s9 + $0x3f8] sm:$0x3] }
  0xb9   : > { %2452 = vmatprep.mubr.f32.mxu0 %v837_v32  ;;  %2522 = vmatprep.mubr.f32.mxu1 %v838_v33  ;;  %v914_v32 = vrot.slane %v507_v20, %v3830_v19  ;;  %v921_v33 = vrot.slane %v907_v27, %v3830_v19  ;;  %v570_v19 = vld [vmem:[%s3815_s9 + $0x1f0] sm:$0xff] }
  0xbb   : > { %2419 = vmatpush1.xpose.msra.mxu0 %v548_v35  ;;  %2489 = vmatpush1.xpose.msra.mxu1 %v550_v36  ;;  %v634_v35 = vld [vmem:[%s3815_s9 + $0x3f0] sm:$0x3]  ;;  %v569_v36 = vld [vmem:[%s3815_s9 + $0x1e8] sm:$0xff] }
  0xbc   : > { %2556 = vmatprep.subr.mxu0 %v617_v37  ;;  %2626 = vmatprep.subr.mxu1 %v619_v38  ;;  %v571_v37 = vld [vmem:[%s3815_s9 + $0x1f8] sm:$0xff]  ;;  %v922_v38 = vcombine.high %v914_v32, %v914_v32 }
  0xbe   : > { %2453 = vmatmul.mubr.f32.vlgmr.msra.gmra.mxu0 %v829_v25  ;;  %2523 = vmatmul.mubr.f32.vlgmr.msra.gmra.mxu1 %v836_v26  ;;  %v905_v25 = vcombine.high %v897_v17, %v897_v17  ;;  %v906_v26 = vcombine.high %v904_v18, %v904_v18 }
  0xbf   : > { %2557 = vmatpush1.xpose.msra.mxu0 %v616_v42  ;;  %2627 = vmatpush1.xpose.msra.mxu1 %v618_v43 }
  0xc0   : > { %2558 = vmatprep.subr.mxu0 %v553_v44  ;;  %2628 = vmatprep.subr.mxu1 %v555_v45 }
  0xc1   : > { %2592 = vmatprep.mubr.f32.mxu0 %v854_v46  ;;  %2662 = vmatprep.mubr.f32.mxu1 %v855_v47 }
  0xc3   : > { %2559 = vmatpush1.xpose.msra.mxu0 %v552_v49  ;;  %2629 = vmatpush1.xpose.msra.mxu1 %v554_v50 }
  0xc4   : > { %2696 = vmatprep.subr.mxu0 %v621_v51  ;;  %2766 = vmatprep.subr.mxu1 %v623_v52 }
  0xc6   : > { %2593 = vmatmul.mubr.f32.vlgmr.msra.gmra.mxu0 %v846_v39  ;;  %2663 = vmatmul.mubr.f32.vlgmr.msra.gmra.mxu1 %v853_v40  ;;  %v923_v39 = vcombine.high %v921_v33, %v921_v33  ;;  %v568_v40 = vld [vmem:[%s3815_s9 + $0x1e0] sm:$0xff] }
  0xc7   : > { %2697 = vmatpush1.xpose.msra.mxu0 %v620_v56  ;;  %2767 = vmatpush1.xpose.msra.mxu1 %v622_v57 }
  0xc8   : > { %2698 = vmatprep.subr.mxu0 %v557_v58  ;;  %2768 = vmatprep.subr.mxu1 %v559_v59 }
  0xc9   : > { %2732 = vmatprep.mubr.f32.mxu0 %v871_v60  ;;  %2802 = vmatprep.mubr.f32.mxu1 %v872_v61 }
  0xcb   : > { %2699 = vmatpush1.xpose.msra.mxu0 %v556_v63  ;;  %2769 = vmatpush1.xpose.msra.mxu1 %v558_v0 }
  0xcc   : > { %2836 = vmatprep.subr.mxu0 %v625_v1  ;;  %2906 = vmatprep.subr.mxu1 %v627_v2 }
  0xce   : > { %2733 = vmatmul.mubr.f32.vlgmr.msra.gmra.mxu0 %v863_v53  ;;  %2803 = vmatmul.mubr.f32.vlgmr.msra.gmra.mxu1 %v870_v54 }
  0xcf   : > { %2837 = vmatpush1.xpose.msra.mxu0 %v624_v6  ;;  %2907 = vmatpush1.xpose.msra.mxu1 %v626_v7 }
  0xd0   : > { %2838 = vmatprep.subr.mxu0 %v561_v8  ;;  %2908 = vmatprep.subr.mxu1 %v563_v9 }
  0xd1   : > { %2872 = vmatprep.mubr.f32.mxu0 %v888_v10  ;;  %2942 = vmatprep.mubr.f32.mxu1 %v889_v11 }
  0xd3   : > { %2839 = vmatpush1.xpose.msra.mxu0 %v560_v13  ;;  %2909 = vmatpush1.xpose.msra.mxu1 %v562_v14 }
  0xd4   : > { %2976 = vmatprep.subr.mxu0 %v629_v15  ;;  %3046 = vmatprep.subr.mxu1 %v631_v16 }
  0xd6   : > { %2873 = vmatmul.mubr.f32.vlgmr.msra.gmra.mxu0 %v880_v3  ;;  %2943 = vmatmul.mubr.f32.vlgmr.msra.gmra.mxu1 %v887_v4 }
  0xd7   : > { %2977 = vmatpush1.xpose.msra.mxu0 %v628_v21  ;;  %3047 = vmatpush1.xpose.msra.mxu1 %v630_v22 }
  0xd8   : > { %2978 = vmatprep.subr.mxu0 %v565_v23  ;;  %3048 = vmatprep.subr.mxu1 %v567_v24 }
  0xd9   : > { %3012 = vmatprep.mubr.f32.mxu0 %v905_v25  ;;  %3082 = vmatprep.mubr.f32.mxu1 %v906_v26 }
  0xdb   : > { %2979 = vmatpush1.xpose.msra.mxu0 %v564_v28  ;;  %3049 = vmatpush1.xpose.msra.mxu1 %v566_v29 }
  0xdc   : > { %3116 = vmatprep.subr.mxu0 %v633_v30  ;;  %3186 = vmatprep.subr.mxu1 %v635_v31 }
  0xde   : > { %3013 = vmatmul.mubr.f32.vlgmr.msra.gmra.mxu0 %v897_v17  ;;  %3083 = vmatmul.mubr.f32.vlgmr.msra.gmra.mxu1 %v904_v18 }
  0xdf   : > { %3117 = vmatpush1.xpose.msra.mxu0 %v632_v34  ;;  %3187 = vmatpush1.xpose.msra.mxu1 %v634_v35 }
  0xe0   : > { %3118 = vmatprep.subr.mxu0 %v569_v36  ;;  %3188 = vmatprep.subr.mxu1 %v571_v37 }
  0xe1   : > { %3152 = vmatprep.mubr.f32.mxu0 %v922_v38  ;;  %3222 = vmatprep.mubr.f32.mxu1 %v923_v39 }
  0xe3   : > { %3119 = vmatpush1.xpose.msra.mxu0 %v568_v40  ;;  %3189 = vmatpush1.xpose.msra.mxu1 %v570_v19 }
  0xe6   : > { %3153 = vmatmul.mubr.f32.vlgmr.msra.gmra.mxu0 %v914_v32  ;;  %3223 = vmatmul.mubr.f32.vlgmr.msra.gmra.mxu1 %v921_v33 }
 0x12e   : > { %v1054_v41 = vpop.f32.mrf.mxu0  ;;  %v1124_v42 = vpop.f32.mrf.mxu1 }
 0x12f   : > { %v1125_v61 = vadd.f32 %v1124_v42, %v1054_v41 }
 0x130   : > { %v1056_v43 = vpop.f32.mrf.mxu0  ;;  %v1126_v44 = vpop.f32.mrf.mxu1 }
 0x136   : > { %v1194_v45 = vpop.f32.mrf.mxu0  ;;  %v1264_v46 = vpop.f32.mrf.mxu1 }
 0x137   : > { %v1195_v62 = vadd.f32 %v1194_v45, %v1125_v61 }
 0x138   : > { %v1196_v47 = vpop.f32.mrf.mxu0  ;;  %v1266_v48 = vpop.f32.mrf.mxu1 }
 0x139   : > { %v1265_v1 = vadd.f32 %v1264_v46, %v1195_v62 }
 0x13e   : > { %v1334_v49 = vpop.f32.mrf.mxu0  ;;  %v1404_v50 = vpop.f32.mrf.mxu1 }
 0x13f   : > { %v1335_v4 = vadd.f32 %v1334_v49, %v1265_v1 }
 0x140   : > { %v1336_v51 = vpop.f32.mrf.mxu0  ;;  %v1406_v52 = vpop.f32.mrf.mxu1 }
 0x141   : > { %v1405_v5 = vadd.f32 %v1404_v50, %v1335_v4 }
 0x146   : > { %v1474_v53 = vpop.f32.mrf.mxu0  ;;  %v1544_v54 = vpop.f32.mrf.mxu1 }
 0x147   : > { %v1475_v8 = vadd.f32 %v1474_v53, %v1405_v5  ;;  %v491_v5 = vld [vmem:[#allocation2] sm:$0x3] }
 0x148   : > { %v1476_v55 = vpop.f32.mrf.mxu0  ;;  %v1546_v56 = vpop.f32.mrf.mxu1 }
 0x149   : > { %v1545_v11 = vadd.f32 %v1544_v54, %v1475_v8 }
 0x14e   : > { %v1614_v57 = vpop.f32.mrf.mxu0  ;;  %v1684_v58 = vpop.f32.mrf.mxu1 }
 0x14f   : > { %v1615_v12 = vadd.f32 %v1614_v57, %v1545_v11 }
 0x150   : > { %v1616_v59 = vpop.f32.mrf.mxu0  ;;  %v1686_v60 = vpop.f32.mrf.mxu1 }
 0x151   : > { %v1685_v17 = vadd.f32 %v1684_v58, %v1615_v12 }
 0x156   : > { %v1754_v63 = vpop.f32.mrf.mxu0  ;;  %v1824_v0 = vpop.f32.mrf.mxu1 }
 0x157   : > { %v1755_v18 = vadd.f32 %v1754_v63, %v1685_v17 }
 0x158   : > { %v1756_v2 = vpop.f32.mrf.mxu0  ;;  %v1826_v3 = vpop.f32.mrf.mxu1 }
 0x159   : > { %v1825_v22 = vadd.f32 %v1824_v0, %v1755_v18 }
 0x15e   : > { %v1894_v6 = vpop.f32.mrf.mxu0  ;;  %v1964_v7 = vpop.f32.mrf.mxu1 }
 0x15f   : > { %v1895_v25 = vadd.f32 %v1894_v6, %v1825_v22 }
 0x160   : > { %v1896_v9 = vpop.f32.mrf.mxu0  ;;  %v1966_v10 = vpop.f32.mrf.mxu1 }
 0x161   : > { %v1965_v26 = vadd.f32 %v1964_v7, %v1895_v25 }
 0x166   : > { %v2034_v13 = vpop.f32.mrf.mxu0  ;;  %v2104_v14 = vpop.f32.mrf.mxu1 }
 0x167   : > { %v2035_v29 = vadd.f32 %v2034_v13, %v1965_v26 }
 0x168   : > { %v2036_v15 = vpop.f32.mrf.mxu0  ;;  %v2106_v16 = vpop.f32.mrf.mxu1 }
 0x169   : > { %v2105_v32 = vadd.f32 %v2104_v14, %v2035_v29 }
 0x16e   : > { %v2174_v20 = vpop.f32.mrf.mxu0  ;;  %v2244_v21 = vpop.f32.mrf.mxu1 }
 0x16f   : > { %v2175_v33 = vadd.f32 %v2174_v20, %v2105_v32 }
 0x170   : > { %v2176_v23 = vpop.f32.mrf.mxu0  ;;  %v2246_v24 = vpop.f32.mrf.mxu1 }
 0x171   : > { %v2245_v38 = vadd.f32 %v2244_v21, %v2175_v33 }
 0x176   : > { %v2314_v27 = vpop.f32.mrf.mxu0  ;;  %v2384_v28 = vpop.f32.mrf.mxu1 }
 0x177   : > { %v2315_v39 = vadd.f32 %v2314_v27, %v2245_v38 }
 0x178   : > { %v2316_v30 = vpop.f32.mrf.mxu0  ;;  %v2386_v31 = vpop.f32.mrf.mxu1 }
 0x179   : > { %v2385_v41 = vadd.f32 %v2384_v28, %v2315_v39 }
 0x17e   : > { %v2454_v34 = vpop.f32.mrf.mxu0  ;;  %v2524_v35 = vpop.f32.mrf.mxu1 }
 0x17f   : > { %v2455_v44 = vadd.f32 %v2454_v34, %v2385_v41 }
 0x180   : > { %v2456_v36 = vpop.f32.mrf.mxu0  ;;  %v2526_v37 = vpop.f32.mrf.mxu1 }
 0x181   : > { %v2525_v45 = vadd.f32 %v2524_v35, %v2455_v44 }
 0x186   : > { %v2594_v40 = vpop.f32.mrf.mxu0  ;;  %v2664_v19 = vpop.f32.mrf.mxu1 }
 0x187   : > { %v2595_v48 = vadd.f32 %v2594_v40, %v2525_v45 }
 0x188   : > { %v2596_v42 = vpop.f32.mrf.mxu0  ;;  %v2666_v43 = vpop.f32.mrf.mxu1 }
 0x189   : > { %v2665_v51 = vadd.f32 %v2664_v19, %v2595_v48 }
 0x18e   : > { %v2734_v46 = vpop.f32.mrf.mxu0  ;;  %v2804_v47 = vpop.f32.mrf.mxu1 }
 0x18f   : > { %v2735_v52 = vadd.f32 %v2734_v46, %v2665_v51 }
 0x190   : > { %v2736_v49 = vpop.f32.mrf.mxu0  ;;  %v2806_v50 = vpop.f32.mrf.mxu1 }
 0x191   : > { %v2805_v57 = vadd.f32 %v2804_v47, %v2735_v52 }
 0x196   : > { %v2874_v53 = vpop.f32.mrf.mxu0  ;;  %v2944_v54 = vpop.f32.mrf.mxu1 }
 0x197   : > { %v2875_v58 = vadd.f32 %v2874_v53, %v2805_v57 }
 0x198   : > { %v2876_v55 = vpop.f32.mrf.mxu0  ;;  %v2946_v56 = vpop.f32.mrf.mxu1 }
 0x199   : > { %v2945_v61 = vadd.f32 %v2944_v54, %v2875_v58 }
 0x19e   : > { %v3014_v59 = vpop.f32.mrf.mxu0  ;;  %v3084_v60 = vpop.f32.mrf.mxu1 }
 0x19f   : > { %v3015_v0 = vadd.f32 %v3014_v59, %v2945_v61 }
 0x1a0   : > { %v3016_v62 = vpop.f32.mrf.mxu0  ;;  %v3086_v63 = vpop.f32.mrf.mxu1 }
 0x1a1   : > { %v3085_v1 = vadd.f32 %v3084_v60, %v3015_v0 }
 0x1a6   : > { %v3154_v2 = vpop.f32.mrf.mxu0  ;;  %v3224_v3 = vpop.f32.mrf.mxu1 }
 0x1a7   : > { %v3155_v4 = vadd.f32 %v3154_v2, %v3085_v1 }
 0x1a8   : > { %v3156_v6 = vpop.f32.mrf.mxu0  ;;  %v3226_v7 = vpop.f32.mrf.mxu1 }
 0x1a9   : > { %v3225_v8 = vadd.f32 %v3224_v3, %v3155_v4  ;;  %3234 = sbr.rel (%p3339_p11) target bundleno = 440 (0x1b8), region = 63 }
 0x1ab   : > { %v3228_v9 = vadd.f32 %v3225_v8, %v491_v5 }
 0x1ad   : > { %3230 = vst.msk [vmem:[#allocation2] sm:$0x3] %vm3229_vm1, %v3228_v9 }
 0x1ae   : > { %v3340_v11 = vld [vmem:[%s4034_s2] ss:$0 sm:$0xff] }
 0x1b4   : > { %v3235_v10 = vld [vmem:[#allocation2] sm:$0x3] }
 0x1b5   : > { %v3243_v12 = vadd.f32 %v3340_v11, %v3235_v10 }
 0x1b7   : > { %3244 = vst.msk [vmem:[#allocation4] sm:$0x3] %vm3229_vm1, %v3243_v12 }
 0x1b8 PF: > { %p4002_p12 = scmp.eq.s32.totalorder %s3328_s17, 3  ;;  %s3481_s19 = smov [#allocation4]  }
 0x1b9   : > { %s3254_s20 = sshll.u32 %s3481_s19, 4  ;;  %s3255_s20 = int_to_ptr.vmem [resolvable:$true] %s3254_s20 }
 0x1ba   : > { %s3411_s14 = scalar_lea.vmem %s3255_s20, 32  ;;  %p3418_p2 = scmp.lt.s32.totalorder %s3255_s20, %s3255_s20 }
 0x1bb   : > { %p3412_p13 = scmp.ne.s32.totalorder %s3255_s20, %s3411_s14  ;;  %p3419_p3 = scmp.lt.s32.totalorder %s3411_s14, %s3411_s14 }
 0x1bd   : > { %p3413_p0 = pnand %p3412_p13, %p4002_p12  ;;  %p3420_p4 = por %p3419_p3, %p3418_p2 }
 0x1bf   : > { %p3414_p1 = pneg %p3413_p0 }
 0x1c1   : > { %p3421_p5 = pnand %p3420_p4, %p3414_p1 }
 0x1c3   : > { %3424 = shalt.err (!%p3421_p5)
}
 0x1c4   : > { %3347 = dma.vmem_to_hbm [thread:$0]  (%p4002_p12), %s3255_s20, 32, %s4035_s3, [#allocation5]  }
 0x1c5   : > { %3456 = dma.done.wait (%p4002_p12), [#allocation5], 32  }
 0x1c6   : > { %3458 = vsyncadd (%p4002_p12), [#allocation5], 4294967264 }
 0x1c7 PF: > { %s14_s16 = sadd.s32 1, %s3477_s16   ;;  %s4037_s12 = smov %s3465_s13 }
 0x1c8   : > { %p11_p6 = scmp.ge.s32.totalorder %s14_s16, 6   ;;  %s4038_s13 = smov %s3538_s21 }
 0x1c9   : > { %s4039_s14 = smov %s3473_s15  ;;  %s4040_s15 = smov %s4042_s18 }
 0x1ca   :  { %13 = sbr.rel (!%p11_p6) target bundleno = 3 (0x3), region = 99 }
 0x1cf   :  { %3267 = vsyncpa [#allocation5], 1 }
 0x1d0   :  { %3269 = vsyncpa [#allocation5 + $0x1], 1 }

// kernel: convnet_forward.2
= control target key start
LH: loop header
LB: loop body
LE: loop exit
PB: predicated region body
PF: predicated region fallthrough
CT: control target
= control target key end

     0   :  { %11 = vsyncpa [#allocation3], 0  ;;  %s6344_s21 = smov [#allocation2]   ;;  %s11756_s0 = inlined_call_operand.vmem [shape: f32[9,512], index: 0, kind: input, shape index: {}]   ;;  %s11757_s1 = inlined_call_operand.hbm [shape: f32[9,1,512], index: 1, kind: input, shape index: {}]   ;;  %s11758_s2 = inlined_call_operand.vmem [shape: f32[64,9], index: 2, kind: input, shape index: {}]   ;;  %s11759_s3 = inlined_call_operand.vmem [shape: f32[64,1], index: 3, kind: input, shape index: {}]   ;;  %s11760_s4 = inlined_call_operand.vmem [shape: f32[9,128,64], index: 4, kind: input, shape index: {}]   ;;  %s11761_s5 = inlined_call_operand.vmem [shape: f32[128,1], index: 5, kind: input, shape index: {}]   ;;  %s11762_s6 = inlined_call_operand.vmem [shape: f32[2,128,256], index: 6, kind: output, shape index: {}]  }
   0x1   :  { %s19_s22 = sshll.u32 %s6344_s21, 4  ;;  %s20_s22 = int_to_ptr.vmem [resolvable:$true] %s19_s22 }
   0x2   :  { %s6330_s23 = scalar_lea.vmem %s20_s22, 576  ;;  %p6335_p1 = scmp.lt.s32.totalorder %s20_s22, %s20_s22 }
   0x3   :  { %p6331_p0 = scmp.ne.s32.totalorder %s20_s22, %s6330_s23  ;;  %p6336_p2 = scmp.lt.s32.totalorder %s6330_s23, %s6330_s23 }
   0x5   :  { %p6337_p3 = por %p6336_p2, %p6335_p1 }
   0x7   :  { %p6338_p4 = pnand %p6337_p3, %p6331_p0 }
   0x9   :  { %6341 = shalt.err (!%p6338_p4)
}
   0xa   :  { %s6345_s24 = smov 64   ;;  %s6346_s25 = smov 4  }
   0xb   :  { %25 = dma.hbm_to_vmem [thread:$0]  %s11757_s1, 576, %s20_s22, [#allocation3], %s6345_s24, %s6345_s24, %s6346_s25  }
   0xc   :  { %6342 = dma.done.wait [#allocation3], 576  }
   0xd   :  { %6343 = vsyncadd [#allocation3], 4294966720  ;;  %v11763_v0 = vmov 0.0   ;;  %v6348_v1 = vmov 0   ;;  %vm126_vm0 = vcmask 1040384   ;;  %v46_v6 = vld [vmem:[%s11756_s0 + $0x8] sm:$0xff] }
   0xe   :  { %203 = vmatprep.mubr.f32.mxu0 %v11763_v0  ;;  %316 = vmatprep.mubr.f32.mxu1 %v11763_v0  ;;  %v50_v2 = vld [vmem:[%s11756_s0 + $0x28] sm:$0x1]  ;;  %v52_v3 = vld [vmem:[%s11756_s0 + $0x38] sm:$0x1]  ;;  %v49_v4 = vld [vmem:[%s11756_s0 + $0x20] sm:$0x1] }
   0xf   :  { %6321 = vset.pattern.permute.xlu1 %v6348_v1  ;;  %6320 = vset.pattern.permute.xlu0 %v6348_v1  ;;  %v51_v5 = vld [vmem:[%s11756_s0 + $0x30] sm:$0x1]  ;;  %v48_v7 = vld [vmem:[%s11756_s0 + $0x18] sm:$0xff]  ;;  %v45_v8 = vld [vmem:[%s11756_s0] sm:$0xff]  ;;  %vm101_vm1 = vcmask 72704   ;;  %s6350_s24 = smov 17  }
  0x10   :  { %5839 = vmatprep.subr.msk.mxu0 %vm126_vm0, %v50_v2  ;;  %5849 = vmatprep.subr.msk.mxu1 %vm126_vm0, %v52_v3  ;;  %v47_v9 = vld [vmem:[%s11756_s0 + $0x10] sm:$0xff]  ;;  %v37_v10 = vld [vmem:[%s11758_s2] sm:$0xff]  ;;  %v58_v11 = vld [vmem:[%s11759_s3 + $0x28] sm:$0xff]  ;;  %s6351_s0 = smov 15   ;;  %vm735_vm3 = vcmask 523264   ;;  %s6352_s8 = smov 1  }
  0x11   :  { %5840 = vmatpush1.msk.msra.mxu0 %vm126_vm0, %v49_v4  ;;  %5850 = vmatpush1.msk.msra.mxu1 %vm126_vm0, %v51_v5  ;;  %v60_v12 = vld [vmem:[%s11759_s3 + $0x38] sm:$0xff]  ;;  %v38_v13 = vld [vmem:[%s11758_s2 + $0x8] sm:$0xff]  ;;  %v57_v14 = vld [vmem:[%s11759_s3 + $0x20] sm:$0xff]  ;;  %s6353_s14 = smov 127   ;;  %s6356_s25 = smov 111  }
  0x12   :  { %169 = vmatprep.subr.mxu0 %v46_v6  ;;  %282 = vmatprep.subr.mxu1 %v48_v7  ;;  %v59_v15 = vld [vmem:[%s11759_s3 + $0x30] sm:$0xff]  ;;  %v56_v18 = vld [vmem:[%s11759_s3 + $0x18] sm:$0xff]  ;;  %v53_v20 = vld [vmem:[%s11759_s3] sm:$0xff] }
  0x13   :  { %170 = vmatpush1.msra.mxu0 %v45_v8  ;;  %283 = vmatpush1.msra.mxu1 %v47_v9  ;;  %v39_v16 = vld [vmem:[%s11758_s2 + $0x10] sm:$0xff]  ;;  %v40_v19 = vld [vmem:[%s11758_s2 + $0x18] sm:$0xff]  ;;  %v54_v21 = vld [vmem:[%s11759_s3 + $0x8] sm:$0xff] }
  0x14   :  { %5841 = vmatmul.mubr.msk.f32.vlgmr.msra.gmra.mxu0 %vm101_vm1, %v37_v10  ;;  %5851 = vmatmul.mubr.msk.f32.vlgmr.msra.gmra.mxu1 %vm101_vm1, %v37_v10  ;;  %v55_v17 = vld [vmem:[%s11759_s3 + $0x10] sm:$0xff]  ;;  %v41_v22 = vld [vmem:[%s11758_s2 + $0x20] sm:$0xff]  ;;  %v42_v23 = vld [vmem:[%s11758_s2 + $0x28] sm:$0xff]  ;;  %s6354_s3 = smov 113  }
  0x15   :  { %209 = vmatprep.mubr.f32.mxu0 %v11763_v0  ;;  %322 = vmatprep.mubr.f32.mxu1 %v11763_v0  ;;  %v43_v24 = vld [vmem:[%s11758_s2 + $0x30] sm:$0xff]  ;;  %v44_v25 = vld [vmem:[%s11758_s2 + $0x38] sm:$0xff]  ;;  %s6349_s2 = smov 16  }
  0x16   :  { %88 = vperm.xlu1 %6321, %v58_v11   ;;  %98 = vperm.xlu0 %6320, %v60_v12  }
  0x18   :  { %5842 = vmatmul.mubr.msk.f32.gmra.mxu0 %vm101_vm1, %v38_v13  ;;  %5852 = vmatmul.mubr.msk.f32.gmra.mxu1 %vm101_vm1, %v38_v13 }
  0x19   :  { %215 = vmatprep.mubr.f32.mxu0 %v11763_v0  ;;  %328 = vmatprep.mubr.f32.mxu1 %v11763_v0 }
  0x1a   :  { %83 = vperm.xlu1 %6321, %v57_v14   ;;  %93 = vperm.xlu0 %6320, %v59_v15  }
  0x1c   :  { %5843 = vmatmul.mubr.msk.f32.gmra.mxu0 %vm101_vm1, %v39_v16  ;;  %5853 = vmatmul.mubr.msk.f32.gmra.mxu1 %vm101_vm1, %v39_v16 }
  0x1d   :  { %221 = vmatprep.mubr.f32.mxu0 %v11763_v0  ;;  %334 = vmatprep.mubr.f32.mxu1 %v11763_v0 }
  0x1e   :  { %73 = vperm.xlu1 %6321, %v55_v17   ;;  %78 = vperm.xlu0 %6320, %v56_v18  }
  0x20   :  { %5844 = vmatmul.mubr.msk.f32.gmra.mxu0 %vm101_vm1, %v40_v19  ;;  %5854 = vmatmul.mubr.msk.f32.gmra.mxu1 %vm101_vm1, %v40_v19 }
  0x21   :  { %227 = vmatprep.mubr.f32.mxu0 %v11763_v0  ;;  %340 = vmatprep.mubr.f32.mxu1 %v11763_v0 }
  0x22   :  { %63 = vperm.xlu1 %6321, %v53_v20   ;;  %68 = vperm.xlu0 %6320, %v54_v21  }
  0x24   :  { %5845 = vmatmul.mubr.msk.f32.gmra.mxu0 %vm101_vm1, %v41_v22  ;;  %5855 = vmatmul.mubr.msk.f32.gmra.mxu1 %vm101_vm1, %v41_v22 }
  0x25   :  { %233 = vmatprep.mubr.f32.mxu0 %v11763_v0  ;;  %346 = vmatprep.mubr.f32.mxu1 %v11763_v0 }
  0x28   :  { %5846 = vmatmul.mubr.msk.f32.gmra.mxu0 %vm101_vm1, %v42_v23  ;;  %5856 = vmatmul.mubr.msk.f32.gmra.mxu1 %vm101_vm1, %v42_v23 }
  0x29   :  { %239 = vmatprep.mubr.f32.mxu0 %v11763_v0  ;;  %352 = vmatprep.mubr.f32.mxu1 %v11763_v0 }
  0x2c   :  { %5847 = vmatmul.mubr.msk.f32.gmra.mxu0 %vm101_vm1, %v43_v24  ;;  %5857 = vmatmul.mubr.msk.f32.gmra.mxu1 %vm101_vm1, %v43_v24 }
  0x2d   :  { %245 = vmatprep.mubr.f32.mxu0 %v11763_v0  ;;  %358 = vmatprep.mubr.f32.mxu1 %v11763_v0 }
  0x30   :  { %5848 = vmatmul.mubr.msk.f32.gmra.mxu0 %vm101_vm1, %v44_v25  ;;  %5858 = vmatmul.mubr.msk.f32.gmra.mxu1 %vm101_vm1, %v44_v25 }
  0x31   :  { %848 = vmatprep.mubr.f32.mxu0 %v11763_v0  ;;  %1009 = vmatprep.mubr.f32.mxu1 %v11763_v0 }
  0x91   :  { %v6501_v26 = vpop.permute.xlu1 %88  ;;  %v6507_v29 = vpop.permute.xlu0 %98 }
  0x95   :  { %v84_v30 = vpop.permute.xlu1 %83  ;;  %v6521_v37 = vpop.permute.xlu0 %93 }
  0x99   :  { %v74_v38 = vpop.permute.xlu1 %73  ;;  %v79_v48 = vpop.permute.xlu0 %78 }
  0xd4   :  { %v6503_v27 = vpop.f32.mrf.mxu0  ;;  %v6505_v28 = vpop.f32.mrf.mxu1 }
  0xd6   :  { %v6509_v31 = vpop.f32.mrf.mxu0  ;;  %v6511_v32 = vpop.f32.mrf.mxu1 }
  0xd8   :  { %v6513_v33 = vpop.f32.mrf.mxu0  ;;  %v6515_v34 = vpop.f32.mrf.mxu1 }
  0xda   :  { %v6517_v35 = vpop.f32.mrf.mxu0  ;;  %v6519_v36 = vpop.f32.mrf.mxu1 }
  0xdc   :  { %v217_v39 = vpop.f32.mrf.mxu0  ;;  %v330_v40 = vpop.f32.mrf.mxu1 }
  0xdd   :  { %v218_v41 = vadd.f32 %v217_v39, %v74_v38  ;;  %v331_v45 = vadd.f32 %v330_v40, %v74_v38 }
  0xde   :  { %v219_v42 = vpop.f32.mrf.mxu0  ;;  %v332_v43 = vpop.f32.mrf.mxu1 }
  0xdf   :  { %v6523_v44 = vmax.f32 %v218_v41, 0.0  ;;  %v220_v46 = vadd.f32 %v219_v42, %v74_v38  ;;  %v333_v50 = vadd.f32 %v332_v43, %v74_v38  ;;  %v6529_v53 = vmax.f32 %v331_v45, 0.0 }
  0xe0   :  { %v223_v47 = vpop.f32.mrf.mxu0  ;;  %v336_v51 = vpop.f32.mrf.mxu1 }
  0xe1   :  { %11855 = vst [vmem:[#allocation5_spill] sm:$0xff] %v6523_v44  ;;  %v6525_v49 = vmax.f32 %v220_v46, 0.0  ;;  %570 = vrot.lane.b32.xlu0 %v6523_v44, %s6349_s2  ;;  %11857 = vst [vmem:[#allocation7_spill] sm:$0xff] %v6529_v53  ;;  %v224_v54 = vadd.f32 %v223_v47, %v79_v48  ;;  %v6533_v55 = vmax.f32 %v333_v50, 0.0  ;;  %v337_v60 = vadd.f32 %v336_v51, %v79_v48 }
  0xe2   :  { %v225_v52 = vpop.f32.mrf.mxu0  ;;  %v338_v57 = vpop.f32.mrf.mxu1 }
  0xe3   :  { %11856 = vst [vmem:[#allocation6_spill] sm:$0xff] %v6525_v49  ;;  %586 = vrot.lane.b32.xlu1 %v6525_v49, %s6349_s2  ;;  %11858 = vst [vmem:[#allocation8_spill] sm:$0xff] %v6533_v55  ;;  %v226_v56 = vadd.f32 %v225_v52, %v79_v48  ;;  %v6537_v59 = vmax.f32 %v224_v54, 0.0  ;;  %v339_v62 = vadd.f32 %v338_v57, %v79_v48  ;;  %v6545_v2 = vmax.f32 %v337_v60, 0.0 }
  0xe4   :  { %v229_v58 = vpop.f32.mrf.mxu0  ;;  %v342_v63 = vpop.f32.mrf.mxu1 }
  0xe5   :  { %602 = vrot.lane.b32.xlu0 %v6529_v53, %s6349_s2  ;;  %11859 = vst [vmem:[#allocation9_spill] sm:$0xff] %v6537_v59  ;;  %v6541_v61 = vmax.f32 %v226_v56, 0.0  ;;  %11861 = vst [vmem:[#allocation11_spill] sm:$0xff] %v6545_v2  ;;  %v230_v3 = vadd.f32 %v229_v58, %v84_v30  ;;  %v6549_v4 = vmax.f32 %v339_v62, 0.0  ;;  %v343_v9 = vadd.f32 %v342_v63, %v84_v30  ;;  %v69_v58 = vpop.permute.xlu0 %68 }
  0xe6   :  { %v231_v1 = vpop.f32.mrf.mxu0  ;;  %v344_v6 = vpop.f32.mrf.mxu1  ;;  %v212_v63 = vadd.f32 %v6513_v33, %v69_v58 }
  0xe7   :  { %618 = vrot.lane.b32.xlu1 %v6533_v55, %s6349_s2  ;;  %11860 = vst [vmem:[#allocation10_spill] sm:$0xff] %v6541_v61  ;;  %11862 = vst [vmem:[#allocation12_spill] sm:$0xff] %v6549_v4  ;;  %v232_v5 = vadd.f32 %v231_v1, %v84_v30  ;;  %v6553_v8 = vmax.f32 %v230_v3, 0.0  ;;  %v345_v11 = vadd.f32 %v344_v6, %v84_v30  ;;  %v6561_v14 = vmax.f32 %v343_v9, 0.0  ;;  %v64_v33 = vpop.permute.xlu1 %63 }
  0xe8   :  { %v235_v7 = vpop.f32.mrf.mxu0  ;;  %v348_v12 = vpop.f32.mrf.mxu1  ;;  %v214_v3 = vadd.f32 %v6517_v35, %v69_v58  ;;  %v6631_v6 = vmax.f32 %v212_v63, 0.0  ;;  %v327_v9 = vadd.f32 %v6519_v36, %v69_v58  ;;  %v206_v35 = vadd.f32 %v6503_v27, %v64_v33 }
  0xe9   :  { %572 = vrot.lane.b32.xlu0 %v6537_v59, %s6349_s2  ;;  %11863 = vst [vmem:[#allocation13_spill] sm:$0xff] %v6553_v8  ;;  %v6557_v10 = vmax.f32 %v232_v5, 0.0  ;;  %11865 = vst [vmem:[#allocation15_spill] sm:$0xff] %v6561_v14  ;;  %v236_v15 = vadd.f32 %v235_v7, %v6501_v26  ;;  %v6566_v16 = vmax.f32 %v345_v11, 0.0  ;;  %v349_v21 = vadd.f32 %v348_v12, %v6501_v26 }
  0xea   :  { %v237_v13 = vpop.f32.mrf.mxu0  ;;  %v350_v18 = vpop.f32.mrf.mxu1  ;;  %11876 = vst [vmem:[#allocation26_spill] sm:$0xff] %v6631_v6  ;;  %v6636_v7 = vmax.f32 %v214_v3, 0.0  ;;  %v6647_v12 = vmax.f32 %v327_v9, 0.0  ;;  %v319_v36 = vadd.f32 %v6505_v28, %v64_v33 }
  0xeb   :  { %588 = vrot.lane.b32.xlu1 %v6541_v61, %s6349_s2  ;;  %11864 = vst [vmem:[#allocation14_spill] sm:$0xff] %v6557_v10  ;;  %11866 = vst [vmem:[#allocation16_spill] sm:$0xff] %v6566_v16  ;;  %v238_v17 = vadd.f32 %v237_v13, %v6501_v26  ;;  %v6571_v20 = vmax.f32 %v236_v15, 0.0  ;;  %v351_v23 = vadd.f32 %v350_v18, %v6501_v26  ;;  %v6581_v30 = vmax.f32 %v349_v21, 0.0 }
  0xec   :  { %v241_v19 = vpop.f32.mrf.mxu0  ;;  %v354_v24 = vpop.f32.mrf.mxu1  ;;  %11877 = vst [vmem:[#allocation27_spill] sm:$0xff] %v6636_v7  ;;  %v6651_v13 = vmax.f32 %v206_v35, 0.0  ;;  %v321_v15 = vadd.f32 %v6511_v32, %v64_v33 }
  0xed   :  { %604 = vrot.lane.b32.xlu0 %v6545_v2, %s6349_s2  ;;  %11867 = vst [vmem:[#allocation17_spill] sm:$0xff] %v6571_v20  ;;  %v6576_v22 = vmax.f32 %v238_v17, 0.0  ;;  %11869 = vst [vmem:[#allocation19_spill] sm:$0xff] %v6581_v30  ;;  %v242_v38 = vadd.f32 %v241_v19, %v6521_v37  ;;  %v6586_v39 = vmax.f32 %v351_v23, 0.0  ;;  %v355_v43 = vadd.f32 %v354_v24, %v6521_v37 }
  0xee   :  { %v243_v25 = vpop.f32.mrf.mxu0  ;;  %v356_v26 = vpop.f32.mrf.mxu1  ;;  %v6665_v17 = vmax.f32 %v321_v15, 0.0 }
  0xef   :  { %620 = vrot.lane.b32.xlu1 %v6549_v4, %s6349_s2  ;;  %11868 = vst [vmem:[#allocation18_spill] sm:$0xff] %v6576_v22  ;;  %11870 = vst [vmem:[#allocation20_spill] sm:$0xff] %v6586_v39  ;;  %v244_v40 = vadd.f32 %v243_v25, %v6521_v37  ;;  %v6591_v42 = vmax.f32 %v242_v38, 0.0  ;;  %v357_v46 = vadd.f32 %v356_v26, %v6521_v37  ;;  %v6601_v50 = vmax.f32 %v355_v43, 0.0 }
  0xf0   :  { %v247_v41 = vpop.f32.mrf.mxu0  ;;  %v360_v47 = vpop.f32.mrf.mxu1 }
  0xf1   :  { %574 = vrot.lane.b32.xlu0 %v6553_v8, %s6349_s2  ;;  %v6596_v45 = vmax.f32 %v244_v40, 0.0  ;;  %11871 = vst [vmem:[#allocation21_spill] sm:$0xff] %v6601_v50  ;;  %v248_v51 = vadd.f32 %v247_v41, %v6507_v29  ;;  %v6606_v52 = vmax.f32 %v357_v46, 0.0  ;;  %v361_v57 = vadd.f32 %v360_v47, %v6507_v29 }
  0xf2   :  { %v249_v48 = vpop.f32.mrf.mxu0  ;;  %v362_v37 = vpop.f32.mrf.mxu1 }
  0xf3   :  { %590 = vrot.lane.b32.xlu1 %v6557_v10, %s6349_s2  ;;  %11872 = vst [vmem:[#allocation22_spill] sm:$0xff] %v6606_v52  ;;  %v250_v54 = vadd.f32 %v249_v48, %v6507_v29  ;;  %v6611_v56 = vmax.f32 %v248_v51, 0.0  ;;  %v363_v62 = vadd.f32 %v362_v37, %v6507_v29  ;;  %v6622_v1 = vmax.f32 %v361_v57, 0.0 }
  0xf4   :  { %v325_v29 = vadd.f32 %v6515_v34, %v69_v58  ;;  %v208_v34 = vadd.f32 %v6509_v31, %v64_v33  ;;  %v6661_v31 = vmax.f32 %v319_v36, 0.0  ;;  %v461_v48 = vlaneseq }
  0xf5   :  { %606 = vrot.lane.b32.xlu0 %v6561_v14, %s6349_s2  ;;  %11873 = vst [vmem:[#allocation23_spill] sm:$0xff] %v6611_v56  ;;  %v6616_v60 = vmax.f32 %v250_v54, 0.0  ;;  %11875 = vst [vmem:[#allocation25_spill] sm:$0xff] %v6622_v1  ;;  %v6627_v5 = vmax.f32 %v363_v62, 0.0 }
  0xf6   :  { %v6642_v11 = vmax.f32 %v325_v29, 0.0  ;;  %v6656_v27 = vmax.f32 %v208_v34, 0.0  ;;  %v499_v37 = vshrl.u32 %v461_v48, 7  ;;  %v6785_v62 = vand.u32 127, %v461_v48  ;;  %v664_v29 = vld [vmem:[#allocation2 + $0x4] sm:$0xf] }
  0xf7   :  { %622 = vrot.lane.b32.xlu1 %v6566_v16, %s6349_s2  ;;  %11874 = vst [vmem:[#allocation24_spill] sm:$0xff] %v6616_v60 }
  0xf8   :  { %11878 = vst [vmem:[#allocation28_spill] sm:$0xff] %v6642_v11  ;;  %v6789_v3 = vsub.s32 1, %v499_v37  ;;  %v6793_v9 = vsub.s32 2, %v499_v37  ;;  %v6795_v35 = vsub.s32 0, %v499_v37  ;;  %v6797_v34 = vsub.s32 3, %v499_v37 }
  0xf9   :  { %576 = vrot.lane.b32.xlu0 %v6571_v20, %s6349_s2  ;;  %vm630_vm2 = vcmp.lt.s32.totalorder %v6785_v62, 16  ;;  %vm463_vm4 = vcmp.lt.s32.totalorder %v6785_v62, 17  ;;  %vm1540_vm5 = vcmp.lt.s32.totalorder %v6785_v62, 15  ;;  %vm2143_vm6 = vcmp.lt.s32.totalorder %v6785_v62, 1 }
  0xfa   :  { %11879 = vst [vmem:[#allocation29_spill] sm:$0xff] %v6789_v3  ;;  %11880 = vst [vmem:[#allocation30_spill] sm:$0xff] %v6793_v9  ;;  %v6803_v15 = vrot.slane %v664_v29, %v6789_v3  ;;  %v6811_v37 = vrot.slane %v664_v29, %v6793_v9  ;;  %vm3197_vm7 = vcmp.lt.s32.totalorder %v6785_v62, 127  ;;  %vm3800_vm8 = vcmp.lt.s32.totalorder %v6785_v62, 113 }
  0xfb   :  { %592 = vrot.lane.b32.xlu1 %v6576_v22, %s6349_s2  ;;  %11881 = vst [vmem:[#allocation31_spill] sm:$0xff] %v6795_v35  ;;  %11882 = vst [vmem:[#allocation32_spill] sm:$0xff] %v6797_v34  ;;  %vm4403_vm9 = vcmp.lt.s32.totalorder %v6785_v62, 112  ;;  %vm5006_vm10 = vcmp.lt.s32.totalorder %v6785_v62, 111 }
  0xfd   :  { %608 = vrot.lane.b32.xlu0 %v6581_v30, %s6349_s2 }
  0xff   :  { %624 = vrot.lane.b32.xlu1 %v6586_v39, %s6349_s2 }
 0x101   :  { %578 = vrot.lane.b32.xlu0 %v6591_v42, %s6349_s2 }
 0x103   :  { %594 = vrot.lane.b32.xlu1 %v6596_v45, %s6349_s2 }
 0x105   :  { %610 = vrot.lane.b32.xlu0 %v6601_v50, %s6349_s2 }
 0x107   :  { %626 = vrot.lane.b32.xlu1 %v6606_v52, %s6349_s2 }
 0x109   :  { %580 = vrot.lane.b32.xlu0 %v6611_v56, %s6349_s2 }
 0x10b   :  { %596 = vrot.lane.b32.xlu1 %v6616_v60, %s6349_s2 }
 0x10d   :  { %612 = vrot.lane.b32.xlu0 %v6622_v1, %s6349_s2 }
 0x10f   :  { %628 = vrot.lane.b32.xlu1 %v6627_v5, %s6349_s2 }
 0x111   :  { %568 = vrot.lane.b32.xlu0 %v6631_v6, %s6349_s2 }
 0x113   :  { %584 = vrot.lane.b32.xlu1 %v6636_v7, %s6349_s2 }
 0x115   :  { %600 = vrot.lane.b32.xlu0 %v6642_v11, %s6349_s2 }
 0x117   :  { %616 = vrot.lane.b32.xlu1 %v6647_v12, %s6349_s2 }
 0x119   :  { %566 = vrot.lane.b32.xlu0 %v6651_v13, %s6349_s2 }
 0x11b   :  { %582 = vrot.lane.b32.xlu1 %v6656_v27, %s6349_s2 }
 0x11d   :  { %598 = vrot.lane.b32.xlu0 %v6661_v31, %s6349_s2 }
 0x11f   :  { %614 = vrot.lane.b32.xlu1 %v6665_v17, %s6349_s2 }
 0x121   :  { %411 = vrot.lane.b32.xlu0 %v6611_v56, %s6350_s24 }
 0x123   :  { %425 = vrot.lane.b32.xlu1 %v6596_v45, %s6350_s24 }
 0x125   :  { %443 = vrot.lane.b32.xlu0 %v6622_v1, %s6350_s24 }
 0x127   :  { %457 = vrot.lane.b32.xlu1 %v6606_v52, %s6350_s24 }
 0x129   :  { %409 = vrot.lane.b32.xlu0 %v6591_v42, %s6350_s24 }
 0x12b   :  { %423 = vrot.lane.b32.xlu1 %v6576_v22, %s6350_s24 }
 0x12d   :  { %441 = vrot.lane.b32.xlu0 %v6601_v50, %s6350_s24 }
 0x12f   :  { %455 = vrot.lane.b32.xlu1 %v6586_v39, %s6350_s24 }
 0x131   :  { %407 = vrot.lane.b32.xlu0 %v6571_v20, %s6350_s24 }
 0x133   :  { %421 = vrot.lane.b32.xlu1 %v6557_v10, %s6350_s24 }
 0x135   :  { %439 = vrot.lane.b32.xlu0 %v6581_v30, %s6350_s24 }
 0x137   :  { %453 = vrot.lane.b32.xlu1 %v6566_v16, %s6350_s24 }
 0x139   :  { %405 = vrot.lane.b32.xlu0 %v6553_v8, %s6350_s24 }
 0x13b   :  { %419 = vrot.lane.b32.xlu1 %v6541_v61, %s6350_s24 }
 0x13d   :  { %437 = vrot.lane.b32.xlu0 %v6561_v14, %s6350_s24 }
 0x13f   :  { %451 = vrot.lane.b32.xlu1 %v6549_v4, %s6350_s24 }
 0x141   :  { %403 = vrot.lane.b32.xlu0 %v6537_v59, %s6350_s24 }
 0x143   :  { %417 = vrot.lane.b32.xlu1 %v6525_v49, %s6350_s24 }
 0x145   :  { %435 = vrot.lane.b32.xlu0 %v6545_v2, %s6350_s24 }
 0x147   :  { %449 = vrot.lane.b32.xlu1 %v6533_v55, %s6350_s24 }
 0x149   :  { %401 = vrot.lane.b32.xlu0 %v6523_v44, %s6350_s24 }
 0x14b   :  { %427 = vrot.lane.b32.xlu1 %v6616_v60, %s6350_s24 }
 0x14d   :  { %433 = vrot.lane.b32.xlu0 %v6529_v53, %s6350_s24 }
 0x14f   :  { %459 = vrot.lane.b32.xlu1 %v6627_v5, %s6350_s24 }
 0x151   :  { %399 = vrot.lane.b32.xlu0 %v6631_v6, %s6350_s24 }
 0x153   :  { %v6721_v28 = vpop.permute.xlu0 %570  ;;  %415 = vrot.lane.b32.xlu1 %v6636_v7, %s6350_s24 }
 0x155   :  { %v587_v32 = vpop.permute.xlu1 %586  ;;  %431 = vrot.lane.b32.xlu0 %v6642_v11, %s6350_s24 }
 0x156   :  { %v6822_v3 = vsel %vm630_vm2, %v6721_v28, %v587_v32 }
 0x157   :  { %v6727_v18 = vpop.permute.xlu0 %602  ;;  %447 = vrot.lane.b32.xlu1 %v6647_v12, %s6350_s24 }
 0x159   :  { %v6731_v19 = vpop.permute.xlu1 %618  ;;  %397 = vrot.lane.b32.xlu0 %v6651_v13, %s6350_s24 }
 0x15b   :  { %v6735_v21 = vpop.permute.xlu0 %572  ;;  %413 = vrot.lane.b32.xlu1 %v6656_v27, %s6350_s24 }
 0x15d   :  { %v6739_v23 = vpop.permute.xlu1 %588  ;;  %429 = vrot.lane.b32.xlu0 %v6661_v31, %s6350_s24 }
 0x15f   :  { %v6743_v24 = vpop.permute.xlu0 %604  ;;  %445 = vrot.lane.b32.xlu1 %v6665_v17, %s6350_s24 }
 0x161   :  { %v6747_v25 = vpop.permute.xlu1 %620  ;;  %1490 = vrot.lane.b32.xlu0 %v6611_v56, %s6351_s0 }
 0x163   :  { %v6751_v38 = vpop.permute.xlu0 %574  ;;  %1504 = vrot.lane.b32.xlu1 %v6596_v45, %s6351_s0 }
 0x165   :  { %v6755_v40 = vpop.permute.xlu1 %590  ;;  %1522 = vrot.lane.b32.xlu0 %v6622_v1, %s6351_s0 }
 0x167   :  { %v6759_v26 = vpop.permute.xlu0 %606  ;;  %1536 = vrot.lane.b32.xlu1 %v6606_v52, %s6351_s0 }
 0x169   :  { %v6763_v41 = vpop.permute.xlu1 %622  ;;  %1488 = vrot.lane.b32.xlu0 %v6591_v42, %s6351_s0 }
 0x16b   :  { %v577_v43 = vpop.permute.xlu0 %576  ;;  %1502 = vrot.lane.b32.xlu1 %v6576_v22, %s6351_s0 }
 0x16d   :  { %v6769_v46 = vpop.permute.xlu1 %592  ;;  %1520 = vrot.lane.b32.xlu0 %v6601_v50, %s6351_s0 }
 0x16f   :  { %v6773_v47 = vpop.permute.xlu0 %608  ;;  %1534 = vrot.lane.b32.xlu1 %v6586_v39, %s6351_s0 }
 0x171   :  { %v625_v51 = vpop.permute.xlu1 %624  ;;  %1486 = vrot.lane.b32.xlu0 %v6571_v20, %s6351_s0 }
 0x173   :  { %v579_v54 = vpop.permute.xlu0 %578  ;;  %1500 = vrot.lane.b32.xlu1 %v6557_v10, %s6351_s0  ;;  %v651_v10 = vsel %vm630_vm2, %v6751_v38, %v6755_v40 }
 0x175   :  { %v595_v57 = vpop.permute.xlu1 %594  ;;  %1518 = vrot.lane.b32.xlu0 %v6581_v30, %s6351_s0 }
 0x177   :  { %v611_v58 = vpop.permute.xlu0 %610  ;;  %1532 = vrot.lane.b32.xlu1 %v6566_v16, %s6351_s0 }
 0x179   :  { %v627_v63 = vpop.permute.xlu1 %626  ;;  %1484 = vrot.lane.b32.xlu0 %v6553_v8, %s6351_s0  ;;  %v6814_v8 = vrot.slane %v664_v29, %v6795_v35 }
 0x17b   :  { %v581_v33 = vpop.permute.xlu0 %580  ;;  %1498 = vrot.lane.b32.xlu1 %v6541_v61, %s6351_s0 }
 0x17d   :  { %v597_v36 = vpop.permute.xlu1 %596  ;;  %1516 = vrot.lane.b32.xlu0 %v6561_v14, %s6351_s0  ;;  %v6817_v14 = vrot.slane %v664_v29, %v6797_v34  ;;  %v661_v29 = vsel %vm630_vm2, %v627_v63, %v579_v54 }
 0x17e   :  { %v654_v48 = vsel %vm630_vm2, %v581_v33, %v597_v36 }
 0x17f   :  { %v613_v0 = vpop.permute.xlu0 %612  ;;  %1530 = vrot.lane.b32.xlu1 %v6549_v4, %s6351_s0  ;;  %v715_v61 = vmul.f32 %v6803_v15, %v654_v48  ;;  %v6827_v4 = vsel %vm630_vm2, %v587_v32, %v6727_v18  ;;  %v653_v48 = vsel %vm630_vm2, %v579_v54, %v595_v57 }
 0x180   :  { %v646_v34 = vsel %vm630_vm2, %v597_v36, %v613_v0 }
 0x181   :  { %v629_v9 = vpop.permute.xlu1 %628  ;;  %800 = vmatprep.subr.mxu0 %v715_v61  ;;  %1482 = vrot.lane.b32.xlu0 %v6537_v59, %s6351_s0  ;;  %v650_v61 = vsel %vm630_vm2, %v6735_v21, %v6739_v23  ;;  %v637_v59 = vsel %vm630_vm2, %v611_v58, %v627_v63  ;;  %v711_v63 = vmul.f32 %v6803_v15, %v653_v48 }
 0x182   :  { %v638_v35 = vsel %vm630_vm2, %v613_v0, %v629_v9  ;;  %v662_v32 = vsel %vm630_vm2, %v629_v9, %v581_v33  ;;  %v652_v0 = vsel %vm630_vm2, %v577_v43, %v6769_v46  ;;  %v636_v33 = vsel %vm630_vm2, %v6773_v47, %v625_v51 }
 0x183   :  { %v714_v16 = vmul.f32 %v6814_v8, %v662_v32  ;;  %v569_v54 = vpop.permute.xlu0 %568  ;;  %1496 = vrot.lane.b32.xlu1 %v6525_v49, %s6351_s0  ;;  %v717_v36 = vmul.f32 %v6817_v14, %v638_v35  ;;  %v645_v9 = vsel %vm630_vm2, %v595_v57, %v611_v58  ;;  %v660_v32 = vsel %vm630_vm2, %v625_v51, %v577_v43 }
 0x184   :  { %v710_v49 = vmul.f32 %v6814_v8, %v661_v29  ;;  %v716_v35 = vmul.f32 %v6811_v37, %v646_v34  ;;  %v659_v57 = vsel %vm630_vm2, %v6763_v41, %v6751_v38  ;;  %v713_v43 = vmul.f32 %v6817_v14, %v637_v59 }
 0x185   :  { %801 = vmatpush1.msra.mxu0 %v714_v16  ;;  %961 = vmatprep.subr.mxu1 %v717_v36  ;;  %v585_v30 = vpop.permute.xlu1 %584  ;;  %v644_v16 = vsel %vm630_vm2, %v6769_v46, %v6773_v47  ;;  %v712_v51 = vmul.f32 %v6811_v37, %v645_v9  ;;  %v707_v34 = vmul.f32 %v6803_v15, %v652_v0 }
 0x186   :  { %1514 = vrot.lane.b32.xlu0 %v6545_v2, %s6351_s0  ;;  %802 = vmatprep.subr.mxu0 %v711_v63  ;;  %v635_v38 = vsel %vm630_vm2, %v6759_v26, %v6763_v41  ;;  %v706_v48 = vmul.f32 %v6814_v8, %v660_v32  ;;  %v709_v59 = vmul.f32 %v6817_v14, %v636_v33 }
 0x187   :  { %962 = vmatpush1.msra.mxu1 %v716_v35  ;;  %803 = vmatpush1.msra.mxu0 %v710_v49  ;;  %v601_v58 = vpop.permute.xlu0 %600  ;;  %v634_v49 = vsel %vm630_vm2, %v6743_v24, %v6747_v25  ;;  %v643_v46 = vsel %vm630_vm2, %v6755_v40, %v6759_v26  ;;  %v703_v47 = vmul.f32 %v6803_v15, %v651_v10 }
 0x188   :  { %963 = vmatprep.subr.mxu1 %v713_v43  ;;  %1528 = vrot.lane.b32.xlu1 %v6533_v55, %s6351_s0  ;;  %v658_v29 = vsel %vm630_vm2, %v6747_v25, %v6735_v21  ;;  %v702_v36 = vmul.f32 %v6814_v8, %v659_v57  ;;  %v708_v0 = vmul.f32 %v6811_v37, %v644_v16 }
 0x189   :  { %804 = vmatprep.subr.mxu0 %v707_v34  ;;  %964 = vmatpush1.msra.mxu1 %v712_v51  ;;  %v617_v41 = vpop.permute.xlu1 %616  ;;  %v633_v40 = vsel %vm630_vm2, %v6727_v18, %v6731_v19  ;;  %v657_v10 = vsel %vm630_vm2, %v6731_v19, %v6721_v28  ;;  %v705_v21 = vmul.f32 %v6817_v14, %v635_v38 }
 0x18a   :  { %805 = vmatpush1.msra.mxu0 %v706_v48  ;;  %965 = vmatprep.subr.mxu1 %v709_v59  ;;  %v642_v26 = vsel %vm630_vm2, %v6739_v23, %v6743_v24  ;;  %v704_v33 = vmul.f32 %v6811_v37, %v643_v46  ;;  %v699_v18 = vmul.f32 %v6803_v15, %v650_v61 }
 0x18b   :  { %1480 = vrot.lane.b32.xlu0 %v6523_v44, %s6351_s0  ;;  %806 = vmatprep.subr.mxu0 %v703_v47  ;;  %v567_v25 = vpop.permute.xlu0 %566  ;;  %v698_v28 = vmul.f32 %v6814_v8, %v658_v29  ;;  %v648_v19 = vsel %vm630_vm2, %v569_v54, %v585_v30  ;;  %v701_v9 = vmul.f32 %v6817_v14, %v634_v49  ;;  %v5859_v29 = vld [vmem:[%s11760_s4 + $0x80] sm:$0xff] }
 0x18c   :  { %966 = vmatpush1.msra.mxu1 %v708_v0  ;;  %807 = vmatpush1.msra.mxu0 %v702_v36  ;;  %v656_v23 = vsel %vm630_vm2, %v617_v41, %v569_v54  ;;  %v695_v61 = vmul.f32 %v6803_v15, %v6822_v3  ;;  %v694_v32 = vmul.f32 %v6814_v8, %v657_v10  ;;  %v11883_v0 = vmov 0.0  }
 0x18d   :  { %967 = vmatprep.subr.mxu1 %v705_v21  ;;  %1506 = vrot.lane.b32.xlu1 %v6616_v60, %s6351_s0  ;;  %v583_v63 = vpop.permute.xlu1 %582  ;;  %v700_v35 = vmul.f32 %v6811_v37, %v642_v26  ;;  %v632_v57 = vsel %vm630_vm2, %v601_v58, %v617_v41  ;;  %v696_v54 = vmul.f32 %v6811_v37, %v6827_v4  ;;  %v5861_v21 = vld [vmem:[%s11760_s4 + $0x90] sm:$0xff] }
 0x18e   :  { %808 = vmatprep.subr.mxu0 %v699_v18  ;;  %968 = vmatpush1.msra.mxu1 %v704_v33  ;;  %v647_v24 = vsel %vm630_vm2, %v567_v25, %v583_v63  ;;  %v697_v16 = vmul.f32 %v6817_v14, %v633_v40  ;;  %v691_v3 = vmul.f32 %v6803_v15, %v648_v19  ;;  %v5862_v33 = vld [vmem:[%s11760_s4 + $0x98] sm:$0xff]  ;;  %v5863_v19 = vld [vmem:[%s11760_s4 + $0xa0] sm:$0xff] }
 0x18f   :  { %809 = vmatpush1.msra.mxu0 %v698_v28  ;;  %969 = vmatprep.subr.mxu1 %v701_v9  ;;  %v599_v43 = vpop.permute.xlu0 %598  ;;  %v640_v51 = vsel %vm630_vm2, %v585_v30, %v601_v58  ;;  %v690_v34 = vmul.f32 %v6814_v8, %v656_v23  ;;  %v687_v48 = vmul.f32 %v6803_v15, %v647_v24  ;;  %v5864_v23 = vld [vmem:[%s11760_s4 + $0xa8] sm:$0xff] }
 0x190   :  { %1512 = vrot.lane.b32.xlu0 %v6529_v53, %s6351_s0  ;;  %810 = vmatprep.subr.mxu0 %v695_v61  ;;  %v693_v4 = vmul.f32 %v6817_v14, %v632_v57  ;;  %v639_v30 = vsel %vm630_vm2, %v583_v63, %v599_v43  ;;  %v692_v41 = vmul.f32 %v6811_v37, %v640_v51  ;;  %v11884_v51 = vld [vmem:[#allocation14_spill] sm:$0xff] }
 0x191   :  { %970 = vmatpush1.msra.mxu1 %v700_v35  ;;  %811 = vmatpush1.msra.mxu0 %v694_v32  ;;  %v615_v38 = vpop.permute.xlu1 %614  ;;  %v5865_v32 = vld [vmem:[%s11760_s4 + $0xb0] sm:$0xff] }
 0x192   :  { %971 = vmatprep.subr.mxu1 %v697_v16  ;;  %1538 = vrot.lane.b32.xlu1 %v6627_v5, %s6351_s0  ;;  %v631_v59 = vsel %vm630_vm2, %v599_v43, %v615_v38  ;;  %v655_v49 = vsel %vm630_vm2, %v615_v38, %v567_v25  ;;  %v5866_v43 = vld [vmem:[%s11760_s4 + $0xb8] sm:$0xff] }
 0x193   :  { %812 = vmatprep.subr.mxu0 %v691_v3  ;;  %972 = vmatpush1.msra.mxu1 %v696_v54  ;;  %v686_v58 = vmul.f32 %v6814_v8, %v655_v49  ;;  %v6957_v15 = vpop.permute.xlu0 %411  ;;  %v689_v46 = vmul.f32 %v6817_v14, %v631_v59  ;;  %v688_v8 = vmul.f32 %v6811_v37, %v639_v30  ;;  %v5860_v37 = vld [vmem:[%s11760_s4 + $0x88] sm:$0xff]  ;;  %v5867_v3 = vld [vmem:[%s11760_s4 + $0xc0] sm:$0xff]  ;;  %v11885_v38 = vld [vmem:[#allocation19_spill] sm:$0xff] }
 0x194   :  { %813 = vmatpush1.msra.mxu0 %v690_v34  ;;  %973 = vmatprep.subr.mxu1 %v693_v4  ;;  %v5868_v4 = vld [vmem:[%s11760_s4 + $0xc8] sm:$0xff]  ;;  %v496_v59 = vld [vmem:[#allocation2] sm:$0xf] }
 0x195   :  { %1478 = vrot.lane.b32.xlu0 %v6631_v6, %s6351_s0  ;;  %814 = vmatprep.subr.mxu0 %v687_v48  ;;  %v6963_v47 = vpop.permute.xlu1 %425  ;;  %v11886_v49 = vld [vmem:[#allocation16_spill] sm:$0xff] }
 0x196   :  { %974 = vmatpush1.msra.mxu1 %v692_v41  ;;  %1494 = vrot.lane.b32.xlu1 %v6636_v7, %s6351_s0  ;;  %v5869_v41 = vld [vmem:[%s11760_s4 + $0xd0] sm:$0xff] }
 0x197   :  { %815 = vmatpush1.msra.mxu0 %v686_v58  ;;  %975 = vmatprep.subr.mxu1 %v689_v46  ;;  %v6971_v14 = vpop.permute.xlu0 %443  ;;  %v11887_v58 = vld [vmem:[#allocation13_spill] sm:$0xff] }
 0x198   :  { %5875 = vmatmul.mubr.msk.f32.vlgmr.msra.gmra.mxu0 %vm735_vm3, %v5859_v29  ;;  %976 = vmatpush1.msra.mxu1 %v688_v8 }
 0x199   :  { %1510 = vrot.lane.b32.xlu0 %v6642_v11, %s6351_s0  ;;  %5891 = vmatmul.mubr.msk.f32.vlgmr.msra.gmra.mxu1 %vm735_vm3, %v5859_v29  ;;  %v6977_v36 = vpop.permute.xlu1 %457  ;;  %v11888_v29 = vld [vmem:[#allocation29_spill] sm:$0xff] }
 0x19a   :  { %1526 = vrot.lane.b32.xlu1 %v6647_v12, %s6351_s0  ;;  %854 = vmatprep.mubr.f32.mxu0 %v11883_v0  ;;  %v7117_v8 = vrot.slane %v496_v59, %v11888_v29 }
 0x19b   :  { %1015 = vmatprep.mubr.f32.mxu1 %v11883_v0  ;;  %v6986_v40 = vpop.permute.xlu0 %409 }
 0x19c   :  { %5876 = vmatmul.mubr.msk.f32.gmra.mxu0 %vm735_vm3, %v5860_v37 }
 0x19d   :  { %1476 = vrot.lane.b32.xlu0 %v6651_v13, %s6351_s0  ;;  %5892 = vmatmul.mubr.msk.f32.gmra.mxu1 %vm735_vm3, %v5860_v37  ;;  %v6992_v10 = vpop.permute.xlu1 %423 }
 0x19e   :  { %1492 = vrot.lane.b32.xlu1 %v6656_v27, %s6351_s0  ;;  %860 = vmatprep.mubr.f32.mxu0 %v11883_v0 }
 0x19f   :  { %1021 = vmatprep.mubr.f32.mxu1 %v11883_v0  ;;  %v7001_v25 = vpop.permute.xlu0 %441 }
 0x1a0   :  { %5877 = vmatmul.mubr.msk.f32.gmra.mxu0 %vm735_vm3, %v5861_v21 }
 0x1a1   :  { %1508 = vrot.lane.b32.xlu0 %v6661_v31, %s6351_s0  ;;  %5893 = vmatmul.mubr.msk.f32.gmra.mxu1 %vm735_vm3, %v5861_v21  ;;  %v7007_v26 = vpop.permute.xlu1 %455 }
 0x1a2   :  { %1524 = vrot.lane.b32.xlu1 %v6665_v17, %s6351_s0  ;;  %866 = vmatprep.mubr.f32.mxu0 %v11883_v0 }
 0x1a3   :  { %1027 = vmatprep.mubr.f32.mxu1 %v11883_v0  ;;  %v7016_v18 = vpop.permute.xlu0 %407 }
 0x1a4   :  { %5878 = vmatmul.mubr.msk.f32.gmra.mxu0 %vm735_vm3, %v5862_v33 }
 0x1a5   :  { %2093 = vrot.lane.b32.xlu0 %v6611_v56, %s6352_s8  ;;  %5894 = vmatmul.mubr.msk.f32.gmra.mxu1 %vm735_vm3, %v5862_v33  ;;  %v7022_v28 = vpop.permute.xlu1 %421 }
 0x1a6   :  { %2107 = vrot.lane.b32.xlu1 %v6596_v45, %s6352_s8  ;;  %872 = vmatprep.mubr.f32.mxu0 %v11883_v0 }
 0x1a7   :  { %1033 = vmatprep.mubr.f32.mxu1 %v11883_v0  ;;  %v7031_v9 = vpop.permute.xlu0 %439 }
 0x1a8   :  { %5879 = vmatmul.mubr.msk.f32.gmra.mxu0 %vm735_vm3, %v5863_v19 }
 0x1a9   :  { %2125 = vrot.lane.b32.xlu0 %v6622_v1, %s6352_s8  ;;  %5895 = vmatmul.mubr.msk.f32.gmra.mxu1 %vm735_vm3, %v5863_v19  ;;  %v7037_v63 = vpop.permute.xlu1 %453  ;;  %v11889_v19 = vld [vmem:[#allocation31_spill] sm:$0xff] }
 0x1aa   :  { %2139 = vrot.lane.b32.xlu1 %v6606_v52, %s6352_s8  ;;  %878 = vmatprep.mubr.f32.mxu0 %v11883_v0 }
 0x1ab   :  { %1039 = vmatprep.mubr.f32.mxu1 %v11883_v0  ;;  %v7046_v24 = vpop.permute.xlu0 %405 }
 0x1ac   :  { %5880 = vmatmul.mubr.msk.f32.gmra.mxu0 %vm735_vm3, %v5864_v23 }
 0x1ad   :  { %2091 = vrot.lane.b32.xlu0 %v6591_v42, %s6352_s8  ;;  %5896 = vmatmul.mubr.msk.f32.gmra.mxu1 %vm735_vm3, %v5864_v23  ;;  %v7052_v61 = vpop.permute.xlu1 %419  ;;  %v7131_v23 = vrot.slane %v496_v59, %v11889_v19  ;;  %v486_v19 = vsel %vm463_vm4, %v6986_v40, %v6963_v47 }
 0x1ae   :  { %2105 = vrot.lane.b32.xlu1 %v6576_v22, %s6352_s8  ;;  %884 = vmatprep.mubr.f32.mxu0 %v11883_v0 }
 0x1af   :  { %1045 = vmatprep.mubr.f32.mxu1 %v11883_v0  ;;  %v7061_v35 = vpop.permute.xlu0 %437 }
 0x1b0   :  { %5881 = vmatmul.mubr.msk.f32.gmra.mxu0 %vm735_vm3, %v5865_v32 }
 0x1b1   :  { %2123 = vrot.lane.b32.xlu0 %v6601_v50, %s6352_s8  ;;  %5897 = vmatmul.mubr.msk.f32.gmra.mxu1 %vm735_vm3, %v5865_v32  ;;  %v7067_v57 = vpop.permute.xlu1 %451  ;;  %v11890_v32 = vld [vmem:[#allocation15_spill] sm:$0xff] }
 0x1b2   :  { %2137 = vrot.lane.b32.xlu1 %v6586_v39, %s6352_s8  ;;  %890 = vmatprep.mubr.f32.mxu0 %v11883_v0 }
 0x1b3   :  { %1051 = vmatprep.mubr.f32.mxu1 %v11883_v0  ;;  %v7076_v54 = vpop.permute.xlu0 %403 }
 0x1b4   :  { %5882 = vmatmul.mubr.msk.f32.gmra.mxu0 %vm735_vm3, %v5866_v43 }
 0x1b5   :  { %2089 = vrot.lane.b32.xlu0 %v6571_v20, %s6352_s8  ;;  %5898 = vmatmul.mubr.msk.f32.gmra.mxu1 %vm735_vm3, %v5866_v43  ;;  %v7082_v16 = vpop.permute.xlu1 %417 }
 0x1b6   :  { %2103 = vrot.lane.b32.xlu1 %v11884_v51, %s6352_s8  ;;  %896 = vmatprep.mubr.f32.mxu0 %v11883_v0 }
 0x1b7   :  { %1057 = vmatprep.mubr.f32.mxu1 %v11883_v0  ;;  %v7091_v34 = vpop.permute.xlu0 %435 }
 0x1b8   :  { %5883 = vmatmul.mubr.msk.f32.gmra.mxu0 %vm735_vm3, %v5867_v3 }
 0x1b9   :  { %2121 = vrot.lane.b32.xlu0 %v11885_v38, %s6352_s8  ;;  %5899 = vmatmul.mubr.msk.f32.gmra.mxu1 %vm735_vm3, %v5867_v3  ;;  %v7097_v48 = vpop.permute.xlu1 %449  ;;  %v5870_v3 = vld [vmem:[%s11760_s4 + $0xd8] sm:$0xff] }
 0x1ba   :  { %2135 = vrot.lane.b32.xlu1 %v11886_v49, %s6352_s8  ;;  %902 = vmatprep.mubr.f32.mxu0 %v11883_v0 }
 0x1bb   :  { %1063 = vmatprep.mubr.f32.mxu1 %v11883_v0  ;;  %v7106_v30 = vpop.permute.xlu0 %401 }
 0x1bc   :  { %5884 = vmatmul.mubr.msk.f32.gmra.mxu0 %vm735_vm3, %v5868_v4 }
 0x1bd   :  { %2087 = vrot.lane.b32.xlu0 %v11887_v58, %s6352_s8  ;;  %5900 = vmatmul.mubr.msk.f32.gmra.mxu1 %vm735_vm3, %v5868_v4  ;;  %v428_v46 = vpop.permute.xlu1 %427  ;;  %v11891_v4 = vld [vmem:[#allocation32_spill] sm:$0xff] }
 0x1be   :  { %2109 = vrot.lane.b32.xlu1 %v6616_v60, %s6352_s8  ;;  %v487_v37 = vsel %vm463_vm4, %v6957_v15, %v428_v46  ;;  %908 = vmatprep.mubr.f32.mxu0 %v11883_v0  ;;  %v7140_v49 = vrot.slane %v496_v59, %v11891_v4  ;;  %v11893_v4 = vld [vmem:[#allocation30_spill] sm:$0xff] }
 0x1bf   :  { %1069 = vmatprep.mubr.f32.mxu1 %v11883_v0  ;;  %v7126_v21 = vpop.permute.xlu0 %433  ;;  %v547_v33 = vmul.f32 %v7117_v8, %v487_v37  ;;  %v7177_v39 = vrot.slane %v496_v59, %v11893_v4 }
 0x1c0   :  { %5885 = vmatmul.mubr.msk.f32.gmra.mxu0 %vm735_vm3, %v5869_v41 }
 0x1c1   :  { %2119 = vrot.lane.b32.xlu0 %v11890_v32, %s6352_s8  ;;  %5901 = vmatmul.mubr.msk.f32.gmra.mxu1 %vm735_vm3, %v5869_v41  ;;  %v460_v43 = vpop.permute.xlu1 %459 }
 0x1c2   :  { %2141 = vrot.lane.b32.xlu1 %v6627_v5, %s6352_s8  ;;  %v471_v37 = vsel %vm463_vm4, %v6971_v14, %v460_v43  ;;  %v495_v32 = vsel %vm463_vm4, %v460_v43, %v6957_v15  ;;  %914 = vmatprep.mubr.f32.mxu0 %v11883_v0  ;;  %v479_v15 = vsel %vm463_vm4, %v428_v46, %v6971_v14  ;;  %v5871_v43 = vld [vmem:[%s11760_s4 + $0xe0] sm:$0xff]  ;;  %v11894_v14 = vld [vmem:[#allocation10_spill] sm:$0xff] }
 0x1c3   :  { %v546_v41 = vmul.f32 %v7131_v23, %v495_v32  ;;  %1170 = vmatprep.subr.mxu0 %v547_v33  ;;  %1075 = vmatprep.mubr.f32.mxu1 %v11883_v0  ;;  %v7153_v51 = vpop.permute.xlu0 %399  ;;  %v549_v58 = vmul.f32 %v7140_v49, %v471_v37  ;;  %v11892_v32 = vld [vmem:[#allocation9_spill] sm:$0xff]  ;;  %v494_v37 = vsel %vm463_vm4, %v6977_v36, %v6986_v40 }
 0x1c4   :  { %5886 = vmatmul.mubr.msk.f32.gmra.mxu0 %vm735_vm3, %v5870_v3  ;;  %v470_v46 = vsel %vm463_vm4, %v7001_v25, %v6977_v36  ;;  %v543_v40 = vmul.f32 %v7117_v8, %v486_v19  ;;  %v542_v36 = vmul.f32 %v7131_v23, %v494_v37  ;;  %v484_v37 = vsel %vm463_vm4, %v7046_v24, %v7022_v28 }
 0x1c5   :  { %2085 = vrot.lane.b32.xlu0 %v11892_v32, %s6352_s8  ;;  %5902 = vmatmul.mubr.msk.f32.gmra.mxu1 %vm735_vm3, %v5870_v3  ;;  %v7167_v33 = vpop.permute.xlu1 %415  ;;  %v485_v3 = vsel %vm463_vm4, %v7016_v18, %v6992_v10  ;;  %v548_v32 = vmul.f32 %v7177_v39, %v479_v15 }
 0x1c6   :  { %2101 = vrot.lane.b32.xlu1 %v11894_v14, %s6352_s8  ;;  %920 = vmatprep.mubr.f32.mxu0 %v11883_v0  ;;  %v478_v14 = vsel %vm463_vm4, %v6963_v47, %v7001_v25  ;;  %v469_v47 = vsel %vm463_vm4, %v7031_v9, %v7007_v26  ;;  %v11895_v25 = vld [vmem:[#allocation12_spill] sm:$0xff]  ;;  %v539_v15 = vmul.f32 %v7117_v8, %v485_v3 }
 0x1c7   :  { %1171 = vmatpush1.msra.mxu0 %v546_v41  ;;  %1331 = vmatprep.subr.mxu1 %v549_v58  ;;  %v7191_v59 = vpop.permute.xlu0 %431  ;;  %v493_v58 = vsel %vm463_vm4, %v7007_v26, %v7016_v18  ;;  %v545_v41 = vmul.f32 %v7140_v49, %v470_v46  ;;  %v544_v18 = vmul.f32 %v7177_v39, %v478_v14  ;;  %v5872_v14 = vld [vmem:[%s11760_s4 + $0xe8] sm:$0xff] }
 0x1c8   :  { %5887 = vmatmul.mubr.msk.f32.gmra.mxu0 %vm735_vm3, %v5871_v43  ;;  %1081 = vmatprep.mubr.f32.mxu1 %v11883_v0  ;;  %v538_v26 = vmul.f32 %v7131_v23, %v493_v58  ;;  %v541_v46 = vmul.f32 %v7140_v49, %v469_v47  ;;  %v476_v58 = vsel %vm463_vm4, %v7022_v28, %v7061_v35 }
 0x1c9   :  { %2117 = vrot.lane.b32.xlu0 %v6545_v2, %s6352_s8  ;;  %1172 = vmatprep.subr.mxu0 %v543_v40  ;;  %v7207_v19 = vpop.permute.xlu1 %447  ;;  %v467_v28 = vsel %vm463_vm4, %v7091_v34, %v7067_v57 }
 0x1ca   :  { %1332 = vmatpush1.msra.mxu1 %v548_v32  ;;  %2133 = vrot.lane.b32.xlu1 %v11895_v25, %s6352_s8  ;;  %v477_v32 = vsel %vm463_vm4, %v6992_v10, %v7031_v9  ;;  %v468_v10 = vsel %vm463_vm4, %v7061_v35, %v7037_v63  ;;  %v483_v9 = vsel %vm463_vm4, %v7076_v54, %v7052_v61  ;;  %v11896_v35 = vld [vmem:[#allocation6_spill] sm:$0xff] }
 0x1cb   :  { %5903 = vmatmul.mubr.msk.f32.gmra.mxu1 %vm735_vm3, %v5871_v43  ;;  %1173 = vmatpush1.msra.mxu0 %v542_v36  ;;  %v7223_v40 = vpop.permute.xlu0 %397  ;;  %v492_v43 = vsel %vm463_vm4, %v7037_v63, %v7046_v24  ;;  %v535_v24 = vmul.f32 %v7117_v8, %v484_v37  ;;  %v540_v36 = vmul.f32 %v7177_v39, %v477_v32 }
 0x1cc   :  { %1333 = vmatprep.subr.mxu1 %v545_v41  ;;  %1174 = vmatprep.subr.mxu0 %v539_v15  ;;  %v534_v47 = vmul.f32 %v7131_v23, %v492_v43  ;;  %v491_v41 = vsel %vm463_vm4, %v7067_v57, %v7076_v54  ;;  %v537_v15 = vmul.f32 %v7140_v49, %v468_v10  ;;  %v5873_v43 = vld [vmem:[%s11760_s4 + $0xf0] sm:$0xff] }
 0x1cd   :  { %1334 = vmatpush1.msra.mxu1 %v544_v18  ;;  %2083 = vrot.lane.b32.xlu0 %v6523_v44, %s6352_s8  ;;  %v7240_v3 = vpop.permute.xlu1 %413  ;;  %v531_v18 = vmul.f32 %v7117_v8, %v483_v9  ;;  %v482_v54 = vsel %vm463_vm4, %v7106_v30, %v7082_v16  ;;  %v530_v57 = vmul.f32 %v7131_v23, %v491_v41 }
 0x1ce   :  { %926 = vmatprep.mubr.f32.mxu0 %v11883_v0  ;;  %1175 = vmatpush1.msra.mxu0 %v538_v26  ;;  %v536_v26 = vmul.f32 %v7177_v39, %v476_v58  ;;  %v475_v32 = vsel %vm463_vm4, %v7052_v61, %v7091_v34  ;;  %v533_v10 = vmul.f32 %v7140_v49, %v467_v28 }
 0x1cf   :  { %1335 = vmatprep.subr.mxu1 %v541_v46  ;;  %5888 = vmatmul.mubr.msk.f32.gmra.mxu0 %vm735_vm3, %v5872_v14  ;;  %v7258_v63 = vpop.permute.xlu0 %429  ;;  %v466_v61 = vsel %vm463_vm4, %v7126_v21, %v7097_v48  ;;  %v481_v34 = vsel %vm463_vm4, %v7153_v51, %v7167_v33  ;;  %v489_v58 = vsel %vm463_vm4, %v7207_v19, %v7153_v51 }
 0x1d0   :  { %1087 = vmatprep.mubr.f32.mxu1 %v11883_v0  ;;  %1176 = vmatprep.subr.mxu0 %v535_v24  ;;  %v532_v24 = vmul.f32 %v7177_v39, %v475_v32  ;;  %v529_v51 = vmul.f32 %v7140_v49, %v466_v61 }
 0x1d1   :  { %1336 = vmatpush1.msra.mxu1 %v540_v36  ;;  %2099 = vrot.lane.b32.xlu1 %v11896_v35, %s6352_s8  ;;  %v446_v37 = vpop.permute.xlu1 %445  ;;  %v474_v36 = vsel %vm463_vm4, %v7082_v16, %v7126_v21  ;;  %v465_v16 = vsel %vm463_vm4, %v7191_v59, %v7207_v19  ;;  %v523_v21 = vmul.f32 %v7117_v8, %v481_v34  ;;  %v552_v34 = vld [vmem:[%s11760_s4 + $0x10] sm:$0xff] }
 0x1d2   :  { %5904 = vmatmul.mubr.msk.f32.gmra.mxu1 %vm735_vm3, %v5872_v14  ;;  %1177 = vmatpush1.msra.mxu0 %v534_v47  ;;  %v490_v14 = vsel %vm463_vm4, %v7097_v48, %v7106_v30  ;;  %v527_v30 = vmul.f32 %v7117_v8, %v482_v54  ;;  %v480_v47 = vsel %vm463_vm4, %v7223_v40, %v7240_v3  ;;  %v5874_v54 = vld [vmem:[%s11760_s4 + $0xf8] sm:$0xff] }
 0x1d3   :  { %1337 = vmatprep.subr.mxu1 %v537_v15  ;;  %1178 = vmatprep.subr.mxu0 %v531_v18  ;;  %v7288_v46 = vpop.permute.xlu0 %1490  ;;  %v526_v48 = vmul.f32 %v7131_v23, %v490_v14  ;;  %v528_v28 = vmul.f32 %v7177_v39, %v474_v36  ;;  %v473_v15 = vsel %vm463_vm4, %v7167_v33, %v7191_v59  ;;  %v553_v36 = vld [vmem:[%s11760_s4 + $0x18] sm:$0xff] }
 0x1d4   :  { %1338 = vmatpush1.msra.mxu1 %v536_v26  ;;  %2115 = vrot.lane.b32.xlu0 %v6529_v53, %s6352_s8  ;;  %v522_v19 = vmul.f32 %v7131_v23, %v489_v58  ;;  %v488_v26 = vsel %vm463_vm4, %v446_v37, %v7223_v40  ;;  %v464_v33 = vsel %vm463_vm4, %v7258_v63, %v446_v37 }
 0x1d5   :  { %932 = vmatprep.mubr.f32.mxu0 %v11883_v0  ;;  %1179 = vmatpush1.msra.mxu0 %v530_v57  ;;  %v7307_v9 = vpop.permute.xlu1 %1504  ;;  %v519_v57 = vmul.f32 %v7117_v8, %v480_v47  ;;  %v525_v59 = vmul.f32 %v7140_v49, %v465_v16  ;;  %v524_v40 = vmul.f32 %v7177_v39, %v473_v15  ;;  %v554_v47 = vld [vmem:[%s11760_s4 + $0x20] sm:$0xff] }
 0x1d6   :  { %1339 = vmatprep.subr.mxu1 %v533_v10  ;;  %5889 = vmatmul.mubr.msk.f32.gmra.mxu0 %vm735_vm3, %v5873_v43  ;;  %v472_v37 = vsel %vm463_vm4, %v7240_v3, %v7258_v63  ;;  %v521_v14 = vmul.f32 %v7140_v49, %v464_v33  ;;  %v551_v63 = vld [vmem:[%s11760_s4 + $0x8] sm:$0xff] }
 0x1d7   :  { %1093 = vmatprep.mubr.f32.mxu1 %v11883_v0  ;;  %1180 = vmatprep.subr.mxu0 %v527_v30  ;;  %v7325_v41 = vpop.permute.xlu0 %1522  ;;  %v520_v3 = vmul.f32 %v7177_v39, %v472_v37  ;;  %v1574_v33 = vld [vmem:[#allocation2 + $0x8] sm:$0xf] }
 0x1d8   :  { %1340 = vmatpush1.msra.mxu1 %v532_v24  ;;  %2131 = vrot.lane.b32.xlu1 %v6533_v55, %s6352_s8  ;;  %v7496_v37 = vrot.slane %v1574_v33, %v11888_v29 }
 0x1d9   :  { %5905 = vmatmul.mubr.msk.f32.gmra.mxu1 %vm735_vm3, %v5873_v43  ;;  %1181 = vmatpush1.msra.mxu0 %v526_v48  ;;  %v7341_v18 = vpop.permute.xlu1 %1536  ;;  %v518_v43 = vmul.f32 %v7131_v23, %v488_v26  ;;  %v550_v23 = vld [vmem:[%s11760_s4] sm:$0xff] }
 0x1da   :  { %1341 = vmatprep.subr.mxu1 %v529_v51  ;;  %1182 = vmatprep.subr.mxu0 %v523_v21  ;;  %v555_v21 = vld [vmem:[%s11760_s4 + $0x28] sm:$0xff] }
 0x1db   :  { %1342 = vmatpush1.msra.mxu1 %v528_v28  ;;  %2081 = vrot.lane.b32.xlu0 %v6631_v6, %s6352_s8  ;;  %v7357_v32 = vpop.permute.xlu0 %1488 }
 0x1dc   :  { %938 = vmatprep.mubr.f32.mxu0 %v11883_v0  ;;  %1183 = vmatpush1.msra.mxu0 %v522_v19  ;;  %v556_v19 = vld [vmem:[%s11760_s4 + $0x30] sm:$0xff] }
 0x1dd   :  { %1343 = vmatprep.subr.mxu1 %v525_v59  ;;  %5890 = vmatmul.mubr.msk.f32.gmra.mxu0 %vm735_vm3, %v5874_v54  ;;  %v7363_v8 = vpop.permute.xlu1 %1502 }
 0x1de   :  { %1099 = vmatprep.mubr.f32.mxu1 %v11883_v0  ;;  %1184 = vmatprep.subr.mxu0 %v519_v57  ;;  %v557_v57 = vld [vmem:[%s11760_s4 + $0x38] sm:$0xff] }
 0x1df   :  { %1344 = vmatpush1.msra.mxu1 %v524_v40  ;;  %2097 = vrot.lane.b32.xlu1 %v6636_v7, %s6352_s8  ;;  %v7376_v10 = vpop.permute.xlu0 %1520  ;;  %v558_v40 = vld [vmem:[%s11760_s4 + $0x40] sm:$0xff] }
 0x1e0   :  { %5906 = vmatmul.mubr.msk.f32.gmra.mxu1 %vm735_vm3, %v5874_v54  ;;  %2113 = vrot.lane.b32.xlu0 %v6642_v11, %s6352_s8 }
 0x1e1   :  { %1185 = vmatpush1.msra.mxu0 %v518_v43  ;;  %1218 = vmatprep.mubr.f32.mxu0 %v11883_v0  ;;  %v7383_v49 = vpop.permute.xlu1 %1534 }
 0x1e2   :  { %1345 = vmatprep.subr.mxu1 %v521_v14  ;;  %5907 = vmatmul.mubr.msk.f32.vlgmr.msra.gmra.mxu0 %vm735_vm3, %v550_v23 }
 0x1e3   :  { %1346 = vmatpush1.msra.mxu1 %v520_v3  ;;  %1379 = vmatprep.mubr.f32.mxu1 %v11883_v0  ;;  %v7390_v61 = vpop.permute.xlu0 %1486 }
 0x1e4   :  { %2129 = vrot.lane.b32.xlu1 %v6647_v12, %s6352_s8  ;;  %5923 = vmatmul.mubr.msk.f32.vlgmr.msra.gmra.mxu1 %vm735_vm3, %v550_v23 }
 0x1e5   :  { %2079 = vrot.lane.b32.xlu0 %v6651_v13, %s6352_s8  ;;  %1224 = vmatprep.mubr.f32.mxu0 %v11883_v0  ;;  %v7398_v39 = vpop.permute.xlu1 %1500 }
 0x1e6   :  { %5908 = vmatmul.mubr.msk.f32.gmra.mxu0 %vm735_vm3, %v551_v63  ;;  %1385 = vmatprep.mubr.f32.mxu1 %v11883_v0 }
 0x1e7   :  { %1230 = vmatprep.mubr.f32.mxu0 %v11883_v0  ;;  %v7406_v30 = vpop.permute.xlu0 %1518 }
 0x1e8   :  { %2095 = vrot.lane.b32.xlu1 %v6656_v27, %s6352_s8  ;;  %5924 = vmatmul.mubr.msk.f32.gmra.mxu1 %vm735_vm3, %v551_v63  ;;  %v559_v63 = vld [vmem:[%s11760_s4 + $0x48] sm:$0xff] }
 0x1e9   :  { %2111 = vrot.lane.b32.xlu0 %v6661_v31, %s6352_s8  ;;  %1391 = vmatprep.mubr.f32.mxu1 %v11883_v0  ;;  %v7414_v24 = vpop.permute.xlu1 %1532 }
 0x1ea   :  { %5909 = vmatmul.mubr.msk.f32.gmra.mxu0 %vm735_vm3, %v552_v34 }
 0x1eb   :  { %1236 = vmatprep.mubr.f32.mxu0 %v11883_v0  ;;  %v7421_v48 = vpop.permute.xlu0 %1484 }
 0x1ec   :  { %2127 = vrot.lane.b32.xlu1 %v6665_v17, %s6352_s8  ;;  %5925 = vmatmul.mubr.msk.f32.gmra.mxu1 %vm735_vm3, %v552_v34  ;;  %v11897_v34 = vld [vmem:[#allocation20_spill] sm:$0xff] }
 0x1ed   :  { %3147 = vrot.lane.b32.xlu0 %v6611_v56, %s6353_s14  ;;  %1397 = vmatprep.mubr.f32.mxu1 %v11883_v0  ;;  %v7429_v58 = vpop.permute.xlu1 %1498 }
 0x1ee   :  { %5910 = vmatmul.mubr.msk.f32.gmra.mxu0 %vm735_vm3, %v553_v36 }
 0x1ef   :  { %1242 = vmatprep.mubr.f32.mxu0 %v11883_v0  ;;  %v7436_v16 = vpop.permute.xlu0 %1516 }
 0x1f0   :  { %3163 = vrot.lane.b32.xlu1 %v6616_v60, %s6353_s14  ;;  %5926 = vmatmul.mubr.msk.f32.gmra.mxu1 %vm735_vm3, %v553_v36 }
 0x1f1   :  { %3179 = vrot.lane.b32.xlu0 %v6622_v1, %s6353_s14  ;;  %1403 = vmatprep.mubr.f32.mxu1 %v11883_v0  ;;  %v7444_v51 = vpop.permute.xlu1 %1530 }
 0x1f2   :  { %5911 = vmatmul.mubr.msk.f32.gmra.mxu0 %vm735_vm3, %v554_v47 }
 0x1f3   :  { %1248 = vmatprep.mubr.f32.mxu0 %v11883_v0  ;;  %v7451_v28 = vpop.permute.xlu0 %1482 }
 0x1f4   :  { %3195 = vrot.lane.b32.xlu1 %v6627_v5, %s6353_s14  ;;  %5927 = vmatmul.mubr.msk.f32.gmra.mxu1 %vm735_vm3, %v554_v47  ;;  %v11898_v47 = vld [vmem:[#allocation32_spill] sm:$0xff] }
 0x1f5   :  { %3145 = vrot.lane.b32.xlu0 %v6591_v42, %s6353_s14  ;;  %1409 = vmatprep.mubr.f32.mxu1 %v11883_v0  ;;  %v7459_v15 = vpop.permute.xlu1 %1496 }
 0x1f6   :  { %5912 = vmatmul.mubr.msk.f32.gmra.mxu0 %vm735_vm3, %v555_v21 }
 0x1f7   :  { %1254 = vmatprep.mubr.f32.mxu0 %v11883_v0 }
 0x1f8   :  { %3161 = vrot.lane.b32.xlu1 %v6596_v45, %s6353_s14  ;;  %5928 = vmatmul.mubr.msk.f32.gmra.mxu1 %vm735_vm3, %v555_v21  ;;  %v7469_v26 = vpop.permute.xlu0 %1514  ;;  %v7519_v21 = vrot.slane %v1574_v33, %v11898_v47 }
 0x1f9   :  { %3177 = vrot.lane.b32.xlu0 %v6601_v50, %s6353_s14  ;;  %1415 = vmatprep.mubr.f32.mxu1 %v11883_v0 }
 0x1fa   :  { %5913 = vmatmul.mubr.msk.f32.gmra.mxu0 %vm735_vm3, %v556_v19  ;;  %v7475_v54 = vpop.permute.xlu1 %1528 }
 0x1fb   :  { %1260 = vmatprep.mubr.f32.mxu0 %v11883_v0 }
 0x1fc   :  { %3193 = vrot.lane.b32.xlu1 %v6606_v52, %s6353_s14  ;;  %5929 = vmatmul.mubr.msk.f32.gmra.mxu1 %vm735_vm3, %v556_v19  ;;  %v11899_v19 = vld [vmem:[#allocation31_spill] sm:$0xff]  ;;  %v11903_v52 = vld [vmem:[#allocation16_spill] sm:$0xff] }
 0x1fd   :  { %3143 = vrot.lane.b32.xlu0 %v6571_v20, %s6353_s14  ;;  %1421 = vmatprep.mubr.f32.mxu1 %v11883_v0  ;;  %v7487_v59 = vpop.permute.xlu0 %1480  ;;  %v11901_v20 = vld [vmem:[#allocation14_spill] sm:$0xff] }
 0x1fe   :  { %5914 = vmatmul.mubr.msk.f32.gmra.mxu0 %vm735_vm3, %v557_v57 }
 0x1ff   :  { %1266 = vmatprep.mubr.f32.mxu0 %v11883_v0  ;;  %v1507_v43 = vpop.permute.xlu1 %1506 }
 0x200   :  { %3159 = vrot.lane.b32.xlu1 %v6576_v22, %s6353_s14  ;;  %5930 = vmatmul.mubr.msk.f32.gmra.mxu1 %vm735_vm3, %v557_v57  ;;  %v1564_v14 = vsel %vm1540_vm5, %v7288_v46, %v1507_v43  ;;  %v7522_v57 = vrot.slane %v1574_v33, %v11899_v19 }
 0x201   :  { %3175 = vrot.lane.b32.xlu0 %v11885_v38, %s6353_s14  ;;  %1427 = vmatprep.mubr.f32.mxu1 %v11883_v0  ;;  %v1625_v23 = vmul.f32 %v7496_v37, %v1564_v14  ;;  %v11900_v14 = vld [vmem:[#allocation13_spill] sm:$0xff] }
 0x202   :  { %5915 = vmatmul.mubr.msk.f32.gmra.mxu0 %vm735_vm3, %v558_v40  ;;  %v7509_v3 = vpop.permute.xlu0 %1512 }
 0x203   :  { %1272 = vmatprep.mubr.f32.mxu0 %v11883_v0  ;;  %1709 = vmatprep.subr.mxu0 %v1625_v23 }
 0x204   :  { %3191 = vrot.lane.b32.xlu1 %v11897_v34, %s6353_s14  ;;  %5931 = vmatmul.mubr.msk.f32.gmra.mxu1 %vm735_vm3, %v558_v40  ;;  %v1539_v36 = vpop.permute.xlu1 %1538 }
 0x205   :  { %3141 = vrot.lane.b32.xlu0 %v11900_v14, %s6353_s14  ;;  %1433 = vmatprep.mubr.f32.mxu1 %v11883_v0  ;;  %v1548_v23 = vsel %vm1540_vm5, %v7325_v41, %v1539_v36  ;;  %v1572_v40 = vsel %vm1540_vm5, %v1539_v36, %v7288_v46  ;;  %v560_v14 = vld [vmem:[%s11760_s4 + $0x50] sm:$0xff]  ;;  %v1563_v36 = vsel %vm1540_vm5, %v7357_v32, %v7307_v9 }
 0x206   :  { %5916 = vmatmul.mubr.msk.f32.gmra.mxu0 %vm735_vm3, %v559_v63  ;;  %v1627_v34 = vmul.f32 %v7519_v21, %v1548_v23  ;;  %v1624_v38 = vmul.f32 %v7522_v57, %v1572_v40  ;;  %v11902_v23 = vld [vmem:[#allocation15_spill] sm:$0xff]  ;;  %v1556_v40 = vsel %vm1540_vm5, %v1507_v43, %v7325_v41  ;;  %v1621_v41 = vmul.f32 %v7496_v37, %v1563_v36 }
 0x207   :  { %1278 = vmatprep.mubr.f32.mxu0 %v11883_v0  ;;  %v7540_v22 = vpop.permute.xlu0 %1478  ;;  %v1555_v36 = vsel %vm1540_vm5, %v7307_v9, %v7376_v10 }
 0x208   :  { %3157 = vrot.lane.b32.xlu1 %v11901_v20, %s6353_s14  ;;  %5932 = vmatmul.mubr.msk.f32.gmra.mxu1 %vm735_vm3, %v559_v63  ;;  %v7545_v46 = vpop.permute.xlu1 %1494  ;;  %v7559_v63 = vrot.slane %v1574_v33, %v11893_v4  ;;  %v561_v20 = vld [vmem:[%s11760_s4 + $0x58] sm:$0xff]  ;;  %v1547_v33 = vsel %vm1540_vm5, %v7376_v10, %v7341_v18 }
 0x209   :  { %3173 = vrot.lane.b32.xlu0 %v11902_v23, %s6353_s14  ;;  %1439 = vmatprep.mubr.f32.mxu1 %v11883_v0  ;;  %v1623_v9 = vmul.f32 %v7519_v21, %v1547_v33  ;;  %v1561_v33 = vsel %vm1540_vm5, %v7421_v48, %v7398_v39 }
 0x20a   :  { %5917 = vmatmul.mubr.msk.f32.gmra.mxu0 %vm735_vm3, %v560_v14  ;;  %1870 = vmatprep.subr.mxu1 %v1627_v34  ;;  %v1626_v34 = vmul.f32 %v7559_v63, %v1556_v40  ;;  %v562_v40 = vld [vmem:[%s11760_s4 + $0x60] sm:$0xff] }
 0x20b   :  { %1284 = vmatprep.mubr.f32.mxu0 %v11883_v0  ;;  %1710 = vmatpush1.msra.mxu0 %v1624_v38  ;;  %v7565_v23 = vpop.permute.xlu0 %1510  ;;  %v11904_v38 = vld [vmem:[#allocation9_spill] sm:$0xff] }
 0x20c   :  { %3189 = vrot.lane.b32.xlu1 %v11903_v52, %s6353_s14  ;;  %5933 = vmatmul.mubr.msk.f32.gmra.mxu1 %vm735_vm3, %v560_v14  ;;  %v7571_v43 = vpop.permute.xlu1 %1526  ;;  %v1571_v14 = vsel %vm1540_vm5, %v7341_v18, %v7357_v32  ;;  %v1562_v18 = vsel %vm1540_vm5, %v7390_v61, %v7363_v8  ;;  %v11905_v32 = vld [vmem:[#allocation10_spill] sm:$0xff]  ;;  %v1570_v52 = vsel %vm1540_vm5, %v7383_v49, %v7390_v61 }
 0x20d   :  { %3139 = vrot.lane.b32.xlu0 %v11904_v38, %s6353_s14  ;;  %1445 = vmatprep.mubr.f32.mxu1 %v11883_v0  ;;  %v1617_v61 = vmul.f32 %v7496_v37, %v1562_v18 }
 0x20e   :  { %5918 = vmatmul.mubr.msk.f32.gmra.mxu0 %vm735_vm3, %v561_v20  ;;  %1711 = vmatprep.subr.mxu0 %v1621_v41  ;;  %v1620_v41 = vmul.f32 %v7522_v57, %v1571_v14 }
 0x20f   :  { %1290 = vmatprep.mubr.f32.mxu0 %v11883_v0  ;;  %1871 = vmatpush1.msra.mxu1 %v1626_v34  ;;  %v7594_v38 = vpop.permute.xlu0 %1476  ;;  %v1622_v34 = vmul.f32 %v7559_v63, %v1555_v36  ;;  %v1616_v36 = vmul.f32 %v7522_v57, %v1570_v52  ;;  %v1569_v52 = vsel %vm1540_vm5, %v7414_v24, %v7421_v48 }
 0x210   :  { %3155 = vrot.lane.b32.xlu1 %v11905_v32, %s6353_s14  ;;  %5934 = vmatmul.mubr.msk.f32.gmra.mxu1 %vm735_vm3, %v561_v20  ;;  %v7604_v10 = vpop.permute.xlu1 %1492  ;;  %v1546_v20 = vsel %vm1540_vm5, %v7406_v30, %v7383_v49  ;;  %v1554_v49 = vsel %vm1540_vm5, %v7363_v8, %v7406_v30  ;;  %v1545_v30 = vsel %vm1540_vm5, %v7436_v16, %v7414_v24 }
 0x211   :  { %3171 = vrot.lane.b32.xlu0 %v6545_v2, %s6353_s14  ;;  %1451 = vmatprep.mubr.f32.mxu1 %v11883_v0  ;;  %v1619_v8 = vmul.f32 %v7519_v21, %v1546_v20  ;;  %v1613_v48 = vmul.f32 %v7496_v37, %v1561_v33  ;;  %v1612_v20 = vmul.f32 %v7522_v57, %v1569_v52 }
 0x212   :  { %5919 = vmatmul.mubr.msk.f32.gmra.mxu0 %vm735_vm3, %v562_v40  ;;  %1872 = vmatprep.subr.mxu1 %v1623_v9  ;;  %v563_v9 = vld [vmem:[%s11760_s4 + $0x68] sm:$0xff]  ;;  %v1552_v52 = vsel %vm1540_vm5, %v7429_v58, %v7469_v26 }
 0x213   :  { %1712 = vmatpush1.msra.mxu0 %v1620_v41  ;;  %1873 = vmatpush1.msra.mxu1 %v1622_v34  ;;  %v7625_v14 = vpop.permute.xlu0 %1508  ;;  %v1618_v41 = vmul.f32 %v7559_v63, %v1554_v49  ;;  %v1553_v34 = vsel %vm1540_vm5, %v7398_v39, %v7436_v16  ;;  %v1544_v39 = vsel %vm1540_vm5, %v7469_v26, %v7444_v51 }
 0x214   :  { %3187 = vrot.lane.b32.xlu1 %v11895_v25, %s6353_s14  ;;  %5935 = vmatmul.mubr.msk.f32.gmra.mxu1 %vm735_vm3, %v562_v40  ;;  %v7638_v18 = vpop.permute.xlu1 %1524  ;;  %v1560_v40 = vsel %vm1540_vm5, %v7451_v28, %v7429_v58  ;;  %v1615_v16 = vmul.f32 %v7519_v21, %v1545_v30  ;;  %v1559_v49 = vsel %vm1540_vm5, %v7487_v59, %v7459_v15 }
 0x215   :  { %1713 = vmatprep.subr.mxu0 %v1617_v61  ;;  %3137 = vrot.lane.b32.xlu0 %v6523_v44, %s6353_s14  ;;  %v1568_v61 = vsel %vm1540_vm5, %v7444_v51, %v7451_v28  ;;  %v1614_v28 = vmul.f32 %v7559_v63, %v1553_v34  ;;  %v1543_v26 = vsel %vm1540_vm5, %v7509_v3, %v7475_v54 }
 0x216   :  { %1296 = vmatprep.mubr.f32.mxu0 %v11883_v0  ;;  %1714 = vmatpush1.msra.mxu0 %v1616_v36  ;;  %v1609_v36 = vmul.f32 %v7496_v37, %v1560_v40  ;;  %v1608_v51 = vmul.f32 %v7522_v57, %v1568_v61  ;;  %v1611_v40 = vmul.f32 %v7519_v21, %v1544_v39 }
 0x217   :  { %1874 = vmatprep.subr.mxu1 %v1619_v8  ;;  %5920 = vmatmul.mubr.msk.f32.gmra.mxu0 %vm735_vm3, %v563_v9  ;;  %v7663_v24 = vpop.permute.xlu0 %2093  ;;  %v564_v8 = vld [vmem:[%s11760_s4 + $0x70] sm:$0xff]  ;;  %v1551_v34 = vsel %vm1540_vm5, %v7459_v15, %v7509_v3  ;;  %v1557_v61 = vsel %vm1540_vm5, %v7594_v38, %v7604_v10  ;;  %v1542_v15 = vsel %vm1540_vm5, %v7565_v23, %v7571_v43 }
 0x218   :  { %1457 = vmatprep.mubr.f32.mxu1 %v11883_v0  ;;  %1715 = vmatprep.subr.mxu0 %v1613_v48  ;;  %v7671_v33 = vpop.permute.xlu1 %2107  ;;  %v1558_v48 = vsel %vm1540_vm5, %v7540_v22, %v7545_v46 }
 0x219   :  { %1875 = vmatpush1.msra.mxu1 %v1618_v41  ;;  %3153 = vrot.lane.b32.xlu1 %v11896_v35, %s6353_s14  ;;  %v1610_v41 = vmul.f32 %v7559_v63, %v1552_v52  ;;  %v1601_v3 = vmul.f32 %v7496_v37, %v1558_v48  ;;  %v1597_v52 = vmul.f32 %v7496_v37, %v1557_v61 }
 0x21a   :  { %5936 = vmatmul.mubr.msk.f32.gmra.mxu1 %vm735_vm3, %v563_v9  ;;  %1716 = vmatpush1.msra.mxu0 %v1612_v20  ;;  %v1567_v9 = vsel %vm1540_vm5, %v7475_v54, %v7487_v59  ;;  %v1605_v59 = vmul.f32 %v7496_v37, %v1559_v49  ;;  %v1566_v20 = vsel %vm1540_vm5, %v7571_v43, %v7540_v22 }
 0x21b   :  { %1876 = vmatprep.subr.mxu1 %v1615_v16  ;;  %1717 = vmatprep.subr.mxu0 %v1609_v36  ;;  %v7695_v30 = vpop.permute.xlu0 %2125  ;;  %v1604_v54 = vmul.f32 %v7522_v57, %v1567_v9  ;;  %v1607_v22 = vmul.f32 %v7519_v21, %v1543_v26  ;;  %v1606_v36 = vmul.f32 %v7559_v63, %v1551_v34 }
 0x21c   :  { %1877 = vmatpush1.msra.mxu1 %v1614_v28  ;;  %3169 = vrot.lane.b32.xlu0 %v6529_v53, %s6353_s14  ;;  %v7704_v58 = vpop.permute.xlu1 %2139  ;;  %v1550_v28 = vsel %vm1540_vm5, %v7545_v46, %v7565_v23  ;;  %v1600_v43 = vmul.f32 %v7522_v57, %v1566_v20  ;;  %v1565_v49 = vsel %vm1540_vm5, %v7638_v18, %v7594_v38 }
 0x21d   :  { %1302 = vmatprep.mubr.f32.mxu0 %v11883_v0  ;;  %1718 = vmatpush1.msra.mxu0 %v1608_v51  ;;  %v565_v51 = vld [vmem:[%s11760_s4 + $0x78] sm:$0xff]  ;;  %v1541_v46 = vsel %vm1540_vm5, %v7625_v14, %v7638_v18  ;;  %v1603_v23 = vmul.f32 %v7519_v21, %v1542_v15  ;;  %v1602_v37 = vmul.f32 %v7559_v63, %v1550_v28 }
 0x21e   :  { %1878 = vmatprep.subr.mxu1 %v1611_v40  ;;  %5921 = vmatmul.mubr.msk.f32.gmra.mxu0 %vm735_vm3, %v564_v8  ;;  %v1596_v9 = vmul.f32 %v7522_v57, %v1565_v49  ;;  %v1549_v18 = vsel %vm1540_vm5, %v7604_v10, %v7625_v14  ;;  %v1599_v40 = vmul.f32 %v7519_v21, %v1541_v46  ;;  %v5939_v57 = vld [vmem:[%s11760_s4 + $0x100] sm:$0xff]  ;;  %v5940_v21 = vld [vmem:[%s11760_s4 + $0x108] sm:$0xff] }
 0x21f   :  { %1463 = vmatprep.mubr.f32.mxu1 %v11883_v0  ;;  %1719 = vmatprep.subr.mxu0 %v1605_v59  ;;  %v7732_v39 = vpop.permute.xlu0 %2091  ;;  %v1598_v14 = vmul.f32 %v7559_v63, %v1549_v18  ;;  %v2177_v59 = vld [vmem:[#allocation2 + $0xc] sm:$0xf]  ;;  %v5943_v46 = vld [vmem:[%s11760_s4 + $0x120] sm:$0xff] }
 0x220   :  { %1879 = vmatpush1.msra.mxu1 %v1610_v41  ;;  %3185 = vrot.lane.b32.xlu1 %v6533_v55, %s6353_s14  ;;  %v7742_v16 = vpop.permute.xlu1 %2105  ;;  %v5941_v41 = vld [vmem:[%s11760_s4 + $0x110] sm:$0xff]  ;;  %v7822_v20 = vrot.slane %v2177_v59, %v11888_v29  ;;  %v7842_v28 = vrot.slane %v2177_v59, %v11898_v47 }
 0x221   :  { %5937 = vmatmul.mubr.msk.f32.gmra.mxu1 %vm735_vm3, %v564_v8  ;;  %1720 = vmatpush1.msra.mxu0 %v1604_v54 }
 0x222   :  { %1880 = vmatprep.subr.mxu1 %v1607_v22  ;;  %1721 = vmatprep.subr.mxu0 %v1601_v3  ;;  %v5942_v22 = vld [vmem:[%s11760_s4 + $0x118] sm:$0xff] }
 0x223   :  { %1881 = vmatpush1.msra.mxu1 %v1606_v36  ;;  %3135 = vrot.lane.b32.xlu0 %v6631_v6, %s6353_s14  ;;  %v7766_v8 = vpop.permute.xlu0 %2123 }
 0x224   :  { %1308 = vmatprep.mubr.f32.mxu0 %v11883_v0  ;;  %1722 = vmatpush1.msra.mxu0 %v1600_v43  ;;  %v7769_v38 = vpop.permute.xlu1 %2137  ;;  %v7845_v43 = vrot.slane %v2177_v59, %v11899_v19 }
 0x225   :  { %1882 = vmatprep.subr.mxu1 %v1603_v23  ;;  %5922 = vmatmul.mubr.msk.f32.gmra.mxu0 %vm735_vm3, %v565_v51 }
 0x226   :  { %1469 = vmatprep.mubr.f32.mxu1 %v11883_v0  ;;  %1723 = vmatprep.subr.mxu0 %v1597_v52 }
 0x227   :  { %1883 = vmatpush1.msra.mxu1 %v1602_v37  ;;  %3151 = vrot.lane.b32.xlu1 %v6636_v7, %s6353_s14  ;;  %v7785_v26 = vpop.permute.xlu0 %2089 }
 0x228   :  { %5938 = vmatmul.mubr.msk.f32.gmra.mxu1 %vm735_vm3, %v565_v51  ;;  %3167 = vrot.lane.b32.xlu0 %v6642_v11, %s6353_s14  ;;  %v7790_v10 = vpop.permute.xlu1 %2103 }
 0x229   :  { %1724 = vmatpush1.msra.mxu0 %v1596_v9  ;;  %1757 = vmatprep.mubr.f32.mxu0 %v11883_v0 }
 0x22a   :  { %1884 = vmatprep.subr.mxu1 %v1599_v40  ;;  %5955 = vmatmul.mubr.msk.f32.vlgmr.msra.gmra.mxu0 %vm735_vm3, %v5939_v57  ;;  %v7882_v40 = vrot.slane %v2177_v59, %v11893_v4 }
 0x22b   :  { %1885 = vmatpush1.msra.mxu1 %v1598_v14  ;;  %1918 = vmatprep.mubr.f32.mxu1 %v11883_v0  ;;  %v7799_v48 = vpop.permute.xlu0 %2121 }
 0x22c   :  { %3183 = vrot.lane.b32.xlu1 %v6647_v12, %s6353_s14  ;;  %5971 = vmatmul.mubr.msk.f32.vlgmr.msra.gmra.mxu1 %vm735_vm3, %v5939_v57  ;;  %v7804_v63 = vpop.permute.xlu1 %2135  ;;  %v5944_v57 = vld [vmem:[%s11760_s4 + $0x128] sm:$0xff] }
 0x22d   :  { %3133 = vrot.lane.b32.xlu0 %v6651_v13, %s6353_s14  ;;  %1763 = vmatprep.mubr.f32.mxu0 %v11883_v0 }
 0x22e   :  { %5956 = vmatmul.mubr.msk.f32.gmra.mxu0 %vm735_vm3, %v5940_v21  ;;  %1924 = vmatprep.mubr.f32.mxu1 %v11883_v0 }
 0x22f   :  { %1769 = vmatprep.mubr.f32.mxu0 %v11883_v0  ;;  %v7815_v34 = vpop.permute.xlu0 %2087 }
 0x230   :  { %3149 = vrot.lane.b32.xlu1 %v6656_v27, %s6353_s14  ;;  %5972 = vmatmul.mubr.msk.f32.gmra.mxu1 %vm735_vm3, %v5940_v21  ;;  %v2110_v54 = vpop.permute.xlu1 %2109  ;;  %v2150_v21 = vsel %vm2143_vm6, %v7766_v8, %v7704_v58 }
 0x231   :  { %3165 = vrot.lane.b32.xlu0 %v6661_v31, %s6353_s14  ;;  %1930 = vmatprep.mubr.f32.mxu1 %v11883_v0  ;;  %v2167_v61 = vsel %vm2143_vm6, %v7663_v24, %v2110_v54  ;;  %v2159_v18 = vsel %vm2143_vm6, %v2110_v54, %v7695_v30  ;;  %v5945_v54 = vld [vmem:[%s11760_s4 + $0x130] sm:$0xff] }
 0x232   :  { %5957 = vmatmul.mubr.msk.f32.gmra.mxu0 %vm735_vm3, %v5941_v41  ;;  %v2228_v15 = vmul.f32 %v7822_v20, %v2167_v61  ;;  %v2229_v59 = vmul.f32 %v7882_v40, %v2159_v18  ;;  %v5947_v18 = vld [vmem:[%s11760_s4 + $0x140] sm:$0xff] }
 0x233   :  { %1775 = vmatprep.mubr.f32.mxu0 %v11883_v0  ;;  %v7836_v3 = vpop.permute.xlu0 %2119 }
 0x234   :  { %3181 = vrot.lane.b32.xlu1 %v6665_v17, %s6353_s14  ;;  %5973 = vmatmul.mubr.msk.f32.gmra.mxu1 %vm735_vm3, %v5941_v41  ;;  %v2142_v36 = vpop.permute.xlu1 %2141  ;;  %v2174_v41 = vsel %vm2143_vm6, %v7704_v58, %v7732_v39 }
 0x235   :  { %3750 = vrot.lane.b32.xlu0 %v6611_v56, %s6354_s3  ;;  %1936 = vmatprep.mubr.f32.mxu1 %v11883_v0  ;;  %v2151_v49 = vsel %vm2143_vm6, %v7695_v30, %v2142_v36  ;;  %v2175_v51 = vsel %vm2143_vm6, %v2142_v36, %v7663_v24  ;;  %v2166_v24 = vsel %vm2143_vm6, %v7732_v39, %v7671_v33 }
 0x236   :  { %5958 = vmatmul.mubr.msk.f32.gmra.mxu0 %vm735_vm3, %v5942_v22  ;;  %2312 = vmatprep.subr.mxu0 %v2228_v15  ;;  %v2230_v52 = vmul.f32 %v7842_v28, %v2151_v49  ;;  %v2227_v23 = vmul.f32 %v7845_v43, %v2175_v51  ;;  %v2224_v30 = vmul.f32 %v7822_v20, %v2166_v24  ;;  %v5946_v49 = vld [vmem:[%s11760_s4 + $0x138] sm:$0xff]  ;;  %v11906_v51 = vld [vmem:[#allocation22_spill] sm:$0xff] }
 0x237   :  { %1781 = vmatprep.mubr.f32.mxu0 %v11883_v0  ;;  %v7863_v37 = vpop.permute.xlu0 %2085  ;;  %v2226_v15 = vmul.f32 %v7842_v28, %v2150_v21  ;;  %v2223_v58 = vmul.f32 %v7845_v43, %v2174_v41  ;;  %v2165_v39 = vsel %vm2143_vm6, %v7785_v26, %v7742_v16  ;;  %v2158_v36 = vsel %vm2143_vm6, %v7671_v33, %v7766_v8  ;;  %v11907_v8 = vld [vmem:[#allocation17_spill] sm:$0xff]  ;;  %v11909_v41 = vld [vmem:[#allocation19_spill] sm:$0xff] }
 0x238   :  { %3766 = vrot.lane.b32.xlu1 %v6616_v60, %s6354_s3  ;;  %5974 = vmatmul.mubr.msk.f32.gmra.mxu1 %vm735_vm3, %v5942_v22  ;;  %v7875_v9 = vpop.permute.xlu1 %2101  ;;  %v2149_v33 = vsel %vm2143_vm6, %v7799_v48, %v7769_v38  ;;  %v2173_v24 = vsel %vm2143_vm6, %v7769_v38, %v7785_v26  ;;  %v2164_v38 = vsel %vm2143_vm6, %v7815_v34, %v7790_v10  ;;  %v11908_v26 = vld [vmem:[#allocation18_spill] sm:$0xff] }
 0x239   :  { %3782 = vrot.lane.b32.xlu0 %v6622_v1, %s6354_s3  ;;  %1942 = vmatprep.mubr.f32.mxu1 %v11883_v0  ;;  %v2222_v21 = vmul.f32 %v7842_v28, %v2149_v33  ;;  %v11911_v33 = vld [vmem:[#allocation13_spill] sm:$0xff] }
 0x23a   :  { %5959 = vmatmul.mubr.msk.f32.gmra.mxu0 %vm735_vm3, %v5943_v46  ;;  %2473 = vmatprep.subr.mxu1 %v2230_v52  ;;  %v2220_v52 = vmul.f32 %v7822_v20, %v2165_v39  ;;  %v2163_v39 = vsel %vm2143_vm6, %v7863_v37, %v7875_v9 }
 0x23b   :  { %1787 = vmatprep.mubr.f32.mxu0 %v11883_v0  ;;  %2313 = vmatpush1.msra.mxu0 %v2227_v23  ;;  %v7888_v14 = vpop.permute.xlu0 %2117 }
 0x23c   :  { %3798 = vrot.lane.b32.xlu1 %v6627_v5, %s6354_s3  ;;  %5975 = vmatmul.mubr.msk.f32.gmra.mxu1 %vm735_vm3, %v5943_v46  ;;  %v2134_v61 = vpop.permute.xlu1 %2133  ;;  %v2225_v46 = vmul.f32 %v7882_v40, %v2158_v36  ;;  %v11910_v36 = vld [vmem:[#allocation20_spill] sm:$0xff] }
 0x23d   :  { %3748 = vrot.lane.b32.xlu0 %v6591_v42, %s6354_s3  ;;  %1948 = vmatprep.mubr.f32.mxu1 %v11883_v0 }
 0x23e   :  { %5960 = vmatmul.mubr.msk.f32.gmra.mxu0 %vm735_vm3, %v5944_v57  ;;  %2314 = vmatprep.subr.mxu0 %v2224_v30  ;;  %v2157_v30 = vsel %vm2143_vm6, %v7742_v16, %v7799_v48  ;;  %v2172_v16 = vsel %vm2143_vm6, %v7804_v63, %v7815_v34  ;;  %v2148_v34 = vsel %vm2143_vm6, %v7836_v3, %v7804_v63 }
 0x23f   :  { %1793 = vmatprep.mubr.f32.mxu0 %v11883_v0  ;;  %2474 = vmatpush1.msra.mxu1 %v2229_v59  ;;  %v7923_v22 = vpop.permute.xlu0 %2083  ;;  %v2219_v59 = vmul.f32 %v7845_v43, %v2173_v24  ;;  %v2221_v48 = vmul.f32 %v7882_v40, %v2157_v30  ;;  %v2156_v63 = vsel %vm2143_vm6, %v7790_v10, %v7836_v3  ;;  %v11912_v30 = vld [vmem:[#allocation14_spill] sm:$0xff] }
 0x240   :  { %3764 = vrot.lane.b32.xlu1 %v6596_v45, %s6354_s3  ;;  %5976 = vmatmul.mubr.msk.f32.gmra.mxu1 %vm735_vm3, %v5944_v57  ;;  %v2212_v10 = vmul.f32 %v7822_v20, %v2163_v39  ;;  %v2217_v3 = vmul.f32 %v7882_v40, %v2156_v63  ;;  %v5950_v39 = vld [vmem:[%s11760_s4 + $0x158] sm:$0xff]  ;;  %v11915_v63 = vld [vmem:[#allocation9_spill] sm:$0xff] }
 0x241   :  { %3780 = vrot.lane.b32.xlu0 %v6601_v50, %s6354_s3  ;;  %1954 = vmatprep.mubr.f32.mxu1 %v11883_v0 }
 0x242   :  { %5961 = vmatmul.mubr.msk.f32.gmra.mxu0 %vm735_vm3, %v5945_v54  ;;  %2475 = vmatprep.subr.mxu1 %v2226_v15  ;;  %v2216_v15 = vmul.f32 %v7822_v20, %v2164_v38 }
 0x243   :  { %1799 = vmatprep.mubr.f32.mxu0 %v11883_v0  ;;  %2315 = vmatpush1.msra.mxu0 %v2223_v58  ;;  %v7946_v23 = vpop.permute.xlu1 %2099 }
 0x244   :  { %3796 = vrot.lane.b32.xlu1 %v11906_v51, %s6354_s3  ;;  %5977 = vmatmul.mubr.msk.f32.gmra.mxu1 %vm735_vm3, %v5945_v54  ;;  %v5948_v54 = vld [vmem:[%s11760_s4 + $0x148] sm:$0xff] }
 0x245   :  { %3746 = vrot.lane.b32.xlu0 %v11907_v8, %s6354_s3  ;;  %1960 = vmatprep.mubr.f32.mxu1 %v11883_v0 }
 0x246   :  { %5962 = vmatmul.mubr.msk.f32.gmra.mxu0 %vm735_vm3, %v5946_v49  ;;  %2316 = vmatprep.subr.mxu0 %v2220_v52  ;;  %v7957_v57 = vpop.permute.xlu0 %2115  ;;  %v2215_v52 = vmul.f32 %v7845_v43, %v2172_v16 }
 0x247   :  { %1805 = vmatprep.mubr.f32.mxu0 %v11883_v0  ;;  %2476 = vmatpush1.msra.mxu1 %v2225_v46  ;;  %v2147_v46 = vsel %vm2143_vm6, %v7888_v14, %v2134_v61 }
 0x248   :  { %3762 = vrot.lane.b32.xlu1 %v11908_v26, %s6354_s3  ;;  %5978 = vmatmul.mubr.msk.f32.gmra.mxu1 %vm735_vm3, %v5946_v49  ;;  %v2171_v49 = vsel %vm2143_vm6, %v2134_v61, %v7863_v37  ;;  %v2155_v61 = vsel %vm2143_vm6, %v7875_v9, %v7888_v14  ;;  %v2214_v38 = vmul.f32 %v7842_v28, %v2147_v46  ;;  %v11913_v9 = vld [vmem:[#allocation15_spill] sm:$0xff] }
 0x249   :  { %3778 = vrot.lane.b32.xlu0 %v11909_v41, %s6354_s3  ;;  %1966 = vmatprep.mubr.f32.mxu1 %v11883_v0  ;;  %v2211_v37 = vmul.f32 %v7845_v43, %v2171_v49  ;;  %v11914_v49 = vld [vmem:[#allocation16_spill] sm:$0xff] }
 0x24a   :  { %5963 = vmatmul.mubr.msk.f32.gmra.mxu0 %vm735_vm3, %v5947_v18  ;;  %2477 = vmatprep.subr.mxu1 %v2222_v21  ;;  %v2132_v58 = vpop.permute.xlu1 %2131  ;;  %v2162_v21 = vsel %vm2143_vm6, %v7923_v22, %v7946_v23 }
 0x24b   :  { %1811 = vmatprep.mubr.f32.mxu0 %v11883_v0  ;;  %2317 = vmatpush1.msra.mxu0 %v2219_v59  ;;  %v5949_v59 = vld [vmem:[%s11760_s4 + $0x150] sm:$0xff] }
 0x24c   :  { %3794 = vrot.lane.b32.xlu1 %v11910_v36, %s6354_s3  ;;  %5979 = vmatmul.mubr.msk.f32.gmra.mxu1 %vm735_vm3, %v5947_v18  ;;  %v2218_v18 = vmul.f32 %v7842_v28, %v2148_v34  ;;  %v2146_v34 = vsel %vm2143_vm6, %v7957_v57, %v2132_v58 }
 0x24d   :  { %3744 = vrot.lane.b32.xlu0 %v11911_v33, %s6354_s3  ;;  %1972 = vmatprep.mubr.f32.mxu1 %v11883_v0  ;;  %v2082_v24 = vpop.permute.xlu0 %2081 }
 0x24e   :  { %5964 = vmatmul.mubr.msk.f32.gmra.mxu0 %vm735_vm3, %v5948_v54  ;;  %2318 = vmatprep.subr.mxu0 %v2216_v15  ;;  %v2208_v15 = vmul.f32 %v7822_v20, %v2162_v21 }
 0x24f   :  { %2478 = vmatpush1.msra.mxu1 %v2221_v48  ;;  %2319 = vmatpush1.msra.mxu0 %v2215_v52  ;;  %v2213_v48 = vmul.f32 %v7882_v40, %v2155_v61 }
 0x250   :  { %3760 = vrot.lane.b32.xlu1 %v11912_v30, %s6354_s3  ;;  %5980 = vmatmul.mubr.msk.f32.gmra.mxu1 %vm735_vm3, %v5948_v54  ;;  %v2170_v54 = vsel %vm2143_vm6, %v2132_v58, %v7923_v22  ;;  %v2154_v58 = vsel %vm2143_vm6, %v7946_v23, %v7957_v57 }
 0x251   :  { %2479 = vmatprep.subr.mxu1 %v2218_v18  ;;  %2320 = vmatprep.subr.mxu0 %v2212_v10  ;;  %v2098_v16 = vpop.permute.xlu1 %2097  ;;  %v2207_v22 = vmul.f32 %v7845_v43, %v2170_v54 }
 0x252   :  { %2480 = vmatpush1.msra.mxu1 %v2217_v3  ;;  %3776 = vrot.lane.b32.xlu0 %v11913_v9, %s6354_s3  ;;  %v2114_v14 = vpop.permute.xlu0 %2113  ;;  %v2161_v10 = vsel %vm2143_vm6, %v2082_v24, %v2098_v16  ;;  %v5951_v3 = vld [vmem:[%s11760_s4 + $0x160] sm:$0xff] }
 0x253   :  { %1817 = vmatprep.mubr.f32.mxu0 %v11883_v0  ;;  %2321 = vmatpush1.msra.mxu0 %v2211_v37  ;;  %v2210_v37 = vmul.f32 %v7842_v28, %v2146_v34  ;;  %v2204_v54 = vmul.f32 %v7822_v20, %v2161_v10 }
 0x254   :  { %2481 = vmatprep.subr.mxu1 %v2214_v38  ;;  %5965 = vmatmul.mubr.msk.f32.gmra.mxu0 %vm735_vm3, %v5949_v59  ;;  %v2209_v38 = vmul.f32 %v7882_v40, %v2154_v58 }
 0x255   :  { %1978 = vmatprep.mubr.f32.mxu1 %v11883_v0  ;;  %2482 = vmatpush1.msra.mxu1 %v2213_v48 }
 0x256   :  { %3792 = vrot.lane.b32.xlu1 %v11914_v49, %s6354_s3  ;;  %5981 = vmatmul.mubr.msk.f32.gmra.mxu1 %vm735_vm3, %v5949_v59  ;;  %v2130_v52 = vpop.permute.xlu1 %2129 }
 0x257   :  { %3742 = vrot.lane.b32.xlu0 %v11915_v63, %s6354_s3  ;;  %1823 = vmatprep.mubr.f32.mxu0 %v11883_v0  ;;  %v2080_v46 = vpop.permute.xlu0 %2079  ;;  %v2169_v48 = vsel %vm2143_vm6, %v2130_v52, %v2082_v24  ;;  %v2145_v34 = vsel %vm2143_vm6, %v2114_v14, %v2130_v52 }
 0x258   :  { %2322 = vmatprep.subr.mxu0 %v2208_v15  ;;  %5966 = vmatmul.mubr.msk.f32.gmra.mxu0 %vm735_vm3, %v5950_v39  ;;  %v8060_v18 = vpop.f32.mrf.mxu0 }
 0x259   :  { %11916 = vst [vmem:[#allocation17_spill] sm:$0xff] %v8060_v18  ;;  %1984 = vmatprep.mubr.f32.mxu1 %v11883_v0  ;;  %1829 = vmatprep.mubr.f32.mxu0 %v11883_v0  ;;  %v8069_v61 = vpop.f32.mrf.mxu1 }
 0x25a   :  { %11917 = vst [vmem:[#allocation33_spill] sm:$0xff] %v8069_v61  ;;  %3758 = vrot.lane.b32.xlu1 %v11905_v32, %s6354_s3  ;;  %5982 = vmatmul.mubr.msk.f32.gmra.mxu1 %vm735_vm3, %v5950_v39  ;;  %v8074_v23 = vpop.permute.xlu1 %2095  ;;  %v8076_v57 = vpop.f32.mrf.mxu0  ;;  %v5952_v39 = vld [vmem:[%s11760_s4 + $0x168] sm:$0xff] }
 0x25b   :  { %11918 = vst [vmem:[#allocation34_spill] sm:$0xff] %v8076_v57  ;;  %3774 = vrot.lane.b32.xlu0 %v6545_v2, %s6354_s3  ;;  %2323 = vmatpush1.msra.mxu0 %v2207_v22  ;;  %v2112_v21 = vpop.permute.xlu0 %2111  ;;  %v8081_v59 = vpop.f32.mrf.mxu1 }
 0x25c   :  { %11919 = vst [vmem:[#allocation35_spill] sm:$0xff] %v8081_v59  ;;  %2483 = vmatprep.subr.mxu1 %v2210_v37  ;;  %5967 = vmatmul.mubr.msk.f32.gmra.mxu0 %vm735_vm3, %v5951_v3  ;;  %v8087_v15 = vpop.f32.mrf.mxu0  ;;  %v2203_v37 = vmul.f32 %v7845_v43, %v2169_v48  ;;  %v2160_v48 = vsel %vm2143_vm6, %v2080_v46, %v8074_v23 }
 0x25d   :  { %11920 = vst [vmem:[#allocation36_spill] sm:$0xff] %v8087_v15  ;;  %1990 = vmatprep.mubr.f32.mxu1 %v11883_v0  ;;  %2484 = vmatpush1.msra.mxu1 %v2209_v38  ;;  %v8095_v22 = vpop.f32.mrf.mxu1  ;;  %v2153_v38 = vsel %vm2143_vm6, %v2098_v16, %v2114_v14 }
 0x25e   :  { %11921 = vst [vmem:[#allocation37_spill] sm:$0xff] %v8095_v22  ;;  %3790 = vrot.lane.b32.xlu1 %v11895_v25, %s6354_s3  ;;  %5983 = vmatmul.mubr.msk.f32.gmra.mxu1 %vm735_vm3, %v5951_v3  ;;  %v2128_v24 = vpop.permute.xlu1 %2127  ;;  %v8100_v58 = vpop.f32.mrf.mxu0  ;;  %v2206_v3 = vmul.f32 %v7842_v28, %v2145_v34  ;;  %v2205_v59 = vmul.f32 %v7882_v40, %v2153_v38 }
 0x25f   :  { %11922 = vst [vmem:[#allocation38_spill] sm:$0xff] %v8100_v58  ;;  %3740 = vrot.lane.b32.xlu0 %v6523_v44, %s6354_s3  ;;  %1835 = vmatprep.mubr.f32.mxu0 %v11883_v0  ;;  %v8106_v52 = vpop.permute.xlu0 %3147  ;;  %v8108_v10 = vpop.f32.mrf.mxu1  ;;  %v2168_v14 = vsel %vm2143_vm6, %v2128_v24, %v2080_v46  ;;  %v2144_v38 = vsel %vm2143_vm6, %v2112_v21, %v2128_v24 }
 0x260   :  { %11923 = vst [vmem:[#allocation39_spill] sm:$0xff] %v8108_v10  ;;  %2324 = vmatprep.subr.mxu0 %v2204_v54  ;;  %5968 = vmatmul.mubr.msk.f32.gmra.mxu0 %vm735_vm3, %v5952_v39  ;;  %v8114_v58 = vpop.f32.mrf.mxu0  ;;  %v5953_v10 = vld [vmem:[%s11760_s4 + $0x170] sm:$0xff]  ;;  %v2152_v24 = vsel %vm2143_vm6, %v8074_v23, %v2112_v21 }
 0x261   :  { %11924 = vst [vmem:[#allocation40_spill] sm:$0xff] %v8114_v58  ;;  %1996 = vmatprep.mubr.f32.mxu1 %v11883_v0  ;;  %1841 = vmatprep.mubr.f32.mxu0 %v11883_v0  ;;  %v8124_v16 = vpop.f32.mrf.mxu1 }
 0x262   :  { %11925 = vst [vmem:[#allocation41_spill] sm:$0xff] %v8124_v16  ;;  %3756 = vrot.lane.b32.xlu1 %v11896_v35, %s6354_s3  ;;  %5984 = vmatmul.mubr.msk.f32.gmra.mxu1 %vm735_vm3, %v5952_v39  ;;  %v8131_v54 = vpop.permute.xlu1 %3163  ;;  %v8133_v34 = vpop.f32.mrf.mxu0  ;;  %v2200_v39 = vmul.f32 %v7822_v20, %v2160_v48 }
 0x263   :  { %11926 = vst [vmem:[#allocation42_spill] sm:$0xff] %v8133_v34  ;;  %3772 = vrot.lane.b32.xlu0 %v6529_v53, %s6354_s3  ;;  %2325 = vmatpush1.msra.mxu0 %v2203_v37  ;;  %v8138_v57 = vpop.permute.xlu0 %3179  ;;  %v8140_v16 = vpop.f32.mrf.mxu1  ;;  %v2199_v34 = vmul.f32 %v7845_v43, %v2168_v14  ;;  %v5954_v37 = vld [vmem:[%s11760_s4 + $0x178] sm:$0xff]  ;;  %v5987_v14 = vld [vmem:[%s11760_s4 + $0x180] sm:$0xff] }
 0x264   :  { %11927 = vst [vmem:[#allocation43_spill] sm:$0xff] %v8140_v16  ;;  %2485 = vmatprep.subr.mxu1 %v2206_v3  ;;  %5969 = vmatmul.mubr.msk.f32.gmra.mxu0 %vm735_vm3, %v5953_v10  ;;  %v8144_v46 = vpop.f32.mrf.mxu0  ;;  %v3213_v61 = vsel %vm3197_vm7, %v8131_v54, %v8138_v57 }
 0x265   :  { %11928 = vst [vmem:[#allocation44_spill] sm:$0xff] %v8144_v46  ;;  %2002 = vmatprep.mubr.f32.mxu1 %v11883_v0  ;;  %2486 = vmatpush1.msra.mxu1 %v2205_v59  ;;  %v8153_v16 = vpop.f32.mrf.mxu1 }
 0x266   :  { %11929 = vst [vmem:[#allocation45_spill] sm:$0xff] %v8153_v16  ;;  %3788 = vrot.lane.b32.xlu1 %v6533_v55, %s6354_s3  ;;  %5985 = vmatmul.mubr.msk.f32.gmra.mxu1 %vm735_vm3, %v5953_v10  ;;  %v8158_v20 = vpop.permute.xlu1 %3195  ;;  %v8160_v3 = vpop.f32.mrf.mxu0  ;;  %v2202_v10 = vmul.f32 %v7842_v28, %v2144_v38  ;;  %v2201_v28 = vmul.f32 %v7882_v40, %v2152_v24 }
 0x267   :  { %11930 = vst [vmem:[#allocation46_spill] sm:$0xff] %v8160_v3  ;;  %3738 = vrot.lane.b32.xlu0 %v6631_v6, %s6354_s3  ;;  %1847 = vmatprep.mubr.f32.mxu0 %v11883_v0  ;;  %v8165_v43 = vpop.permute.xlu0 %3145  ;;  %v8167_v59 = vpop.f32.mrf.mxu1 }
 0x268   :  { %11931 = vst [vmem:[#allocation47_spill] sm:$0xff] %v8167_v59  ;;  %2326 = vmatprep.subr.mxu0 %v2200_v39  ;;  %5970 = vmatmul.mubr.msk.f32.gmra.mxu0 %vm735_vm3, %v5954_v37  ;;  %v8174_v48 = vpop.f32.mrf.mxu0 }
 0x269   :  { %11932 = vst [vmem:[#allocation48_spill] sm:$0xff] %v8174_v48  ;;  %2008 = vmatprep.mubr.f32.mxu1 %v11883_v0  ;;  %2327 = vmatpush1.msra.mxu0 %v2199_v34  ;;  %v8180_v3 = vpop.f32.mrf.mxu1 }
 0x26a   :  { %11933 = vst [vmem:[#allocation49_spill] sm:$0xff] %v8180_v3  ;;  %3754 = vrot.lane.b32.xlu1 %v6636_v7, %s6354_s3  ;;  %5986 = vmatmul.mubr.msk.f32.gmra.mxu1 %vm735_vm3, %v5954_v37  ;;  %v8185_v23 = vpop.permute.xlu1 %3161  ;;  %v8187_v21 = vpop.f32.mrf.mxu0 }
 0x26b   :  { %11934 = vst [vmem:[#allocation50_spill] sm:$0xff] %v8187_v21  ;;  %3770 = vrot.lane.b32.xlu0 %v6642_v11, %s6354_s3  ;;  %2360 = vmatprep.mubr.f32.mxu0 %v11883_v0  ;;  %v8193_v34 = vpop.permute.xlu0 %3177  ;;  %v8195_v39 = vpop.f32.mrf.mxu1 }
 0x26c   :  { %11935 = vst [vmem:[#allocation51_spill] sm:$0xff] %v8195_v39  ;;  %2487 = vmatprep.subr.mxu1 %v2202_v10  ;;  %6003 = vmatmul.mubr.msk.f32.vlgmr.msra.gmra.mxu0 %vm735_vm3, %v5987_v14  ;;  %v8198_v38 = vpop.f32.mrf.mxu0  ;;  %v5988_v39 = vld [vmem:[%s11760_s4 + $0x188] sm:$0xff] }
 0x26d   :  { %11936 = vst [vmem:[#allocation52_spill] sm:$0xff] %v8198_v38  ;;  %2488 = vmatpush1.msra.mxu1 %v2201_v28  ;;  %2521 = vmatprep.mubr.f32.mxu1 %v11883_v0  ;;  %v8201_v37 = vpop.f32.mrf.mxu1 }
 0x26e   :  { %11937 = vst [vmem:[#allocation53_spill] sm:$0xff] %v8201_v37  ;;  %2763 = vmatprep.subr.mxu0 %v6616_v60  ;;  %3786 = vrot.lane.b32.xlu1 %v6647_v12, %s6354_s3  ;;  %v8206_v40 = vpop.permute.xlu1 %3193  ;;  %v8208_v24 = vpop.f32.mrf.mxu0 }
 0x26f   :  { %11938 = vst [vmem:[#allocation54_spill] sm:$0xff] %v8208_v24  ;;  %6019 = vmatmul.mubr.msk.f32.vlgmr.msra.gmra.mxu1 %vm735_vm3, %v5987_v14  ;;  %2764 = vmatpush1.msra.mxu0 %v6611_v56  ;;  %v8212_v10 = vpop.permute.xlu0 %3143  ;;  %v8214_v28 = vpop.f32.mrf.mxu1 }
 0x270   :  { %11939 = vst [vmem:[#allocation55_spill] sm:$0xff] %v8214_v28  ;;  %2924 = vmatprep.subr.mxu1 %v6627_v5  ;;  %2765 = vmatprep.subr.mxu0 %v6596_v45  ;;  %v8221_v21 = vpop.f32.mrf.mxu0 }
 0x271   :  { %11940 = vst [vmem:[#allocation56_spill] sm:$0xff] %v8221_v21  ;;  %2925 = vmatpush1.msra.mxu1 %v6622_v1  ;;  %3736 = vrot.lane.b32.xlu0 %v6651_v13, %s6354_s3  ;;  %v8226_v14 = vpop.f32.mrf.mxu1 }
 0x272   :  { %11941 = vst [vmem:[#allocation57_spill] sm:$0xff] %v8226_v14  ;;  %2366 = vmatprep.mubr.f32.mxu0 %v11883_v0  ;;  %2766 = vmatpush1.msra.mxu0 %v6591_v42  ;;  %v8230_v28 = vpop.permute.xlu1 %3159  ;;  %v8232_v24 = vpop.f32.mrf.mxu0 }
 0x273   :  { %11942 = vst [vmem:[#allocation58_spill] sm:$0xff] %v8232_v24  ;;  %2926 = vmatprep.subr.mxu1 %v11906_v51  ;;  %6004 = vmatmul.mubr.msk.f32.gmra.mxu0 %vm735_vm3, %v5988_v39  ;;  %v8236_v59 = vpop.permute.xlu0 %3175  ;;  %v8238_v21 = vpop.f32.mrf.mxu1 }
 0x274   :  { %11943 = vst [vmem:[#allocation59_spill] sm:$0xff] %v8238_v21  ;;  %2527 = vmatprep.mubr.f32.mxu1 %v11883_v0  ;;  %2767 = vmatprep.subr.mxu0 %v11908_v26  ;;  %v8242_v14 = vpop.f32.mrf.mxu0 }
 0x275   :  { %11944 = vst [vmem:[#allocation60_spill] sm:$0xff] %v8242_v14  ;;  %2927 = vmatpush1.msra.mxu1 %v6601_v50  ;;  %3752 = vrot.lane.b32.xlu1 %v6656_v27, %s6354_s3  ;;  %v8247_v24 = vpop.f32.mrf.mxu1  ;;  %v5989_v14 = vld [vmem:[%s11760_s4 + $0x190] sm:$0xff] }
 0x276   :  { %11945 = vst [vmem:[#allocation61_spill] sm:$0xff] %v8247_v24  ;;  %6020 = vmatmul.mubr.msk.f32.gmra.mxu1 %vm735_vm3, %v5988_v39  ;;  %2768 = vmatpush1.msra.mxu0 %v11907_v8  ;;  %v8251_v37 = vpop.permute.xlu1 %3191  ;;  %v8253_v21 = vpop.f32.mrf.mxu0 }
 0x277   :  { %11946 = vst [vmem:[#allocation62_spill] sm:$0xff] %v8253_v21  ;;  %2928 = vmatprep.subr.mxu1 %v11910_v36  ;;  %2769 = vmatprep.subr.mxu0 %v11912_v30  ;;  %v8260_v38 = vpop.permute.xlu0 %3141  ;;  %v8262_v3 = vpop.f32.mrf.mxu1 }
 0x278   :  { %11947 = vst [vmem:[#allocation63_spill] sm:$0xff] %v8262_v3  ;;  %2929 = vmatpush1.msra.mxu1 %v11909_v41  ;;  %3768 = vrot.lane.b32.xlu0 %v6661_v31, %s6354_s3  ;;  %v8267_v39 = vpop.f32.mrf.mxu0 }
 0x279   :  { %11948 = vst [vmem:[#allocation64_spill] sm:$0xff] %v8267_v39  ;;  %2372 = vmatprep.mubr.f32.mxu0 %v11883_v0  ;;  %2770 = vmatpush1.msra.mxu0 %v11911_v33  ;;  %v8271_v21 = vpop.f32.mrf.mxu1 }
 0x27a   :  { %11949 = vst [vmem:[#allocation65_spill] sm:$0xff] %v8271_v21  ;;  %2930 = vmatprep.subr.mxu1 %v11914_v49  ;;  %6005 = vmatmul.mubr.msk.f32.gmra.mxu0 %vm735_vm3, %v5989_v14  ;;  %v8275_v24 = vpop.permute.xlu1 %3157  ;;  %v8277_v3 = vpop.f32.mrf.mxu0 }
 0x27b   :  { %11950 = vst [vmem:[#allocation66_spill] sm:$0xff] %v8277_v3  ;;  %2533 = vmatprep.mubr.f32.mxu1 %v11883_v0  ;;  %2771 = vmatprep.subr.mxu0 %v11905_v32  ;;  %v8281_v48 = vpop.permute.xlu0 %3173  ;;  %v8283_v39 = vpop.f32.mrf.mxu1 }
 0x27c   :  { %11951 = vst [vmem:[#allocation67_spill] sm:$0xff] %v8283_v39  ;;  %2931 = vmatpush1.msra.mxu1 %v11913_v9  ;;  %3784 = vrot.lane.b32.xlu1 %v6665_v17, %s6354_s3  ;;  %v8288_v21 = vpop.f32.mrf.mxu0  ;;  %v5990_v39 = vld [vmem:[%s11760_s4 + $0x198] sm:$0xff]  ;;  %s6355_s3 = smov 112  }
 0x27d   :  { %11952 = vst [vmem:[#allocation68_spill] sm:$0xff] %v8288_v21  ;;  %6021 = vmatmul.mubr.msk.f32.gmra.mxu1 %vm735_vm3, %v5989_v14  ;;  %2772 = vmatpush1.msra.mxu0 %v11915_v63  ;;  %v8292_v3 = vpop.f32.mrf.mxu1 }
 0x27e   :  { %11953 = vst [vmem:[#allocation69_spill] sm:$0xff] %v8292_v3  ;;  %2932 = vmatprep.subr.mxu1 %v11895_v25  ;;  %2773 = vmatprep.subr.mxu0 %v11896_v35  ;;  %v8299_v16 = vpop.permute.xlu1 %3189  ;;  %v8301_v46 = vpop.f32.mrf.mxu0 }
 0x27f   :  { %11954 = vst [vmem:[#allocation70_spill] sm:$0xff] %v8301_v46  ;;  %2933 = vmatpush1.msra.mxu1 %v6545_v2  ;;  %4353 = vrot.lane.b32.xlu0 %v6611_v56, %s6355_s3  ;;  %v8306_v14 = vpop.permute.xlu0 %3139  ;;  %v8308_v3 = vpop.f32.mrf.mxu1 }
 0x280   :  { %11955 = vst [vmem:[#allocation71_spill] sm:$0xff] %v8308_v3  ;;  %2378 = vmatprep.mubr.f32.mxu0 %v11883_v0  ;;  %2774 = vmatpush1.msra.mxu0 %v6523_v44  ;;  %v8312_v21 = vpop.f32.mrf.mxu0  ;;  %v8324_v3 = vld [vmem:[#allocation2 + $0x14] sm:$0xf] }
 0x281   :  { %11956 = vst [vmem:[#allocation72_spill] sm:$0xff] %v8312_v21  ;;  %2934 = vmatprep.subr.mxu1 %v6533_v55  ;;  %6006 = vmatmul.mubr.msk.f32.gmra.mxu0 %vm735_vm3, %v5990_v39  ;;  %v8316_v46 = vpop.f32.mrf.mxu1 }
 0x282   :  { %11957 = vst [vmem:[#allocation73_spill] sm:$0xff] %v8316_v46  ;;  %2539 = vmatprep.mubr.f32.mxu1 %v11883_v0  ;;  %2775 = vmatprep.subr.mxu0 %v6636_v7  ;;  %v8320_v58 = vpop.permute.xlu1 %3155  ;;  %v8322_v22 = vpop.f32.mrf.mxu0 }
 0x283   :  { %11958 = vst [vmem:[#allocation74_spill] sm:$0xff] %v8322_v22  ;;  %2935 = vmatpush1.msra.mxu1 %v6529_v53  ;;  %4369 = vrot.lane.b32.xlu1 %v6616_v60, %s6355_s3  ;;  %v8329_v21 = vpop.permute.xlu0 %3171  ;;  %v8331_v15 = vpop.f32.mrf.mxu1  ;;  %v8338_v22 = vrot.slane %v8324_v3, %v11888_v29 }
 0x284   :  { %11959 = vst [vmem:[#allocation75_spill] sm:$0xff] %v8331_v15  ;;  %6022 = vmatmul.mubr.msk.f32.gmra.mxu1 %vm735_vm3, %v5990_v39  ;;  %2776 = vmatpush1.msra.mxu0 %v6631_v6  ;;  %v8340_v46 = vpop.f32.mrf.mxu0  ;;  %v5991_v39 = vld [vmem:[%s11760_s4 + $0x1a0] sm:$0xff]  ;;  %v8353_v15 = vrot.slane %v8324_v3, %v11898_v47 }
 0x285   :  { %11960 = vst [vmem:[#allocation76_spill] sm:$0xff] %v8340_v46  ;;  %2936 = vmatprep.subr.mxu1 %v6647_v12  ;;  %2777 = vmatprep.subr.mxu0 %v6656_v27  ;;  %v8355_v18 = vpop.f32.mrf.mxu1  ;;  %v3229_v46 = vsel %vm3197_vm7, %v8158_v20, %v8106_v52 }
 0x286   :  { %11961 = vst [vmem:[#allocation77_spill] sm:$0xff] %v8355_v18  ;;  %2937 = vmatpush1.msra.mxu1 %v6642_v11  ;;  %4385 = vrot.lane.b32.xlu0 %v6622_v1, %s6355_s3  ;;  %v8364_v60 = vpop.f32.mrf.mxu0  ;;  %v8368_v47 = vpop.permute.xlu1 %3187  ;;  %v3282_v18 = vmul.f32 %v8338_v22, %v3213_v61 }
 0x287   :  { %11962 = vst [vmem:[#allocation78_spill] sm:$0xff] %v8364_v60  ;;  %2384 = vmatprep.mubr.f32.mxu0 %v11883_v0  ;;  %2778 = vmatpush1.msra.mxu0 %v6651_v13  ;;  %v8370_v29 = vpop.f32.mrf.mxu1  ;;  %v3284_v60 = vmul.f32 %v8353_v15, %v3229_v46  ;;  %v8380_v1 = vpop.permute.xlu0 %3137 }
 0x288   :  { %11963 = vst [vmem:[#allocation79_spill] sm:$0xff] %v8370_v29  ;;  %2938 = vmatprep.subr.mxu1 %v6665_v17  ;;  %6007 = vmatmul.mubr.msk.f32.gmra.mxu0 %vm735_vm3, %v5991_v39  ;;  %v8375_v56 = vpop.f32.mrf.mxu0  ;;  %v5992_v29 = vld [vmem:[%s11760_s4 + $0x1a8] sm:$0xff] }
 0x289   :  { %11964 = vst [vmem:[#allocation80_spill] sm:$0xff] %v8375_v56  ;;  %2545 = vmatprep.mubr.f32.mxu1 %v11883_v0  ;;  %2939 = vmatpush1.msra.mxu1 %v6661_v31 }
 0x28a   :  { %3366 = vmatprep.subr.mxu0 %v3282_v18  ;;  %4401 = vrot.lane.b32.xlu1 %v6627_v5, %s6355_s3  ;;  %v8390_v56 = vpop.f32.mrf.mxu0 }
 0x28b   :  { %6023 = vmatmul.mubr.msk.f32.gmra.mxu1 %vm735_vm3, %v5991_v39  ;;  %3527 = vmatprep.subr.mxu1 %v3284_v60  ;;  %v8388_v61 = vpop.f32.mrf.mxu1  ;;  %11966 = vst [vmem:[#allocation82_spill] sm:$0xff] %v8390_v56  ;;  %v8397_v18 = vpop.permute.xlu1 %3153  ;;  %v5993_v60 = vld [vmem:[%s11760_s4 + $0x1b0] sm:$0xff] }
 0x28c   :  { %11965 = vst [vmem:[#allocation81_spill] sm:$0xff] %v8388_v61  ;;  %4351 = vrot.lane.b32.xlu0 %v6591_v42, %s6355_s3  ;;  %2390 = vmatprep.mubr.f32.mxu0 %v11883_v0 }
 0x28d   :  { %6008 = vmatmul.mubr.msk.f32.gmra.mxu0 %vm735_vm3, %v5992_v29  ;;  %2551 = vmatprep.mubr.f32.mxu1 %v11883_v0  ;;  %v8405_v46 = vpop.f32.mrf.mxu1 }
 0x28e   :  { %4367 = vrot.lane.b32.xlu1 %v6596_v45, %s6355_s3  ;;  %2396 = vmatprep.mubr.f32.mxu0 %v11883_v0  ;;  %11967 = vst [vmem:[#allocation83_spill] sm:$0xff] %v8405_v46  ;;  %v8408_v39 = vpop.permute.xlu0 %3169 }
 0x28f   :  { %6024 = vmatmul.mubr.msk.f32.gmra.mxu1 %vm735_vm3, %v5992_v29  ;;  %v8410_v56 = vpop.f32.mrf.mxu0  ;;  %v5994_v29 = vld [vmem:[%s11760_s4 + $0x1b8] sm:$0xff] }
 0x290   :  { %11968 = vst [vmem:[#allocation84_spill] sm:$0xff] %v8410_v56  ;;  %4383 = vrot.lane.b32.xlu0 %v6601_v50, %s6355_s3  ;;  %2557 = vmatprep.mubr.f32.mxu1 %v11883_v0 }
 0x291   :  { %6009 = vmatmul.mubr.msk.f32.gmra.mxu0 %vm735_vm3, %v5993_v60  ;;  %v8424_v61 = vpop.f32.mrf.mxu0 }
 0x292   :  { %4399 = vrot.lane.b32.xlu1 %v11906_v51, %s6355_s3  ;;  %2402 = vmatprep.mubr.f32.mxu0 %v11883_v0  ;;  %v8422_v46 = vpop.f32.mrf.mxu1  ;;  %11970 = vst [vmem:[#allocation86_spill] sm:$0xff] %v8424_v61  ;;  %v8427_v56 = vpop.permute.xlu1 %3185 }
 0x293   :  { %11969 = vst [vmem:[#allocation85_spill] sm:$0xff] %v8422_v46  ;;  %6025 = vmatmul.mubr.msk.f32.gmra.mxu1 %vm735_vm3, %v5993_v60  ;;  %v5995_v60 = vld [vmem:[%s11760_s4 + $0x1c0] sm:$0xff] }
 0x294   :  { %4349 = vrot.lane.b32.xlu0 %v11907_v8, %s6355_s3  ;;  %2563 = vmatprep.mubr.f32.mxu1 %v11883_v0  ;;  %v8435_v50 = vpop.f32.mrf.mxu1 }
 0x295   :  { %6010 = vmatmul.mubr.msk.f32.gmra.mxu0 %vm735_vm3, %v5994_v29  ;;  %v8433_v51 = vpop.permute.xlu0 %3135  ;;  %11971 = vst [vmem:[#allocation87_spill] sm:$0xff] %v8435_v50 }
 0x296   :  { %4365 = vrot.lane.b32.xlu1 %v11908_v26, %s6355_s3  ;;  %2408 = vmatprep.mubr.f32.mxu0 %v11883_v0  ;;  %v8443_v61 = vpop.f32.mrf.mxu0 }
 0x297   :  { %11972 = vst [vmem:[#allocation88_spill] sm:$0xff] %v8443_v61  ;;  %6026 = vmatmul.mubr.msk.f32.gmra.mxu1 %vm735_vm3, %v5994_v29  ;;  %v5996_v29 = vld [vmem:[%s11760_s4 + $0x1c8] sm:$0xff] }
 0x298   :  { %4381 = vrot.lane.b32.xlu0 %v11909_v41, %s6355_s3  ;;  %2569 = vmatprep.mubr.f32.mxu1 %v11883_v0  ;;  %v8449_v46 = vpop.f32.mrf.mxu0 }
 0x299   :  { %11973 = vst [vmem:[#allocation89_spill] sm:$0xff] %v8449_v46  ;;  %6011 = vmatmul.mubr.msk.f32.gmra.mxu0 %vm735_vm3, %v5995_v60  ;;  %v8452_v50 = vpop.permute.xlu1 %3151  ;;  %v8454_v26 = vpop.f32.mrf.mxu1 }
 0x29a   :  { %11974 = vst [vmem:[#allocation90_spill] sm:$0xff] %v8454_v26  ;;  %4397 = vrot.lane.b32.xlu1 %v11910_v36, %s6355_s3  ;;  %2414 = vmatprep.mubr.f32.mxu0 %v11883_v0  ;;  %v8462_v61 = vpop.permute.xlu0 %3167 }
 0x29b   :  { %6027 = vmatmul.mubr.msk.f32.gmra.mxu1 %vm735_vm3, %v5995_v60  ;;  %v8468_v46 = vpop.f32.mrf.mxu1  ;;  %v5997_v60 = vld [vmem:[%s11760_s4 + $0x1d0] sm:$0xff] }
 0x29c   :  { %4347 = vrot.lane.b32.xlu0 %v11911_v33, %s6355_s3  ;;  %2575 = vmatprep.mubr.f32.mxu1 %v11883_v0  ;;  %11975 = vst [vmem:[#allocation91_spill] sm:$0xff] %v8468_v46 }
 0x29d   :  { %6012 = vmatmul.mubr.msk.f32.gmra.mxu0 %vm735_vm3, %v5996_v29  ;;  %v8471_v26 = vpop.f32.mrf.mxu0 }
 0x29e   :  { %11976 = vst [vmem:[#allocation92_spill] sm:$0xff] %v8471_v26  ;;  %4363 = vrot.lane.b32.xlu1 %v11912_v30, %s6355_s3  ;;  %2420 = vmatprep.mubr.f32.mxu0 %v11883_v0  ;;  %v8479_v36 = vpop.permute.xlu1 %3183 }
 0x29f   :  { %6028 = vmatmul.mubr.msk.f32.gmra.mxu1 %vm735_vm3, %v5996_v29  ;;  %v8482_v33 = vpop.permute.xlu0 %3133  ;;  %v8484_v46 = vpop.f32.mrf.mxu0  ;;  %v5998_v29 = vld [vmem:[%s11760_s4 + $0x1d8] sm:$0xff] }
 0x2a0   :  { %11977 = vst [vmem:[#allocation93_spill] sm:$0xff] %v8484_v46  ;;  %4379 = vrot.lane.b32.xlu0 %v11913_v9, %s6355_s3  ;;  %2581 = vmatprep.mubr.f32.mxu1 %v11883_v0  ;;  %v8489_v26 = vpop.f32.mrf.mxu1 }
 0x2a1   :  { %11978 = vst [vmem:[#allocation94_spill] sm:$0xff] %v8489_v26  ;;  %6013 = vmatmul.mubr.msk.f32.gmra.mxu0 %vm735_vm3, %v5997_v60 }
 0x2a2   :  { %4395 = vrot.lane.b32.xlu1 %v11914_v49, %s6355_s3  ;;  %2426 = vmatprep.mubr.f32.mxu0 %v11883_v0  ;;  %v8498_v30 = vpop.permute.xlu1 %3149  ;;  %v8500_v46 = vpop.f32.mrf.mxu1 }
 0x2a3   :  { %11979 = vst [vmem:[#allocation95_spill] sm:$0xff] %v8500_v46  ;;  %6029 = vmatmul.mubr.msk.f32.gmra.mxu1 %vm735_vm3, %v5997_v60  ;;  %v8503_v9 = vpop.permute.xlu0 %3165  ;;  %v8505_v26 = vpop.f32.mrf.mxu0  ;;  %v5999_v60 = vld [vmem:[%s11760_s4 + $0x1e0] sm:$0xff] }
 0x2a4   :  { %11980 = vst [vmem:[#allocation96_spill] sm:$0xff] %v8505_v26  ;;  %4345 = vrot.lane.b32.xlu0 %v11915_v63, %s6355_s3  ;;  %2587 = vmatprep.mubr.f32.mxu1 %v11883_v0  ;;  %v8510_v49 = vpop.f32.mrf.mxu1 }
 0x2a5   :  { %11981 = vst [vmem:[#allocation97_spill] sm:$0xff] %v8510_v49  ;;  %6014 = vmatmul.mubr.msk.f32.gmra.mxu0 %vm735_vm3, %v5998_v29  ;;  %v8513_v41 = vpop.f32.mrf.mxu0 }
 0x2a6   :  { %11982 = vst [vmem:[#allocation98_spill] sm:$0xff] %v8513_v41  ;;  %4361 = vrot.lane.b32.xlu1 %v11905_v32, %s6355_s3  ;;  %2432 = vmatprep.mubr.f32.mxu0 %v11883_v0  ;;  %v8521_v46 = vpop.permute.xlu1 %3181  ;;  %v8523_v63 = vpop.f32.mrf.mxu1 }
 0x2a7   :  { %11983 = vst [vmem:[#allocation99_spill] sm:$0xff] %v8523_v63  ;;  %6030 = vmatmul.mubr.msk.f32.gmra.mxu1 %vm735_vm3, %v5998_v29  ;;  %v8526_v49 = vpop.permute.xlu0 %3750  ;;  %v8528_v26 = vpop.f32.mrf.mxu0  ;;  %v6000_v29 = vld [vmem:[%s11760_s4 + $0x1e8] sm:$0xff] }
 0x2a8   :  { %11984 = vst [vmem:[#allocation100_spill] sm:$0xff] %v8528_v26  ;;  %4377 = vrot.lane.b32.xlu0 %v6545_v2, %s6355_s3  ;;  %2593 = vmatprep.mubr.f32.mxu1 %v11883_v0  ;;  %v8533_v41 = vpop.f32.mrf.mxu1 }
 0x2a9   :  { %11985 = vst [vmem:[#allocation101_spill] sm:$0xff] %v8533_v41  ;;  %6015 = vmatmul.mubr.msk.f32.gmra.mxu0 %vm735_vm3, %v5999_v60  ;;  %v8536_v32 = vpop.f32.mrf.mxu0 }
 0x2aa   :  { %11986 = vst [vmem:[#allocation102_spill] sm:$0xff] %v8536_v32  ;;  %4393 = vrot.lane.b32.xlu1 %v11895_v25, %s6355_s3  ;;  %2438 = vmatprep.mubr.f32.mxu0 %v11883_v0  ;;  %v8544_v63 = vpop.permute.xlu1 %3766  ;;  %v8546_v2 = vpop.f32.mrf.mxu1 }
 0x2ab   :  { %11987 = vst [vmem:[#allocation103_spill] sm:$0xff] %v8546_v2  ;;  %6031 = vmatmul.mubr.msk.f32.gmra.mxu1 %vm735_vm3, %v5999_v60  ;;  %v8549_v41 = vpop.permute.xlu0 %3782  ;;  %v8551_v26 = vpop.f32.mrf.mxu0  ;;  %v6001_v60 = vld [vmem:[%s11760_s4 + $0x1f0] sm:$0xff] }
 0x2ac   :  { %11988 = vst [vmem:[#allocation104_spill] sm:$0xff] %v8551_v26  ;;  %4343 = vrot.lane.b32.xlu0 %v6523_v44, %s6355_s3  ;;  %2599 = vmatprep.mubr.f32.mxu1 %v11883_v0  ;;  %v8556_v32 = vpop.f32.mrf.mxu1 }
 0x2ad   :  { %11989 = vst [vmem:[#allocation105_spill] sm:$0xff] %v8556_v32  ;;  %6016 = vmatmul.mubr.msk.f32.gmra.mxu0 %vm735_vm3, %v6000_v29  ;;  %v8559_v25 = vpop.f32.mrf.mxu0 }
 0x2ae   :  { %11990 = vst [vmem:[#allocation106_spill] sm:$0xff] %v8559_v25  ;;  %4359 = vrot.lane.b32.xlu1 %v11896_v35, %s6355_s3  ;;  %2444 = vmatprep.mubr.f32.mxu0 %v11883_v0  ;;  %v8567_v2 = vpop.permute.xlu1 %3798  ;;  %v8569_v44 = vpop.f32.mrf.mxu1 }
 0x2af   :  { %11991 = vst [vmem:[#allocation107_spill] sm:$0xff] %v8569_v44  ;;  %6032 = vmatmul.mubr.msk.f32.gmra.mxu1 %vm735_vm3, %v6000_v29  ;;  %v8572_v32 = vpop.permute.xlu0 %3748  ;;  %v8574_v26 = vpop.f32.mrf.mxu0  ;;  %v6002_v29 = vld [vmem:[%s11760_s4 + $0x1f8] sm:$0xff] }
 0x2b0   :  { %11992 = vst [vmem:[#allocation108_spill] sm:$0xff] %v8572_v32  ;;  %4375 = vrot.lane.b32.xlu0 %v6529_v53, %s6355_s3  ;;  %2605 = vmatprep.mubr.f32.mxu1 %v11883_v0  ;;  %v8579_v25 = vpop.f32.mrf.mxu1 }
 0x2b1   :  { %11993 = vst [vmem:[#allocation109_spill] sm:$0xff] %v8579_v25  ;;  %6017 = vmatmul.mubr.msk.f32.gmra.mxu0 %vm735_vm3, %v6001_v60  ;;  %v8582_v35 = vpop.f32.mrf.mxu0 }
 0x2b2   :  { %11994 = vst [vmem:[#allocation110_spill] sm:$0xff] %v8582_v35  ;;  %4391 = vrot.lane.b32.xlu1 %v6533_v55, %s6355_s3  ;;  %2450 = vmatprep.mubr.f32.mxu0 %v11883_v0  ;;  %v8590_v44 = vpop.permute.xlu1 %3764  ;;  %v8592_v32 = vpop.f32.mrf.mxu1  ;;  %v8601_v35 = vrot.slane %v8324_v3, %v11899_v19 }
 0x2b3   :  { %11995 = vst [vmem:[#allocation111_spill] sm:$0xff] %v8590_v44  ;;  %11996 = vst [vmem:[#allocation112_spill] sm:$0xff] %v8592_v32  ;;  %6033 = vmatmul.mubr.msk.f32.gmra.mxu1 %vm735_vm3, %v6001_v60  ;;  %v8595_v53 = vpop.permute.xlu0 %3780  ;;  %v8597_v25 = vpop.f32.mrf.mxu0  ;;  %v3221_v60 = vsel %vm3197_vm7, %v8106_v52, %v8131_v54  ;;  %v3212_v44 = vsel %vm3197_vm7, %v8185_v23, %v8193_v34  ;;  %v6035_v52 = vld [vmem:[%s11760_s4 + $0x200] sm:$0xff] }
 0x2b4   :  { %11997 = vst [vmem:[#allocation113_spill] sm:$0xff] %v8595_v53  ;;  %4341 = vrot.lane.b32.xlu0 %v6631_v6, %s6355_s3  ;;  %2611 = vmatprep.mubr.f32.mxu1 %v11883_v0  ;;  %v8606_v55 = vpop.f32.mrf.mxu1  ;;  %v8617_v53 = vrot.slane %v8324_v3, %v11893_v4  ;;  %v3205_v3 = vsel %vm3197_vm7, %v8138_v57, %v8158_v20 }
 0x2b5   :  { %6018 = vmatmul.mubr.msk.f32.gmra.mxu0 %vm735_vm3, %v6002_v29  ;;  %v8613_v32 = vpop.f32.mrf.mxu0  ;;  %v3211_v20 = vsel %vm3197_vm7, %v8230_v28, %v8236_v59 }
 0x2b6   :  { %11998 = vst [vmem:[#allocation114_spill] sm:$0xff] %v8613_v32  ;;  %4357 = vrot.lane.b32.xlu1 %v6636_v7, %s6355_s3  ;;  %2811 = vmatprep.mubr.f32.mxu0 %v11883_v0  ;;  %v8629_v54 = vpop.permute.xlu1 %3796  ;;  %v8631_v32 = vpop.f32.mrf.mxu1  ;;  %v3220_v7 = vsel %vm3197_vm7, %v8165_v43, %v8185_v23  ;;  %v3278_v23 = vmul.f32 %v8338_v22, %v3212_v44 }
 0x2b7   :  { %11999 = vst [vmem:[#allocation115_spill] sm:$0xff] %v8629_v54  ;;  %12000 = vst [vmem:[#allocation116_spill] sm:$0xff] %v8631_v32  ;;  %6034 = vmatmul.mubr.msk.f32.gmra.mxu1 %vm735_vm3, %v6002_v29  ;;  %v8642_v6 = vpop.permute.xlu0 %3746  ;;  %v8644_v4 = vpop.f32.mrf.mxu0  ;;  %v3281_v54 = vmul.f32 %v8601_v35, %v3221_v60  ;;  %v3228_v32 = vsel %vm3197_vm7, %v8206_v40, %v8165_v43  ;;  %v3283_v43 = vmul.f32 %v8617_v53, %v3205_v3 }
 0x2b8   :  { %12001 = vst [vmem:[#allocation117_spill] sm:$0xff] %v8642_v6  ;;  %4373 = vrot.lane.b32.xlu0 %v6642_v11, %s6355_s3  ;;  %2972 = vmatprep.mubr.f32.mxu1 %v11883_v0  ;;  %v8654_v57 = vpop.f32.mrf.mxu1  ;;  %v3277_v60 = vmul.f32 %v8601_v35, %v3220_v7  ;;  %v3204_v6 = vsel %vm3197_vm7, %v8193_v34, %v8206_v40 }
 0x2b9   :  { %12002 = vst [vmem:[#allocation118_spill] sm:$0xff] %v8654_v57  ;;  %6051 = vmatmul.mubr.msk.f32.vlgmr.msra.gmra.mxu0 %vm735_vm3, %v6035_v52  ;;  %v8662_v29 = vpop.f32.mrf.mxu0  ;;  %v3219_v44 = vsel %vm3197_vm7, %v8212_v10, %v8230_v28  ;;  %v3280_v7 = vmul.f32 %v8353_v15, %v3228_v32  ;;  %v3227_v40 = vsel %vm3197_vm7, %v8251_v37, %v8212_v10  ;;  %v6036_v28 = vld [vmem:[%s11760_s4 + $0x208] sm:$0xff] }
 0x2ba   :  { %12003 = vst [vmem:[#allocation119_spill] sm:$0xff] %v8662_v29  ;;  %3367 = vmatpush1.msra.mxu0 %v3281_v54  ;;  %4389 = vrot.lane.b32.xlu1 %v6647_v12, %s6355_s3  ;;  %v8672_v11 = vpop.permute.xlu1 %3762  ;;  %v8674_v57 = vpop.f32.mrf.mxu1  ;;  %v3274_v54 = vmul.f32 %v8338_v22, %v3211_v20  ;;  %v3279_v32 = vmul.f32 %v8617_v53, %v3204_v6 }
 0x2bb   :  { %12004 = vst [vmem:[#allocation120_spill] sm:$0xff] %v8674_v57  ;;  %6067 = vmatmul.mubr.msk.f32.vlgmr.msra.gmra.mxu1 %vm735_vm3, %v6035_v52  ;;  %3368 = vmatprep.subr.mxu0 %v3278_v23  ;;  %v8682_v3 = vpop.permute.xlu0 %3778  ;;  %v8684_v34 = vpop.f32.mrf.mxu0  ;;  %v3210_v23 = vsel %vm3197_vm7, %v8275_v24, %v8281_v48  ;;  %v3273_v20 = vmul.f32 %v8601_v35, %v3219_v44 }
 0x2bc   :  { %3528 = vmatpush1.msra.mxu1 %v3283_v43  ;;  %3369 = vmatpush1.msra.mxu0 %v3277_v60  ;;  %v8694_v52 = vpop.f32.mrf.mxu1  ;;  %v3203_v43 = vsel %vm3197_vm7, %v8236_v59, %v8251_v37  ;;  %v3218_v6 = vsel %vm3197_vm7, %v8260_v38, %v8275_v24  ;;  %v3226_v44 = vsel %vm3197_vm7, %v8299_v16, %v8260_v38 }
 0x2bd   :  { %3529 = vmatprep.subr.mxu1 %v3280_v7  ;;  %4339 = vrot.lane.b32.xlu0 %v6651_v13, %s6355_s3  ;;  %v8703_v10 = vpop.f32.mrf.mxu0  ;;  %v3276_v59 = vmul.f32 %v8353_v15, %v3227_v40  ;;  %v3269_v40 = vmul.f32 %v8601_v35, %v3218_v6 }
 0x2be   :  { %12005 = vst [vmem:[#allocation121_spill] sm:$0xff] %v8703_v10  ;;  %2817 = vmatprep.mubr.f32.mxu0 %v11883_v0  ;;  %3370 = vmatprep.subr.mxu0 %v3274_v54  ;;  %v8715_v60 = vpop.permute.xlu1 %3794  ;;  %v8717_v7 = vpop.f32.mrf.mxu1  ;;  %v3209_v54 = vsel %vm3197_vm7, %v8320_v58, %v8329_v21  ;;  %v3202_v10 = vsel %vm3197_vm7, %v8281_v48, %v8299_v16 }
 0x2bf   :  { %12006 = vst [vmem:[#allocation122_spill] sm:$0xff] %v8717_v7  ;;  %3530 = vmatpush1.msra.mxu1 %v3279_v32  ;;  %6052 = vmatmul.mubr.msk.f32.gmra.mxu0 %vm735_vm3, %v6036_v28  ;;  %v8725_v37 = vpop.permute.xlu0 %3744  ;;  %v8727_v24 = vpop.f32.mrf.mxu0  ;;  %v3270_v7 = vmul.f32 %v8338_v22, %v3210_v23  ;;  %v3275_v32 = vmul.f32 %v8617_v53, %v3203_v43 }
 0x2c0   :  { %2978 = vmatprep.mubr.f32.mxu1 %v11883_v0  ;;  %3371 = vmatpush1.msra.mxu0 %v3273_v20  ;;  %v8735_v38 = vpop.f32.mrf.mxu1  ;;  %v3217_v23 = vsel %vm3197_vm7, %v8306_v14, %v8320_v58  ;;  %v3272_v20 = vmul.f32 %v8353_v15, %v3226_v44  ;;  %v3225_v16 = vsel %vm3197_vm7, %v8368_v47, %v8306_v14  ;;  %v6037_v58 = vld [vmem:[%s11760_s4 + $0x210] sm:$0xff] }
 0x2c1   :  { %3531 = vmatprep.subr.mxu1 %v3276_v59  ;;  %4355 = vrot.lane.b32.xlu1 %v6656_v27, %s6355_s3  ;;  %v8745_v57 = vpop.f32.mrf.mxu0  ;;  %v3266_v48 = vmul.f32 %v8338_v22, %v3209_v54  ;;  %v3208_v44 = vsel %vm3197_vm7, %v8397_v18, %v8408_v39  ;;  %v3265_v54 = vmul.f32 %v8601_v35, %v3217_v23 }
 0x2c2   :  { %12007 = vst [vmem:[#allocation123_spill] sm:$0xff] %v8745_v57  ;;  %6068 = vmatmul.mubr.msk.f32.gmra.mxu1 %vm735_vm3, %v6036_v28  ;;  %3372 = vmatprep.subr.mxu0 %v3270_v7  ;;  %v8753_v43 = vpop.permute.xlu1 %3760  ;;  %v8755_v6 = vpop.f32.mrf.mxu1  ;;  %v3271_v7 = vmul.f32 %v8617_v53, %v3202_v10  ;;  %v3216_v10 = vsel %vm3197_vm7, %v8380_v1, %v8397_v18 }
 0x2c3   :  { %12008 = vst [vmem:[#allocation124_spill] sm:$0xff] %v8755_v6  ;;  %3532 = vmatpush1.msra.mxu1 %v3275_v32  ;;  %3373 = vmatpush1.msra.mxu0 %v3269_v40  ;;  %v8765_v28 = vpop.f32.mrf.mxu0  ;;  %v3201_v32 = vsel %vm3197_vm7, %v8329_v21, %v8368_v47  ;;  %v3224_v23 = vsel %vm3197_vm7, %v8427_v56, %v8380_v1 }
 0x2c4   :  { %3533 = vmatprep.subr.mxu1 %v3272_v20  ;;  %2823 = vmatprep.mubr.f32.mxu0 %v11883_v0  ;;  %v8773_v14 = vpop.permute.xlu0 %3776  ;;  %v8775_v59 = vpop.f32.mrf.mxu1  ;;  %v3268_v47 = vmul.f32 %v8353_v15, %v3225_v16  ;;  %v3207_v18 = vsel %vm3197_vm7, %v8452_v50, %v8462_v61  ;;  %v3262_v20 = vmul.f32 %v8338_v22, %v3208_v44 }
 0x2c5   :  { %4371 = vrot.lane.b32.xlu0 %v6661_v31, %s6355_s3  ;;  %3374 = vmatprep.subr.mxu0 %v3266_v48  ;;  %v8788_v40 = vpop.f32.mrf.mxu0  ;;  %v3267_v1 = vmul.f32 %v8617_v53, %v3201_v32  ;;  %v3200_v16 = vsel %vm3197_vm7, %v8408_v39, %v8427_v56  ;;  %v3215_v44 = vsel %vm3197_vm7, %v8433_v51, %v8452_v50  ;;  %v6038_v50 = vld [vmem:[%s11760_s4 + $0x218] sm:$0xff] }
 0x2c6   :  { %12009 = vst [vmem:[#allocation125_spill] sm:$0xff] %v8788_v40  ;;  %3534 = vmatpush1.msra.mxu1 %v3271_v7  ;;  %6053 = vmatmul.mubr.msk.f32.gmra.mxu0 %vm735_vm3, %v6037_v58  ;;  %v8796_v21 = vpop.f32.mrf.mxu1  ;;  %v3261_v7 = vmul.f32 %v8601_v35, %v3216_v10  ;;  %v3264_v32 = vmul.f32 %v8353_v15, %v3224_v23 }
 0x2c7   :  { %12010 = vst [vmem:[#allocation126_spill] sm:$0xff] %v8796_v21  ;;  %2984 = vmatprep.mubr.f32.mxu1 %v11883_v0  ;;  %3375 = vmatpush1.msra.mxu0 %v3265_v54  ;;  %v8804_v48 = vpop.f32.mrf.mxu0  ;;  %v3223_v39 = vsel %vm3197_vm7, %v8479_v36, %v8433_v51  ;;  %v3263_v23 = vmul.f32 %v8617_v53, %v3200_v16  ;;  %v8855_v16 = vld [vmem:[#allocation2 + $0x18] sm:$0xf] }
 0x2c8   :  { %3535 = vmatprep.subr.mxu1 %v3268_v47  ;;  %4387 = vrot.lane.b32.xlu1 %v6665_v17, %s6355_s3  ;;  %v8814_v21 = vpop.permute.xlu1 %3792  ;;  %v8816_v54 = vpop.f32.mrf.mxu1  ;;  %v3258_v47 = vmul.f32 %v8338_v22, %v3207_v18  ;;  %v3257_v18 = vmul.f32 %v8601_v35, %v3215_v44 }
 0x2c9   :  { %6069 = vmatmul.mubr.msk.f32.gmra.mxu1 %vm735_vm3, %v6037_v58  ;;  %3376 = vmatprep.subr.mxu0 %v3262_v20  ;;  %v8824_v10 = vpop.permute.xlu0 %3742  ;;  %v8826_v56 = vpop.f32.mrf.mxu0  ;;  %v3206_v20 = vsel %vm3197_vm7, %v8498_v30, %v8503_v9 }
 0x2ca   :  { %12011 = vst [vmem:[#allocation127_spill] sm:$0xff] %v8826_v56  ;;  %3536 = vmatpush1.msra.mxu1 %v3267_v1  ;;  %3377 = vmatpush1.msra.mxu0 %v3261_v7  ;;  %v8836_v58 = vpop.f32.mrf.mxu1  ;;  %v3199_v1 = vsel %vm3197_vm7, %v8462_v61, %v8479_v36  ;;  %v3214_v7 = vsel %vm3197_vm7, %v8482_v33, %v8498_v30  ;;  %v12014_v61 = vld [vmem:[#allocation29_spill] sm:$0xff] }
 0x2cb   :  { %12012 = vst [vmem:[#allocation128_spill] sm:$0xff] %v8836_v58  ;;  %3537 = vmatprep.subr.mxu1 %v3264_v32  ;;  %2829 = vmatprep.mubr.f32.mxu0 %v11883_v0  ;;  %v8844_v51 = vpop.f32.mrf.mxu0  ;;  %v12013_v32 = vld [vmem:[#allocation23_spill] sm:$0xff]  ;;  %v3222_v36 = vsel %vm3197_vm7, %v8521_v46, %v8482_v33  ;;  %v3260_v30 = vmul.f32 %v8353_v15, %v3223_v39 }
 0x2cc   :  { %4956 = vrot.lane.b32.xlu0 %v12013_v32, %s6356_s25  ;;  %3378 = vmatprep.subr.mxu0 %v3258_v47  ;;  %v8859_v58 = vpop.permute.xlu1 %3758  ;;  %v8861_v44 = vpop.f32.mrf.mxu1  ;;  %v8871_v56 = vrot.slane %v8855_v16, %v12014_v61  ;;  %v3198_v33 = vsel %vm3197_vm7, %v8503_v9, %v8521_v46  ;;  %v3254_v39 = vmul.f32 %v8338_v22, %v3206_v20  ;;  %v12018_v46 = vld [vmem:[#allocation24_spill] sm:$0xff] }
 0x2cd   :  { %3538 = vmatpush1.msra.mxu1 %v3263_v23  ;;  %6054 = vmatmul.mubr.msk.f32.gmra.mxu0 %vm735_vm3, %v6038_v50  ;;  %v8873_v32 = vpop.permute.xlu0 %3774  ;;  %v8875_v47 = vpop.f32.mrf.mxu0  ;;  %v12016_v23 = vld [vmem:[#allocation32_spill] sm:$0xff]  ;;  %v3253_v57 = vmul.f32 %v8601_v35, %v3214_v7  ;;  %v3816_v9 = vsel %vm3800_vm8, %v8544_v63, %v8549_v41  ;;  %v3832_v20 = vsel %vm3800_vm8, %v8567_v2, %v8526_v49 }
 0x2ce   :  { %12015 = vst [vmem:[#allocation23_spill] sm:$0xff] %v8875_v47  ;;  %2990 = vmatprep.mubr.f32.mxu1 %v11883_v0  ;;  %3379 = vmatpush1.msra.mxu0 %v3257_v18  ;;  %v8886_v40 = vrot.slane %v8855_v16, %v12016_v23  ;;  %v8888_v6 = vpop.f32.mrf.mxu1  ;;  %v3259_v47 = vmul.f32 %v8617_v53, %v3199_v1 }
 0x2cf   :  { %12017 = vst [vmem:[#allocation129_spill] sm:$0xff] %v8888_v6  ;;  %3539 = vmatprep.subr.mxu1 %v3260_v30  ;;  %4972 = vrot.lane.b32.xlu1 %v12018_v46, %s6356_s25  ;;  %v8898_v22 = vpop.f32.mrf.mxu0  ;;  %v3256_v35 = vmul.f32 %v8353_v15, %v3222_v36  ;;  %v3255_v7 = vmul.f32 %v8617_v53, %v3198_v33  ;;  %v6039_v30 = vld [vmem:[%s11760_s4 + $0x220] sm:$0xff] }
 0x2d0   :  { %6070 = vmatmul.mubr.msk.f32.gmra.mxu1 %vm735_vm3, %v6038_v50  ;;  %3380 = vmatprep.subr.mxu0 %v3254_v39  ;;  %v8906_v18 = vpop.permute.xlu1 %3790  ;;  %v8908_v1 = vpop.f32.mrf.mxu1  ;;  %v3885_v15 = vmul.f32 %v8871_v56, %v3816_v9  ;;  %v12022_v36 = vld [vmem:[#allocation25_spill] sm:$0xff]  ;;  %v3887_v53 = vmul.f32 %v8886_v40, %v3832_v20 }
 0x2d1   :  { %12019 = vst [vmem:[#allocation24_spill] sm:$0xff] %v8908_v1  ;;  %3540 = vmatpush1.msra.mxu1 %v3259_v47  ;;  %3381 = vmatpush1.msra.mxu0 %v3253_v57  ;;  %v8914_v46 = vpop.permute.xlu0 %3740  ;;  %v8916_v6 = vpop.f32.mrf.mxu0  ;;  %v6040_v39 = vld [vmem:[%s11760_s4 + $0x228] sm:$0xff]  ;;  %v12054_v1 = vld [vmem:[#allocation15_spill] sm:$0xff] }
 0x2d2   :  { %12020 = vst [vmem:[#allocation130_spill] sm:$0xff] %v8916_v6  ;;  %3541 = vmatprep.subr.mxu1 %v3256_v35  ;;  %2835 = vmatprep.mubr.f32.mxu0 %v11883_v0  ;;  %v8920_v50 = vpop.f32.mrf.mxu1 }
 0x2d3   :  { %12021 = vst [vmem:[#allocation131_spill] sm:$0xff] %v8920_v50  ;;  %4988 = vrot.lane.b32.xlu0 %v12022_v36, %s6356_s25  ;;  %3542 = vmatpush1.msra.mxu1 %v3255_v7  ;;  %v8925_v57 = vpop.f32.mrf.mxu0  ;;  %v12037_v50 = vld [vmem:[#allocation18_spill] sm:$0xff] }
 0x2d4   :  { %12023 = vst [vmem:[#allocation25_spill] sm:$0xff] %v8925_v57  ;;  %3969 = vmatprep.subr.mxu0 %v3885_v15  ;;  %6055 = vmatmul.mubr.msk.f32.gmra.mxu0 %vm735_vm3, %v6039_v30  ;;  %v8928_v47 = vpop.permute.xlu1 %3756  ;;  %v8930_v33 = vpop.f32.mrf.mxu1 }
 0x2d5   :  { %12024 = vst [vmem:[#allocation132_spill] sm:$0xff] %v8930_v33  ;;  %2996 = vmatprep.mubr.f32.mxu1 %v11883_v0  ;;  %4130 = vmatprep.subr.mxu1 %v3887_v53  ;;  %v8936_v9 = vpop.permute.xlu0 %3772  ;;  %v8938_v35 = vpop.f32.mrf.mxu0  ;;  %v12031_v53 = vld [vmem:[#allocation21_spill] sm:$0xff] }
 0x2d6   :  { %12025 = vst [vmem:[#allocation133_spill] sm:$0xff] %v8938_v35  ;;  %5004 = vrot.lane.b32.xlu1 %v6627_v5, %s6356_s25  ;;  %6071 = vmatmul.mubr.msk.f32.gmra.mxu1 %vm735_vm3, %v6039_v30  ;;  %v8943_v20 = vpop.f32.mrf.mxu1  ;;  %v6041_v5 = vld [vmem:[%s11760_s4 + $0x230] sm:$0xff]  ;;  %v12052_v33 = vld [vmem:[#allocation33_spill] sm:$0xff] }
 0x2d7   :  { %12026 = vst [vmem:[#allocation134_spill] sm:$0xff] %v8943_v20  ;;  %2841 = vmatprep.mubr.f32.mxu0 %v11883_v0  ;;  %4954 = vrot.lane.b32.xlu0 %v6591_v42, %s6356_s25  ;;  %v8948_v7 = vpop.f32.mrf.mxu0  ;;  %v6042_v20 = vld [vmem:[%s11760_s4 + $0x238] sm:$0xff] }
 0x2d8   :  { %12027 = vst [vmem:[#allocation135_spill] sm:$0xff] %v8948_v7  ;;  %6056 = vmatmul.mubr.msk.f32.gmra.mxu0 %vm735_vm3, %v6040_v39  ;;  %3002 = vmatprep.mubr.f32.mxu1 %v11883_v0  ;;  %v8952_v15 = vpop.permute.xlu1 %3788  ;;  %v12049_v7 = vld [vmem:[#allocation14_spill] sm:$0xff] }
 0x2d9   :  { %2847 = vmatprep.mubr.f32.mxu0 %v11883_v0  ;;  %v8958_v30 = vpop.permute.xlu0 %3738  ;;  %v8965_v36 = vpop.f32.mrf.mxu0 }
 0x2da   :  { %12028 = vst [vmem:[#allocation136_spill] sm:$0xff] %v8958_v30  ;;  %4970 = vrot.lane.b32.xlu1 %v6596_v45, %s6356_s25  ;;  %6072 = vmatmul.mubr.msk.f32.gmra.mxu1 %vm735_vm3, %v6040_v39  ;;  %v8963_v42 = vpop.f32.mrf.mxu1  ;;  %12030 = vst [vmem:[#allocation138_spill] sm:$0xff] %v8965_v36  ;;  %v12033_v39 = vld [vmem:[#allocation22_spill] sm:$0xff]  ;;  %v12065_v30 = vld [vmem:[#allocation9_spill] sm:$0xff] }
 0x2db   :  { %12029 = vst [vmem:[#allocation137_spill] sm:$0xff] %v8963_v42  ;;  %4986 = vrot.lane.b32.xlu0 %v12031_v53, %s6356_s25  ;;  %3008 = vmatprep.mubr.f32.mxu1 %v11883_v0 }
 0x2dc   :  { %6057 = vmatmul.mubr.msk.f32.gmra.mxu0 %vm735_vm3, %v6041_v5  ;;  %v8975_v45 = vpop.f32.mrf.mxu1  ;;  %v8980_v36 = vpop.permute.xlu1 %3754 }
 0x2dd   :  { %2853 = vmatprep.mubr.f32.mxu0 %v11883_v0  ;;  %12032 = vst [vmem:[#allocation21_spill] sm:$0xff] %v8975_v45  ;;  %v8988_v35 = vpop.permute.xlu0 %3770 }
 0x2de   :  { %5002 = vrot.lane.b32.xlu1 %v12033_v39, %s6356_s25  ;;  %6073 = vmatmul.mubr.msk.f32.gmra.mxu1 %vm735_vm3, %v6041_v5  ;;  %v8982_v53 = vpop.f32.mrf.mxu0  ;;  %v6043_v39 = vld [vmem:[%s11760_s4 + $0x240] sm:$0xff] }
 0x2df   :  { %12034 = vst [vmem:[#allocation22_spill] sm:$0xff] %v8982_v53  ;;  %4952 = vrot.lane.b32.xlu0 %v11907_v8, %s6356_s25  ;;  %3014 = vmatprep.mubr.f32.mxu1 %v11883_v0  ;;  %v12038_v8 = vld [vmem:[#allocation19_spill] sm:$0xff] }
 0x2e0   :  { %6058 = vmatmul.mubr.msk.f32.gmra.mxu0 %vm735_vm3, %v6042_v20  ;;  %v8996_v45 = vpop.f32.mrf.mxu0  ;;  %v9005_v6 = vpop.permute.xlu1 %3786 }
 0x2e1   :  { %2859 = vmatprep.mubr.f32.mxu0 %v11883_v0  ;;  %v8994_v5 = vpop.f32.mrf.mxu1  ;;  %12036 = vst [vmem:[#allocation140_spill] sm:$0xff] %v8996_v45  ;;  %12039 = vst [vmem:[#allocation18_spill] sm:$0xff] %v9005_v6  ;;  %v6044_v45 = vld [vmem:[%s11760_s4 + $0x248] sm:$0xff]  ;;  %v12061_v6 = vld [vmem:[#allocation16_spill] sm:$0xff] }
 0x2e2   :  { %12035 = vst [vmem:[#allocation139_spill] sm:$0xff] %v8994_v5  ;;  %4968 = vrot.lane.b32.xlu1 %v12037_v50, %s6356_s25  ;;  %6074 = vmatmul.mubr.msk.f32.gmra.mxu1 %vm735_vm3, %v6042_v20  ;;  %v12042_v20 = vld [vmem:[#allocation20_spill] sm:$0xff]  ;;  %v12044_v5 = vld [vmem:[#allocation13_spill] sm:$0xff] }
 0x2e3   :  { %4984 = vrot.lane.b32.xlu0 %v12038_v8, %s6356_s25  ;;  %3020 = vmatprep.mubr.f32.mxu1 %v11883_v0  ;;  %v9007_v29 = vpop.f32.mrf.mxu1  ;;  %v9018_v8 = vpop.permute.xlu0 %3736 }
 0x2e4   :  { %6059 = vmatmul.mubr.msk.f32.gmra.mxu0 %vm735_vm3, %v6043_v39  ;;  %12040 = vst [vmem:[#allocation19_spill] sm:$0xff] %v9007_v29  ;;  %12043 = vst [vmem:[#allocation20_spill] sm:$0xff] %v9018_v8 }
 0x2e5   :  { %2865 = vmatprep.mubr.f32.mxu0 %v11883_v0  ;;  %v9013_v50 = vpop.f32.mrf.mxu0 }
 0x2e6   :  { %12041 = vst [vmem:[#allocation141_spill] sm:$0xff] %v9013_v50  ;;  %5000 = vrot.lane.b32.xlu1 %v12042_v20, %s6356_s25  ;;  %6075 = vmatmul.mubr.msk.f32.gmra.mxu1 %vm735_vm3, %v6043_v39  ;;  %v6045_v20 = vld [vmem:[%s11760_s4 + $0x250] sm:$0xff]  ;;  %v12047_v39 = vld [vmem:[#allocation17_spill] sm:$0xff]  ;;  %v12048_v50 = vld [vmem:[#allocation96_spill] sm:$0xff] }
 0x2e7   :  { %4950 = vrot.lane.b32.xlu0 %v12044_v5, %s6356_s25  ;;  %3026 = vmatprep.mubr.f32.mxu1 %v11883_v0  ;;  %v9023_v29 = vpop.f32.mrf.mxu0  ;;  %v1221_v42 = vadd.f32 %v12048_v50, %v12047_v39  ;;  %v9037_v5 = vpop.permute.xlu1 %3752  ;;  %v6046_v39 = vld [vmem:[%s11760_s4 + $0x258] sm:$0xff] }
 0x2e8   :  { %12045 = vst [vmem:[#allocation13_spill] sm:$0xff] %v9023_v29  ;;  %6060 = vmatmul.mubr.msk.f32.gmra.mxu0 %vm735_vm3, %v6044_v45  ;;  %v9026_v53 = vpop.f32.mrf.mxu1  ;;  %12050 = vst [vmem:[#allocation17_spill] sm:$0xff] %v9037_v5 }
 0x2e9   :  { %12046 = vst [vmem:[#allocation142_spill] sm:$0xff] %v9026_v53  ;;  %2871 = vmatprep.mubr.f32.mxu0 %v11883_v0  ;;  %v12053_v53 = vld [vmem:[#allocation97_spill] sm:$0xff] }
 0x2ea   :  { %4966 = vrot.lane.b32.xlu1 %v12049_v7, %s6356_s25  ;;  %6076 = vmatmul.mubr.msk.f32.gmra.mxu1 %vm735_vm3, %v6044_v45  ;;  %v9039_v29 = vpop.f32.mrf.mxu1  ;;  %v1382_v57 = vadd.f32 %v12053_v53, %v12052_v33  ;;  %v1759_v8 = vpop.f32.mrf.mxu0 }
 0x2eb   :  { %12051 = vst [vmem:[#allocation96_spill] sm:$0xff] %v9039_v29  ;;  %4982 = vrot.lane.b32.xlu0 %v12054_v1, %s6356_s25  ;;  %3032 = vmatprep.mubr.f32.mxu1 %v11883_v0  ;;  %v9047_v50 = vpop.permute.xlu0 %3768  ;;  %v9049_v7 = vadd.f32 %v1759_v8, %v1221_v42  ;;  %v12059_v1 = vld [vmem:[#allocation36_spill] sm:$0xff]  ;;  %v12063_v8 = vld [vmem:[#allocation37_spill] sm:$0xff] }
 0x2ec   :  { %6061 = vmatmul.mubr.msk.f32.gmra.mxu0 %vm735_vm3, %v6045_v20  ;;  %12055 = vst [vmem:[#allocation14_spill] sm:$0xff] %v9047_v50  ;;  %v1920_v45 = vpop.f32.mrf.mxu1  ;;  %v9057_v53 = vpop.f32.mrf.mxu0  ;;  %v12060_v29 = vld [vmem:[#allocation100_spill] sm:$0xff] }
 0x2ed   :  { %12056 = vst [vmem:[#allocation33_spill] sm:$0xff] %v9049_v7  ;;  %2877 = vmatprep.mubr.f32.mxu0 %v11883_v0  ;;  %v9055_v33 = vadd.f32 %v1920_v45, %v1382_v57  ;;  %12058 = vst [vmem:[#allocation15_spill] sm:$0xff] %v9057_v53  ;;  %v1227_v5 = vadd.f32 %v12060_v29, %v12059_v1  ;;  %v12064_v7 = vld [vmem:[#allocation101_spill] sm:$0xff]  ;;  %v12072_v53 = vld [vmem:[#allocation10_spill] sm:$0xff] }
 0x2ee   :  { %4998 = vrot.lane.b32.xlu1 %v12061_v6, %s6356_s25  ;;  %6077 = vmatmul.mubr.msk.f32.gmra.mxu1 %vm735_vm3, %v6045_v20  ;;  %v9064_v42 = vpop.f32.mrf.mxu1  ;;  %v1388_v50 = vadd.f32 %v12064_v7, %v12063_v8  ;;  %v1765_v57 = vpop.f32.mrf.mxu0  ;;  %v6047_v20 = vld [vmem:[%s11760_s4 + $0x260] sm:$0xff] }
 0x2ef   :  { %12057 = vst [vmem:[#allocation97_spill] sm:$0xff] %v9055_v33  ;;  %12062 = vst [vmem:[#allocation36_spill] sm:$0xff] %v9064_v42  ;;  %4948 = vrot.lane.b32.xlu0 %v12065_v30, %s6356_s25  ;;  %3038 = vmatprep.mubr.f32.mxu1 %v11883_v0  ;;  %v9072_v45 = vpop.permute.xlu1 %3784  ;;  %v9074_v29 = vadd.f32 %v1765_v57, %v1227_v5  ;;  %v12070_v30 = vld [vmem:[#allocation40_spill] sm:$0xff]  ;;  %v12075_v33 = vld [vmem:[#allocation105_spill] sm:$0xff] }
 0x2f0   :  { %6062 = vmatmul.mubr.msk.f32.gmra.mxu0 %vm735_vm3, %v6046_v39  ;;  %12066 = vst [vmem:[#allocation100_spill] sm:$0xff] %v9072_v45  ;;  %v1926_v6 = vpop.f32.mrf.mxu1  ;;  %v9082_v1 = vpop.f32.mrf.mxu0  ;;  %v12071_v8 = vld [vmem:[#allocation104_spill] sm:$0xff] }
 0x2f1   :  { %12067 = vst [vmem:[#allocation16_spill] sm:$0xff] %v9074_v29  ;;  %2883 = vmatprep.mubr.f32.mxu0 %v11883_v0  ;;  %v9080_v7 = vadd.f32 %v1926_v6, %v1388_v50  ;;  %12069 = vst [vmem:[#allocation101_spill] sm:$0xff] %v9082_v1  ;;  %v1233_v42 = vadd.f32 %v12071_v8, %v12070_v30  ;;  %v9089_v5 = vpop.permute.xlu0 %4353  ;;  %v12074_v29 = vld [vmem:[#allocation41_spill] sm:$0xff]  ;;  %v12076_v50 = vld [vmem:[#allocation11_spill] sm:$0xff] }
 0x2f2   :  { %4964 = vrot.lane.b32.xlu1 %v12072_v53, %s6356_s25  ;;  %6078 = vmatmul.mubr.msk.f32.gmra.mxu1 %vm735_vm3, %v6046_v39  ;;  %v9091_v57 = vpop.f32.mrf.mxu1  ;;  %v1394_v45 = vadd.f32 %v12075_v33, %v12074_v29  ;;  %v1771_v6 = vpop.f32.mrf.mxu0  ;;  %v6048_v39 = vld [vmem:[%s11760_s4 + $0x268] sm:$0xff]  ;;  %v12080_v29 = vld [vmem:[#allocation44_spill] sm:$0xff] }
 0x2f3   :  { %12068 = vst [vmem:[#allocation37_spill] sm:$0xff] %v9080_v7  ;;  %12073 = vst [vmem:[#allocation9_spill] sm:$0xff] %v9091_v57  ;;  %4980 = vrot.lane.b32.xlu0 %v12076_v50, %s6356_s25  ;;  %3044 = vmatprep.mubr.f32.mxu1 %v11883_v0  ;;  %v9099_v30 = vadd.f32 %v1771_v6, %v1233_v42  ;;  %v1239_v50 = vadd.f32 %v8574_v26, %v12080_v29  ;;  %v12081_v57 = vld [vmem:[#allocation12_spill] sm:$0xff]  ;;  %v12083_v1 = vld [vmem:[#allocation45_spill] sm:$0xff] }
 0x2f4   :  { %6063 = vmatmul.mubr.msk.f32.gmra.mxu0 %vm735_vm3, %v6047_v20  ;;  %v1932_v53 = vpop.f32.mrf.mxu1  ;;  %v9107_v33 = vpop.f32.mrf.mxu0  ;;  %v6049_v29 = vld [vmem:[%s11760_s4 + $0x270] sm:$0xff] }
 0x2f5   :  { %12077 = vst [vmem:[#allocation40_spill] sm:$0xff] %v9099_v30  ;;  %2889 = vmatprep.mubr.f32.mxu0 %v11883_v0  ;;  %v9105_v8 = vadd.f32 %v1932_v53, %v1394_v45  ;;  %12079 = vst [vmem:[#allocation10_spill] sm:$0xff] %v9107_v33  ;;  %v9114_v42 = vpop.permute.xlu1 %4369  ;;  %v12084_v30 = vld [vmem:[#allocation109_spill] sm:$0xff] }
 0x2f6   :  { %4996 = vrot.lane.b32.xlu1 %v12081_v57, %s6356_s25  ;;  %6079 = vmatmul.mubr.msk.f32.gmra.mxu1 %vm735_vm3, %v6047_v20  ;;  %v9116_v6 = vpop.f32.mrf.mxu1  ;;  %v1400_v7 = vadd.f32 %v12084_v30, %v12083_v1  ;;  %v12085_v45 = vld [vmem:[#allocation5_spill] sm:$0xff]  ;;  %v1777_v53 = vpop.f32.mrf.mxu0 }
 0x2f7   :  { %12078 = vst [vmem:[#allocation104_spill] sm:$0xff] %v9105_v8  ;;  %12082 = vst [vmem:[#allocation41_spill] sm:$0xff] %v9116_v6  ;;  %4946 = vrot.lane.b32.xlu0 %v12085_v45, %s6356_s25  ;;  %3050 = vmatprep.mubr.f32.mxu1 %v11883_v0  ;;  %v9126_v57 = vadd.f32 %v1777_v53, %v1239_v50  ;;  %v12089_v45 = vld [vmem:[#allocation48_spill] sm:$0xff]  ;;  %v12090_v8 = vld [vmem:[#allocation6_spill] sm:$0xff] }
 0x2f8   :  { %6064 = vmatmul.mubr.msk.f32.gmra.mxu0 %vm735_vm3, %v6048_v39  ;;  %v9124_v26 = vpop.permute.xlu0 %4385  ;;  %v1938_v20 = vpop.f32.mrf.mxu1  ;;  %v1245_v33 = vadd.f32 %v8597_v25, %v12089_v45  ;;  %v12092_v53 = vld [vmem:[#allocation49_spill] sm:$0xff]  ;;  %v12093_v6 = vld [vmem:[#allocation7_spill] sm:$0xff] }
 0x2f9   :  { %12086 = vst [vmem:[#allocation105_spill] sm:$0xff] %v9126_v57  ;;  %2895 = vmatprep.mubr.f32.mxu0 %v11883_v0  ;;  %v9132_v1 = vadd.f32 %v1938_v20, %v1400_v7  ;;  %v9134_v30 = vpop.f32.mrf.mxu0  ;;  %v1406_v57 = vadd.f32 %v8606_v55, %v12092_v53  ;;  %v6050_v55 = vld [vmem:[%s11760_s4 + $0x278] sm:$0xff]  ;;  %v12097_v53 = vld [vmem:[#allocation30_spill] sm:$0xff] }
 0x2fa   :  { %12088 = vst [vmem:[#allocation44_spill] sm:$0xff] %v9134_v30  ;;  %4962 = vrot.lane.b32.xlu1 %v12090_v8, %s6356_s25  ;;  %6080 = vmatmul.mubr.msk.f32.gmra.mxu1 %vm735_vm3, %v6048_v39  ;;  %v9141_v50 = vpop.f32.mrf.mxu1  ;;  %v9155_v39 = vrot.slane %v8855_v16, %v11899_v19 }
 0x2fb   :  { %12087 = vst [vmem:[#allocation11_spill] sm:$0xff] %v9132_v1  ;;  %12091 = vst [vmem:[#allocation12_spill] sm:$0xff] %v9141_v50  ;;  %4978 = vrot.lane.b32.xlu0 %v12093_v6, %s6356_s25  ;;  %3056 = vmatprep.mubr.f32.mxu1 %v11883_v0  ;;  %v1783_v7 = vpop.f32.mrf.mxu0  ;;  %v12099_v50 = vld [vmem:[#allocation8_spill] sm:$0xff] }
 0x2fc   :  { %6065 = vmatmul.mubr.msk.f32.gmra.mxu0 %vm735_vm3, %v6049_v29  ;;  %v9149_v20 = vpop.permute.xlu1 %4401  ;;  %v9151_v25 = vadd.f32 %v1783_v7, %v1245_v33  ;;  %v1944_v8 = vpop.f32.mrf.mxu1  ;;  %v3824_v33 = vsel %vm3800_vm8, %v8526_v49, %v8544_v63  ;;  %v9171_v7 = vrot.slane %v8855_v16, %v12097_v53  ;;  %v3808_v49 = vsel %vm3800_vm8, %v8549_v41, %v8567_v2  ;;  %v12102_v63 = vld [vmem:[#allocation53_spill] sm:$0xff]  ;;  %v12103_v16 = vld [vmem:[#allocation118_spill] sm:$0xff]  ;;  %v12111_v53 = vld [vmem:[#allocation115_spill] sm:$0xff] }
 0x2fd   :  { %2901 = vmatprep.mubr.f32.mxu0 %v11883_v0  ;;  %v9161_v6 = vadd.f32 %v1944_v8, %v1406_v57  ;;  %v9163_v45 = vpop.f32.mrf.mxu0  ;;  %v3884_v30 = vmul.f32 %v9155_v39, %v3824_v33 }
 0x2fe   :  { %12094 = vst [vmem:[#allocation45_spill] sm:$0xff] %v9151_v25  ;;  %12096 = vst [vmem:[#allocation5_spill] sm:$0xff] %v9163_v45  ;;  %v12098_v25 = vld [vmem:[#allocation52_spill] sm:$0xff]  ;;  %4994 = vrot.lane.b32.xlu1 %v12099_v50, %s6356_s25  ;;  %6081 = vmatmul.mubr.msk.f32.gmra.mxu1 %vm735_vm3, %v6049_v29  ;;  %v9178_v57 = vpop.permute.xlu0 %4351  ;;  %v9180_v8 = vpop.f32.mrf.mxu1  ;;  %v12104_v45 = vld [vmem:[#allocation26_spill] sm:$0xff]  ;;  %v3886_v33 = vmul.f32 %v9171_v7, %v3808_v49 }
 0x2ff   :  { %12095 = vst [vmem:[#allocation109_spill] sm:$0xff] %v9161_v6  ;;  %v1251_v1 = vadd.f32 %v8644_v4, %v12098_v25  ;;  %12100 = vst [vmem:[#allocation48_spill] sm:$0xff] %v9178_v57  ;;  %v1412_v6 = vadd.f32 %v12103_v16, %v12102_v63  ;;  %4944 = vrot.lane.b32.xlu0 %v12104_v45, %s6356_s25  ;;  %3062 = vmatprep.mubr.f32.mxu1 %v11883_v0  ;;  %v9191_v4 = vld [vmem:[#allocation2 + $0x1c] sm:$0xf]  ;;  %v1789_v29 = vpop.f32.mrf.mxu0  ;;  %v12105_v50 = vld [vmem:[#allocation111_spill] sm:$0xff] }
 0x300   :  { %12101 = vst [vmem:[#allocation6_spill] sm:$0xff] %v9180_v8  ;;  %v12106_v25 = vld [vmem:[#allocation108_spill] sm:$0xff]  ;;  %v12107_v57 = vld [vmem:[#allocation113_spill] sm:$0xff]  ;;  %6066 = vmatmul.mubr.msk.f32.gmra.mxu0 %vm735_vm3, %v6050_v55  ;;  %v9204_v41 = vrot.slane %v9191_v4, %v12014_v61  ;;  %v9206_v45 = vpop.permute.xlu1 %4367  ;;  %v1950_v16 = vpop.f32.mrf.mxu1  ;;  %v9221_v61 = vrot.slane %v9191_v4, %v12016_v23 }
 0x301   :  { %v3823_v8 = vsel %vm3800_vm8, %v12106_v25, %v12105_v50  ;;  %v3815_v2 = vsel %vm3800_vm8, %v12105_v50, %v12107_v57  ;;  %12109 = vst [vmem:[#allocation7_spill] sm:$0xff] %v9206_v45  ;;  %v9208_v63 = vadd.f32 %v1789_v29, %v1251_v1  ;;  %v3807_v19 = vsel %vm3800_vm8, %v12107_v57, %v12111_v53  ;;  %v6083_v50 = vld [vmem:[%s11760_s4 + $0x280] sm:$0xff]  ;;  %v9225_v29 = vpop.f32.mrf.mxu0 }
 0x302   :  { %12108 = vst [vmem:[#allocation49_spill] sm:$0xff] %v9204_v41  ;;  %3414 = vmatprep.mubr.f32.mxu0 %v11883_v0  ;;  %v9223_v1 = vadd.f32 %v1950_v16, %v1412_v6  ;;  %12113 = vst [vmem:[#allocation53_spill] sm:$0xff] %v9225_v29  ;;  %v3831_v57 = vsel %vm3800_vm8, %v12111_v53, %v12106_v25  ;;  %v12115_v41 = vld [vmem:[#allocation27_spill] sm:$0xff]  ;;  %6082 = vmatmul.mubr.msk.f32.gmra.mxu1 %vm735_vm3, %v6050_v55  ;;  %v9237_v23 = vpop.permute.xlu0 %4383  ;;  %v9239_v6 = vpop.f32.mrf.mxu1  ;;  %v12116_v49 = vld [vmem:[#allocation57_spill] sm:$0xff] }
 0x303   :  { %12110 = vst [vmem:[#allocation52_spill] sm:$0xff] %v9208_v63  ;;  %v12114_v63 = vld [vmem:[#allocation56_spill] sm:$0xff]  ;;  %4960 = vrot.lane.b32.xlu1 %v12115_v41, %s6356_s25  ;;  %v3880_v16 = vmul.f32 %v9155_v39, %v3823_v8  ;;  %3575 = vmatprep.mubr.f32.mxu1 %v11883_v0  ;;  %v1795_v53 = vpop.f32.mrf.mxu0  ;;  %v3882_v25 = vmul.f32 %v9171_v7, %v3807_v19  ;;  %v12118_v55 = vld [vmem:[#allocation117_spill] sm:$0xff] }
 0x304   :  { %12112 = vst [vmem:[#allocation8_spill] sm:$0xff] %v9223_v1  ;;  %v1257_v45 = vadd.f32 %v8684_v34, %v12114_v63  ;;  %v1418_v1 = vadd.f32 %v8694_v52, %v12116_v49  ;;  %v12117_v29 = vld [vmem:[#allocation28_spill] sm:$0xff]  ;;  %v3881_v34 = vmul.f32 %v8871_v56, %v3815_v2  ;;  %v3822_v41 = vsel %vm3800_vm8, %v12118_v55, %v8672_v11  ;;  %v9258_v8 = vpop.permute.xlu1 %4399  ;;  %v1956_v2 = vpop.f32.mrf.mxu1 }
 0x305   :  { %4976 = vrot.lane.b32.xlu0 %v12117_v29, %s6356_s25  ;;  %v3814_v52 = vsel %vm3800_vm8, %v8672_v11, %v8682_v3  ;;  %6099 = vmatmul.mubr.msk.f32.vlgmr.msra.gmra.mxu0 %vm735_vm3, %v6083_v50  ;;  %v3806_v19 = vsel %vm3800_vm8, %v8682_v3, %v8715_v60  ;;  %v3883_v29 = vmul.f32 %v8886_v40, %v3831_v57  ;;  %v9270_v11 = vpop.f32.mrf.mxu0  ;;  %v12120_v3 = vld [vmem:[#allocation60_spill] sm:$0xff] }
 0x306   :  { %v9260_v63 = vadd.f32 %v1795_v53, %v1257_v45  ;;  %3970 = vmatpush1.msra.mxu0 %v3884_v30  ;;  %3420 = vmatprep.mubr.f32.mxu0 %v11883_v0  ;;  %v9268_v49 = vadd.f32 %v1956_v2, %v1418_v1  ;;  %v3830_v45 = vsel %vm3800_vm8, %v8715_v60, %v12118_v55  ;;  %v9285_v1 = vpop.permute.xlu0 %4349  ;;  %v9287_v57 = vpop.f32.mrf.mxu1  ;;  %v12121_v60 = vld [vmem:[#allocation61_spill] sm:$0xff] }
 0x307   :  { %v3821_v53 = vsel %vm3800_vm8, %v8725_v37, %v8753_v43  ;;  %v1263_v30 = vadd.f32 %v8727_v24, %v12120_v3  ;;  %4992 = vrot.lane.b32.xlu1 %v6647_v12, %s6356_s25  ;;  %6115 = vmatmul.mubr.msk.f32.vlgmr.msra.gmra.mxu1 %vm735_vm3, %v6083_v50  ;;  %v3876_v2 = vmul.f32 %v9155_v39, %v3822_v41  ;;  %v6084_v24 = vld [vmem:[%s11760_s4 + $0x288] sm:$0xff]  ;;  %v1801_v12 = vpop.f32.mrf.mxu0 }
 0x308   :  { %12119 = vst [vmem:[#allocation118_spill] sm:$0xff] %v9268_v49  ;;  %v1424_v55 = vadd.f32 %v8735_v38, %v12121_v60  ;;  %3971 = vmatprep.subr.mxu0 %v3881_v34  ;;  %4131 = vmatpush1.msra.mxu1 %v3886_v33  ;;  %v3877_v49 = vmul.f32 %v8871_v56, %v3814_v52  ;;  %v9301_v41 = vpop.permute.xlu1 %4365  ;;  %v1962_v33 = vpop.f32.mrf.mxu1 }
 0x309   :  { %v3878_v50 = vmul.f32 %v9171_v7, %v3806_v19  ;;  %v3813_v3 = vsel %vm3800_vm8, %v8753_v43, %v8773_v14  ;;  %3972 = vmatpush1.msra.mxu0 %v3880_v16  ;;  %4132 = vmatprep.subr.mxu1 %v3883_v29  ;;  %v9303_v38 = vadd.f32 %v1801_v12, %v1263_v30  ;;  %v9311_v60 = vpop.f32.mrf.mxu0  ;;  %v12122_v16 = vld [vmem:[#allocation64_spill] sm:$0xff]  ;;  %v12123_v30 = vld [vmem:[#allocation65_spill] sm:$0xff] }
 0x30a   :  { %v3872_v34 = vmul.f32 %v9155_v39, %v3821_v53  ;;  %4942 = vrot.lane.b32.xlu0 %v6651_v13, %s6356_s25  ;;  %3973 = vmatprep.subr.mxu0 %v3877_v49  ;;  %v3879_v52 = vmul.f32 %v8886_v40, %v3830_v45  ;;  %v9309_v19 = vadd.f32 %v1962_v33, %v1424_v55  ;;  %v9322_v13 = vpop.permute.xlu0 %4381  ;;  %v9324_v49 = vpop.f32.mrf.mxu1  ;;  %v12124_v55 = vld [vmem:[#allocation68_spill] sm:$0xff]  ;;  %v12126_v33 = vld [vmem:[#allocation69_spill] sm:$0xff] }
 0x30b   :  { %v3829_v43 = vsel %vm3800_vm8, %v8814_v21, %v8725_v37  ;;  %v1269_v29 = vadd.f32 %v8765_v28, %v12122_v16  ;;  %v1430_v53 = vadd.f32 %v8775_v59, %v12123_v30  ;;  %4133 = vmatpush1.msra.mxu1 %v3882_v25  ;;  %6100 = vmatmul.mubr.msk.f32.gmra.mxu0 %vm735_vm3, %v6084_v24  ;;  %v1807_v59 = vpop.f32.mrf.mxu0 }
 0x30c   :  { %v3873_v45 = vmul.f32 %v8871_v56, %v3813_v3  ;;  %v3805_v37 = vsel %vm3800_vm8, %v8773_v14, %v8814_v21  ;;  %v3812_v28 = vsel %vm3800_vm8, %v8859_v58, %v8873_v32  ;;  %3581 = vmatprep.mubr.f32.mxu1 %v11883_v0  ;;  %3974 = vmatpush1.msra.mxu0 %v3876_v2  ;;  %v9344_v14 = vpop.permute.xlu1 %4397  ;;  %v1968_v3 = vpop.f32.mrf.mxu1 }
 0x30d   :  { %v3820_v25 = vsel %vm3800_vm8, %v8824_v10, %v8859_v58  ;;  %v1275_v12 = vadd.f32 %v8804_v48, %v12124_v55  ;;  %4134 = vmatprep.subr.mxu1 %v3879_v52  ;;  %4958 = vrot.lane.b32.xlu1 %v6656_v27, %s6356_s25  ;;  %v9346_v21 = vadd.f32 %v1807_v59, %v1269_v29  ;;  %v9354_v48 = vpop.f32.mrf.mxu0 }
 0x30e   :  { %v3875_v2 = vmul.f32 %v8886_v40, %v3829_v43  ;;  %v1436_v16 = vadd.f32 %v8816_v54, %v12126_v33  ;;  %6116 = vmatmul.mubr.msk.f32.gmra.mxu1 %vm735_vm3, %v6084_v24  ;;  %3975 = vmatprep.subr.mxu0 %v3873_v45  ;;  %v9352_v58 = vadd.f32 %v1968_v3, %v1430_v53  ;;  %v6085_v54 = vld [vmem:[%s11760_s4 + $0x290] sm:$0xff]  ;;  %v9365_v24 = vpop.permute.xlu0 %4347  ;;  %v9367_v43 = vpop.f32.mrf.mxu1  ;;  %v12128_v53 = vld [vmem:[#allocation72_spill] sm:$0xff] }
 0x30f   :  { %12125 = vst [vmem:[#allocation26_spill] sm:$0xff] %v9346_v21  ;;  %v3874_v52 = vmul.f32 %v9171_v7, %v3805_v37  ;;  %v3869_v27 = vmul.f32 %v8871_v56, %v3812_v28  ;;  %v3828_v29 = vsel %vm3800_vm8, %v8906_v18, %v8824_v10  ;;  %4135 = vmatpush1.msra.mxu1 %v3878_v50  ;;  %v1813_v50 = vpop.f32.mrf.mxu0  ;;  %v12229_v21 = vld [vmem:[#allocation121_spill] sm:$0xff] }
 0x310   :  { %12127 = vst [vmem:[#allocation111_spill] sm:$0xff] %v9352_v58  ;;  %3976 = vmatpush1.msra.mxu0 %v3872_v34  ;;  %v3868_v30 = vmul.f32 %v9155_v39, %v3820_v25  ;;  %v1281_v45 = vadd.f32 %v8844_v51, %v12128_v53  ;;  %v3811_v10 = vsel %vm3800_vm8, %v8928_v47, %v8936_v9  ;;  %v9387_v37 = vpop.permute.xlu1 %4363  ;;  %v1974_v59 = vpop.f32.mrf.mxu1  ;;  %v12131_v25 = vld [vmem:[#allocation73_spill] sm:$0xff] }
 0x311   :  { %4136 = vmatprep.subr.mxu1 %v3875_v2  ;;  %4974 = vrot.lane.b32.xlu0 %v6661_v31, %s6356_s25  ;;  %v3804_v34 = vsel %vm3800_vm8, %v8873_v32, %v8906_v18  ;;  %v3819_v51 = vsel %vm3800_vm8, %v8914_v46, %v8928_v47  ;;  %v9389_v28 = vadd.f32 %v1813_v50, %v1275_v12  ;;  %v9399_v47 = vpop.f32.mrf.mxu0  ;;  %v12135_v50 = vld [vmem:[#allocation18_spill] sm:$0xff] }
 0x312   :  { %3426 = vmatprep.mubr.f32.mxu0 %v11883_v0  ;;  %3977 = vmatprep.subr.mxu0 %v3869_v27  ;;  %v3871_v31 = vmul.f32 %v8886_v40, %v3828_v29  ;;  %v3827_v32 = vsel %vm3800_vm8, %v8952_v15, %v8914_v46  ;;  %v9397_v18 = vadd.f32 %v1974_v59, %v1436_v16  ;;  %v9409_v46 = vpop.permute.xlu0 %4379  ;;  %v9411_v2 = vpop.f32.mrf.mxu1  ;;  %v12133_v27 = vld [vmem:[#allocation76_spill] sm:$0xff]  ;;  %v12137_v59 = vld [vmem:[#allocation14_spill] sm:$0xff] }
 0x313   :  { %12129 = vst [vmem:[#allocation108_spill] sm:$0xff] %v9389_v28  ;;  %4137 = vmatpush1.msra.mxu1 %v3874_v52  ;;  %6101 = vmatmul.mubr.msk.f32.gmra.mxu0 %vm735_vm3, %v6085_v54  ;;  %v1442_v55 = vadd.f32 %v8861_v44, %v12131_v25  ;;  %v3865_v12 = vmul.f32 %v8871_v56, %v3811_v10  ;;  %12132 = vst [vmem:[#allocation115_spill] sm:$0xff] %v9411_v2  ;;  %v12178_v2 = vld [vmem:[#allocation142_spill] sm:$0xff] }
 0x314   :  { %12130 = vst [vmem:[#allocation113_spill] sm:$0xff] %v9397_v18  ;;  %v3810_v3 = vsel %vm3800_vm8, %v8980_v36, %v8988_v35  ;;  %3587 = vmatprep.mubr.f32.mxu1 %v11883_v0  ;;  %3978 = vmatpush1.msra.mxu0 %v3868_v30  ;;  %v3870_v33 = vmul.f32 %v9171_v7, %v3804_v34  ;;  %v12134_v30 = vld [vmem:[#allocation136_spill] sm:$0xff]  ;;  %v12217_v18 = vld [vmem:[#allocation30_spill] sm:$0xff] }
 0x315   :  { %v3864_v16 = vmul.f32 %v9155_v39, %v3819_v51  ;;  %v3803_v44 = vsel %vm3800_vm8, %v8936_v9, %v8952_v15  ;;  %4138 = vmatprep.subr.mxu1 %v3871_v31  ;;  %4990 = vrot.lane.b32.xlu1 %v6665_v17, %s6356_s25  ;;  %v3867_v52 = vmul.f32 %v8886_v40, %v3827_v32  ;;  %v5545_v9 = vld [vmem:[%s11761_s5] sm:$0xff]  ;;  %v9432_v15 = vpop.permute.xlu1 %4395  ;;  %v1819_v17 = vpop.f32.mrf.mxu0 }
 0x316   :  { %v1287_v29 = vadd.f32 %v8898_v22, %v12133_v27  ;;  %v3818_v53 = vsel %vm3800_vm8, %v12134_v30, %v8980_v36  ;;  %6117 = vmatmul.mubr.msk.f32.gmra.mxu1 %vm735_vm3, %v6085_v54  ;;  %3979 = vmatprep.subr.mxu0 %v3865_v12  ;;  %v3861_v10 = vmul.f32 %v8871_v56, %v3810_v3  ;;  %v6086_v36 = vld [vmem:[%s11760_s4 + $0x298] sm:$0xff]  ;;  %v12138_v31 = vld [vmem:[#allocation17_spill] sm:$0xff]  ;;  %v9454_v25 = vpop.permute.xlu0 %4345  ;;  %v1980_v12 = vpop.f32.mrf.mxu1 }
 0x317   :  { %v3826_v22 = vsel %vm3800_vm8, %v12135_v50, %v12134_v30  ;;  %4139 = vmatpush1.msra.mxu1 %v3870_v33  ;;  %3980 = vmatpush1.msra.mxu0 %v3864_v16  ;;  %v9442_v54 = vadd.f32 %v1819_v17, %v1281_v45  ;;  %v3866_v34 = vmul.f32 %v9171_v7, %v3803_v44  ;;  %v12139_v3 = vld [vmem:[#allocation20_spill] sm:$0xff]  ;;  %v9466_v44 = vpop.f32.mrf.mxu0 }
 0x318   :  { %v3802_v51 = vsel %vm3800_vm8, %v8988_v35, %v12135_v50  ;;  %v3809_v32 = vsel %vm3800_vm8, %v12138_v31, %v12137_v59  ;;  %4140 = vmatprep.subr.mxu1 %v3867_v52  ;;  %3432 = vmatprep.mubr.f32.mxu0 %v11883_v0  ;;  %v3860_v45 = vmul.f32 %v9155_v39, %v3818_v53  ;;  %v5546_v35 = vld [vmem:[%s11761_s5 + $0x8] sm:$0xff]  ;;  %v12143_v27 = vld [vmem:[#allocation24_spill] sm:$0xff] }
 0x319   :  { %12136 = vst [vmem:[#allocation56_spill] sm:$0xff] %v9442_v54  ;;  %v3817_v33 = vsel %vm3800_vm8, %v12139_v3, %v12138_v31  ;;  %5563 = vperm.xlu0 %6320, %v5545_v9   ;;  %3981 = vmatprep.subr.mxu0 %v3861_v10  ;;  %v9464_v16 = vadd.f32 %v1980_v12, %v1442_v55  ;;  %12141 = vst [vmem:[#allocation57_spill] sm:$0xff] %v9466_v44  ;;  %v12142_v52 = vld [vmem:[#allocation77_spill] sm:$0xff]  ;;  %v12144_v17 = vld [vmem:[#allocation100_spill] sm:$0xff]  ;;  %v9476_v9 = vpop.permute.xlu1 %4361  ;;  %v9478_v10 = vpop.f32.mrf.mxu1 }
 0x31a   :  { %v1448_v30 = vadd.f32 %v12143_v27, %v12142_v52  ;;  %v3863_v53 = vmul.f32 %v8886_v40, %v3826_v22  ;;  %v3825_v50 = vsel %vm3800_vm8, %v12144_v17, %v12139_v3  ;;  %4141 = vmatpush1.msra.mxu1 %v3866_v34  ;;  %6102 = vmatmul.mubr.msk.f32.gmra.mxu0 %vm735_vm3, %v6086_v36  ;;  %v1825_v34 = vpop.f32.mrf.mxu0  ;;  %v9514_v27 = vpop.permute.xlu0 %4377  ;;  %v12177_v44 = vld [vmem:[#allocation94_spill] sm:$0xff] }
 0x31b   :  { %12140 = vst [vmem:[#allocation27_spill] sm:$0xff] %v9464_v16  ;;  %12145 = vst [vmem:[#allocation28_spill] sm:$0xff] %v9478_v10  ;;  %v3862_v55 = vmul.f32 %v9171_v7, %v3802_v51  ;;  %v3857_v31 = vmul.f32 %v8871_v56, %v3809_v32  ;;  %v3801_v22 = vsel %vm3800_vm8, %v12137_v59, %v12144_v17  ;;  %3593 = vmatprep.mubr.f32.mxu1 %v11883_v0  ;;  %v1986_v56 = vpop.f32.mrf.mxu1  ;;  %v12152_v17 = vld [vmem:[#allocation81_spill] sm:$0xff]  ;;  %v12214_v16 = vld [vmem:[#allocation50_spill] sm:$0xff] }
 0x31c   :  { %3982 = vmatpush1.msra.mxu0 %v3860_v45  ;;  %v3856_v12 = vmul.f32 %v9155_v39, %v3817_v33  ;;  %v4419_v3 = vsel %vm4403_vm9, %v9114_v42, %v9124_v26  ;;  %4142 = vmatprep.subr.mxu1 %v3863_v53  ;;  %v9493_v51 = vadd.f32 %v1825_v34, %v1287_v29  ;;  %v5547_v39 = vld [vmem:[%s11761_s5 + $0x10] sm:$0xff]  ;;  %v9506_v33 = vpop.f32.mrf.mxu0  ;;  %v12149_v29 = vld [vmem:[#allocation80_spill] sm:$0xff] }
 0x31d   :  { %5568 = vperm.xlu1 %6321, %v5546_v35   ;;  %v3859_v32 = vmul.f32 %v8886_v40, %v3825_v50  ;;  %v4435_v59 = vsel %vm4403_vm9, %v9149_v20, %v9089_v5  ;;  %6118 = vmatmul.mubr.msk.f32.gmra.mxu1 %vm735_vm3, %v6086_v36  ;;  %v9504_v45 = vadd.f32 %v1986_v56, %v1448_v30  ;;  %v12150_v35 = vld [vmem:[#allocation25_spill] sm:$0xff]  ;;  %v9516_v53 = vpop.f32.mrf.mxu1  ;;  %v12153_v30 = vld [vmem:[#allocation132_spill] sm:$0xff]  ;;  %v9522_v56 = vpop.permute.xlu1 %4393 }
 0x31e   :  { %12146 = vst [vmem:[#allocation117_spill] sm:$0xff] %v9493_v51  ;;  %3983 = vmatprep.subr.mxu0 %v3857_v31  ;;  %12148 = vst [vmem:[#allocation61_spill] sm:$0xff] %v9506_v33  ;;  %v1293_v52 = vadd.f32 %v12150_v35, %v12149_v29  ;;  %v3858_v40 = vmul.f32 %v9171_v7, %v3801_v22  ;;  %4143 = vmatpush1.msra.mxu1 %v3862_v55  ;;  %v6087_v36 = vld [vmem:[%s11760_s4 + $0x2a0] sm:$0xff]  ;;  %v1831_v7 = vpop.f32.mrf.mxu0  ;;  %v5548_v22 = vld [vmem:[%s11761_s5 + $0x18] sm:$0xff] }
 0x31f   :  { %12147 = vst [vmem:[#allocation60_spill] sm:$0xff] %v9504_v45  ;;  %3984 = vmatpush1.msra.mxu0 %v3856_v12  ;;  %12151 = vst [vmem:[#allocation64_spill] sm:$0xff] %v9516_v53  ;;  %v1454_v50 = vadd.f32 %v12153_v30, %v12152_v17  ;;  %v12154_v31 = vld [vmem:[#allocation49_spill] sm:$0xff]  ;;  %4144 = vmatprep.subr.mxu1 %v3859_v32  ;;  %v4490_v55 = vmul.f32 %v9221_v61, %v4435_v59  ;;  %v1992_v29 = vpop.f32.mrf.mxu1  ;;  %v12158_v59 = vld [vmem:[#allocation84_spill] sm:$0xff] }
 0x320   :  { %v4488_v34 = vmul.f32 %v12154_v31, %v4419_v3  ;;  %3438 = vmatprep.mubr.f32.mxu0 %v11883_v0  ;;  %5573 = vperm.xlu0 %6320, %v5547_v39   ;;  %v9528_v12 = vadd.f32 %v1831_v7, %v1293_v52  ;;  %v5549_v3 = vld [vmem:[%s11761_s5 + $0x20] sm:$0xff]  ;;  %v9536_v35 = vpop.f32.mrf.mxu0  ;;  %v12159_v39 = vld [vmem:[#allocation135_spill] sm:$0xff]  ;;  %v6088_v52 = vld [vmem:[%s11760_s4 + $0x2a8] sm:$0xff] }
 0x321   :  { %4145 = vmatpush1.msra.mxu1 %v3858_v40  ;;  %6103 = vmatmul.mubr.msk.f32.gmra.mxu0 %vm735_vm3, %v6087_v36  ;;  %v9534_v32 = vadd.f32 %v1992_v29, %v1454_v50  ;;  %12157 = vst [vmem:[#allocation69_spill] sm:$0xff] %v9536_v35  ;;  %v1299_v40 = vadd.f32 %v12159_v39, %v12158_v59  ;;  %v9544_v17 = vpop.f32.mrf.mxu1  ;;  %v12161_v30 = vld [vmem:[#allocation85_spill] sm:$0xff]  ;;  %v9553_v29 = vpop.permute.xlu0 %4343  ;;  %v12169_v53 = vld [vmem:[#allocation90_spill] sm:$0xff]  ;;  %v12170_v33 = vld [vmem:[#allocation139_spill] sm:$0xff] }
 0x322   :  { %12155 = vst [vmem:[#allocation65_spill] sm:$0xff] %v9528_v12  ;;  %4572 = vmatprep.subr.mxu0 %v4488_v34  ;;  %3599 = vmatprep.mubr.f32.mxu1 %v11883_v0  ;;  %12160 = vst [vmem:[#allocation72_spill] sm:$0xff] %v9544_v17  ;;  %v12162_v34 = vld [vmem:[#allocation137_spill] sm:$0xff]  ;;  %v1837_v50 = vpop.f32.mrf.mxu0  ;;  %v12167_v17 = vld [vmem:[#allocation22_spill] sm:$0xff]  ;;  %v1466_v10 = vadd.f32 %v12170_v33, %v12169_v53 }
 0x323   :  { %12156 = vst [vmem:[#allocation68_spill] sm:$0xff] %v9534_v32  ;;  %4733 = vmatprep.subr.mxu1 %v4490_v55  ;;  %v1460_v7 = vadd.f32 %v12162_v34, %v12161_v30  ;;  %5578 = vperm.xlu1 %6321, %v5548_v22   ;;  %v5550_v55 = vld [vmem:[%s11761_s5 + $0x28] sm:$0xff]  ;;  %v9555_v59 = vadd.f32 %v1837_v50, %v1299_v40  ;;  %v1998_v39 = vpop.f32.mrf.mxu1  ;;  %v9562_v22 = vpop.permute.xlu1 %4359  ;;  %v12166_v34 = vld [vmem:[#allocation88_spill] sm:$0xff]  ;;  %v6089_v40 = vld [vmem:[%s11760_s4 + $0x2b0] sm:$0xff] }
 0x324   :  { %6119 = vmatmul.mubr.msk.f32.gmra.mxu1 %vm735_vm3, %v6087_v36  ;;  %3444 = vmatprep.mubr.f32.mxu0 %v11883_v0  ;;  %v5551_v36 = vld [vmem:[%s11761_s5 + $0x30] sm:$0xff]  ;;  %v9566_v30 = vpop.f32.mrf.mxu0  ;;  %v1305_v35 = vadd.f32 %v12167_v17, %v12166_v34  ;;  %v5552_v17 = vld [vmem:[%s11761_s5 + $0x38] sm:$0xff]  ;;  %v5553_v33 = vld [vmem:[%s11761_s5 + $0x40] sm:$0xff] }
 0x325   :  { %5583 = vperm.xlu0 %6320, %v5549_v3   ;;  %12163 = vst [vmem:[#allocation73_spill] sm:$0xff] %v9555_v59  ;;  %6104 = vmatmul.mubr.msk.f32.gmra.mxu0 %vm735_vm3, %v6088_v52  ;;  %v9564_v3 = vadd.f32 %v1998_v39, %v1460_v7  ;;  %12165 = vst [vmem:[#allocation136_spill] sm:$0xff] %v9566_v30  ;;  %v9574_v50 = vpop.f32.mrf.mxu1  ;;  %v12206_v32 = vld [vmem:[#allocation41_spill] sm:$0xff] }
 0x326   :  { %3605 = vmatprep.mubr.f32.mxu1 %v11883_v0  ;;  %3450 = vmatprep.mubr.f32.mxu0 %v11883_v0  ;;  %12168 = vst [vmem:[#allocation18_spill] sm:$0xff] %v9574_v50  ;;  %v1843_v7 = vpop.f32.mrf.mxu0 }
 0x327   :  { %12164 = vst [vmem:[#allocation76_spill] sm:$0xff] %v9564_v3  ;;  %5588 = vperm.xlu1 %6321, %v5550_v55   ;;  %v9583_v39 = vadd.f32 %v1843_v7, %v1305_v35  ;;  %v2004_v34 = vpop.f32.mrf.mxu1  ;;  %v12174_v55 = vld [vmem:[#allocation92_spill] sm:$0xff]  ;;  %v9599_v7 = vpop.permute.xlu0 %4375 }
 0x328   :  { %6120 = vmatmul.mubr.msk.f32.gmra.mxu1 %vm735_vm3, %v6088_v52  ;;  %v9589_v53 = vadd.f32 %v2004_v34, %v1466_v10  ;;  %v9591_v52 = vpop.f32.mrf.mxu0  ;;  %v6090_v35 = vld [vmem:[%s11760_s4 + $0x2b8] sm:$0xff]  ;;  %v9606_v10 = vpop.permute.xlu1 %4391 }
 0x329   :  { %5593 = vperm.xlu0 %6320, %v5551_v36   ;;  %3611 = vmatprep.mubr.f32.mxu1 %v11883_v0  ;;  %12171 = vst [vmem:[#allocation14_spill] sm:$0xff] %v9583_v39  ;;  %12173 = vst [vmem:[#allocation20_spill] sm:$0xff] %v9591_v52  ;;  %v12175_v36 = vld [vmem:[#allocation141_spill] sm:$0xff]  ;;  %v9601_v30 = vpop.f32.mrf.mxu1  ;;  %v1472_v39 = vadd.f32 %v12178_v2, %v12177_v44  ;;  %v5555_v2 = vld [vmem:[%s11761_s5 + $0x50] sm:$0xff] }
 0x32a   :  { %6105 = vmatmul.mubr.msk.f32.gmra.mxu0 %vm735_vm3, %v6089_v40  ;;  %12172 = vst [vmem:[#allocation17_spill] sm:$0xff] %v9589_v53  ;;  %v1311_v50 = vadd.f32 %v12175_v36, %v12174_v55  ;;  %12176 = vst [vmem:[#allocation77_spill] sm:$0xff] %v9601_v30  ;;  %v1849_v34 = vpop.f32.mrf.mxu0  ;;  %v5554_v55 = vld [vmem:[%s11761_s5 + $0x48] sm:$0xff] }
 0x32b   :  { %3456 = vmatprep.mubr.f32.mxu0 %v11883_v0  ;;  %5598 = vperm.xlu1 %6321, %v5552_v17   ;;  %v2010_v52 = vpop.f32.mrf.mxu1  ;;  %v6091_v17 = vld [vmem:[%s11760_s4 + $0x2c0] sm:$0xff] }
 0x32c   :  { %6121 = vmatmul.mubr.msk.f32.gmra.mxu1 %vm735_vm3, %v6089_v40  ;;  %v9612_v36 = vadd.f32 %v1849_v34, %v1311_v50  ;;  %v9618_v44 = vadd.f32 %v2010_v52, %v1472_v39  ;;  %v9620_v40 = vpop.f32.mrf.mxu0  ;;  %v5556_v39 = vld [vmem:[%s11761_s5 + $0x58] sm:$0xff]  ;;  %v9633_v52 = vpop.permute.xlu0 %4341  ;;  %v12184_v34 = vld [vmem:[#allocation33_spill] sm:$0xff] }
 0x32d   :  { %5603 = vperm.xlu0 %6320, %v5553_v33   ;;  %3617 = vmatprep.mubr.f32.mxu1 %v11883_v0  ;;  %12181 = vst [vmem:[#allocation80_spill] sm:$0xff] %v9620_v40  ;;  %v9626_v33 = vpop.f32.mrf.mxu1  ;;  %12183 = vst [vmem:[#allocation81_spill] sm:$0xff] %v9633_v52  ;;  %v12187_v30 = vld [vmem:[#allocation97_spill] sm:$0xff] }
 0x32e   :  { %12179 = vst [vmem:[#allocation24_spill] sm:$0xff] %v9612_v36  ;;  %6106 = vmatmul.mubr.msk.f32.gmra.mxu0 %vm735_vm3, %v6090_v35  ;;  %12180 = vst [vmem:[#allocation100_spill] sm:$0xff] %v9618_v44  ;;  %v2362_v50 = vpop.f32.mrf.mxu0 }
 0x32f   :  { %3462 = vmatprep.mubr.f32.mxu0 %v11883_v0  ;;  %12182 = vst [vmem:[#allocation25_spill] sm:$0xff] %v9626_v33  ;;  %5608 = vperm.xlu1 %6321, %v5554_v55   ;;  %v9636_v40 = vadd.f32 %v2362_v50, %v12184_v34  ;;  %v5557_v55 = vld [vmem:[%s11761_s5 + $0x60] sm:$0xff]  ;;  %v6092_v33 = vld [vmem:[%s11760_s4 + $0x2c8] sm:$0xff] }
 0x330   :  { %6122 = vmatmul.mubr.msk.f32.gmra.mxu1 %vm735_vm3, %v6090_v35  ;;  %v9642_v35 = vpop.permute.xlu1 %4357  ;;  %v9651_v50 = vpop.f32.mrf.mxu0  ;;  %v5558_v34 = vld [vmem:[%s11761_s5 + $0x68] sm:$0xff] }
 0x331   :  { %5613 = vperm.xlu0 %6320, %v5555_v2   ;;  %3623 = vmatprep.mubr.f32.mxu1 %v11883_v0  ;;  %12185 = vst [vmem:[#allocation132_spill] sm:$0xff] %v9636_v40  ;;  %12186 = vst [vmem:[#allocation49_spill] sm:$0xff] %v9642_v35  ;;  %v2523_v2 = vpop.f32.mrf.mxu1 }
 0x332   :  { %6107 = vmatmul.mubr.msk.f32.gmra.mxu0 %vm735_vm3, %v6091_v17  ;;  %v9649_v44 = vadd.f32 %v2523_v2, %v12187_v30  ;;  %12189 = vst [vmem:[#allocation135_spill] sm:$0xff] %v9651_v50  ;;  %v5559_v30 = vld [vmem:[%s11761_s5 + $0x70] sm:$0xff]  ;;  %v5560_v50 = vld [vmem:[%s11761_s5 + $0x78] sm:$0xff] }
 0x333   :  { %3468 = vmatprep.mubr.f32.mxu0 %v11883_v0  ;;  %5618 = vperm.xlu1 %6321, %v5556_v39   ;;  %v9658_v40 = vpop.f32.mrf.mxu1  ;;  %v2368_v2 = vpop.f32.mrf.mxu0  ;;  %v12191_v39 = vld [vmem:[#allocation16_spill] sm:$0xff] }
 0x334   :  { %12188 = vst [vmem:[#allocation84_spill] sm:$0xff] %v9649_v44  ;;  %6123 = vmatmul.mubr.msk.f32.gmra.mxu1 %vm735_vm3, %v6091_v17  ;;  %12190 = vst [vmem:[#allocation85_spill] sm:$0xff] %v9658_v40  ;;  %v6093_v17 = vld [vmem:[%s11760_s4 + $0x2d0] sm:$0xff]  ;;  %v9672_v44 = vpop.permute.xlu0 %4373  ;;  %v9674_v40 = vpop.permute.xlu1 %4389 }
 0x335   :  { %5623 = vperm.xlu0 %6320, %v5557_v55   ;;  %3629 = vmatprep.mubr.f32.mxu1 %v11883_v0  ;;  %v9669_v55 = vadd.f32 %v2368_v2, %v12191_v39  ;;  %12193 = vst [vmem:[#allocation88_spill] sm:$0xff] %v9672_v44  ;;  %12194 = vst [vmem:[#allocation22_spill] sm:$0xff] %v9674_v40  ;;  %v9680_v53 = vpop.f32.mrf.mxu0  ;;  %v12196_v2 = vld [vmem:[#allocation37_spill] sm:$0xff]  ;;  %v12230_v40 = vld [vmem:[#allocation59_spill] sm:$0xff] }
 0x336   :  { %6108 = vmatmul.mubr.msk.f32.gmra.mxu0 %vm735_vm3, %v6092_v33  ;;  %v2529_v36 = vpop.f32.mrf.mxu1  ;;  %12195 = vst [vmem:[#allocation90_spill] sm:$0xff] %v9680_v53  ;;  %v12203_v53 = vld [vmem:[#allocation107_spill] sm:$0xff]  ;;  %v12231_v44 = vld [vmem:[#allocation122_spill] sm:$0xff] }
 0x337   :  { %3474 = vmatprep.mubr.f32.mxu0 %v11883_v0  ;;  %12192 = vst [vmem:[#allocation137_spill] sm:$0xff] %v9669_v55  ;;  %5628 = vperm.xlu1 %6321, %v5558_v34   ;;  %v9684_v34 = vadd.f32 %v2529_v36, %v12196_v2  ;;  %v12200_v36 = vld [vmem:[#allocation40_spill] sm:$0xff]  ;;  %v1420_v52 = vadd.f32 %v12231_v44, %v12230_v40  ;;  %v6097_v44 = vld [vmem:[%s11760_s4 + $0x2f0] sm:$0xff] }
 0x338   :  { %6124 = vmatmul.mubr.msk.f32.gmra.mxu1 %vm735_vm3, %v6092_v33  ;;  %v6094_v33 = vld [vmem:[%s11760_s4 + $0x2d8] sm:$0xff]  ;;  %v9695_v55 = vpop.permute.xlu0 %4339 }
 0x339   :  { %5633 = vperm.xlu0 %6320, %v5559_v30   ;;  %3635 = vmatprep.mubr.f32.mxu1 %v11883_v0  ;;  %12197 = vst [vmem:[#allocation139_spill] sm:$0xff] %v9684_v34  ;;  %v9691_v30 = vpop.f32.mrf.mxu1  ;;  %12199 = vst [vmem:[#allocation141_spill] sm:$0xff] %v9695_v55  ;;  %v12202_v34 = vld [vmem:[#allocation43_spill] sm:$0xff] }
 0x33a   :  { %6109 = vmatmul.mubr.msk.f32.gmra.mxu0 %vm735_vm3, %v6093_v17  ;;  %12198 = vst [vmem:[#allocation92_spill] sm:$0xff] %v9691_v30  ;;  %v2374_v39 = vpop.f32.mrf.mxu0  ;;  %v1396_v3 = vadd.f32 %v12203_v53, %v12202_v34  ;;  %v12209_v34 = vld [vmem:[#allocation46_spill] sm:$0xff] }
 0x33b   :  { %3480 = vmatprep.mubr.f32.mxu0 %v11883_v0  ;;  %5638 = vperm.xlu1 %6321, %v5560_v50   ;;  %v9698_v2 = vadd.f32 %v2374_v39, %v12200_v36  ;;  %v6095_v50 = vld [vmem:[%s11760_s4 + $0x2e0] sm:$0xff] }
 0x33c   :  { %6125 = vmatmul.mubr.msk.f32.gmra.mxu1 %vm735_vm3, %v6093_v17  ;;  %v9706_v17 = vpop.permute.xlu1 %4355  ;;  %v9709_v59 = vpop.f32.mrf.mxu0  ;;  %v2026_v12 = vadd.f32 %v12206_v32, %v1396_v3  ;;  %v12207_v39 = vld [vmem:[#allocation104_spill] sm:$0xff]  ;;  %v12212_v32 = vld [vmem:[#allocation47_spill] sm:$0xff] }
 0x33d   :  { %3641 = vmatprep.mubr.f32.mxu1 %v11883_v0  ;;  %12201 = vst [vmem:[#allocation94_spill] sm:$0xff] %v9698_v2  ;;  %12204 = vst [vmem:[#allocation142_spill] sm:$0xff] %v9706_v17  ;;  %v2535_v30 = vpop.f32.mrf.mxu1  ;;  %v12210_v2 = vld [vmem:[#allocation110_spill] sm:$0xff]  ;;  %v12213_v3 = vld [vmem:[#allocation112_spill] sm:$0xff] }
 0x33e   :  { %6110 = vmatmul.mubr.msk.f32.gmra.mxu0 %vm735_vm3, %v6094_v33  ;;  %12205 = vst [vmem:[#allocation33_spill] sm:$0xff] %v9709_v59  ;;  %v9714_v36 = vadd.f32 %v2535_v30, %v12207_v39  ;;  %v1241_v45 = vadd.f32 %v12210_v2, %v12209_v34  ;;  %v1402_v51 = vadd.f32 %v12213_v3, %v12212_v32  ;;  %v12215_v30 = vld [vmem:[#allocation114_spill] sm:$0xff]  ;;  %v9738_v34 = vpop.permute.xlu0 %4371  ;;  %v12222_v3 = vld [vmem:[#allocation119_spill] sm:$0xff] }
 0x33f   :  { %3486 = vmatprep.mubr.f32.mxu0 %v11883_v0  ;;  %v2537_v53 = vpop.f32.mrf.mxu1  ;;  %v1247_v39 = vadd.f32 %v12215_v30, %v12214_v16  ;;  %v9735_v2 = vrot.slane %v9191_v4, %v12217_v18  ;;  %12218 = vst [vmem:[#allocation37_spill] sm:$0xff] %v9738_v34  ;;  %v12221_v32 = vld [vmem:[#allocation54_spill] sm:$0xff]  ;;  %v12223_v16 = vld [vmem:[#allocation44_spill] sm:$0xff] }
 0x340   :  { %6126 = vmatmul.mubr.msk.f32.gmra.mxu1 %vm735_vm3, %v6094_v33  ;;  %12208 = vst [vmem:[#allocation97_spill] sm:$0xff] %v9714_v36  ;;  %v6096_v33 = vld [vmem:[%s11760_s4 + $0x2e8] sm:$0xff]  ;;  %v9723_v59 = vadd.f32 %v2537_v53, %v2026_v12  ;;  %v12216_v36 = vld [vmem:[#allocation31_spill] sm:$0xff]  ;;  %v1253_v55 = vadd.f32 %v12222_v3, %v12221_v32  ;;  %v2028_v30 = vadd.f32 %v12223_v16, %v1241_v45  ;;  %v12227_v18 = vld [vmem:[#allocation120_spill] sm:$0xff]  ;;  %v9760_v45 = vpop.permute.xlu1 %4387 }
 0x341   :  { %3647 = vmatprep.mubr.f32.mxu1 %v11883_v0  ;;  %v9731_v54 = vrot.slane %v9191_v4, %v12216_v36  ;;  %v2380_v12 = vpop.f32.mrf.mxu0  ;;  %v12219_v53 = vld [vmem:[#allocation51_spill] sm:$0xff]  ;;  %v12224_v36 = vld [vmem:[#allocation105_spill] sm:$0xff]  ;;  %12234 = vst [vmem:[#allocation43_spill] sm:$0xff] %v9760_v45  ;;  %v12237_v16 = vld [vmem:[#allocation66_spill] sm:$0xff] }
 0x342   :  { %6111 = vmatmul.mubr.msk.f32.gmra.mxu0 %vm735_vm3, %v6095_v50  ;;  %12211 = vst [vmem:[#allocation16_spill] sm:$0xff] %v9723_v59  ;;  %v12220_v59 = vld [vmem:[#allocation116_spill] sm:$0xff]  ;;  %v9747_v17 = vadd.f32 %v2380_v12, %v12224_v36  ;;  %v12226_v4 = vld [vmem:[#allocation55_spill] sm:$0xff] }
 0x343   :  { %3492 = vmatprep.mubr.f32.mxu0 %v11883_v0  ;;  %v1408_v28 = vadd.f32 %v12220_v59, %v12219_v53  ;;  %v1414_v58 = vadd.f32 %v12227_v18, %v12226_v4  ;;  %v12232_v59 = vld [vmem:[#allocation62_spill] sm:$0xff]  ;;  %v12233_v53 = vld [vmem:[#allocation123_spill] sm:$0xff]  ;;  %v2382_v32 = vpop.f32.mrf.mxu0  ;;  %v12236_v12 = vld [vmem:[#allocation124_spill] sm:$0xff] }
 0x344   :  { %6127 = vmatmul.mubr.msk.f32.gmra.mxu1 %vm735_vm3, %v6095_v50  ;;  %12225 = vst [vmem:[#allocation40_spill] sm:$0xff] %v9747_v17  ;;  %v12228_v50 = vld [vmem:[#allocation58_spill] sm:$0xff]  ;;  %v9757_v35 = vadd.f32 %v12233_v53, %v12232_v59  ;;  %v12235_v36 = vld [vmem:[#allocation63_spill] sm:$0xff]  ;;  %v12238_v18 = vld [vmem:[#allocation125_spill] sm:$0xff]  ;;  %v2541_v40 = vpop.f32.mrf.mxu1 }
 0x345   :  { %3653 = vmatprep.mubr.f32.mxu1 %v11883_v0  ;;  %v1259_v34 = vadd.f32 %v12229_v21, %v12228_v50  ;;  %v1426_v3 = vadd.f32 %v12236_v12, %v12235_v36  ;;  %v9766_v4 = vadd.f32 %v12238_v18, %v12237_v16  ;;  %v4427_v21 = vsel %vm4403_vm9, %v9089_v5, %v9114_v42  ;;  %v12240_v59 = vld [vmem:[#allocation67_spill] sm:$0xff]  ;;  %v12241_v53 = vld [vmem:[#allocation126_spill] sm:$0xff]  ;;  %v12242_v16 = vld [vmem:[#allocation12_spill] sm:$0xff] }
 0x346   :  { %6112 = vmatmul.mubr.msk.f32.gmra.mxu0 %vm735_vm3, %v6096_v33  ;;  %v9776_v50 = vadd.f32 %v2382_v32, %v2028_v30  ;;  %v9780_v36 = vadd.f32 %v12241_v53, %v12240_v59  ;;  %v4411_v12 = vsel %vm4403_vm9, %v9124_v26, %v9149_v20  ;;  %v2030_v5 = vadd.f32 %v12242_v16, %v1402_v51  ;;  %v9788_v42 = vld [vmem:[#allocation2 + $0x20] sm:$0xf]  ;;  %v12244_v18 = vld [vmem:[#allocation11_spill] sm:$0xff]  ;;  %v12246_v30 = vld [vmem:[#allocation70_spill] sm:$0xff] }
 0x347   :  { %3498 = vmatprep.mubr.f32.mxu0 %v11883_v0  ;;  %12243 = vst [vmem:[#allocation41_spill] sm:$0xff] %v9788_v42  ;;  %v9791_v17 = vadd.f32 %v2541_v40, %v12244_v18  ;;  %v12247_v32 = vld [vmem:[#allocation127_spill] sm:$0xff]  ;;  %v12249_v53 = vld [vmem:[#allocation48_spill] sm:$0xff]  ;;  %v12250_v26 = vld [vmem:[#allocation29_spill] sm:$0xff]  ;;  %v2543_v40 = vpop.f32.mrf.mxu1  ;;  %v4487_v16 = vmul.f32 %v9731_v54, %v4427_v21 }
 0x348   :  { %12239 = vst [vmem:[#allocation107_spill] sm:$0xff] %v9776_v50  ;;  %6128 = vmatmul.mubr.msk.f32.gmra.mxu1 %vm735_vm3, %v6096_v33  ;;  %v9795_v50 = vadd.f32 %v12247_v32, %v12246_v30  ;;  %v12248_v59 = vld [vmem:[#allocation7_spill] sm:$0xff]  ;;  %v9804_v20 = vrot.slane %v9788_v42, %v12250_v26  ;;  %v12252_v51 = vld [vmem:[#allocation32_spill] sm:$0xff]  ;;  %v4410_v30 = vsel %vm4403_vm9, %v9237_v23, %v9258_v8  ;;  %v9820_v32 = vpop.permute.xlu0 %4956 }
 0x349   :  { %12245 = vst [vmem:[#allocation104_spill] sm:$0xff] %v9791_v17  ;;  %v4426_v45 = vsel %vm4403_vm9, %v12249_v53, %v12248_v59  ;;  %3659 = vmatprep.mubr.f32.mxu1 %v11883_v0  ;;  %v9808_v33 = vrot.slane %v9788_v42, %v12252_v51  ;;  %v4418_v18 = vsel %vm4403_vm9, %v12248_v59, %v9237_v23  ;;  %v12255_v59 = vld [vmem:[#allocation5_spill] sm:$0xff]  ;;  %v12256_v42 = vld [vmem:[#allocation6_spill] sm:$0xff]  ;;  %v6098_v23 = vld [vmem:[%s11760_s4 + $0x2f8] sm:$0xff] }
 0x34a   :  { %12251 = vst [vmem:[#allocation46_spill] sm:$0xff] %v9804_v20  ;;  %6113 = vmatmul.mubr.msk.f32.gmra.mxu0 %vm735_vm3, %v6097_v44  ;;  %v9822_v26 = vadd.f32 %v2543_v40, %v2030_v5  ;;  %v9825_v51 = vmul.f32 %v9735_v2, %v4411_v12  ;;  %v4434_v21 = vsel %vm4403_vm9, %v9258_v8, %v12249_v53  ;;  %v2386_v5 = vpop.f32.mrf.mxu0 }
 0x34b   :  { %12253 = vst [vmem:[#allocation110_spill] sm:$0xff] %v9808_v33  ;;  %v2032_v17 = vadd.f32 %v12255_v59, %v1247_v39  ;;  %v2034_v33 = vadd.f32 %v12256_v42, %v1408_v28  ;;  %3504 = vmatprep.mubr.f32.mxu0 %v11883_v0  ;;  %v4483_v40 = vmul.f32 %v9731_v54, %v4426_v45  ;;  %v9844_v39 = vpop.permute.xlu1 %4972  ;;  %v12258_v28 = vld [vmem:[#allocation45_spill] sm:$0xff] }
 0x34c   :  { %12254 = vst [vmem:[#allocation47_spill] sm:$0xff] %v9822_v26  ;;  %v4425_v12 = vsel %vm4403_vm9, %v9285_v1, %v9301_v41  ;;  %v12257_v26 = vld [vmem:[#allocation53_spill] sm:$0xff]  ;;  %6129 = vmatmul.mubr.msk.f32.gmra.mxu1 %vm735_vm3, %v6097_v44  ;;  %v9847_v42 = vadd.f32 %v2386_v5, %v12258_v28  ;;  %v4484_v53 = vmul.f32 %v12154_v31, %v4418_v18 }
 0x34d   :  { %v2036_v8 = vadd.f32 %v12257_v26, %v1253_v55  ;;  %v9851_v59 = vmul.f32 %v9735_v2, %v4410_v30  ;;  %v4417_v45 = vsel %vm4403_vm9, %v9301_v41, %v9322_v13  ;;  %v2038_v20 = vadd.f32 %v9239_v6, %v1414_v58  ;;  %3665 = vmatprep.mubr.f32.mxu1 %v11883_v0  ;;  %v2388_v55 = vpop.f32.mrf.mxu0  ;;  %v2547_v41 = vpop.f32.mrf.mxu1  ;;  %v12259_v5 = vld [vmem:[#allocation109_spill] sm:$0xff] }
 0x34e   :  { %v4486_v44 = vmul.f32 %v9221_v61, %v4434_v21  ;;  %v4409_v18 = vsel %vm4403_vm9, %v9322_v13, %v9344_v14  ;;  %v4433_v30 = vsel %vm4403_vm9, %v9344_v14, %v9285_v1  ;;  %6114 = vmatmul.mubr.msk.f32.gmra.mxu0 %vm735_vm3, %v6098_v23  ;;  %v9869_v26 = vadd.f32 %v2388_v55, %v2032_v17  ;;  %v6131_v13 = vld [vmem:[%s11760_s4 + $0x300] sm:$0xff] }
 0x34f   :  { %v4479_v6 = vmul.f32 %v9731_v54, %v4425_v12  ;;  %v2040_v58 = vadd.f32 %v9270_v11, %v1259_v34  ;;  %v9874_v21 = vadd.f32 %v9287_v57, %v1420_v52  ;;  %4017 = vmatprep.mubr.f32.mxu0 %v11883_v0  ;;  %v9881_v1 = vadd.f32 %v2547_v41, %v12259_v5  ;;  %v9896_v52 = vpop.permute.xlu0 %4988  ;;  %v2549_v34 = vpop.f32.mrf.mxu1 }
 0x350   :  { %v4480_v14 = vmul.f32 %v12154_v31, %v4417_v45  ;;  %v4424_v17 = vsel %vm4403_vm9, %v9365_v24, %v9387_v37  ;;  %v9890_v11 = vadd.f32 %v9311_v60, %v9757_v35  ;;  %v9893_v57 = vadd.f32 %v9324_v49, %v1426_v3  ;;  %6130 = vmatmul.mubr.msk.f32.gmra.mxu1 %vm735_vm3, %v6098_v23  ;;  %v2392_v49 = vpop.f32.mrf.mxu0 }
 0x351   :  { %v4481_v12 = vmul.f32 %v9735_v2, %v4409_v18  ;;  %v4482_v28 = vmul.f32 %v9221_v61, %v4433_v30  ;;  %v4416_v45 = vsel %vm4403_vm9, %v9387_v37, %v9409_v46  ;;  %4178 = vmatprep.mubr.f32.mxu1 %v11883_v0  ;;  %v9905_v60 = vadd.f32 %v2549_v34, %v2034_v33  ;;  %v9920_v37 = vpop.permute.xlu1 %5004  ;;  %v12260_v33 = vld [vmem:[#allocation52_spill] sm:$0xff]  ;;  %v2553_v18 = vpop.f32.mrf.mxu1 }
 0x352   :  { %v4408_v35 = vsel %vm4403_vm9, %v9409_v46, %v9432_v15  ;;  %v9913_v3 = vadd.f32 %v9354_v48, %v9766_v4  ;;  %v9917_v23 = vadd.f32 %v9367_v43, %v9780_v36  ;;  %6147 = vmatmul.mubr.msk.f32.vlgmr.msra.gmra.mxu0 %vm735_vm3, %v6131_v13  ;;  %v9923_v55 = vadd.f32 %v2392_v49, %v12260_v33  ;;  %v12261_v48 = vld [vmem:[#allocation8_spill] sm:$0xff]  ;;  %v2394_v4 = vpop.f32.mrf.mxu0 }
 0x353   :  { %v4475_v30 = vmul.f32 %v9731_v54, %v4424_v17  ;;  %v9928_v46 = vadd.f32 %v9399_v47, %v9795_v50  ;;  %4573 = vmatpush1.msra.mxu0 %v4487_v16  ;;  %4023 = vmatprep.mubr.f32.mxu0 %v11883_v0  ;;  %v9932_v43 = vadd.f32 %v2553_v18, %v12261_v48  ;;  %v6132_v47 = vld [vmem:[%s11760_s4 + $0x308] sm:$0xff]  ;;  %v2555_v16 = vpop.f32.mrf.mxu1 }
 0x354   :  { %v4476_v36 = vmul.f32 %v12154_v31, %v4416_v45  ;;  %v4432_v41 = vsel %vm4403_vm9, %v9432_v15, %v9365_v24  ;;  %6163 = vmatmul.mubr.msk.f32.vlgmr.msra.gmra.mxu1 %vm735_vm3, %v6131_v13  ;;  %4574 = vmatprep.subr.mxu0 %v4484_v53  ;;  %v9943_v50 = vadd.f32 %v2394_v4, %v2036_v8  ;;  %v2398_v15 = vpop.f32.mrf.mxu0  ;;  %v9961_v13 = vpop.permute.xlu0 %4954 }
 0x355   :  { %v4477_v5 = vmul.f32 %v9735_v2, %v4408_v35  ;;  %v4423_v17 = vsel %vm4403_vm9, %v9454_v25, %v9476_v9  ;;  %4734 = vmatpush1.msra.mxu1 %v9825_v51  ;;  %4575 = vmatpush1.msra.mxu0 %v4483_v40  ;;  %v9951_v24 = vadd.f32 %v2555_v16, %v2038_v20  ;;  %v2559_v20 = vpop.f32.mrf.mxu1  ;;  %v9982_v45 = vpop.permute.xlu1 %4970 }
 0x356   :  { %v4415_v8 = vsel %vm4403_vm9, %v9476_v9, %v9514_v27  ;;  %v4407_v53 = vsel %vm4403_vm9, %v9514_v27, %v9522_v56  ;;  %4735 = vmatprep.subr.mxu1 %v4486_v44  ;;  %4576 = vmatprep.subr.mxu0 %v4480_v14  ;;  %v9964_v51 = vadd.f32 %v2398_v15, %v9260_v63  ;;  %v12262_v27 = vld [vmem:[#allocation118_spill] sm:$0xff]  ;;  %v2400_v14 = vpop.f32.mrf.mxu0 }
 0x357   :  { %v4478_v40 = vmul.f32 %v9221_v61, %v4432_v41  ;;  %v4431_v9 = vsel %vm4403_vm9, %v9522_v56, %v9454_v25  ;;  %4736 = vmatpush1.msra.mxu1 %v9851_v59  ;;  %6148 = vmatmul.mubr.msk.f32.gmra.mxu0 %vm735_vm3, %v6132_v47  ;;  %v9974_v44 = vadd.f32 %v2559_v20, %v12262_v27  ;;  %v2561_v56 = vpop.f32.mrf.mxu1  ;;  %v12264_v41 = vld [vmem:[#allocation81_spill] sm:$0xff] }
 0x358   :  { %v4471_v34 = vmul.f32 %v9731_v54, %v4423_v17  ;;  %v4422_v63 = vsel %vm4403_vm9, %v9553_v29, %v9562_v22  ;;  %4184 = vmatprep.mubr.f32.mxu1 %v11883_v0  ;;  %4577 = vmatpush1.msra.mxu0 %v4479_v6  ;;  %v9984_v25 = vadd.f32 %v2400_v14, %v2040_v58  ;;  %v2404_v33 = vpop.f32.mrf.mxu0  ;;  %v6133_v58 = vld [vmem:[%s11760_s4 + $0x310] sm:$0xff]  ;;  %v12265_v17 = vld [vmem:[#allocation88_spill] sm:$0xff] }
 0x359   :  { %v4472_v59 = vmul.f32 %v12154_v31, %v4415_v8  ;;  %v4473_v49 = vmul.f32 %v9735_v2, %v4407_v53  ;;  %4737 = vmatprep.subr.mxu1 %v4482_v28  ;;  %6164 = vmatmul.mubr.msk.f32.gmra.mxu1 %vm735_vm3, %v6132_v47  ;;  %v9990_v35 = vadd.f32 %v2561_v56, %v9874_v21  ;;  %v2565_v48 = vpop.f32.mrf.mxu1  ;;  %v12266_v53 = vld [vmem:[#allocation22_spill] sm:$0xff]  ;;  %v10040_v20 = vpop.permute.xlu1 %5002  ;;  %v12268_v14 = vld [vmem:[#allocation111_spill] sm:$0xff] }
 0x35a   :  { %v4474_v18 = vmul.f32 %v9221_v61, %v4431_v9  ;;  %v4414_v6 = vsel %vm4403_vm9, %v9562_v22, %v9599_v7  ;;  %4578 = vmatprep.subr.mxu0 %v4476_v36  ;;  %4738 = vmatpush1.msra.mxu1 %v4481_v12  ;;  %v10001_v28 = vadd.f32 %v2404_v33, %v9303_v38  ;;  %v2406_v12 = vpop.f32.mrf.mxu0  ;;  %v12263_v36 = vld [vmem:[#allocation49_spill] sm:$0xff]  ;;  %v6134_v33 = vld [vmem:[%s11760_s4 + $0x318] sm:$0xff] }
 0x35b   :  { %v4467_v21 = vmul.f32 %v9731_v54, %v4422_v63  ;;  %v4406_v4 = vsel %vm4403_vm9, %v9599_v7, %v9606_v10  ;;  %4579 = vmatpush1.msra.mxu0 %v4475_v30  ;;  %4739 = vmatprep.subr.mxu1 %v4478_v40  ;;  %v10009_v22 = vadd.f32 %v2565_v48, %v9309_v19  ;;  %v10020_v7 = vpop.permute.xlu0 %4986  ;;  %v2567_v19 = vpop.f32.mrf.mxu1  ;;  %v12267_v40 = vld [vmem:[#allocation26_spill] sm:$0xff]  ;;  %v12269_v48 = vld [vmem:[#allocation37_spill] sm:$0xff] }
 0x35c   :  { %v4430_v38 = vsel %vm4403_vm9, %v9606_v10, %v9553_v29  ;;  %v4421_v47 = vsel %vm4403_vm9, %v12264_v41, %v12263_v36  ;;  %4029 = vmatprep.mubr.f32.mxu0 %v11883_v0  ;;  %4580 = vmatprep.subr.mxu0 %v4472_v59  ;;  %v10023_v30 = vadd.f32 %v2406_v12, %v9890_v11  ;;  %v2410_v15 = vpop.f32.mrf.mxu0 }
 0x35d   :  { %v4468_v16 = vmul.f32 %v12154_v31, %v4414_v6  ;;  %v4413_v29 = vsel %vm4403_vm9, %v12263_v36, %v12265_v17  ;;  %4740 = vmatpush1.msra.mxu1 %v4477_v5  ;;  %6149 = vmatmul.mubr.msk.f32.gmra.mxu0 %vm735_vm3, %v6133_v58  ;;  %v10032_v10 = vadd.f32 %v2567_v19, %v9893_v57  ;;  %v2571_v9 = vpop.f32.mrf.mxu1  ;;  %v12271_v36 = vld [vmem:[#allocation141_spill] sm:$0xff] }
 0x35e   :  { %v4469_v8 = vmul.f32 %v9735_v2, %v4406_v4  ;;  %v4405_v11 = vsel %vm4403_vm9, %v12265_v17, %v12266_v53  ;;  %4190 = vmatprep.mubr.f32.mxu1 %v11883_v0  ;;  %4581 = vmatpush1.msra.mxu0 %v4471_v34  ;;  %v10043_v5 = vadd.f32 %v2410_v15, %v12267_v40  ;;  %v2412_v56 = vpop.f32.mrf.mxu0  ;;  %v12270_v4 = vld [vmem:[#allocation142_spill] sm:$0xff]  ;;  %v12274_v15 = vld [vmem:[#allocation113_spill] sm:$0xff] }
 0x35f   :  { %v4470_v57 = vmul.f32 %v9221_v61, %v4430_v38  ;;  %v4463_v27 = vmul.f32 %v9731_v54, %v4421_v47  ;;  %4741 = vmatprep.subr.mxu1 %v4474_v18  ;;  %6165 = vmatmul.mubr.msk.f32.gmra.mxu1 %vm735_vm3, %v6133_v58  ;;  %v10049_v63 = vadd.f32 %v2571_v9, %v12268_v14  ;;  %v2573_v6 = vpop.f32.mrf.mxu1  ;;  %v10079_v19 = vpop.permute.xlu0 %4952 }
 0x360   :  { %v4464_v59 = vmul.f32 %v12154_v31, %v4413_v29  ;;  %v4429_v34 = vsel %vm4403_vm9, %v12266_v53, %v12264_v41  ;;  %4582 = vmatprep.subr.mxu0 %v4468_v16  ;;  %4742 = vmatpush1.msra.mxu1 %v4473_v49  ;;  %v10060_v18 = vadd.f32 %v2412_v56, %v9913_v3  ;;  %v2416_v49 = vpop.f32.mrf.mxu0  ;;  %v12272_v41 = vld [vmem:[#allocation43_spill] sm:$0xff] }
 0x361   :  { %v4465_v58 = vmul.f32 %v9735_v2, %v4405_v11  ;;  %v4412_v12 = vsel %vm4403_vm9, %v12270_v4, %v12269_v48  ;;  %4583 = vmatpush1.msra.mxu0 %v4467_v21  ;;  %4743 = vmatprep.subr.mxu1 %v4470_v57  ;;  %v10068_v38 = vadd.f32 %v2573_v6, %v9917_v23  ;;  %v12273_v21 = vld [vmem:[#allocation108_spill] sm:$0xff]  ;;  %v2577_v23 = vpop.f32.mrf.mxu1  ;;  %v10100_v57 = vpop.permute.xlu1 %4968 }
 0x362   :  { %v4420_v3 = vsel %vm4403_vm9, %v12271_v36, %v12270_v4  ;;  %v4428_v47 = vsel %vm4403_vm9, %v12272_v41, %v12271_v36  ;;  %4035 = vmatprep.mubr.f32.mxu0 %v11883_v0  ;;  %4584 = vmatprep.subr.mxu0 %v4464_v59  ;;  %v10082_v16 = vadd.f32 %v2416_v49, %v12273_v21  ;;  %v2418_v11 = vpop.f32.mrf.mxu0  ;;  %v6136_v21 = vld [vmem:[%s11760_s4 + $0x328] sm:$0xff] }
 0x363   :  { %v4466_v17 = vmul.f32 %v9221_v61, %v4429_v34  ;;  %v4404_v29 = vsel %vm4403_vm9, %v12269_v48, %v12272_v41  ;;  %4744 = vmatpush1.msra.mxu1 %v4469_v8  ;;  %6150 = vmatmul.mubr.msk.f32.gmra.mxu0 %vm735_vm3, %v6134_v33  ;;  %v10092_v53 = vadd.f32 %v2577_v23, %v12274_v15  ;;  %v10105_v14 = vpop.f32.mrf.mxu1  ;;  %v12280_v48 = vld [vmem:[#allocation46_spill] sm:$0xff]  ;;  %v12286_v23 = vld [vmem:[#allocation117_spill] sm:$0xff]  ;;  %v12288_v15 = vld [vmem:[#allocation60_spill] sm:$0xff] }
 0x364   :  { %v4460_v40 = vmul.f32 %v12154_v31, %v4412_v12  ;;  %v5022_v9 = vsel %vm5006_vm10, %v9844_v39, %v9896_v52  ;;  %4196 = vmatprep.mubr.f32.mxu1 %v11883_v0  ;;  %4585 = vmatpush1.msra.mxu0 %v4463_v27  ;;  %v10103_v8 = vadd.f32 %v2418_v11, %v9928_v46  ;;  %v2422_v27 = vpop.f32.mrf.mxu0  ;;  %v6135_v46 = vld [vmem:[%s11760_s4 + $0x320] sm:$0xff]  ;;  %v12281_v12 = vld [vmem:[#allocation27_spill] sm:$0xff] }
 0x365   :  { %12275 = vst [vmem:[#allocation112_spill] sm:$0xff] %v10092_v53  ;;  %12277 = vst [vmem:[#allocation114_spill] sm:$0xff] %v10105_v14  ;;  %v4459_v56 = vmul.f32 %v9731_v54, %v4420_v3  ;;  %v4462_v59 = vmul.f32 %v9221_v61, %v4428_v47  ;;  %v5038_v31 = vsel %vm5006_vm10, %v9920_v37, %v9820_v32  ;;  %4745 = vmatprep.subr.mxu1 %v4466_v17  ;;  %v12278_v54 = vld [vmem:[#allocation56_spill] sm:$0xff]  ;;  %v2583_v61 = vpop.f32.mrf.mxu1  ;;  %v10135_v47 = vpop.permute.xlu1 %5000 }
 0x366   :  { %12276 = vst [vmem:[#allocation50_spill] sm:$0xff] %v10103_v8  ;;  %6166 = vmatmul.mubr.msk.f32.gmra.mxu1 %vm735_vm3, %v6134_v33  ;;  %v4461_v34 = vmul.f32 %v9735_v2, %v4404_v29  ;;  %4586 = vmatprep.subr.mxu0 %v4460_v40  ;;  %v10119_v6 = vadd.f32 %v2422_v27, %v12278_v54  ;;  %v10125_v33 = vpop.f32.mrf.mxu0  ;;  %v12284_v2 = vld [vmem:[#allocation110_spill] sm:$0xff]  ;;  %v12292_v27 = vld [vmem:[#allocation65_spill] sm:$0xff]  ;;  %v12294_v54 = vld [vmem:[#allocation68_spill] sm:$0xff] }
 0x367   :  { %4746 = vmatpush1.msra.mxu1 %v4465_v58  ;;  %v5091_v4 = vmul.f32 %v12280_v48, %v5022_v9  ;;  %4587 = vmatpush1.msra.mxu0 %v4459_v56  ;;  %v10123_v49 = vadd.f32 %v2583_v61, %v12281_v12  ;;  %12283 = vst [vmem:[#allocation54_spill] sm:$0xff] %v10125_v33  ;;  %v10129_v58 = vpop.permute.xlu0 %4984  ;;  %v10131_v3 = vpop.f32.mrf.mxu1  ;;  %v12342_v53 = vld [vmem:[#allocation92_spill] sm:$0xff] }
 0x368   :  { %12279 = vst [vmem:[#allocation51_spill] sm:$0xff] %v10119_v6  ;;  %4747 = vmatprep.subr.mxu1 %v4462_v59  ;;  %v5093_v36 = vmul.f32 %v12284_v2, %v5038_v31  ;;  %4041 = vmatprep.mubr.f32.mxu0 %v11883_v0  ;;  %12285 = vst [vmem:[#allocation119_spill] sm:$0xff] %v10131_v3  ;;  %v2428_v41 = vpop.f32.mrf.mxu0  ;;  %v6137_v31 = vld [vmem:[%s11760_s4 + $0x330] sm:$0xff] }
 0x369   :  { %12282 = vst [vmem:[#allocation116_spill] sm:$0xff] %v10123_v49  ;;  %4748 = vmatpush1.msra.mxu1 %v4461_v34  ;;  %5175 = vmatprep.subr.mxu0 %v5091_v4  ;;  %v10141_v17 = vadd.f32 %v2428_v41, %v12286_v23  ;;  %v2589_v29 = vpop.f32.mrf.mxu1  ;;  %v10169_v12 = vpop.permute.xlu1 %4966  ;;  %v12298_v23 = vld [vmem:[#allocation73_spill] sm:$0xff] }
 0x36a   :  { %6151 = vmatmul.mubr.msk.f32.gmra.mxu0 %vm735_vm3, %v6135_v46  ;;  %4202 = vmatprep.mubr.f32.mxu1 %v11883_v0  ;;  %v10146_v11 = vadd.f32 %v2589_v29, %v12288_v15  ;;  %v10148_v40 = vpop.f32.mrf.mxu0 }
 0x36b   :  { %5336 = vmatprep.subr.mxu1 %v5093_v36  ;;  %12287 = vst [vmem:[#allocation44_spill] sm:$0xff] %v10141_v17  ;;  %6167 = vmatmul.mubr.msk.f32.gmra.mxu1 %vm735_vm3, %v6135_v46  ;;  %12290 = vst [vmem:[#allocation55_spill] sm:$0xff] %v10148_v40  ;;  %v10151_v9 = vpop.f32.mrf.mxu1  ;;  %v10154_v59 = vpop.permute.xlu0 %4950 }
 0x36c   :  { %4047 = vmatprep.mubr.f32.mxu0 %v11883_v0  ;;  %12289 = vst [vmem:[#allocation105_spill] sm:$0xff] %v10146_v11  ;;  %4208 = vmatprep.mubr.f32.mxu1 %v11883_v0  ;;  %12291 = vst [vmem:[#allocation120_spill] sm:$0xff] %v10151_v9  ;;  %v2434_v56 = vpop.f32.mrf.mxu0  ;;  %v12311_v11 = vld [vmem:[#allocation98_spill] sm:$0xff] }
 0x36d   :  { %v10161_v34 = vadd.f32 %v2434_v56, %v12292_v27  ;;  %v2595_v46 = vpop.f32.mrf.mxu1  ;;  %v12300_v56 = vld [vmem:[#allocation76_spill] sm:$0xff] }
 0x36e   :  { %6152 = vmatmul.mubr.msk.f32.gmra.mxu0 %vm735_vm3, %v6136_v21  ;;  %v10165_v61 = vadd.f32 %v2595_v46, %v12294_v54  ;;  %v10167_v4 = vpop.f32.mrf.mxu0 }
 0x36f   :  { %4053 = vmatprep.mubr.f32.mxu0 %v11883_v0  ;;  %12293 = vst [vmem:[#allocation58_spill] sm:$0xff] %v10161_v34  ;;  %6168 = vmatmul.mubr.msk.f32.gmra.mxu1 %vm735_vm3, %v6136_v21  ;;  %12296 = vst [vmem:[#allocation59_spill] sm:$0xff] %v10167_v4  ;;  %v10172_v36 = vpop.f32.mrf.mxu1  ;;  %v6138_v21 = vld [vmem:[%s11760_s4 + $0x338] sm:$0xff]  ;;  %v10188_v54 = vpop.permute.xlu0 %4982  ;;  %v12310_v4 = vld [vmem:[#allocation34_spill] sm:$0xff] }
 0x370   :  { %12295 = vst [vmem:[#allocation121_spill] sm:$0xff] %v10165_v61  ;;  %4214 = vmatprep.mubr.f32.mxu1 %v11883_v0  ;;  %12297 = vst [vmem:[#allocation122_spill] sm:$0xff] %v10172_v36  ;;  %v2440_v41 = vpop.f32.mrf.mxu0  ;;  %v10194_v34 = vpop.permute.xlu1 %4998  ;;  %v1223_v9 = vadd.f32 %v12311_v11, %v12310_v4  ;;  %v12319_v4 = vld [vmem:[#allocation15_spill] sm:$0xff] }
 0x371   :  { %v10180_v29 = vadd.f32 %v2440_v41, %v12298_v23  ;;  %v2601_v15 = vpop.f32.mrf.mxu1  ;;  %v12304_v41 = vld [vmem:[#allocation14_spill] sm:$0xff] }
 0x372   :  { %6153 = vmatmul.mubr.msk.f32.gmra.mxu0 %vm735_vm3, %v6137_v31  ;;  %v10184_v27 = vadd.f32 %v2601_v15, %v12300_v56  ;;  %v10186_v46 = vpop.f32.mrf.mxu0  ;;  %v12306_v56 = vld [vmem:[#allocation17_spill] sm:$0xff]  ;;  %v2016_v40 = vadd.f32 %v12319_v4, %v1223_v9  ;;  %v12323_v9 = vld [vmem:[#allocation132_spill] sm:$0xff] }
 0x373   :  { %4059 = vmatprep.mubr.f32.mxu0 %v11883_v0  ;;  %12299 = vst [vmem:[#allocation62_spill] sm:$0xff] %v10180_v29  ;;  %6169 = vmatmul.mubr.msk.f32.gmra.mxu1 %vm735_vm3, %v6137_v31  ;;  %12302 = vst [vmem:[#allocation63_spill] sm:$0xff] %v10186_v46  ;;  %v10191_v61 = vpop.f32.mrf.mxu1  ;;  %v6139_v31 = vld [vmem:[%s11760_s4 + $0x340] sm:$0xff] }
 0x374   :  { %12301 = vst [vmem:[#allocation123_spill] sm:$0xff] %v10184_v27  ;;  %4220 = vmatprep.mubr.f32.mxu1 %v11883_v0  ;;  %12303 = vst [vmem:[#allocation124_spill] sm:$0xff] %v10191_v61  ;;  %v2446_v36 = vpop.f32.mrf.mxu0  ;;  %v10233_v49 = vpop.permute.xlu1 %4964 }
 0x375   :  { %v10201_v23 = vadd.f32 %v2446_v36, %v12304_v41  ;;  %v2607_v15 = vpop.f32.mrf.mxu1  ;;  %v10215_v36 = vpop.permute.xlu0 %4948  ;;  %v12312_v41 = vld [vmem:[#allocation24_spill] sm:$0xff] }
 0x376   :  { %6154 = vmatmul.mubr.msk.f32.gmra.mxu0 %vm735_vm3, %v6138_v21  ;;  %v10205_v27 = vadd.f32 %v2607_v15, %v12306_v56  ;;  %v10207_v61 = vpop.f32.mrf.mxu0 }
 0x377   :  { %4065 = vmatprep.mubr.f32.mxu0 %v11883_v0  ;;  %12305 = vst [vmem:[#allocation66_spill] sm:$0xff] %v10201_v23  ;;  %6170 = vmatmul.mubr.msk.f32.gmra.mxu1 %vm735_vm3, %v6138_v21  ;;  %12308 = vst [vmem:[#allocation67_spill] sm:$0xff] %v10207_v61  ;;  %v10210_v29 = vpop.f32.mrf.mxu1  ;;  %v6140_v21 = vld [vmem:[%s11760_s4 + $0x348] sm:$0xff]  ;;  %v12316_v61 = vld [vmem:[#allocation100_spill] sm:$0xff] }
 0x378   :  { %12307 = vst [vmem:[#allocation125_spill] sm:$0xff] %v10205_v27  ;;  %4226 = vmatprep.mubr.f32.mxu1 %v11883_v0  ;;  %12309 = vst [vmem:[#allocation126_spill] sm:$0xff] %v10210_v29  ;;  %v2452_v46 = vpop.f32.mrf.mxu0  ;;  %v12314_v27 = vld [vmem:[#allocation35_spill] sm:$0xff] }
 0x379   :  { %v10222_v15 = vadd.f32 %v2452_v46, %v12312_v41  ;;  %v2613_v56 = vpop.f32.mrf.mxu1  ;;  %v12315_v29 = vld [vmem:[#allocation99_spill] sm:$0xff]  ;;  %v12321_v46 = vld [vmem:[#allocation36_spill] sm:$0xff] }
 0x37a   :  { %6155 = vmatmul.mubr.msk.f32.gmra.mxu0 %vm735_vm3, %v6139_v31  ;;  %v1384_v23 = vadd.f32 %v12315_v29, %v12314_v27  ;;  %v10228_v17 = vadd.f32 %v2613_v56, %v12316_v61  ;;  %v10230_v11 = vpop.f32.mrf.mxu0  ;;  %v12322_v27 = vld [vmem:[#allocation135_spill] sm:$0xff] }
 0x37b   :  { %4071 = vmatprep.mubr.f32.mxu0 %v11883_v0  ;;  %12313 = vst [vmem:[#allocation12_spill] sm:$0xff] %v10222_v15  ;;  %6171 = vmatmul.mubr.msk.f32.gmra.mxu1 %vm735_vm3, %v6139_v31  ;;  %12318 = vst [vmem:[#allocation70_spill] sm:$0xff] %v10230_v11  ;;  %v10236_v3 = vpop.f32.mrf.mxu1  ;;  %v2619_v31 = vadd.f32 %v12322_v27, %v2016_v40  ;;  %v6141_v61 = vld [vmem:[%s11760_s4 + $0x350] sm:$0xff]  ;;  %v12327_v11 = vld [vmem:[#allocation85_spill] sm:$0xff]  ;;  %v10255_v27 = vpop.permute.xlu0 %4980 }
 0x37c   :  { %12317 = vst [vmem:[#allocation11_spill] sm:$0xff] %v10228_v17  ;;  %4232 = vmatprep.mubr.f32.mxu1 %v11883_v0  ;;  %12320 = vst [vmem:[#allocation127_spill] sm:$0xff] %v10236_v3  ;;  %v2018_v41 = vadd.f32 %v12321_v46, %v1384_v23  ;;  %v2813_v29 = vpop.f32.mrf.mxu0  ;;  %v12325_v17 = vld [vmem:[#allocation38_spill] sm:$0xff]  ;;  %v12328_v46 = vld [vmem:[#allocation84_spill] sm:$0xff] }
 0x37d   :  { %v10246_v56 = vadd.f32 %v2813_v29, %v12323_v9  ;;  %v2974_v4 = vpop.f32.mrf.mxu1  ;;  %v12326_v15 = vld [vmem:[#allocation102_spill] sm:$0xff]  ;;  %v12331_v9 = vld [vmem:[#allocation101_spill] sm:$0xff] }
 0x37e   :  { %6156 = vmatmul.mubr.msk.f32.gmra.mxu0 %vm735_vm3, %v6140_v21  ;;  %v1229_v3 = vadd.f32 %v12326_v15, %v12325_v17  ;;  %v2621_v23 = vadd.f32 %v12327_v11, %v2018_v41  ;;  %v10253_v6 = vadd.f32 %v2974_v4, %v12328_v46  ;;  %v2815_v40 = vpop.f32.mrf.mxu0  ;;  %v12333_v15 = vld [vmem:[#allocation39_spill] sm:$0xff]  ;;  %v10266_v41 = vpop.permute.xlu1 %4996  ;;  %v12335_v46 = vld [vmem:[#allocation90_spill] sm:$0xff] }
 0x37f   :  { %4077 = vmatprep.mubr.f32.mxu0 %v11883_v0  ;;  %12324 = vst [vmem:[#allocation7_spill] sm:$0xff] %v10246_v56  ;;  %6172 = vmatmul.mubr.msk.f32.gmra.mxu1 %vm735_vm3, %v6140_v21  ;;  %v10258_v33 = vadd.f32 %v2815_v40, %v2619_v31  ;;  %v2976_v29 = vpop.f32.mrf.mxu1  ;;  %v12334_v11 = vld [vmem:[#allocation103_spill] sm:$0xff] }
 0x380   :  { %12329 = vst [vmem:[#allocation48_spill] sm:$0xff] %v10253_v6  ;;  %4238 = vmatprep.mubr.f32.mxu1 %v11883_v0  ;;  %v2020_v56 = vadd.f32 %v12331_v9, %v1229_v3  ;;  %v10262_v17 = vadd.f32 %v2976_v29, %v2621_v23  ;;  %v1390_v21 = vadd.f32 %v12334_v11, %v12333_v15  ;;  %v6142_v4 = vld [vmem:[%s11760_s4 + $0x358] sm:$0xff]  ;;  %v2819_v31 = vpop.f32.mrf.mxu0  ;;  %v12336_v3 = vld [vmem:[#allocation137_spill] sm:$0xff]  ;;  %v12341_v6 = vld [vmem:[#allocation106_spill] sm:$0xff] }
 0x381   :  { %12330 = vst [vmem:[#allocation29_spill] sm:$0xff] %v10258_v33  ;;  %v10275_v9 = vadd.f32 %v2819_v31, %v12336_v3  ;;  %v12338_v23 = vld [vmem:[#allocation9_spill] sm:$0xff]  ;;  %v12340_v33 = vld [vmem:[#allocation42_spill] sm:$0xff] }
 0x382   :  { %6157 = vmatmul.mubr.msk.f32.gmra.mxu0 %vm735_vm3, %v6141_v61  ;;  %12332 = vst [vmem:[#allocation32_spill] sm:$0xff] %v10262_v17  ;;  %v2623_v40 = vadd.f32 %v12335_v46, %v2020_v56  ;;  %v2022_v29 = vadd.f32 %v12338_v23, %v1390_v21  ;;  %v2821_v15 = vpop.f32.mrf.mxu0  ;;  %v2980_v11 = vpop.f32.mrf.mxu1  ;;  %v1235_v8 = vadd.f32 %v12341_v6, %v12340_v33  ;;  %v12343_v21 = vld [vmem:[#allocation139_spill] sm:$0xff]  ;;  %v12345_v3 = vld [vmem:[#allocation10_spill] sm:$0xff]  ;;  %v12347_v33 = vld [vmem:[#allocation33_spill] sm:$0xff] }
 0x383   :  { %4083 = vmatprep.mubr.f32.mxu0 %v11883_v0  ;;  %6173 = vmatmul.mubr.msk.f32.gmra.mxu1 %vm735_vm3, %v6141_v61  ;;  %12337 = vst [vmem:[#allocation5_spill] sm:$0xff] %v10275_v9  ;;  %v10285_v46 = vpop.permute.xlu0 %4946  ;;  %v6143_v61 = vld [vmem:[%s11760_s4 + $0x360] sm:$0xff]  ;;  %v10292_v31 = vadd.f32 %v2980_v11, %v12343_v21  ;;  %v12348_v11 = vld [vmem:[#allocation94_spill] sm:$0xff] }
 0x384   :  { %4244 = vmatprep.mubr.f32.mxu1 %v11883_v0  ;;  %v10280_v17 = vadd.f32 %v2821_v15, %v2623_v40  ;;  %v2625_v56 = vadd.f32 %v12342_v53, %v2022_v29  ;;  %v2982_v40 = vpop.f32.mrf.mxu1  ;;  %v2024_v23 = vadd.f32 %v12345_v3, %v1235_v8  ;;  %v10296_v15 = vpop.permute.xlu1 %4962 }
 0x385   :  { %12344 = vst [vmem:[#allocation53_spill] sm:$0xff] %v10292_v31 }
 0x386   :  { %6158 = vmatmul.mubr.msk.f32.gmra.mxu0 %vm735_vm3, %v6142_v4  ;;  %12339 = vst [vmem:[#allocation6_spill] sm:$0xff] %v10280_v17  ;;  %v10299_v53 = vadd.f32 %v2982_v40, %v2625_v56  ;;  %v2825_v6 = vpop.f32.mrf.mxu0  ;;  %v2627_v29 = vadd.f32 %v12347_v33, %v2024_v23  ;;  %v12351_v23 = vld [vmem:[#allocation97_spill] sm:$0xff] }
 0x387   :  { %4089 = vmatprep.mubr.f32.mxu0 %v11883_v0  ;;  %6174 = vmatmul.mubr.msk.f32.gmra.mxu1 %vm735_vm3, %v6142_v4  ;;  %v6144_v4 = vld [vmem:[%s11760_s4 + $0x368] sm:$0xff]  ;;  %v10308_v21 = vadd.f32 %v2825_v6, %v12348_v11  ;;  %v10311_v3 = vpop.permute.xlu0 %4978  ;;  %v12353_v11 = vld [vmem:[#allocation16_spill] sm:$0xff] }
 0x388   :  { %4250 = vmatprep.mubr.f32.mxu1 %v11883_v0  ;;  %12346 = vst [vmem:[#allocation45_spill] sm:$0xff] %v10299_v53  ;;  %v2827_v8 = vpop.f32.mrf.mxu0  ;;  %v10320_v53 = vpop.permute.xlu1 %4994 }
 0x389   :  { %12349 = vst [vmem:[#allocation109_spill] sm:$0xff] %v10308_v21  ;;  %v2986_v56 = vpop.f32.mrf.mxu1  ;;  %v10314_v40 = vadd.f32 %v2827_v8, %v2627_v29  ;;  %v12355_v8 = vld [vmem:[#allocation40_spill] sm:$0xff] }
 0x38a   :  { %6159 = vmatmul.mubr.msk.f32.gmra.mxu0 %vm735_vm3, %v6143_v61  ;;  %v10318_v33 = vadd.f32 %v2986_v56, %v12351_v23  ;;  %v12357_v23 = vld [vmem:[#allocation71_spill] sm:$0xff] }
 0x38b   :  { %4095 = vmatprep.mubr.f32.mxu0 %v11883_v0  ;;  %6175 = vmatmul.mubr.msk.f32.gmra.mxu1 %vm735_vm3, %v6143_v61  ;;  %12350 = vst [vmem:[#allocation52_spill] sm:$0xff] %v10314_v40  ;;  %v6145_v61 = vld [vmem:[%s11760_s4 + $0x370] sm:$0xff]  ;;  %v2988_v6 = vpop.f32.mrf.mxu1  ;;  %v10337_v31 = vpop.permute.xlu0 %4944 }
 0x38c   :  { %4256 = vmatprep.mubr.f32.mxu1 %v11883_v0  ;;  %12352 = vst [vmem:[#allocation8_spill] sm:$0xff] %v10318_v33  ;;  %v10328_v21 = vadd.f32 %v2988_v6, %v12353_v11  ;;  %v12358_v33 = vld [vmem:[#allocation128_spill] sm:$0xff]  ;;  %v12359_v11 = vld [vmem:[#allocation31_spill] sm:$0xff] }
 0x38d   :  { %v2831_v29 = vpop.f32.mrf.mxu0  ;;  %v1438_v40 = vadd.f32 %v12358_v33, %v12357_v23 }
 0x38e   :  { %6160 = vmatmul.mubr.msk.f32.gmra.mxu0 %vm735_vm3, %v6144_v4  ;;  %12354 = vst [vmem:[#allocation118_spill] sm:$0xff] %v10328_v21  ;;  %v10333_v56 = vadd.f32 %v2831_v29, %v12355_v8  ;;  %v12360_v21 = vld [vmem:[#allocation41_spill] sm:$0xff]  ;;  %v5030_v29 = vsel %vm5006_vm10, %v9820_v32, %v9844_v39  ;;  %v12361_v8 = vld [vmem:[#allocation30_spill] sm:$0xff]  ;;  %v5029_v32 = vsel %vm5006_vm10, %v9961_v13, %v9982_v45 }
 0x38f   :  { %4101 = vmatprep.mubr.f32.mxu0 %v11883_v0  ;;  %6176 = vmatmul.mubr.msk.f32.gmra.mxu1 %vm735_vm3, %v6144_v4  ;;  %v6146_v4 = vld [vmem:[%s11760_s4 + $0x378] sm:$0xff]  ;;  %v2833_v6 = vpop.f32.mrf.mxu0  ;;  %v10345_v17 = vrot.slane %v12360_v21, %v12359_v11  ;;  %v10353_v33 = vrot.slane %v12360_v21, %v12361_v8  ;;  %v5014_v11 = vsel %vm5006_vm10, %v9896_v52, %v9920_v37  ;;  %v10371_v21 = vpop.permute.xlu1 %4960 }
 0x390   :  { %4262 = vmatprep.mubr.f32.mxu1 %v11883_v0  ;;  %12356 = vst [vmem:[#allocation49_spill] sm:$0xff] %v10333_v56  ;;  %v2992_v23 = vpop.f32.mrf.mxu1  ;;  %v12362_v56 = vld [vmem:[#allocation107_spill] sm:$0xff]  ;;  %v5021_v39 = vsel %vm5006_vm10, %v9982_v45, %v10020_v7  ;;  %v5013_v52 = vsel %vm5006_vm10, %v10020_v7, %v10040_v20  ;;  %v5037_v37 = vsel %vm5006_vm10, %v10040_v20, %v9961_v13  ;;  %v6179_v20 = vld [vmem:[%s11760_s4 + $0x380] sm:$0xff] }
 0x391   :  { %v10357_v9 = vadd.f32 %v2833_v6, %v12362_v56  ;;  %v12366_v6 = vld [vmem:[#allocation115_spill] sm:$0xff]  ;;  %v5028_v45 = vsel %vm5006_vm10, %v10079_v19, %v10100_v57  ;;  %v5012_v7 = vsel %vm5006_vm10, %v10129_v58, %v10135_v47  ;;  %v5036_v13 = vsel %vm5006_vm10, %v10135_v47, %v10079_v19 }
 0x392   :  { %6161 = vmatmul.mubr.msk.f32.gmra.mxu0 %vm735_vm3, %v6145_v61  ;;  %v10378_v8 = vadd.f32 %v12366_v6, %v1438_v40  ;;  %v5020_v40 = vsel %vm5006_vm10, %v10100_v57, %v10129_v58  ;;  %v5090_v57 = vmul.f32 %v10345_v17, %v5030_v29  ;;  %v5086_v58 = vmul.f32 %v10345_v17, %v5029_v32 }
 0x393   :  { %4107 = vmatprep.mubr.f32.mxu0 %v11883_v0  ;;  %6177 = vmatmul.mubr.msk.f32.gmra.mxu1 %vm735_vm3, %v6145_v61  ;;  %12363 = vst [vmem:[#allocation81_spill] sm:$0xff] %v10357_v9  ;;  %v12364_v61 = vld [vmem:[#allocation104_spill] sm:$0xff]  ;;  %v5087_v9 = vmul.f32 %v12280_v48, %v5021_v39  ;;  %v5088_v47 = vmul.f32 %v10353_v33, %v5013_v52 }
 0x394   :  { %4268 = vmatprep.mubr.f32.mxu1 %v11883_v0  ;;  %v10375_v56 = vadd.f32 %v2992_v23, %v12364_v61  ;;  %12367 = vst [vmem:[#allocation22_spill] sm:$0xff] %v10378_v8  ;;  %v2994_v23 = vpop.f32.mrf.mxu1  ;;  %v12368_v61 = vld [vmem:[#allocation47_spill] sm:$0xff]  ;;  %v2837_v19 = vpop.f32.mrf.mxu0  ;;  %v5089_v14 = vmul.f32 %v12284_v2, %v5037_v37  ;;  %v5084_v32 = vmul.f32 %v10353_v33, %v5012_v7 }
 0x395   :  { %v10410_v6 = vadd.f32 %v2994_v23, %v12368_v61  ;;  %v5027_v23 = vsel %vm5006_vm10, %v10154_v59, %v10169_v12  ;;  %v10423_v61 = vpop.permute.xlu0 %4976  ;;  %v10427_v29 = vadd.f32 %v2837_v19, %v9847_v42  ;;  %v5085_v39 = vmul.f32 %v12284_v2, %v5036_v13  ;;  %v10438_v8 = vpop.permute.xlu1 %4992 }
 0x396   :  { %12365 = vst [vmem:[#allocation88_spill] sm:$0xff] %v10375_v56  ;;  %6162 = vmatmul.mubr.msk.f32.gmra.mxu0 %vm735_vm3, %v6146_v4  ;;  %v5092_v56 = vmul.f32 %v10353_v33, %v5014_v11  ;;  %v5082_v11 = vmul.f32 %v10345_v17, %v5028_v45  ;;  %v2998_v52 = vpop.f32.mrf.mxu1  ;;  %v2839_v37 = vpop.f32.mrf.mxu0  ;;  %v5011_v7 = vsel %vm5006_vm10, %v10188_v54, %v10194_v34 }
 0x397   :  { %4620 = vmatprep.mubr.f32.mxu0 %v11883_v0  ;;  %12369 = vst [vmem:[#allocation26_spill] sm:$0xff] %v10410_v6  ;;  %6178 = vmatmul.mubr.msk.f32.gmra.mxu1 %vm735_vm3, %v6146_v4  ;;  %v5083_v4 = vmul.f32 %v12280_v48, %v5020_v40  ;;  %v5019_v6 = vsel %vm5006_vm10, %v10169_v12, %v10188_v54 }
 0x398   :  { %4781 = vmatprep.mubr.f32.mxu1 %v11883_v0  ;;  %v10442_v42 = vadd.f32 %v2998_v52, %v9881_v1  ;;  %v10445_v45 = vadd.f32 %v2839_v37, %v9869_v26  ;;  %v5078_v40 = vmul.f32 %v10345_v17, %v5027_v23  ;;  %v5035_v12 = vsel %vm5006_vm10, %v10194_v34, %v10154_v59  ;;  %v6180_v26 = vld [vmem:[%s11760_s4 + $0x388] sm:$0xff]  ;;  %v3000_v1 = vpop.f32.mrf.mxu1  ;;  %v2843_v13 = vpop.f32.mrf.mxu0  ;;  %v6181_v52 = vld [vmem:[%s11760_s4 + $0x390] sm:$0xff] }
 0x399   :  { %v10465_v54 = vadd.f32 %v3000_v1, %v9905_v60  ;;  %v10468_v59 = vadd.f32 %v2843_v13, %v9923_v55  ;;  %v5079_v34 = vmul.f32 %v12280_v48, %v5019_v6  ;;  %v5034_v55 = vsel %vm5006_vm10, %v10266_v41, %v10215_v36  ;;  %v10493_v19 = vpop.permute.xlu0 %4942 }
 0x39a   :  { %6195 = vmatmul.mubr.msk.f32.vlgmr.msra.gmra.mxu0 %vm735_vm3, %v6179_v20  ;;  %v2845_v60 = vpop.f32.mrf.mxu0 }
 0x39b   :  { %5176 = vmatpush1.msra.mxu0 %v5090_v57  ;;  %4626 = vmatprep.mubr.f32.mxu0 %v11883_v0  ;;  %v5026_v57 = vsel %vm5006_vm10, %v10215_v36, %v10233_v49 }
 0x39c   :  { %6211 = vmatmul.mubr.msk.f32.vlgmr.msra.gmra.mxu1 %vm735_vm3, %v6179_v20  ;;  %5177 = vmatprep.subr.mxu0 %v5087_v9  ;;  %v5018_v9 = vsel %vm5006_vm10, %v10233_v49, %v10255_v27  ;;  %v5010_v20 = vsel %vm5006_vm10, %v10255_v27, %v10266_v41  ;;  %v10488_v49 = vadd.f32 %v2845_v60, %v9943_v50  ;;  %v2849_v23 = vpop.f32.mrf.mxu0 }
 0x39d   :  { %5337 = vmatpush1.msra.mxu1 %v5092_v56  ;;  %5178 = vmatpush1.msra.mxu0 %v5086_v58  ;;  %v3004_v56 = vpop.f32.mrf.mxu1  ;;  %v5080_v27 = vmul.f32 %v10353_v33, %v5011_v7  ;;  %v5074_v58 = vmul.f32 %v10345_v17, %v5026_v57  ;;  %v5075_v41 = vmul.f32 %v12280_v48, %v5018_v9  ;;  %v4975_v13 = vpop.permute.xlu0 %4974 }
 0x39e   :  { %5338 = vmatprep.subr.mxu1 %v5089_v14  ;;  %5179 = vmatprep.subr.mxu0 %v5083_v4  ;;  %v10485_v6 = vadd.f32 %v3004_v56, %v9932_v43  ;;  %v5081_v14 = vmul.f32 %v12284_v2, %v5035_v12  ;;  %v5076_v43 = vmul.f32 %v10353_v33, %v5010_v20  ;;  %v2851_v12 = vpop.f32.mrf.mxu0 }
 0x39f   :  { %5339 = vmatpush1.msra.mxu1 %v5088_v47  ;;  %6196 = vmatmul.mubr.msk.f32.gmra.mxu0 %vm735_vm3, %v6180_v26  ;;  %v3006_v36 = vpop.f32.mrf.mxu1  ;;  %v4959_v47 = vpop.permute.xlu1 %4958  ;;  %v5077_v4 = vmul.f32 %v12284_v2, %v5034_v55  ;;  %v5009_v7 = vsel %vm5006_vm10, %v10311_v3, %v10320_v53  ;;  %v6182_v55 = vld [vmem:[%s11760_s4 + $0x398] sm:$0xff] }
 0x3a0   :  { %4787 = vmatprep.mubr.f32.mxu1 %v11883_v0  ;;  %5180 = vmatpush1.msra.mxu0 %v5082_v11  ;;  %v10500_v50 = vadd.f32 %v3006_v36, %v9951_v24  ;;  %v5025_v11 = vsel %vm5006_vm10, %v10285_v46, %v10296_v15  ;;  %v5017_v24 = vsel %vm5006_vm10, %v10296_v15, %v10311_v3 }
 0x3a1   :  { %5340 = vmatprep.subr.mxu1 %v5085_v39  ;;  %6212 = vmatmul.mubr.msk.f32.gmra.mxu1 %vm735_vm3, %v6180_v26  ;;  %v10511_v39 = vadd.f32 %v2849_v23, %v9964_v51  ;;  %v3010_v37 = vpop.f32.mrf.mxu1  ;;  %v5033_v51 = vsel %vm5006_vm10, %v10320_v53, %v10285_v46  ;;  %v5024_v15 = vsel %vm5006_vm10, %v10337_v31, %v10371_v21  ;;  %v2855_v53 = vpop.f32.mrf.mxu0 }
 0x3a2   :  { %5181 = vmatprep.subr.mxu0 %v5079_v34  ;;  %5341 = vmatpush1.msra.mxu1 %v5084_v32  ;;  %v10522_v32 = vadd.f32 %v3010_v37, %v9974_v44  ;;  %v10534_v3 = vadd.f32 %v2851_v12, %v9984_v25  ;;  %v5070_v44 = vmul.f32 %v10345_v17, %v5025_v11 }
 0x3a3   :  { %5182 = vmatpush1.msra.mxu0 %v5078_v40  ;;  %5342 = vmatprep.subr.mxu1 %v5081_v14  ;;  %v3012_v40 = vpop.f32.mrf.mxu1  ;;  %v5016_v26 = vsel %vm5006_vm10, %v10371_v21, %v10423_v61  ;;  %v5071_v1 = vmul.f32 %v12280_v48, %v5017_v24  ;;  %v5072_v25 = vmul.f32 %v10353_v33, %v5009_v7  ;;  %v4991_v20 = vpop.permute.xlu1 %4990  ;;  %v12370_v24 = vld [vmem:[#allocation74_spill] sm:$0xff] }
 0x3a4   :  { %4632 = vmatprep.mubr.f32.mxu0 %v11883_v0  ;;  %5183 = vmatprep.subr.mxu0 %v5075_v41  ;;  %v10543_v46 = vadd.f32 %v3012_v40, %v9990_v35  ;;  %v10549_v57 = vadd.f32 %v2855_v53, %v10001_v28  ;;  %v5073_v21 = vmul.f32 %v12284_v2, %v5033_v51  ;;  %v2857_v56 = vpop.f32.mrf.mxu0  ;;  %v12372_v51 = vld [vmem:[#allocation75_spill] sm:$0xff]  ;;  %v12374_v40 = vld [vmem:[#allocation22_spill] sm:$0xff]  ;;  %v12376_v53 = vld [vmem:[#allocation112_spill] sm:$0xff] }
 0x3a5   :  { %5343 = vmatpush1.msra.mxu1 %v5080_v27  ;;  %6197 = vmatmul.mubr.msk.f32.gmra.mxu0 %vm735_vm3, %v6181_v52  ;;  %v3016_v34 = vpop.f32.mrf.mxu1  ;;  %v5066_v9 = vmul.f32 %v10345_v17, %v5024_v15  ;;  %v5067_v60 = vmul.f32 %v12280_v48, %v5016_v26  ;;  %v5032_v28 = vsel %vm5006_vm10, %v10438_v8, %v10337_v31  ;;  %v12373_v15 = vld [vmem:[#allocation129_spill] sm:$0xff] }
 0x3a6   :  { %4793 = vmatprep.mubr.f32.mxu1 %v11883_v0  ;;  %5184 = vmatpush1.msra.mxu0 %v5074_v58  ;;  %v10555_v35 = vadd.f32 %v3016_v34, %v10009_v22  ;;  %v10566_v27 = vadd.f32 %v2857_v56, %v10023_v30  ;;  %v5008_v22 = vsel %vm5006_vm10, %v10423_v61, %v10438_v8  ;;  %v2861_v36 = vpop.f32.mrf.mxu0 }
 0x3a7   :  { %5344 = vmatprep.subr.mxu1 %v5077_v4  ;;  %6213 = vmatmul.mubr.msk.f32.gmra.mxu1 %vm735_vm3, %v6181_v52  ;;  %v3018_v14 = vpop.f32.mrf.mxu1  ;;  %v5015_v58 = vsel %vm5006_vm10, %v4959_v47, %v4975_v13  ;;  %v5023_v30 = vsel %vm5006_vm10, %v10493_v19, %v4959_v47  ;;  %v5031_v41 = vsel %vm5006_vm10, %v4991_v20, %v10493_v19 }
 0x3a8   :  { %5185 = vmatprep.subr.mxu0 %v5071_v1  ;;  %5345 = vmatpush1.msra.mxu1 %v5076_v43  ;;  %v10575_v31 = vadd.f32 %v3018_v14, %v10032_v10  ;;  %v10585_v8 = vadd.f32 %v2861_v36, %v10043_v5  ;;  %v5069_v43 = vmul.f32 %v12284_v2, %v5032_v28  ;;  %v2863_v23 = vpop.f32.mrf.mxu0  ;;  %v12380_v28 = vld [vmem:[#allocation78_spill] sm:$0xff] }
 0x3a9   :  { %5186 = vmatpush1.msra.mxu0 %v5070_v44  ;;  %5346 = vmatprep.subr.mxu1 %v5073_v21  ;;  %v3022_v61 = vpop.f32.mrf.mxu1  ;;  %v5007_v10 = vsel %vm5006_vm10, %v4975_v13, %v4991_v20  ;;  %v5068_v19 = vmul.f32 %v10353_v33, %v5008_v22  ;;  %v5063_v4 = vmul.f32 %v12280_v48, %v5015_v58  ;;  %v12371_v48 = vld [vmem:[#allocation23_spill] sm:$0xff]  ;;  %v12375_v44 = vld [vmem:[#allocation114_spill] sm:$0xff] }
 0x3aa   :  { %4638 = vmatprep.mubr.f32.mxu0 %v11883_v0  ;;  %5187 = vmatprep.subr.mxu0 %v5067_v60  ;;  %v10592_v47 = vadd.f32 %v3022_v61, %v10049_v63  ;;  %v10598_v5 = vadd.f32 %v2863_v23, %v10060_v18  ;;  %v5062_v62 = vmul.f32 %v10345_v17, %v5023_v30  ;;  %v2867_v37 = vpop.f32.mrf.mxu0  ;;  %v6183_v18 = vld [vmem:[%s11760_s4 + $0x3a0] sm:$0xff]  ;;  %v12382_v22 = vld [vmem:[#allocation54_spill] sm:$0xff]  ;;  %v12383_v30 = vld [vmem:[#allocation51_spill] sm:$0xff] }
 0x3ab   :  { %5347 = vmatpush1.msra.mxu1 %v5072_v25  ;;  %6198 = vmatmul.mubr.msk.f32.gmra.mxu0 %vm735_vm3, %v6182_v55  ;;  %v3024_v11 = vpop.f32.mrf.mxu1  ;;  %v5065_v52 = vmul.f32 %v12284_v2, %v5031_v41  ;;  %v1283_v7 = vadd.f32 %v12371_v48, %v12370_v24  ;;  %v5064_v12 = vmul.f32 %v10353_v33, %v5007_v10  ;;  %v12377_v25 = vld [vmem:[#allocation57_spill] sm:$0xff]  ;;  %v12385_v10 = vld [vmem:[#allocation131_spill] sm:$0xff] }
 0x3ac   :  { %4799 = vmatprep.mubr.f32.mxu1 %v11883_v0  ;;  %5188 = vmatpush1.msra.mxu0 %v5066_v9  ;;  %v10604_v63 = vadd.f32 %v3024_v11, %v10068_v38  ;;  %v10613_v2 = vadd.f32 %v2867_v37, %v10082_v16  ;;  %v1444_v38 = vadd.f32 %v12373_v15, %v12372_v51  ;;  %v2869_v1 = vpop.f32.mrf.mxu0  ;;  %v12378_v16 = vld [vmem:[#allocation50_spill] sm:$0xff]  ;;  %v12379_v9 = vld [vmem:[#allocation28_spill] sm:$0xff]  ;;  %v12388_v37 = vld [vmem:[#allocation61_spill] sm:$0xff] }
 0x3ad   :  { %5348 = vmatprep.subr.mxu1 %v5069_v43  ;;  %6214 = vmatmul.mubr.msk.f32.gmra.mxu1 %vm735_vm3, %v6182_v55  ;;  %v3028_v17 = vpop.f32.mrf.mxu1  ;;  %v2657_v26 = vadd.f32 %v12375_v44, %v12374_v40  ;;  %v2056_v13 = vadd.f32 %v12377_v25, %v1283_v7  ;;  %v10625_v34 = vadd.f32 %v2869_v1, %v12378_v16  ;;  %v12381_v55 = vld [vmem:[#allocation130_spill] sm:$0xff]  ;;  %v12384_v43 = vld [vmem:[#allocation79_spill] sm:$0xff]  ;;  %v12387_v11 = vld [vmem:[#allocation116_spill] sm:$0xff] }
 0x3ae   :  { %5189 = vmatprep.subr.mxu0 %v5063_v4  ;;  %5349 = vmatpush1.msra.mxu1 %v5068_v19  ;;  %v10620_v33 = vadd.f32 %v3028_v17, %v12376_v53  ;;  %v2058_v20 = vadd.f32 %v12379_v9, %v1444_v38  ;;  %v2873_v60 = vpop.f32.mrf.mxu0  ;;  %v1289_v14 = vadd.f32 %v12381_v55, %v12380_v28  ;;  %v6184_v36 = vld [vmem:[%s11760_s4 + $0x3a8] sm:$0xff]  ;;  %v12386_v19 = vld [vmem:[#allocation119_spill] sm:$0xff]  ;;  %v12393_v1 = vld [vmem:[#allocation44_spill] sm:$0xff] }
 0x3af   :  { %5190 = vmatpush1.msra.mxu0 %v5062_v62  ;;  %5350 = vmatprep.subr.mxu1 %v5065_v52  ;;  %v3030_v21 = vpop.f32.mrf.mxu1  ;;  %v2659_v58 = vadd.f32 %v12382_v22, %v2056_v13  ;;  %v10641_v41 = vadd.f32 %v2873_v60, %v12383_v30  ;;  %v1450_v23 = vadd.f32 %v12385_v10, %v12384_v43  ;;  %v12390_v15 = vld [vmem:[#allocation82_spill] sm:$0xff]  ;;  %v12391_v38 = vld [vmem:[#allocation133_spill] sm:$0xff]  ;;  %v12392_v44 = vld [vmem:[#allocation55_spill] sm:$0xff] }
 0x3b0   :  { %4644 = vmatprep.mubr.f32.mxu0 %v11883_v0  ;;  %5351 = vmatpush1.msra.mxu1 %v5064_v12  ;;  %v10630_v56 = vadd.f32 %v3030_v21, %v2657_v26  ;;  %v2661_v4 = vadd.f32 %v12386_v19, %v2058_v20  ;;  %v2875_v52 = vpop.f32.mrf.mxu0  ;;  %v2060_v24 = vadd.f32 %v12388_v37, %v1289_v14  ;;  %v12389_v12 = vld [vmem:[#allocation64_spill] sm:$0xff]  ;;  %v6185_v53 = vld [vmem:[%s11760_s4 + $0x3b0] sm:$0xff]  ;;  %v12397_v28 = vld [vmem:[#allocation105_spill] sm:$0xff] }
 0x3b1   :  { %6199 = vmatmul.mubr.msk.f32.gmra.mxu0 %vm735_vm3, %v6183_v18  ;;  %4805 = vmatprep.mubr.f32.mxu1 %v11883_v0  ;;  %v3034_v61 = vpop.f32.mrf.mxu1  ;;  %v10651_v48 = vadd.f32 %v2875_v52, %v2659_v58  ;;  %v1295_v40 = vadd.f32 %v12391_v38, %v12390_v15  ;;  %v12394_v16 = vld [vmem:[#allocation83_spill] sm:$0xff]  ;;  %v12395_v21 = vld [vmem:[#allocation134_spill] sm:$0xff]  ;;  %v12396_v20 = vld [vmem:[#allocation120_spill] sm:$0xff] }
 0x3b2   :  { %6215 = vmatmul.mubr.msk.f32.gmra.mxu1 %vm735_vm3, %v6183_v18  ;;  %4650 = vmatprep.mubr.f32.mxu0 %v11883_v0  ;;  %v10648_v62 = vadd.f32 %v3034_v61, %v12387_v11  ;;  %v2062_v18 = vadd.f32 %v12389_v12, %v1450_v23  ;;  %v2879_v51 = vpop.f32.mrf.mxu0  ;;  %v2663_v26 = vadd.f32 %v12392_v44, %v2060_v24  ;;  %v12398_v22 = vld [vmem:[#allocation69_spill] sm:$0xff]  ;;  %v12399_v61 = vld [vmem:[#allocation72_spill] sm:$0xff]  ;;  %v12400_v19 = vld [vmem:[#allocation86_spill] sm:$0xff] }
 0x3b3   :  { %4811 = vmatprep.mubr.f32.mxu1 %v11883_v0  ;;  %v3036_v7 = vpop.f32.mrf.mxu1  ;;  %v10666_v25 = vadd.f32 %v2879_v51, %v12393_v1  ;;  %v1456_v9 = vadd.f32 %v12395_v21, %v12394_v16  ;;  %v2064_v58 = vadd.f32 %v12398_v22, %v1295_v40  ;;  %v12402_v52 = vld [vmem:[#allocation59_spill] sm:$0xff]  ;;  %v12405_v15 = vld [vmem:[#allocation21_spill] sm:$0xff]  ;;  %v12406_v40 = vld [vmem:[#allocation122_spill] sm:$0xff] }
 0x3b4   :  { %v10655_v17 = vadd.f32 %v3036_v7, %v2661_v4  ;;  %v2665_v60 = vadd.f32 %v12396_v20, %v2062_v18  ;;  %v2881_v14 = vpop.f32.mrf.mxu0  ;;  %v12401_v4 = vld [vmem:[#allocation138_spill] sm:$0xff]  ;;  %v6186_v24 = vld [vmem:[%s11760_s4 + $0x3b8] sm:$0xff]  ;;  %v12410_v22 = vld [vmem:[#allocation89_spill] sm:$0xff] }
 0x3b5   :  { %6200 = vmatmul.mubr.msk.f32.gmra.mxu0 %vm735_vm3, %v6184_v36  ;;  %v3040_v13 = vpop.f32.mrf.mxu1  ;;  %v2066_v43 = vadd.f32 %v12399_v61, %v1456_v9  ;;  %v1301_v11 = vadd.f32 %v12401_v4, %v12400_v19  ;;  %v2667_v37 = vadd.f32 %v12402_v52, %v2064_v58  ;;  %v12403_v7 = vld [vmem:[#allocation58_spill] sm:$0xff]  ;;  %v12404_v51 = vld [vmem:[#allocation87_spill] sm:$0xff]  ;;  %v12411_v58 = vld [vmem:[#allocation140_spill] sm:$0xff] }
 0x3b6   :  { %6216 = vmatmul.mubr.msk.f32.gmra.mxu1 %vm735_vm3, %v6184_v36  ;;  %4656 = vmatprep.mubr.f32.mxu0 %v11883_v0  ;;  %v10673_v55 = vadd.f32 %v3040_v13, %v12397_v28  ;;  %v10676_v36 = vadd.f32 %v2881_v14, %v2663_v26  ;;  %v2885_v23 = vpop.f32.mrf.mxu0  ;;  %v1462_v38 = vadd.f32 %v12405_v15, %v12404_v51  ;;  %v12407_v26 = vld [vmem:[#allocation121_spill] sm:$0xff]  ;;  %v12408_v13 = vld [vmem:[#allocation136_spill] sm:$0xff]  ;;  %v12409_v20 = vld [vmem:[#allocation18_spill] sm:$0xff] }
 0x3b7   :  { %4817 = vmatprep.mubr.f32.mxu1 %v11883_v0  ;;  %v3042_v30 = vpop.f32.mrf.mxu1  ;;  %v10691_v12 = vadd.f32 %v2885_v23, %v12403_v7  ;;  %v2669_v44 = vadd.f32 %v12406_v40, %v2066_v43  ;;  %v2068_v16 = vadd.f32 %v12408_v13, %v1301_v11  ;;  %v12412_v61 = vld [vmem:[#allocation63_spill] sm:$0xff]  ;;  %v6187_v23 = vld [vmem:[%s11760_s4 + $0x3c0] sm:$0xff]  ;;  %v12413_v19 = vld [vmem:[#allocation62_spill] sm:$0xff] }
 0x3b8   :  { %v10680_v10 = vadd.f32 %v3042_v30, %v2665_v60  ;;  %v2070_v60 = vadd.f32 %v12409_v20, %v1462_v38  ;;  %v1307_v30 = vadd.f32 %v12411_v58, %v12410_v22  ;;  %v12414_v52 = vld [vmem:[#allocation91_spill] sm:$0xff]  ;;  %v12418_v40 = vld [vmem:[#allocation20_spill] sm:$0xff]  ;;  %v12419_v13 = vld [vmem:[#allocation77_spill] sm:$0xff] }
 0x3b9   :  { %6201 = vmatmul.mubr.msk.f32.gmra.mxu0 %vm735_vm3, %v6185_v53  ;;  %v3046_v18 = vpop.f32.mrf.mxu1  ;;  %v2671_v43 = vadd.f32 %v12412_v61, %v2068_v16  ;;  %v12417_v15 = vld [vmem:[#allocation123_spill] sm:$0xff] }
 0x3ba   :  { %6217 = vmatmul.mubr.msk.f32.gmra.mxu1 %vm735_vm3, %v6185_v53  ;;  %4662 = vmatprep.mubr.f32.mxu0 %v11883_v0  ;;  %v10698_v1 = vadd.f32 %v3046_v18, %v12407_v26  ;;  %v2887_v53 = vpop.f32.mrf.mxu0  ;;  %v12416_v18 = vld [vmem:[#allocation124_spill] sm:$0xff]  ;;  %v12422_v58 = vld [vmem:[#allocation67_spill] sm:$0xff] }
 0x3bb   :  { %4823 = vmatprep.mubr.f32.mxu1 %v11883_v0  ;;  %v10701_v21 = vadd.f32 %v2887_v53, %v2667_v37  ;;  %v3048_v9 = vpop.f32.mrf.mxu1  ;;  %v12415_v37 = vld [vmem:[#allocation19_spill] sm:$0xff]  ;;  %v2673_v51 = vadd.f32 %v12416_v18, %v2070_v60  ;;  %v12421_v60 = vld [vmem:[#allocation13_spill] sm:$0xff]  ;;  %v12426_v18 = vld [vmem:[#allocation126_spill] sm:$0xff] }
 0x3bc   :  { %v10705_v28 = vadd.f32 %v3048_v9, %v2669_v44  ;;  %v2891_v14 = vpop.f32.mrf.mxu0  ;;  %v1468_v7 = vadd.f32 %v12415_v37, %v12414_v52  ;;  %v2072_v44 = vadd.f32 %v12418_v40, %v1307_v30  ;;  %v6188_v30 = vld [vmem:[%s11760_s4 + $0x3c8] sm:$0xff]  ;;  %v12424_v52 = vld [vmem:[#allocation95_spill] sm:$0xff]  ;;  %v12425_v37 = vld [vmem:[#allocation96_spill] sm:$0xff] }
 0x3bd   :  { %6202 = vmatmul.mubr.msk.f32.gmra.mxu0 %vm735_vm3, %v6186_v24  ;;  %v10716_v4 = vadd.f32 %v2891_v14, %v12413_v19  ;;  %v3052_v11 = vpop.f32.mrf.mxu1  ;;  %v12420_v14 = vld [vmem:[#allocation93_spill] sm:$0xff]  ;;  %v12428_v40 = vld [vmem:[#allocation80_spill] sm:$0xff] }
 0x3be   :  { %6218 = vmatmul.mubr.msk.f32.gmra.mxu1 %vm735_vm3, %v6186_v24  ;;  %4668 = vmatprep.mubr.f32.mxu0 %v11883_v0  ;;  %v10723_v38 = vadd.f32 %v3052_v11, %v12417_v15  ;;  %v2893_v24 = vpop.f32.mrf.mxu0  ;;  %v2074_v16 = vadd.f32 %v12419_v13, %v1468_v7  ;;  %v1313_v22 = vadd.f32 %v12421_v60, %v12420_v14  ;;  %v12427_v15 = vld [vmem:[#allocation125_spill] sm:$0xff] }
 0x3bf   :  { %4829 = vmatprep.mubr.f32.mxu1 %v11883_v0  ;;  %v10726_v26 = vadd.f32 %v2893_v24, %v2671_v43  ;;  %v3054_v53 = vpop.f32.mrf.mxu1  ;;  %v2675_v61 = vadd.f32 %v12422_v58, %v2072_v44  ;;  %v12423_v43 = vld [vmem:[#allocation66_spill] sm:$0xff]  ;;  %v1474_v7 = vadd.f32 %v12425_v37, %v12424_v52  ;;  %v12429_v14 = vld [vmem:[#allocation25_spill] sm:$0xff]  ;;  %v12432_v37 = vld [vmem:[#allocation127_spill] sm:$0xff] }
 0x3c0   :  { %v10730_v9 = vadd.f32 %v3054_v53, %v2673_v51  ;;  %v2897_v20 = vpop.f32.mrf.mxu0  ;;  %v2677_v51 = vadd.f32 %v12426_v18, %v2074_v16  ;;  %v2076_v44 = vadd.f32 %v12428_v40, %v1313_v22  ;;  %v6189_v22 = vld [vmem:[%s11760_s4 + $0x3d0] sm:$0xff] }
 0x3c1   :  { %6203 = vmatmul.mubr.msk.f32.gmra.mxu0 %vm735_vm3, %v6187_v23  ;;  %v10741_v19 = vadd.f32 %v2897_v20, %v12423_v43  ;;  %v3058_v11 = vpop.f32.mrf.mxu1  ;;  %v2078_v20 = vadd.f32 %v12429_v14, %v1474_v7  ;;  %v12430_v43 = vld [vmem:[#allocation70_spill] sm:$0xff]  ;;  %v12433_v18 = vld [vmem:[#allocation11_spill] sm:$0xff] }
 0x3c2   :  { %6219 = vmatmul.mubr.msk.f32.gmra.mxu1 %vm735_vm3, %v6187_v23  ;;  %4674 = vmatprep.mubr.f32.mxu0 %v11883_v0  ;;  %v10748_v24 = vadd.f32 %v3058_v11, %v12427_v15  ;;  %v2899_v23 = vpop.f32.mrf.mxu0  ;;  %v2679_v16 = vadd.f32 %v12430_v43, %v2076_v44  ;;  %v12434_v14 = vld [vmem:[#allocation7_spill] sm:$0xff]  ;;  %v12435_v43 = vld [vmem:[#allocation48_spill] sm:$0xff] }
 0x3c3   :  { %4835 = vmatprep.mubr.f32.mxu1 %v11883_v0  ;;  %v10751_v53 = vadd.f32 %v2899_v23, %v2675_v61  ;;  %v3060_v13 = vpop.f32.mrf.mxu1  ;;  %v12431_v61 = vld [vmem:[#allocation12_spill] sm:$0xff]  ;;  %v2681_v7 = vadd.f32 %v12432_v37, %v2078_v20 }
 0x3c4   :  { %v10755_v60 = vadd.f32 %v3060_v13, %v2677_v51  ;;  %v2903_v58 = vpop.f32.mrf.mxu0  ;;  %v6190_v13 = vld [vmem:[%s11760_s4 + $0x3d8] sm:$0xff] }
 0x3c5   :  { %6204 = vmatmul.mubr.msk.f32.gmra.mxu0 %vm735_vm3, %v6188_v30  ;;  %v10764_v11 = vadd.f32 %v2903_v58, %v12431_v61  ;;  %v3064_v52 = vpop.f32.mrf.mxu1 }
 0x3c6   :  { %6220 = vmatmul.mubr.msk.f32.gmra.mxu1 %vm735_vm3, %v6188_v30  ;;  %4680 = vmatprep.mubr.f32.mxu0 %v11883_v0  ;;  %v10769_v51 = vadd.f32 %v3064_v52, %v12433_v18  ;;  %v2905_v15 = vpop.f32.mrf.mxu0  ;;  %v12436_v52 = vld [vmem:[#allocation29_spill] sm:$0xff] }
 0x3c7   :  { %4841 = vmatprep.mubr.f32.mxu1 %v11883_v0  ;;  %v10771_v23 = vadd.f32 %v2905_v15, %v2679_v16  ;;  %v3066_v30 = vpop.f32.mrf.mxu1  ;;  %v6191_v15 = vld [vmem:[%s11760_s4 + $0x3e0] sm:$0xff] }
 0x3c8   :  { %v10774_v40 = vadd.f32 %v3066_v30, %v2681_v7  ;;  %v3416_v44 = vpop.f32.mrf.mxu0  ;;  %v12437_v7 = vld [vmem:[#allocation32_spill] sm:$0xff] }
 0x3c9   :  { %6205 = vmatmul.mubr.msk.f32.gmra.mxu0 %vm735_vm3, %v6189_v22  ;;  %v10782_v20 = vadd.f32 %v3416_v44, %v12434_v14  ;;  %v3577_v58 = vpop.f32.mrf.mxu1  ;;  %v12438_v44 = vld [vmem:[#allocation5_spill] sm:$0xff] }
 0x3ca   :  { %6221 = vmatmul.mubr.msk.f32.gmra.mxu1 %vm735_vm3, %v6189_v22  ;;  %4686 = vmatprep.mubr.f32.mxu0 %v11883_v0  ;;  %v10786_v16 = vadd.f32 %v3577_v58, %v12435_v43  ;;  %v3418_v61 = vpop.f32.mrf.mxu0 }
 0x3cb   :  { %4847 = vmatprep.mubr.f32.mxu1 %v11883_v0  ;;  %v10789_v37 = vadd.f32 %v3418_v61, %v12436_v52  ;;  %v3579_v22 = vpop.f32.mrf.mxu1  ;;  %v12440_v61 = vld [vmem:[#allocation6_spill] sm:$0xff] }
 0x3cc   :  { %v10793_v18 = vadd.f32 %v3579_v22, %v12437_v7  ;;  %v3422_v30 = vpop.f32.mrf.mxu0  ;;  %v12442_v22 = vld [vmem:[#allocation53_spill] sm:$0xff] }
 0x3cd   :  { %6206 = vmatmul.mubr.msk.f32.gmra.mxu0 %vm735_vm3, %v6190_v13  ;;  %v10802_v14 = vadd.f32 %v3422_v30, %v12438_v44  ;;  %v12444_v44 = vld [vmem:[#allocation45_spill] sm:$0xff] }
 0x3ce   :  { %6222 = vmatmul.mubr.msk.f32.gmra.mxu1 %vm735_vm3, %v6190_v13  ;;  %4692 = vmatprep.mubr.f32.mxu0 %v11883_v0  ;;  %v3424_v58 = vpop.f32.mrf.mxu0  ;;  %v3583_v43 = vpop.f32.mrf.mxu1  ;;  %v6192_v13 = vld [vmem:[%s11760_s4 + $0x3e8] sm:$0xff] }
 0x3cf   :  { %4853 = vmatprep.mubr.f32.mxu1 %v11883_v0  ;;  %12439 = vst [vmem:[#allocation111_spill] sm:$0xff] %v10802_v14  ;;  %v10806_v52 = vadd.f32 %v3424_v58, %v12440_v61  ;;  %v10814_v7 = vadd.f32 %v3583_v43, %v12442_v22  ;;  %v12446_v61 = vld [vmem:[#allocation109_spill] sm:$0xff] }
 0x3d0   :  { %v3585_v30 = vpop.f32.mrf.mxu1 }
 0x3d1   :  { %6207 = vmatmul.mubr.msk.f32.gmra.mxu0 %vm735_vm3, %v6191_v15  ;;  %12441 = vst [vmem:[#allocation37_spill] sm:$0xff] %v10806_v52  ;;  %12443 = vst [vmem:[#allocation142_spill] sm:$0xff] %v10814_v7  ;;  %v10818_v14 = vadd.f32 %v3585_v30, %v12444_v44  ;;  %v12448_v30 = vld [vmem:[#allocation52_spill] sm:$0xff] }
 0x3d2   :  { %6223 = vmatmul.mubr.msk.f32.gmra.mxu1 %vm735_vm3, %v6191_v15  ;;  %4698 = vmatprep.mubr.f32.mxu0 %v11883_v0  ;;  %v6193_v15 = vld [vmem:[%s11760_s4 + $0x3f0] sm:$0xff] }
 0x3d3   :  { %4859 = vmatprep.mubr.f32.mxu1 %v11883_v0  ;;  %12445 = vst [vmem:[#allocation141_spill] sm:$0xff] %v10818_v14  ;;  %v3428_v58 = vpop.f32.mrf.mxu0  ;;  %v12450_v14 = vld [vmem:[#allocation8_spill] sm:$0xff] }
 0x3d4   :  { %v10827_v43 = vadd.f32 %v3428_v58, %v12446_v61  ;;  %v6194_v58 = vld [vmem:[%s11760_s4 + $0x3f8] sm:$0xff] }
 0x3d5   :  { %6208 = vmatmul.mubr.msk.f32.gmra.mxu0 %vm735_vm3, %v6192_v13  ;;  %v3430_v22 = vpop.f32.mrf.mxu0 }
 0x3d6   :  { %6224 = vmatmul.mubr.msk.f32.gmra.mxu1 %vm735_vm3, %v6192_v13  ;;  %4704 = vmatprep.mubr.f32.mxu0 %v11883_v0  ;;  %12447 = vst [vmem:[#allocation43_spill] sm:$0xff] %v10827_v43  ;;  %v3589_v52 = vpop.f32.mrf.mxu1  ;;  %v10831_v44 = vadd.f32 %v3430_v22, %v12448_v30  ;;  %v12452_v43 = vld [vmem:[#allocation118_spill] sm:$0xff]  ;;  %v12454_v30 = vld [vmem:[#allocation49_spill] sm:$0xff] }
 0x3d7   :  { %4865 = vmatprep.mubr.f32.mxu1 %v11883_v0  ;;  %v10835_v13 = vadd.f32 %v3589_v52, %v12450_v14  ;;  %v6227_v52 = vld [vmem:[%s11760_s4 + $0x400] sm:$0xff] }
 0x3d8   :  { %12449 = vst [vmem:[#allocation108_spill] sm:$0xff] %v10831_v44  ;;  %v3591_v61 = vpop.f32.mrf.mxu1 }
 0x3d9   :  { %6209 = vmatmul.mubr.msk.f32.gmra.mxu0 %vm735_vm3, %v6193_v15  ;;  %12451 = vst [vmem:[#allocation113_spill] sm:$0xff] %v10835_v13  ;;  %v10844_v7 = vadd.f32 %v3591_v61, %v12452_v43  ;;  %v12456_v43 = vld [vmem:[#allocation81_spill] sm:$0xff] }
 0x3da   :  { %6225 = vmatmul.mubr.msk.f32.gmra.mxu1 %vm735_vm3, %v6193_v15  ;;  %4710 = vmatprep.mubr.f32.mxu0 %v11883_v0  ;;  %v3434_v22 = vpop.f32.mrf.mxu0 }
 0x3db   :  { %4871 = vmatprep.mubr.f32.mxu1 %v11883_v0  ;;  %12453 = vst [vmem:[#allocation56_spill] sm:$0xff] %v10844_v7  ;;  %v10848_v14 = vadd.f32 %v3434_v22, %v12454_v30  ;;  %v12458_v7 = vld [vmem:[#allocation88_spill] sm:$0xff]  ;;  %v12459_v30 = vld [vmem:[#allocation26_spill] sm:$0xff] }
 0x3dc   :  { %v3436_v15 = vpop.f32.mrf.mxu0 }
 0x3dd   :  { %6210 = vmatmul.mubr.msk.f32.gmra.mxu0 %vm735_vm3, %v6194_v58  ;;  %12455 = vst [vmem:[#allocation46_spill] sm:$0xff] %v10848_v14  ;;  %v3595_v44 = vpop.f32.mrf.mxu1  ;;  %v10857_v61 = vadd.f32 %v3436_v15, %v12456_v43 }
 0x3de   :  { %6226 = vmatmul.mubr.msk.f32.gmra.mxu1 %vm735_vm3, %v6194_v58  ;;  %5223 = vmatprep.mubr.f32.mxu0 %v11883_v0  ;;  %v10860_v13 = vadd.f32 %v3595_v44, %v12458_v7  ;;  %v6228_v58 = vld [vmem:[%s11760_s4 + $0x408] sm:$0xff] }
 0x3df   :  { %5384 = vmatprep.mubr.f32.mxu1 %v11883_v0  ;;  %12457 = vst [vmem:[#allocation27_spill] sm:$0xff] %v10857_v61  ;;  %v3597_v22 = vpop.f32.mrf.mxu1 }
 0x3e0   :  { %v10869_v14 = vadd.f32 %v3597_v22, %v12459_v30 }
 0x3e1   :  { %6243 = vmatmul.mubr.msk.f32.vlgmr.msra.gmra.mxu0 %vm735_vm3, %v6227_v52  ;;  %v3440_v15 = vpop.f32.mrf.mxu0 }
 0x3e2   :  { %6259 = vmatmul.mubr.msk.f32.vlgmr.msra.gmra.mxu1 %vm735_vm3, %v6227_v52  ;;  %5229 = vmatprep.mubr.f32.mxu0 %v11883_v0  ;;  %12460 = vst [vmem:[#allocation110_spill] sm:$0xff] %v10869_v14  ;;  %v10873_v7 = vadd.f32 %v3440_v15, %v10427_v29  ;;  %v6229_v52 = vld [vmem:[%s11760_s4 + $0x410] sm:$0xff] }
 0x3e3   :  { %5390 = vmatprep.mubr.f32.mxu1 %v11883_v0  ;;  %v3442_v43 = vpop.f32.mrf.mxu0 }
 0x3e4   :  { %12461 = vst [vmem:[#allocation117_spill] sm:$0xff] %v10873_v7  ;;  %v3601_v44 = vpop.f32.mrf.mxu1  ;;  %v10885_v30 = vadd.f32 %v3442_v43, %v10445_v45 }
 0x3e5   :  { %6244 = vmatmul.mubr.msk.f32.gmra.mxu0 %vm735_vm3, %v6228_v58  ;;  %v10882_v22 = vadd.f32 %v3601_v44, %v10442_v42  ;;  %v3446_v15 = vpop.f32.mrf.mxu0  ;;  %v6230_v42 = vld [vmem:[%s11760_s4 + $0x418] sm:$0xff] }
 0x3e6   :  { %6260 = vmatmul.mubr.msk.f32.gmra.mxu1 %vm735_vm3, %v6228_v58  ;;  %5235 = vmatprep.mubr.f32.mxu0 %v11883_v0  ;;  %v3603_v29 = vpop.f32.mrf.mxu1  ;;  %v10892_v58 = vadd.f32 %v3446_v15, %v10468_v59 }
 0x3e7   :  { %5396 = vmatprep.mubr.f32.mxu1 %v11883_v0  ;;  %v10889_v7 = vadd.f32 %v3603_v29, %v10465_v54  ;;  %v3448_v61 = vpop.f32.mrf.mxu0 }
 0x3e8   :  { %v3607_v14 = vpop.f32.mrf.mxu1  ;;  %v10904_v54 = vadd.f32 %v3448_v61, %v10488_v49 }
 0x3e9   :  { %6245 = vmatmul.mubr.msk.f32.gmra.mxu0 %vm735_vm3, %v6229_v52  ;;  %v10901_v45 = vadd.f32 %v3607_v14, %v10485_v6  ;;  %v6231_v6 = vld [vmem:[%s11760_s4 + $0x420] sm:$0xff] }
 0x3ea   :  { %6261 = vmatmul.mubr.msk.f32.gmra.mxu1 %vm735_vm3, %v6229_v52  ;;  %5241 = vmatprep.mubr.f32.mxu0 %v11883_v0  ;;  %v3609_v59 = vpop.f32.mrf.mxu1  ;;  %v3452_v44 = vpop.f32.mrf.mxu0 }
 0x3eb   :  { %5402 = vmatprep.mubr.f32.mxu1 %v11883_v0  ;;  %v10908_v43 = vadd.f32 %v3609_v59, %v10500_v50  ;;  %v10911_v52 = vadd.f32 %v3452_v44, %v10511_v39 }
 0x3ec   :  { %v3613_v29 = vpop.f32.mrf.mxu1  ;;  %v3454_v15 = vpop.f32.mrf.mxu0 }
 0x3ed   :  { %6246 = vmatmul.mubr.msk.f32.gmra.mxu0 %vm735_vm3, %v6230_v42  ;;  %v10920_v49 = vadd.f32 %v3613_v29, %v10522_v32  ;;  %v10923_v50 = vadd.f32 %v3454_v15, %v10534_v3  ;;  %v6232_v32 = vld [vmem:[%s11760_s4 + $0x428] sm:$0xff] }
 0x3ee   :  { %6262 = vmatmul.mubr.msk.f32.gmra.mxu1 %vm735_vm3, %v6230_v42  ;;  %5247 = vmatprep.mubr.f32.mxu0 %v11883_v0  ;;  %v3615_v39 = vpop.f32.mrf.mxu1  ;;  %v3458_v14 = vpop.f32.mrf.mxu0 }
 0x3ef   :  { %5408 = vmatprep.mubr.f32.mxu1 %v11883_v0  ;;  %v10927_v61 = vadd.f32 %v3615_v39, %v10543_v46  ;;  %v10930_v42 = vadd.f32 %v3458_v14, %v10549_v57 }
 0x3f0   :  { %v3619_v59 = vpop.f32.mrf.mxu1  ;;  %v3460_v44 = vpop.f32.mrf.mxu0 }
 0x3f1   :  { %6247 = vmatmul.mubr.msk.f32.gmra.mxu0 %vm735_vm3, %v6231_v6  ;;  %v10939_v3 = vadd.f32 %v3619_v59, %v10555_v35  ;;  %v10942_v46 = vadd.f32 %v3460_v44, %v10566_v27  ;;  %v6233_v35 = vld [vmem:[%s11760_s4 + $0x430] sm:$0xff] }
 0x3f2   :  { %6263 = vmatmul.mubr.msk.f32.gmra.mxu1 %vm735_vm3, %v6231_v6  ;;  %5253 = vmatprep.mubr.f32.mxu0 %v11883_v0  ;;  %v3621_v57 = vpop.f32.mrf.mxu1  ;;  %v3464_v29 = vpop.f32.mrf.mxu0 }
 0x3f3   :  { %5414 = vmatprep.mubr.f32.mxu1 %v11883_v0  ;;  %v10946_v15 = vadd.f32 %v3621_v57, %v10575_v31  ;;  %v10949_v6 = vadd.f32 %v3464_v29, %v10585_v8 }
 0x3f4   :  { %v3625_v39 = vpop.f32.mrf.mxu1  ;;  %v3466_v14 = vpop.f32.mrf.mxu0 }
 0x3f5   :  { %6248 = vmatmul.mubr.msk.f32.gmra.mxu0 %vm735_vm3, %v6232_v32  ;;  %v10958_v27 = vadd.f32 %v3625_v39, %v10592_v47  ;;  %v10961_v31 = vadd.f32 %v3466_v14, %v10598_v5  ;;  %v6234_v47 = vld [vmem:[%s11760_s4 + $0x438] sm:$0xff] }
 0x3f6   :  { %6264 = vmatmul.mubr.msk.f32.gmra.mxu1 %vm735_vm3, %v6232_v32  ;;  %5259 = vmatprep.mubr.f32.mxu0 %v11883_v0  ;;  %v3627_v8 = vpop.f32.mrf.mxu1  ;;  %v3470_v59 = vpop.f32.mrf.mxu0 }
 0x3f7   :  { %5420 = vmatprep.mubr.f32.mxu1 %v11883_v0  ;;  %v10965_v44 = vadd.f32 %v3627_v8, %v10604_v63  ;;  %v10968_v32 = vadd.f32 %v3470_v59, %v10613_v2 }
 0x3f8   :  { %v3631_v57 = vpop.f32.mrf.mxu1  ;;  %v3472_v29 = vpop.f32.mrf.mxu0 }
 0x3f9   :  { %6249 = vmatmul.mubr.msk.f32.gmra.mxu0 %vm735_vm3, %v6233_v35  ;;  %v10977_v5 = vadd.f32 %v3631_v57, %v10620_v33  ;;  %v10980_v63 = vadd.f32 %v3472_v29, %v10625_v34  ;;  %v6235_v33 = vld [vmem:[%s11760_s4 + $0x440] sm:$0xff] }
 0x3fa   :  { %6265 = vmatmul.mubr.msk.f32.gmra.mxu1 %vm735_vm3, %v6233_v35  ;;  %5265 = vmatprep.mubr.f32.mxu0 %v11883_v0  ;;  %v3633_v2 = vpop.f32.mrf.mxu1  ;;  %v3476_v39 = vpop.f32.mrf.mxu0 }
 0x3fb   :  { %5426 = vmatprep.mubr.f32.mxu1 %v11883_v0  ;;  %v10984_v14 = vadd.f32 %v3633_v2, %v10630_v56  ;;  %v10987_v35 = vadd.f32 %v3476_v39, %v10641_v41 }
 0x3fc   :  { %v3637_v8 = vpop.f32.mrf.mxu1  ;;  %v3478_v59 = vpop.f32.mrf.mxu0 }
 0x3fd   :  { %6250 = vmatmul.mubr.msk.f32.gmra.mxu0 %vm735_vm3, %v6234_v47  ;;  %v10996_v34 = vadd.f32 %v3637_v8, %v10648_v62  ;;  %v10999_v56 = vadd.f32 %v3478_v59, %v10651_v48  ;;  %v6236_v62 = vld [vmem:[%s11760_s4 + $0x448] sm:$0xff] }
 0x3fe   :  { %6266 = vmatmul.mubr.msk.f32.gmra.mxu1 %vm735_vm3, %v6234_v47  ;;  %5271 = vmatprep.mubr.f32.mxu0 %v11883_v0  ;;  %v3639_v41 = vpop.f32.mrf.mxu1  ;;  %v3482_v57 = vpop.f32.mrf.mxu0 }
 0x3ff   :  { %5432 = vmatprep.mubr.f32.mxu1 %v11883_v0  ;;  %v11003_v29 = vadd.f32 %v3639_v41, %v10655_v17  ;;  %v11006_v47 = vadd.f32 %v3482_v57, %v10666_v25 }
 0x400   :  { %v3643_v2 = vpop.f32.mrf.mxu1  ;;  %v3484_v39 = vpop.f32.mrf.mxu0 }
 0x401   :  { %6251 = vmatmul.mubr.msk.f32.gmra.mxu0 %vm735_vm3, %v6235_v33  ;;  %v11015_v48 = vadd.f32 %v3643_v2, %v10673_v55  ;;  %v11018_v17 = vadd.f32 %v3484_v39, %v10676_v36  ;;  %v6237_v55 = vld [vmem:[%s11760_s4 + $0x450] sm:$0xff] }
 0x402   :  { %6267 = vmatmul.mubr.msk.f32.gmra.mxu1 %vm735_vm3, %v6235_v33  ;;  %5277 = vmatprep.mubr.f32.mxu0 %v11883_v0  ;;  %v3645_v25 = vpop.f32.mrf.mxu1  ;;  %v3488_v8 = vpop.f32.mrf.mxu0 }
 0x403   :  { %5438 = vmatprep.mubr.f32.mxu1 %v11883_v0  ;;  %v11022_v59 = vadd.f32 %v3645_v25, %v10680_v10  ;;  %v11025_v33 = vadd.f32 %v3488_v8, %v10691_v12 }
 0x404   :  { %v3649_v41 = vpop.f32.mrf.mxu1  ;;  %v3490_v57 = vpop.f32.mrf.mxu0 }
 0x405   :  { %6252 = vmatmul.mubr.msk.f32.gmra.mxu0 %vm735_vm3, %v6236_v62  ;;  %v11034_v36 = vadd.f32 %v3649_v41, %v10698_v1  ;;  %v11037_v10 = vadd.f32 %v3490_v57, %v10701_v21  ;;  %v6238_v1 = vld [vmem:[%s11760_s4 + $0x458] sm:$0xff] }
 0x406   :  { %6268 = vmatmul.mubr.msk.f32.gmra.mxu1 %vm735_vm3, %v6236_v62  ;;  %5283 = vmatprep.mubr.f32.mxu0 %v11883_v0  ;;  %v3651_v12 = vpop.f32.mrf.mxu1  ;;  %v3494_v2 = vpop.f32.mrf.mxu0 }
 0x407   :  { %5444 = vmatprep.mubr.f32.mxu1 %v11883_v0  ;;  %v11041_v39 = vadd.f32 %v3651_v12, %v10705_v28  ;;  %v11044_v62 = vadd.f32 %v3494_v2, %v10716_v4 }
 0x408   :  { %v3655_v25 = vpop.f32.mrf.mxu1  ;;  %v3496_v8 = vpop.f32.mrf.mxu0 }
 0x409   :  { %6253 = vmatmul.mubr.msk.f32.gmra.mxu0 %vm735_vm3, %v6237_v55  ;;  %v11053_v21 = vadd.f32 %v3655_v25, %v10723_v38  ;;  %v11056_v28 = vadd.f32 %v3496_v8, %v10726_v26  ;;  %v6239_v38 = vld [vmem:[%s11760_s4 + $0x460] sm:$0xff] }
 0x40a   :  { %6269 = vmatmul.mubr.msk.f32.gmra.mxu1 %vm735_vm3, %v6237_v55  ;;  %5289 = vmatprep.mubr.f32.mxu0 %v11883_v0  ;;  %v3657_v4 = vpop.f32.mrf.mxu1  ;;  %v3500_v41 = vpop.f32.mrf.mxu0 }
 0x40b   :  { %5450 = vmatprep.mubr.f32.mxu1 %v11883_v0  ;;  %v11060_v57 = vadd.f32 %v3657_v4, %v10730_v9  ;;  %v11063_v55 = vadd.f32 %v3500_v41, %v10741_v19 }
 0x40c   :  { %v3661_v12 = vpop.f32.mrf.mxu1  ;;  %v3502_v2 = vpop.f32.mrf.mxu0 }
 0x40d   :  { %6254 = vmatmul.mubr.msk.f32.gmra.mxu0 %vm735_vm3, %v6238_v1  ;;  %v11072_v26 = vadd.f32 %v3661_v12, %v10748_v24  ;;  %v11075_v9 = vadd.f32 %v3502_v2, %v10751_v53  ;;  %v6240_v24 = vld [vmem:[%s11760_s4 + $0x468] sm:$0xff] }
 0x40e   :  { %6270 = vmatmul.mubr.msk.f32.gmra.mxu1 %vm735_vm3, %v6238_v1  ;;  %5295 = vmatprep.mubr.f32.mxu0 %v11883_v0  ;;  %v3663_v19 = vpop.f32.mrf.mxu1  ;;  %v3506_v25 = vpop.f32.mrf.mxu0 }
 0x40f   :  { %5456 = vmatprep.mubr.f32.mxu1 %v11883_v0  ;;  %v11079_v8 = vadd.f32 %v3663_v19, %v10755_v60  ;;  %v11082_v1 = vadd.f32 %v3506_v25, %v10764_v11 }
 0x410   :  { %v3667_v4 = vpop.f32.mrf.mxu1  ;;  %v3508_v41 = vpop.f32.mrf.mxu0 }
 0x411   :  { %6255 = vmatmul.mubr.msk.f32.gmra.mxu0 %vm735_vm3, %v6239_v38  ;;  %v11091_v53 = vadd.f32 %v3667_v4, %v10769_v51  ;;  %v11094_v60 = vadd.f32 %v3508_v41, %v10771_v23  ;;  %v6241_v51 = vld [vmem:[%s11760_s4 + $0x470] sm:$0xff] }
 0x412   :  { %6271 = vmatmul.mubr.msk.f32.gmra.mxu1 %vm735_vm3, %v6239_v38  ;;  %5301 = vmatprep.mubr.f32.mxu0 %v11883_v0  ;;  %v3669_v11 = vpop.f32.mrf.mxu1  ;;  %v4019_v12 = vpop.f32.mrf.mxu0 }
 0x413   :  { %5462 = vmatprep.mubr.f32.mxu1 %v11883_v0  ;;  %v11098_v2 = vadd.f32 %v3669_v11, %v10774_v40  ;;  %v11101_v38 = vadd.f32 %v4019_v12, %v10782_v20 }
 0x414   :  { %v4180_v19 = vpop.f32.mrf.mxu1  ;;  %v4021_v25 = vpop.f32.mrf.mxu0 }
 0x415   :  { %12462 = vst [vmem:[#allocation60_spill] sm:$0xff] %v11098_v2  ;;  %12463 = vst [vmem:[#allocation65_spill] sm:$0xff] %v11101_v38  ;;  %6256 = vmatmul.mubr.msk.f32.gmra.mxu0 %vm735_vm3, %v6240_v24  ;;  %v11110_v23 = vadd.f32 %v4180_v19, %v10786_v16  ;;  %v11113_v40 = vadd.f32 %v4021_v25, %v10789_v37  ;;  %v6242_v16 = vld [vmem:[%s11760_s4 + $0x478] sm:$0xff]  ;;  %v12471_v25 = vld [vmem:[#allocation37_spill] sm:$0xff] }
 0x416   :  { %6272 = vmatmul.mubr.msk.f32.gmra.mxu1 %vm735_vm3, %v6240_v24  ;;  %5307 = vmatprep.mubr.f32.mxu0 %v11883_v0  ;;  %v4182_v20 = vpop.f32.mrf.mxu1  ;;  %v12467_v24 = vld [vmem:[#allocation111_spill] sm:$0xff]  ;;  %v12477_v38 = vld [vmem:[#allocation113_spill] sm:$0xff] }
 0x417   :  { %12464 = vst [vmem:[#allocation68_spill] sm:$0xff] %v11110_v23  ;;  %12465 = vst [vmem:[#allocation73_spill] sm:$0xff] %v11113_v40  ;;  %5468 = vmatprep.mubr.f32.mxu1 %v11883_v0  ;;  %v11117_v4 = vadd.f32 %v4182_v20, %v10793_v18  ;;  %v4025_v41 = vpop.f32.mrf.mxu0  ;;  %v12469_v18 = vld [vmem:[#allocation142_spill] sm:$0xff] }
 0x418   :  { %v11121_v11 = vadd.f32 %v4025_v41, %v12467_v24 }
 0x419   :  { %12466 = vst [vmem:[#allocation76_spill] sm:$0xff] %v11117_v4  ;;  %6257 = vmatmul.mubr.msk.f32.gmra.mxu0 %vm735_vm3, %v6241_v51  ;;  %v4186_v37 = vpop.f32.mrf.mxu1  ;;  %v4027_v12 = vpop.f32.mrf.mxu0  ;;  %v12475_v4 = vld [vmem:[#allocation43_spill] sm:$0xff] }
 0x41a   :  { %12468 = vst [vmem:[#allocation14_spill] sm:$0xff] %v11121_v11  ;;  %6273 = vmatmul.mubr.msk.f32.gmra.mxu1 %vm735_vm3, %v6241_v51  ;;  %5313 = vmatprep.mubr.f32.mxu0 %v11883_v0  ;;  %v11130_v19 = vadd.f32 %v4186_v37, %v12469_v18  ;;  %v11133_v20 = vadd.f32 %v4027_v12, %v12471_v25  ;;  %v12473_v51 = vld [vmem:[#allocation141_spill] sm:$0xff]  ;;  %v12478_v18 = vld [vmem:[#allocation108_spill] sm:$0xff] }
 0x41b   :  { %5474 = vmatprep.mubr.f32.mxu1 %v11883_v0  ;;  %v4188_v41 = vpop.f32.mrf.mxu1 }
 0x41c   :  { %12470 = vst [vmem:[#allocation17_spill] sm:$0xff] %v11130_v19  ;;  %12472 = vst [vmem:[#allocation34_spill] sm:$0xff] %v11133_v20  ;;  %v11137_v24 = vadd.f32 %v4188_v41, %v12473_v51  ;;  %v12480_v20 = vld [vmem:[#allocation56_spill] sm:$0xff]  ;;  %v12482_v51 = vld [vmem:[#allocation46_spill] sm:$0xff] }
 0x41d   :  { %6258 = vmatmul.mubr.msk.f32.gmra.mxu0 %vm735_vm3, %v6242_v16  ;;  %v4031_v11 = vpop.f32.mrf.mxu0 }
 0x41e   :  { %12474 = vst [vmem:[#allocation98_spill] sm:$0xff] %v11137_v24  ;;  %6274 = vmatmul.mubr.msk.f32.gmra.mxu1 %vm735_vm3, %v6242_v16  ;;  %v11141_v40 = vadd.f32 %v4031_v11, %v12475_v4  ;;  %v12483_v11 = vld [vmem:[#allocation27_spill] sm:$0xff] }
 0x41f   :  { %v4192_v23 = vpop.f32.mrf.mxu1  ;;  %v4033_v0 = vpop.f32.mrf.mxu0 }
 0x420   :  { %12476 = vst [vmem:[#allocation24_spill] sm:$0xff] %v11141_v40  ;;  %v11144_v37 = vadd.f32 %v4192_v23, %v12477_v38  ;;  %v11147_v12 = vadd.f32 %v4033_v0, %v12478_v18  ;;  %v12484_v23 = vld [vmem:[#allocation110_spill] sm:$0xff] }
 0x421   :  { %v4194_v25 = vpop.f32.mrf.mxu1 }
 0x422   :  { %12479 = vst [vmem:[#allocation35_spill] sm:$0xff] %v11147_v12  ;;  %v11150_v19 = vadd.f32 %v4194_v25, %v12480_v20  ;;  %v12485_v12 = vld [vmem:[#allocation117_spill] sm:$0xff] }
 0x423   :  { %v4037_v41 = vpop.f32.mrf.mxu0 }
 0x424   :  { %12481 = vst [vmem:[#allocation99_spill] sm:$0xff] %v11150_v19  ;;  %v11153_v24 = vadd.f32 %v4037_v41, %v12482_v51 }
 0x425   :  { %v4039_v2 = vpop.f32.mrf.mxu0 }
 0x426   :  { %v4198_v16 = vpop.f32.mrf.mxu1  ;;  %v11159_v40 = vadd.f32 %v4039_v2, %v12483_v11 }
 0x427   :  { %v11156_v4 = vadd.f32 %v4198_v16, %v10860_v13 }
 0x428   :  { %v4200_v38 = vpop.f32.mrf.mxu1 }
 0x429   :  { %v11162_v0 = vadd.f32 %v4200_v38, %v12484_v23 }
 0x42a   :  { %v4043_v18 = vpop.f32.mrf.mxu0 }
 0x42b   :  { %v11165_v20 = vadd.f32 %v4043_v18, %v12485_v12  ;;  %v4204_v25 = vpop.f32.mrf.mxu1 }
 0x42c   :  { %v4045_v19 = vpop.f32.mrf.mxu0  ;;  %v11168_v41 = vadd.f32 %v4204_v25, %v10882_v22 }
 0x42d   :  { %v11171_v51 = vadd.f32 %v4045_v19, %v10885_v30  ;;  %v4206_v13 = vpop.f32.mrf.mxu1 }
 0x42e   :  { %v4049_v16 = vpop.f32.mrf.mxu0  ;;  %v11174_v2 = vadd.f32 %v4206_v13, %v10889_v7 }
 0x42f   :  { %v11177_v11 = vadd.f32 %v4049_v16, %v10892_v58  ;;  %v4210_v38 = vpop.f32.mrf.mxu1 }
 0x430   :  { %v4051_v23 = vpop.f32.mrf.mxu0  ;;  %v11180_v12 = vadd.f32 %v4210_v38, %v10901_v45 }
 0x431   :  { %v11183_v18 = vadd.f32 %v4051_v23, %v10904_v54  ;;  %v4212_v22 = vpop.f32.mrf.mxu1 }
 0x432   :  { %v4055_v25 = vpop.f32.mrf.mxu0  ;;  %v11186_v30 = vadd.f32 %v4212_v22, %v10908_v43 }
 0x433   :  { %v11189_v19 = vadd.f32 %v4055_v25, %v10911_v52  ;;  %v4216_v7 = vpop.f32.mrf.mxu1 }
 0x434   :  { %v4057_v13 = vpop.f32.mrf.mxu0  ;;  %v11192_v58 = vadd.f32 %v4216_v7, %v10920_v49 }
 0x435   :  { %v11195_v16 = vadd.f32 %v4057_v13, %v10923_v50  ;;  %v4218_v45 = vpop.f32.mrf.mxu1 }
 0x436   :  { %v4061_v38 = vpop.f32.mrf.mxu0  ;;  %v11198_v54 = vadd.f32 %v4218_v45, %v10927_v61 }
 0x437   :  { %v11201_v23 = vadd.f32 %v4061_v38, %v10930_v42  ;;  %v4222_v43 = vpop.f32.mrf.mxu1 }
 0x438   :  { %12486 = vst [vmem:[#allocation100_spill] sm:$0xff] %v11198_v54  ;;  %v4063_v22 = vpop.f32.mrf.mxu0  ;;  %v11204_v52 = vadd.f32 %v4222_v43, %v10939_v3  ;;  %v12569_v54 = vld [vmem:[#allocation24_spill] sm:$0xff] }
 0x439   :  { %12487 = vst [vmem:[#allocation15_spill] sm:$0xff] %v11201_v23  ;;  %v11207_v25 = vadd.f32 %v4063_v22, %v10942_v46  ;;  %v4224_v49 = vpop.f32.mrf.mxu1 }
 0x43a   :  { %12488 = vst [vmem:[#allocation36_spill] sm:$0xff] %v11204_v52  ;;  %v4067_v7 = vpop.f32.mrf.mxu0  ;;  %v11210_v50 = vadd.f32 %v4224_v49, %v10946_v15 }
 0x43b   :  { %12489 = vst [vmem:[#allocation135_spill] sm:$0xff] %v11207_v25  ;;  %v11213_v13 = vadd.f32 %v4067_v7, %v10949_v6  ;;  %v4228_v61 = vpop.f32.mrf.mxu1 }
 0x43c   :  { %12490 = vst [vmem:[#allocation132_spill] sm:$0xff] %v11210_v50  ;;  %v4069_v45 = vpop.f32.mrf.mxu0  ;;  %v11216_v42 = vadd.f32 %v4228_v61, %v10958_v27 }
 0x43d   :  { %12491 = vst [vmem:[#allocation38_spill] sm:$0xff] %v11213_v13  ;;  %v11219_v38 = vadd.f32 %v4069_v45, %v10961_v31  ;;  %v4230_v3 = vpop.f32.mrf.mxu1 }
 0x43e   :  { %12492 = vst [vmem:[#allocation102_spill] sm:$0xff] %v11216_v42  ;;  %v4073_v43 = vpop.f32.mrf.mxu0  ;;  %v11222_v46 = vadd.f32 %v4230_v3, %v10965_v44 }
 0x43f   :  { %12493 = vst [vmem:[#allocation85_spill] sm:$0xff] %v11219_v38  ;;  %v11225_v22 = vadd.f32 %v4073_v43, %v10968_v32  ;;  %v4234_v15 = vpop.f32.mrf.mxu1 }
 0x440   :  { %12494 = vst [vmem:[#allocation84_spill] sm:$0xff] %v11222_v46  ;;  %v4075_v49 = vpop.f32.mrf.mxu0  ;;  %v11228_v6 = vadd.f32 %v4234_v15, %v10977_v5 }
 0x441   :  { %12495 = vst [vmem:[#allocation101_spill] sm:$0xff] %v11225_v22  ;;  %v11231_v7 = vadd.f32 %v4075_v49, %v10980_v63  ;;  %v4236_v27 = vpop.f32.mrf.mxu1 }
 0x442   :  { %12496 = vst [vmem:[#allocation39_spill] sm:$0xff] %v11228_v6  ;;  %v4079_v61 = vpop.f32.mrf.mxu0  ;;  %v11234_v31 = vadd.f32 %v4236_v27, %v10984_v14 }
 0x443   :  { %12497 = vst [vmem:[#allocation103_spill] sm:$0xff] %v11231_v7  ;;  %v11237_v45 = vadd.f32 %v4079_v61, %v10987_v35  ;;  %v4240_v44 = vpop.f32.mrf.mxu1 }
 0x444   :  { %12498 = vst [vmem:[#allocation90_spill] sm:$0xff] %v11234_v31  ;;  %v4081_v3 = vpop.f32.mrf.mxu0  ;;  %v11240_v32 = vadd.f32 %v4240_v44, %v10996_v34 }
 0x445   :  { %12499 = vst [vmem:[#allocation137_spill] sm:$0xff] %v11237_v45  ;;  %v11243_v43 = vadd.f32 %v4081_v3, %v10999_v56  ;;  %v4242_v5 = vpop.f32.mrf.mxu1 }
 0x446   :  { %12500 = vst [vmem:[#allocation9_spill] sm:$0xff] %v11240_v32  ;;  %v4085_v15 = vpop.f32.mrf.mxu0  ;;  %v11246_v63 = vadd.f32 %v4242_v5, %v11003_v29 }
 0x447   :  { %12501 = vst [vmem:[#allocation42_spill] sm:$0xff] %v11243_v43  ;;  %v11249_v49 = vadd.f32 %v4085_v15, %v11006_v47  ;;  %v4246_v14 = vpop.f32.mrf.mxu1 }
 0x448   :  { %12502 = vst [vmem:[#allocation106_spill] sm:$0xff] %v11246_v63  ;;  %v4087_v27 = vpop.f32.mrf.mxu0  ;;  %v11252_v35 = vadd.f32 %v4246_v14, %v11015_v48 }
 0x449   :  { %12503 = vst [vmem:[#allocation92_spill] sm:$0xff] %v11249_v49  ;;  %v11255_v61 = vadd.f32 %v4087_v27, %v11018_v17  ;;  %v4248_v34 = vpop.f32.mrf.mxu1 }
 0x44a   :  { %12504 = vst [vmem:[#allocation139_spill] sm:$0xff] %v11252_v35  ;;  %v4091_v44 = vpop.f32.mrf.mxu0  ;;  %v11258_v56 = vadd.f32 %v4248_v34, %v11022_v59 }
 0x44b   :  { %12505 = vst [vmem:[#allocation10_spill] sm:$0xff] %v11255_v61  ;;  %v11261_v3 = vadd.f32 %v4091_v44, %v11025_v33  ;;  %v4252_v29 = vpop.f32.mrf.mxu1 }
 0x44c   :  { %12506 = vst [vmem:[#allocation33_spill] sm:$0xff] %v11258_v56  ;;  %v4093_v5 = vpop.f32.mrf.mxu0  ;;  %v11264_v47 = vadd.f32 %v4252_v29, %v11034_v36 }
 0x44d   :  { %12507 = vst [vmem:[#allocation94_spill] sm:$0xff] %v11261_v3  ;;  %v11267_v15 = vadd.f32 %v4093_v5, %v11037_v10  ;;  %v4254_v48 = vpop.f32.mrf.mxu1 }
 0x44e   :  { %12508 = vst [vmem:[#allocation97_spill] sm:$0xff] %v11264_v47  ;;  %v4097_v14 = vpop.f32.mrf.mxu0  ;;  %v11270_v17 = vadd.f32 %v4254_v48, %v11041_v39 }
 0x44f   :  { %12509 = vst [vmem:[#allocation16_spill] sm:$0xff] %v11267_v15  ;;  %v11273_v27 = vadd.f32 %v4097_v14, %v11044_v62  ;;  %v4258_v59 = vpop.f32.mrf.mxu1 }
 0x450   :  { %12510 = vst [vmem:[#allocation40_spill] sm:$0xff] %v11270_v17  ;;  %v4099_v34 = vpop.f32.mrf.mxu0  ;;  %v11276_v33 = vadd.f32 %v4258_v59, %v11053_v21 }
 0x451   :  { %12511 = vst [vmem:[#allocation71_spill] sm:$0xff] %v11273_v27  ;;  %v11279_v44 = vadd.f32 %v4099_v34, %v11056_v28  ;;  %v4260_v36 = vpop.f32.mrf.mxu1 }
 0x452   :  { %12512 = vst [vmem:[#allocation128_spill] sm:$0xff] %v11276_v33  ;;  %v4103_v29 = vpop.f32.mrf.mxu0  ;;  %v11282_v10 = vadd.f32 %v4260_v36, %v11060_v57 }
 0x453   :  { %12513 = vst [vmem:[#allocation31_spill] sm:$0xff] %v11279_v44  ;;  %v11285_v5 = vadd.f32 %v4103_v29, %v11063_v55  ;;  %v4264_v39 = vpop.f32.mrf.mxu1 }
 0x454   :  { %12514 = vst [vmem:[#allocation41_spill] sm:$0xff] %v11282_v10  ;;  %v4105_v48 = vpop.f32.mrf.mxu0  ;;  %v11288_v62 = vadd.f32 %v4264_v39, %v11072_v26 }
 0x455   :  { %12515 = vst [vmem:[#allocation30_spill] sm:$0xff] %v11285_v5  ;;  %v11291_v14 = vadd.f32 %v4105_v48, %v11075_v9  ;;  %v4266_v21 = vpop.f32.mrf.mxu1  ;;  %v12522_v9 = vld [vmem:[#allocation60_spill] sm:$0xff] }
 0x456   :  { %12516 = vst [vmem:[#allocation107_spill] sm:$0xff] %v11288_v62  ;;  %v4109_v59 = vpop.f32.mrf.mxu0  ;;  %v11294_v28 = vadd.f32 %v4266_v21, %v11079_v8 }
 0x457   :  { %12517 = vst [vmem:[#allocation104_spill] sm:$0xff] %v11291_v14  ;;  %v11297_v34 = vadd.f32 %v4109_v59, %v11082_v1  ;;  %v4270_v57 = vpop.f32.mrf.mxu1 }
 0x458   :  { %12518 = vst [vmem:[#allocation115_spill] sm:$0xff] %v11294_v28  ;;  %v4111_v36 = vpop.f32.mrf.mxu0  ;;  %v11300_v55 = vadd.f32 %v4270_v57, %v11091_v53 }
 0x459   :  { %12519 = vst [vmem:[#allocation47_spill] sm:$0xff] %v11297_v34  ;;  %v11303_v29 = vadd.f32 %v4111_v36, %v11094_v60  ;;  %v4272_v26 = vpop.f32.mrf.mxu1 }
 0x45a   :  { %12520 = vst [vmem:[#allocation74_spill] sm:$0xff] %v11300_v55  ;;  %v11305_v39 = vpop.f32.mrf.mxu0  ;;  %v11308_v48 = vadd.f32 %v4272_v26, %v12522_v9 }
 0x45b   :  { %12521 = vst [vmem:[#allocation23_spill] sm:$0xff] %v11303_v29 }
 0x45c   :  { %12523 = vst [vmem:[#allocation75_spill] sm:$0xff] %v11308_v48  ;;  %v11310_v14 = vpop.f32.mrf.mxu1  ;;  %v11312_v8 = vpop.f32.mrf.mxu0 }
 0x45e   :  { %v11314_v1 = vpop.f32.mrf.mxu1 }
 0x45f   :  { %v11316_v21 = vpop.f32.mrf.mxu0 }
 0x461   :  { %v11318_v59 = vpop.f32.mrf.mxu1  ;;  %v11320_v53 = vpop.f32.mrf.mxu0 }
 0x463   :  { %v11322_v60 = vpop.f32.mrf.mxu1 }
 0x465   :  { %v11324_v57 = vpop.f32.mrf.mxu0 }
 0x467   :  { %v11326_v36 = vpop.f32.mrf.mxu1  ;;  %v11328_v26 = vpop.f32.mrf.mxu0 }
 0x469   :  { %v11330_v9 = vpop.f32.mrf.mxu1 }
 0x46b   :  { %v11332_v48 = vpop.f32.mrf.mxu0 }
 0x46d   :  { %v11334_v29 = vpop.f32.mrf.mxu1  ;;  %v11336_v55 = vpop.f32.mrf.mxu0 }
 0x46f   :  { %v11338_v34 = vpop.f32.mrf.mxu1 }
 0x471   :  { %v11340_v28 = vpop.f32.mrf.mxu0 }
 0x472   :  { %v11342_v62 = vpop.f32.mrf.mxu1 }
 0x473   :  { %v11344_v5 = vpop.f32.mrf.mxu0 }
 0x474   :  { %v11346_v10 = vpop.f32.mrf.mxu1 }
 0x475   :  { %v11348_v44 = vpop.f32.mrf.mxu0 }
 0x476   :  { %v11350_v33 = vpop.f32.mrf.mxu1 }
 0x477   :  { %v11352_v27 = vpop.f32.mrf.mxu0 }
 0x478   :  { %v11354_v17 = vpop.f32.mrf.mxu1 }
 0x479   :  { %v11356_v15 = vpop.f32.mrf.mxu0 }
 0x47a   :  { %v11358_v47 = vpop.f32.mrf.mxu1 }
 0x47b   :  { %v11360_v3 = vpop.f32.mrf.mxu0 }
 0x47c   :  { %v11362_v56 = vpop.f32.mrf.mxu1 }
 0x47d   :  { %12524 = vst [vmem:[#allocation129_spill] sm:$0xff] %v11362_v56  ;;  %v11364_v61 = vpop.f32.mrf.mxu0 }
 0x47e   :  { %12525 = vst [vmem:[#allocation22_spill] sm:$0xff] %v11364_v61  ;;  %v11366_v35 = vpop.f32.mrf.mxu1  ;;  %v12566_v61 = vld [vmem:[#allocation17_spill] sm:$0xff] }
 0x47f   :  { %12526 = vst [vmem:[#allocation114_spill] sm:$0xff] %v11366_v35  ;;  %v11368_v49 = vpop.f32.mrf.mxu0  ;;  %v12565_v35 = vld [vmem:[#allocation14_spill] sm:$0xff] }
 0x480   :  { %12527 = vst [vmem:[#allocation112_spill] sm:$0xff] %v11368_v49  ;;  %v11370_v63 = vpop.f32.mrf.mxu1  ;;  %v5564_v49 = vpop.permute.xlu0 %5563 }
 0x481   :  { %12528 = vst [vmem:[#allocation57_spill] sm:$0xff] %v11370_v63  ;;  %v11372_v43 = vpop.f32.mrf.mxu0 }
 0x482   :  { %12529 = vst [vmem:[#allocation50_spill] sm:$0xff] %v11372_v43  ;;  %v11374_v32 = vpop.f32.mrf.mxu1 }
 0x483   :  { %12530 = vst [vmem:[#allocation28_spill] sm:$0xff] %v11374_v32  ;;  %v11376_v45 = vpop.f32.mrf.mxu0 }
 0x484   :  { %12531 = vst [vmem:[#allocation78_spill] sm:$0xff] %v11376_v45  ;;  %v11378_v31 = vpop.f32.mrf.mxu1 }
 0x485   :  { %12532 = vst [vmem:[#allocation130_spill] sm:$0xff] %v11378_v31  ;;  %v11380_v7 = vpop.f32.mrf.mxu0 }
 0x486   :  { %12533 = vst [vmem:[#allocation54_spill] sm:$0xff] %v11380_v7  ;;  %v11382_v6 = vpop.f32.mrf.mxu1 }
 0x487   :  { %12534 = vst [vmem:[#allocation51_spill] sm:$0xff] %v11382_v6  ;;  %v11384_v22 = vpop.f32.mrf.mxu0 }
 0x488   :  { %12535 = vst [vmem:[#allocation79_spill] sm:$0xff] %v11384_v22  ;;  %v11386_v46 = vpop.f32.mrf.mxu1 }
 0x489   :  { %12536 = vst [vmem:[#allocation131_spill] sm:$0xff] %v11386_v46  ;;  %v11388_v38 = vpop.f32.mrf.mxu0 }
 0x48a   :  { %12537 = vst [vmem:[#allocation119_spill] sm:$0xff] %v11388_v38  ;;  %v11390_v42 = vpop.f32.mrf.mxu1 }
 0x48b   :  { %12538 = vst [vmem:[#allocation116_spill] sm:$0xff] %v11390_v42  ;;  %v11392_v13 = vpop.f32.mrf.mxu0 }
 0x48c   :  { %12539 = vst [vmem:[#allocation61_spill] sm:$0xff] %v11392_v13  ;;  %v11394_v43 = vpop.f32.mrf.mxu1 }
 0x48d   :  { %12540 = vst [vmem:[#allocation64_spill] sm:$0xff] %v11394_v43  ;;  %v11396_v32 = vpop.f32.mrf.mxu0 }
 0x48e   :  { %12541 = vst [vmem:[#allocation82_spill] sm:$0xff] %v11396_v32  ;;  %v11398_v45 = vpop.f32.mrf.mxu1 }
 0x48f   :  { %12542 = vst [vmem:[#allocation133_spill] sm:$0xff] %v11398_v45  ;;  %v11400_v31 = vpop.f32.mrf.mxu0 }
 0x490   :  { %12543 = vst [vmem:[#allocation55_spill] sm:$0xff] %v11400_v31  ;;  %v11402_v7 = vpop.f32.mrf.mxu1 }
 0x491   :  { %12544 = vst [vmem:[#allocation44_spill] sm:$0xff] %v11402_v7  ;;  %v11404_v6 = vpop.f32.mrf.mxu0 }
 0x492   :  { %12545 = vst [vmem:[#allocation83_spill] sm:$0xff] %v11404_v6  ;;  %v11406_v22 = vpop.f32.mrf.mxu1 }
 0x493   :  { %12546 = vst [vmem:[#allocation134_spill] sm:$0xff] %v11406_v22  ;;  %v11408_v46 = vpop.f32.mrf.mxu0 }
 0x494   :  { %12547 = vst [vmem:[#allocation120_spill] sm:$0xff] %v11408_v46  ;;  %v11410_v38 = vpop.f32.mrf.mxu1 }
 0x495   :  { %12548 = vst [vmem:[#allocation105_spill] sm:$0xff] %v11410_v38  ;;  %v11412_v42 = vpop.f32.mrf.mxu0 }
 0x496   :  { %12549 = vst [vmem:[#allocation69_spill] sm:$0xff] %v11412_v42  ;;  %v11414_v13 = vpop.f32.mrf.mxu1  ;;  %v12560_v42 = vld [vmem:[#allocation65_spill] sm:$0xff] }
 0x497   :  { %12550 = vst [vmem:[#allocation72_spill] sm:$0xff] %v11414_v13  ;;  %v11416_v43 = vpop.f32.mrf.mxu0  ;;  %v4878_v13 = vadd.f32 %v11305_v39, %v12560_v42  ;;  %v4882_v42 = vadd.f32 %v11316_v21, %v12565_v35 }
 0x498   :  { %12551 = vst [vmem:[#allocation86_spill] sm:$0xff] %v11416_v43  ;;  %v11418_v32 = vpop.f32.mrf.mxu1 }
 0x499   :  { %12552 = vst [vmem:[#allocation138_spill] sm:$0xff] %v11418_v32  ;;  %v11420_v45 = vpop.f32.mrf.mxu0  ;;  %v12562_v32 = vld [vmem:[#allocation68_spill] sm:$0xff] }
 0x49a   :  { %12553 = vst [vmem:[#allocation59_spill] sm:$0xff] %v11420_v45  ;;  %v11422_v31 = vpop.f32.mrf.mxu1  ;;  %v4880_v45 = vadd.f32 %v11310_v14, %v12562_v32  ;;  %v4884_v32 = vadd.f32 %v11318_v59, %v12566_v61  ;;  %v4888_v59 = vadd.f32 %v11326_v36, %v11144_v37  ;;  %v5574_v37 = vpop.permute.xlu0 %5573  ;;  %v12571_v36 = vld [vmem:[#allocation99_spill] sm:$0xff] }
 0x49b   :  { %12554 = vst [vmem:[#allocation58_spill] sm:$0xff] %v11422_v31  ;;  %v11424_v7 = vpop.f32.mrf.mxu0  ;;  %v12563_v31 = vld [vmem:[#allocation73_spill] sm:$0xff] }
 0x49c   :  { %12555 = vst [vmem:[#allocation87_spill] sm:$0xff] %v11424_v7  ;;  %v11426_v6 = vpop.f32.mrf.mxu1  ;;  %v4879_v7 = vadd.f32 %v11312_v8, %v12563_v31 }
 0x49d   :  { %12556 = vst [vmem:[#allocation21_spill] sm:$0xff] %v11426_v6  ;;  %v11428_v22 = vpop.f32.mrf.mxu0 }
 0x49e   :  { %12557 = vst [vmem:[#allocation122_spill] sm:$0xff] %v11428_v22  ;;  %v11430_v46 = vpop.f32.mrf.mxu1  ;;  %v12564_v22 = vld [vmem:[#allocation76_spill] sm:$0xff] }
 0x49f   :  { %12558 = vst [vmem:[#allocation121_spill] sm:$0xff] %v11430_v46  ;;  %v11432_v38 = vpop.f32.mrf.mxu0  ;;  %v4881_v46 = vadd.f32 %v11314_v1, %v12564_v22  ;;  %v12568_v1 = vld [vmem:[#allocation98_spill] sm:$0xff] }
 0x4a0   :  { %12559 = vst [vmem:[#allocation136_spill] sm:$0xff] %v11432_v38  ;;  %v11436_v43 = vpop.f32.mrf.mxu1  ;;  %v4885_v35 = vadd.f32 %v11322_v60, %v12568_v1 }
 0x4a1   :  { %12561 = vst [vmem:[#allocation18_spill] sm:$0xff] %v11436_v43  ;;  %v5225_v63 = vpop.f32.mrf.mxu0 }
 0x4a2   :  { %v5481_v50 = vadd.f32 %v5225_v63, %v4878_v13  ;;  %v5386_v6 = vpop.f32.mrf.mxu1  ;;  %v12567_v13 = vld [vmem:[#allocation34_spill] sm:$0xff] }
 0x4a3   :  { %v5483_v25 = vadd.f32 %v5386_v6, %v4880_v45  ;;  %v5227_v38 = vpop.f32.mrf.mxu0  ;;  %v4883_v63 = vadd.f32 %v11320_v53, %v12567_v13  ;;  %v5569_v45 = vpop.permute.xlu1 %5568 }
 0x4a4   :  { %v5641_v39 = vadd.f32 %v5564_v49, %v5481_v50  ;;  %v5482_v43 = vadd.f32 %v5227_v38, %v4879_v7  ;;  %v5388_v52 = vpop.f32.mrf.mxu1 }
 0x4a5   :  { %v5643_v14 = vadd.f32 %v5564_v49, %v5483_v25  ;;  %v5484_v23 = vadd.f32 %v5388_v52, %v4881_v46  ;;  %v5231_v31 = vpop.f32.mrf.mxu0  ;;  %v4886_v25 = vadd.f32 %v11324_v57, %v12569_v54  ;;  %v12570_v54 = vld [vmem:[#allocation35_spill] sm:$0xff] }
 0x4a6   :  { %v5705_v8 = vmax.f32 %v5641_v39, 0.0  ;;  %v5642_v56 = vadd.f32 %v5564_v49, %v5482_v43  ;;  %v5485_v22 = vadd.f32 %v5231_v31, %v4882_v42  ;;  %v5392_v6 = vpop.f32.mrf.mxu1  ;;  %v4887_v57 = vadd.f32 %v11328_v26, %v12570_v54 }
 0x4a7   :  { %v5707_v50 = vmax.f32 %v5643_v14, 0.0  ;;  %v5644_v38 = vadd.f32 %v5564_v49, %v5484_v23  ;;  %v5487_v7 = vadd.f32 %v5392_v6, %v4884_v32  ;;  %v5233_v21 = vpop.f32.mrf.mxu0  ;;  %v4889_v14 = vadd.f32 %v11330_v9, %v12571_v36 }
 0x4a8   :  { %5769 = vst [vmem:[%s11762_s6] sm:$0xff] %v5705_v8  ;;  %v5706_v52 = vmax.f32 %v5642_v56, 0.0  ;;  %v5645_v46 = vadd.f32 %v5569_v45, %v5485_v22  ;;  %v5486_v43 = vadd.f32 %v5233_v21, %v4883_v63  ;;  %v5394_v61 = vpop.f32.mrf.mxu1  ;;  %v4890_v8 = vadd.f32 %v11332_v48, %v11153_v24 }
 0x4a9   :  { %6275 = vst [vmem:[%s11762_s6 + $0x100] sm:$0xff] %v5707_v50  ;;  %v5708_v23 = vmax.f32 %v5644_v38, 0.0  ;;  %v5647_v49 = vadd.f32 %v5569_v45, %v5487_v7  ;;  %v5488_v53 = vadd.f32 %v5394_v61, %v4885_v35  ;;  %v5237_v60 = vpop.f32.mrf.mxu0  ;;  %v4892_v9 = vadd.f32 %v11334_v29, %v11156_v4  ;;  %v5579_v4 = vpop.permute.xlu1 %5578 }
 0x4aa   :  { %5770 = vst [vmem:[%s11762_s6 + $0x8] sm:$0xff] %v5706_v52  ;;  %v5709_v56 = vmax.f32 %v5645_v46, 0.0  ;;  %v5646_v42 = vadd.f32 %v5569_v45, %v5486_v43  ;;  %v5489_v39 = vadd.f32 %v5237_v60, %v4886_v25  ;;  %v5398_v32 = vpop.f32.mrf.mxu1  ;;  %v4891_v24 = vadd.f32 %v11336_v55, %v11159_v40 }
 0x4ab   :  { %6276 = vst [vmem:[%s11762_s6 + $0x108] sm:$0xff] %v5708_v23  ;;  %v5711_v31 = vmax.f32 %v5647_v49, 0.0  ;;  %v5648_v13 = vadd.f32 %v5569_v45, %v5488_v53  ;;  %v5491_v63 = vadd.f32 %v5398_v32, %v4888_v59  ;;  %v5239_v26 = vpop.f32.mrf.mxu0  ;;  %v4893_v29 = vadd.f32 %v11338_v34, %v11162_v0 }
 0x4ac   :  { %5771 = vst [vmem:[%s11762_s6 + $0x10] sm:$0xff] %v5709_v56  ;;  %v5710_v22 = vmax.f32 %v5646_v42, 0.0  ;;  %v5649_v6 = vadd.f32 %v5574_v37, %v5489_v39  ;;  %v5490_v1 = vadd.f32 %v5239_v26, %v4887_v57  ;;  %v5400_v35 = vpop.f32.mrf.mxu1  ;;  %v4894_v55 = vadd.f32 %v11340_v28, %v11165_v20 }
 0x4ad   :  { %6277 = vst [vmem:[%s11762_s6 + $0x110] sm:$0xff] %v5711_v31  ;;  %v5712_v45 = vmax.f32 %v5648_v13, 0.0  ;;  %v5651_v50 = vadd.f32 %v5574_v37, %v5491_v63  ;;  %v5492_v38 = vadd.f32 %v5400_v35, %v4889_v14  ;;  %v5243_v7 = vpop.f32.mrf.mxu0  ;;  %v4896_v0 = vadd.f32 %v11342_v62, %v11168_v41  ;;  %v5584_v41 = vpop.permute.xlu0 %5583 }
 0x4ae   :  { %5772 = vst [vmem:[%s11762_s6 + $0x18] sm:$0xff] %v5710_v22  ;;  %v5713_v48 = vmax.f32 %v5649_v6, 0.0  ;;  %v5650_v21 = vadd.f32 %v5574_v37, %v5490_v1  ;;  %v5493_v25 = vadd.f32 %v5243_v7, %v4890_v8  ;;  %v5404_v52 = vpop.f32.mrf.mxu1  ;;  %v4895_v20 = vadd.f32 %v11344_v5, %v11171_v51 }
 0x4af   :  { %6278 = vst [vmem:[%s11762_s6 + $0x118] sm:$0xff] %v5712_v45  ;;  %v5715_v46 = vmax.f32 %v5651_v50, 0.0  ;;  %v5652_v43 = vadd.f32 %v5574_v37, %v5492_v38  ;;  %v5495_v61 = vadd.f32 %v5404_v52, %v4892_v9  ;;  %v5245_v40 = vpop.f32.mrf.mxu0  ;;  %v4897_v62 = vadd.f32 %v11346_v10, %v11174_v2 }
 0x4b0   :  { %5773 = vst [vmem:[%s11762_s6 + $0x20] sm:$0xff] %v5713_v48  ;;  %v5714_v59 = vmax.f32 %v5650_v21, 0.0  ;;  %v5653_v23 = vadd.f32 %v5579_v4, %v5493_v25  ;;  %v5494_v49 = vadd.f32 %v5245_v40, %v4891_v24  ;;  %v5406_v53 = vpop.f32.mrf.mxu1  ;;  %v4898_v5 = vadd.f32 %v11348_v44, %v11177_v11 }
 0x4b1   :  { %6279 = vst [vmem:[%s11762_s6 + $0x120] sm:$0xff] %v5715_v46  ;;  %v5716_v34 = vmax.f32 %v5652_v43, 0.0  ;;  %v5655_v60 = vadd.f32 %v5579_v4, %v5495_v61  ;;  %v5496_v54 = vadd.f32 %v5406_v53, %v4893_v29  ;;  %v5249_v57 = vpop.f32.mrf.mxu0  ;;  %v4900_v2 = vadd.f32 %v11350_v33, %v11180_v12  ;;  %v5589_v12 = vpop.permute.xlu1 %5588  ;;  %v12573_v43 = vld [vmem:[#allocation129_spill] sm:$0xff] }
 0x4b2   :  { %5774 = vst [vmem:[%s11762_s6 + $0x28] sm:$0xff] %v5714_v59  ;;  %v5717_v28 = vmax.f32 %v5653_v23, 0.0  ;;  %v5654_v56 = vadd.f32 %v5579_v4, %v5494_v49  ;;  %v5497_v42 = vadd.f32 %v5249_v57, %v4894_v55  ;;  %v5410_v39 = vpop.f32.mrf.mxu1  ;;  %v4899_v11 = vadd.f32 %v11352_v27, %v11183_v18  ;;  %v12575_v23 = vld [vmem:[#allocation22_spill] sm:$0xff] }
 0x4b3   :  { %6280 = vst [vmem:[%s11762_s6 + $0x128] sm:$0xff] %v5716_v34  ;;  %v5719_v32 = vmax.f32 %v5655_v60, 0.0  ;;  %v5656_v37 = vadd.f32 %v5579_v4, %v5496_v54  ;;  %v5499_v36 = vadd.f32 %v5410_v39, %v4896_v0  ;;  %v5251_v51 = vpop.f32.mrf.mxu0  ;;  %v4901_v33 = vadd.f32 %v11354_v17, %v11186_v30  ;;  %v12576_v54 = vld [vmem:[#allocation36_spill] sm:$0xff]  ;;  %v12577_v57 = vld [vmem:[#allocation114_spill] sm:$0xff] }
 0x4b4   :  { %5775 = vst [vmem:[%s11762_s6 + $0x30] sm:$0xff] %v5717_v28  ;;  %v5718_v14 = vmax.f32 %v5654_v56, 0.0  ;;  %v5657_v31 = vadd.f32 %v5584_v41, %v5497_v42  ;;  %v5498_v13 = vadd.f32 %v5251_v51, %v4895_v20  ;;  %v5412_v63 = vpop.f32.mrf.mxu1  ;;  %v4902_v27 = vadd.f32 %v11356_v15, %v11189_v19 }
 0x4b5   :  { %6281 = vst [vmem:[%s11762_s6 + $0x130] sm:$0xff] %v5719_v32  ;;  %v5720_v10 = vmax.f32 %v5656_v37, 0.0  ;;  %v5659_v26 = vadd.f32 %v5584_v41, %v5499_v36  ;;  %v5500_v8 = vadd.f32 %v5412_v63, %v4897_v62  ;;  %v5255_v22 = vpop.f32.mrf.mxu0  ;;  %v4904_v30 = vadd.f32 %v11358_v47, %v11192_v58  ;;  %v5594_v58 = vpop.permute.xlu0 %5593  ;;  %v12572_v47 = vld [vmem:[#allocation100_spill] sm:$0xff] }
 0x4b6   :  { %5776 = vst [vmem:[%s11762_s6 + $0x38] sm:$0xff] %v5718_v14  ;;  %v5721_v44 = vmax.f32 %v5657_v31, 0.0  ;;  %v5658_v6 = vadd.f32 %v5584_v41, %v5498_v13  ;;  %v5501_v1 = vadd.f32 %v5255_v22, %v4898_v5  ;;  %v5416_v35 = vpop.f32.mrf.mxu1  ;;  %v4903_v19 = vadd.f32 %v11360_v3, %v11195_v16  ;;  %v12574_v3 = vld [vmem:[#allocation15_spill] sm:$0xff]  ;;  %v12579_v62 = vld [vmem:[#allocation112_spill] sm:$0xff]  ;;  %v5599_v14 = vpop.permute.xlu1 %5598  ;;  %v12581_v13 = vld [vmem:[#allocation57_spill] sm:$0xff] }
 0x4b7   :  { %6282 = vst [vmem:[%s11762_s6 + $0x138] sm:$0xff] %v5720_v10  ;;  %v5723_v9 = vmax.f32 %v5659_v26, 0.0  ;;  %v5660_v45 = vadd.f32 %v5584_v41, %v5500_v8  ;;  %v5503_v50 = vadd.f32 %v5416_v35, %v4900_v2  ;;  %v5257_v18 = vpop.f32.mrf.mxu0  ;;  %v4905_v61 = vadd.f32 %v12573_v43, %v12572_v47  ;;  %v12578_v41 = vld [vmem:[#allocation135_spill] sm:$0xff]  ;;  %v12580_v31 = vld [vmem:[#allocation132_spill] sm:$0xff]  ;;  %v12582_v22 = vld [vmem:[#allocation38_spill] sm:$0xff] }
 0x4b8   :  { %5777 = vst [vmem:[%s11762_s6 + $0x40] sm:$0xff] %v5721_v44  ;;  %v5722_v38 = vmax.f32 %v5658_v6, 0.0  ;;  %v5661_v7 = vadd.f32 %v5589_v12, %v5501_v1  ;;  %v5502_v24 = vadd.f32 %v5257_v18, %v4899_v11  ;;  %v5418_v48 = vpop.f32.mrf.mxu1  ;;  %v4906_v49 = vadd.f32 %v12575_v23, %v12574_v3  ;;  %v12583_v11 = vld [vmem:[#allocation50_spill] sm:$0xff]  ;;  %v12590_v43 = vld [vmem:[#allocation101_spill] sm:$0xff]  ;;  %v12592_v23 = vld [vmem:[#allocation39_spill] sm:$0xff] }
 0x4b9   :  { %6283 = vst [vmem:[%s11762_s6 + $0x140] sm:$0xff] %v5723_v9  ;;  %v5724_v17 = vmax.f32 %v5660_v45, 0.0  ;;  %v5663_v21 = vadd.f32 %v5589_v12, %v5503_v50  ;;  %v5504_v25 = vadd.f32 %v5418_v48, %v4901_v33  ;;  %v5261_v52 = vpop.f32.mrf.mxu0  ;;  %v4908_v20 = vadd.f32 %v12577_v57, %v12576_v54  ;;  %v12584_v33 = vld [vmem:[#allocation102_spill] sm:$0xff]  ;;  %v12585_v9 = vld [vmem:[#allocation28_spill] sm:$0xff]  ;;  %v12594_v57 = vld [vmem:[#allocation103_spill] sm:$0xff] }
 0x4ba   :  { %5778 = vst [vmem:[%s11762_s6 + $0x48] sm:$0xff] %v5722_v38  ;;  %v5725_v15 = vmax.f32 %v5661_v7, 0.0  ;;  %v5662_v4 = vadd.f32 %v5589_v12, %v5502_v24  ;;  %v5505_v29 = vadd.f32 %v5261_v52, %v4902_v27  ;;  %v5422_v46 = vpop.f32.mrf.mxu1  ;;  %v4907_v32 = vadd.f32 %v12579_v62, %v12578_v41  ;;  %v12586_v7 = vld [vmem:[#allocation85_spill] sm:$0xff]  ;;  %v12587_v24 = vld [vmem:[#allocation78_spill] sm:$0xff]  ;;  %v5604_v52 = vpop.permute.xlu0 %5603 }
 0x4bb   :  { %6284 = vst [vmem:[%s11762_s6 + $0x148] sm:$0xff] %v5724_v17  ;;  %v5727_v40 = vmax.f32 %v5663_v21, 0.0  ;;  %v5664_v55 = vadd.f32 %v5589_v12, %v5504_v25  ;;  %v5507_v59 = vadd.f32 %v5422_v46, %v4904_v30  ;;  %v5263_v16 = vpop.f32.mrf.mxu0  ;;  %v4909_v63 = vadd.f32 %v12581_v13, %v12580_v31  ;;  %v5609_v62 = vpop.permute.xlu1 %5608  ;;  %v12598_v13 = vld [vmem:[#allocation137_spill] sm:$0xff] }
 0x4bc   :  { %5779 = vst [vmem:[%s11762_s6 + $0x50] sm:$0xff] %v5725_v15  ;;  %v5726_v53 = vmax.f32 %v5662_v4, 0.0  ;;  %v5665_v0 = vadd.f32 %v5594_v58, %v5505_v29  ;;  %v5506_v34 = vadd.f32 %v5263_v16, %v4903_v19  ;;  %v5424_v60 = vpop.f32.mrf.mxu1  ;;  %v4910_v44 = vadd.f32 %v12583_v11, %v12582_v22  ;;  %v12588_v19 = vld [vmem:[#allocation84_spill] sm:$0xff]  ;;  %v12589_v15 = vld [vmem:[#allocation130_spill] sm:$0xff]  ;;  %v12600_v11 = vld [vmem:[#allocation9_spill] sm:$0xff] }
 0x4bd   :  { %6285 = vst [vmem:[%s11762_s6 + $0x150] sm:$0xff] %v5727_v40  ;;  %v5728_v28 = vmax.f32 %v5664_v55, 0.0  ;;  %v5667_v56 = vadd.f32 %v5594_v58, %v5507_v59  ;;  %v5508_v42 = vadd.f32 %v5424_v60, %v4905_v61  ;;  %v5267_v39 = vpop.f32.mrf.mxu0  ;;  %v4912_v45 = vadd.f32 %v12585_v9, %v12584_v33  ;;  %v12591_v61 = vld [vmem:[#allocation54_spill] sm:$0xff] }
 0x4be   :  { %5780 = vst [vmem:[%s11762_s6 + $0x58] sm:$0xff] %v5726_v53  ;;  %v5729_v37 = vmax.f32 %v5665_v0, 0.0  ;;  %v5666_v36 = vadd.f32 %v5594_v58, %v5506_v34  ;;  %v5509_v51 = vadd.f32 %v5267_v39, %v4906_v49  ;;  %v5428_v5 = vpop.f32.mrf.mxu1  ;;  %v4911_v48 = vadd.f32 %v12587_v24, %v12586_v7  ;;  %v12593_v49 = vld [vmem:[#allocation51_spill] sm:$0xff]  ;;  %v12602_v9 = vld [vmem:[#allocation42_spill] sm:$0xff]  ;;  %v5614_v24 = vpop.permute.xlu0 %5613 }
 0x4bf   :  { %6286 = vst [vmem:[%s11762_s6 + $0x158] sm:$0xff] %v5728_v28  ;;  %v5731_v2 = vmax.f32 %v5667_v56, 0.0  ;;  %v5668_v10 = vadd.f32 %v5594_v58, %v5508_v42  ;;  %v5511_v26 = vadd.f32 %v5428_v5, %v4908_v20  ;;  %v5269_v8 = vpop.f32.mrf.mxu0  ;;  %v4913_v4 = vadd.f32 %v12589_v15, %v12588_v19  ;;  %v12595_v20 = vld [vmem:[#allocation79_spill] sm:$0xff]  ;;  %v12606_v15 = vld [vmem:[#allocation92_spill] sm:$0xff] }
 0x4c0   :  { %5781 = vst [vmem:[%s11762_s6 + $0x60] sm:$0xff] %v5729_v37  ;;  %v5730_v6 = vmax.f32 %v5666_v36, 0.0  ;;  %v5669_v1 = vadd.f32 %v5599_v14, %v5509_v51  ;;  %v5510_v35 = vadd.f32 %v5269_v8, %v4907_v32  ;;  %v5430_v12 = vpop.f32.mrf.mxu1  ;;  %v4914_v40 = vadd.f32 %v12591_v61, %v12590_v43  ;;  %v12596_v32 = vld [vmem:[#allocation90_spill] sm:$0xff]  ;;  %v12597_v37 = vld [vmem:[#allocation131_spill] sm:$0xff] }
 0x4c1   :  { %6287 = vst [vmem:[%s11762_s6 + $0x160] sm:$0xff] %v5731_v2  ;;  %v5732_v50 = vmax.f32 %v5668_v10, 0.0  ;;  %v5671_v18 = vadd.f32 %v5599_v14, %v5511_v26  ;;  %v5512_v27 = vadd.f32 %v5430_v12, %v4909_v63  ;;  %v5273_v38 = vpop.f32.mrf.mxu0  ;;  %v4916_v53 = vadd.f32 %v12593_v49, %v12592_v23  ;;  %v12599_v63 = vld [vmem:[#allocation119_spill] sm:$0xff]  ;;  %v12610_v49 = vld [vmem:[#allocation10_spill] sm:$0xff] }
 0x4c2   :  { %5782 = vst [vmem:[%s11762_s6 + $0x68] sm:$0xff] %v5730_v6  ;;  %v5733_v30 = vmax.f32 %v5669_v1, 0.0  ;;  %v5670_v17 = vadd.f32 %v5599_v14, %v5510_v35  ;;  %v5513_v21 = vadd.f32 %v5273_v38, %v4910_v44  ;;  %v5434_v25 = vpop.f32.mrf.mxu1  ;;  %v4915_v28 = vadd.f32 %v12595_v20, %v12594_v57  ;;  %v12601_v44 = vld [vmem:[#allocation116_spill] sm:$0xff]  ;;  %v12608_v61 = vld [vmem:[#allocation139_spill] sm:$0xff]  ;;  %v5619_v20 = vpop.permute.xlu1 %5618 }
 0x4c3   :  { %6288 = vst [vmem:[%s11762_s6 + $0x168] sm:$0xff] %v5732_v50  ;;  %v5735_v29 = vmax.f32 %v5671_v18, 0.0  ;;  %v5672_v46 = vadd.f32 %v5599_v14, %v5512_v27  ;;  %v5515_v58 = vadd.f32 %v5434_v25, %v4912_v45  ;;  %v5275_v47 = vpop.f32.mrf.mxu0  ;;  %v4917_v36 = vadd.f32 %v12597_v37, %v12596_v32  ;;  %v12603_v45 = vld [vmem:[#allocation61_spill] sm:$0xff]  ;;  %v12614_v37 = vld [vmem:[#allocation94_spill] sm:$0xff] }
 0x4c4   :  { %5783 = vst [vmem:[%s11762_s6 + $0x70] sm:$0xff] %v5733_v30  ;;  %v5734_v55 = vmax.f32 %v5670_v17, 0.0  ;;  %v5673_v59 = vadd.f32 %v5604_v52, %v5513_v21  ;;  %v5514_v16 = vadd.f32 %v5275_v47, %v4911_v48  ;;  %v5436_v3 = vpop.f32.mrf.mxu1  ;;  %v4918_v2 = vadd.f32 %v12599_v63, %v12598_v13  ;;  %v12604_v48 = vld [vmem:[#allocation106_spill] sm:$0xff]  ;;  %v12605_v30 = vld [vmem:[#allocation64_spill] sm:$0xff]  ;;  %v12616_v63 = vld [vmem:[#allocation97_spill] sm:$0xff] }
 0x4c5   :  { %6289 = vst [vmem:[%s11762_s6 + $0x170] sm:$0xff] %v5735_v29  ;;  %v5736_v0 = vmax.f32 %v5672_v46, 0.0  ;;  %v5675_v34 = vadd.f32 %v5604_v52, %v5515_v58  ;;  %v5516_v60 = vadd.f32 %v5436_v3, %v4913_v4  ;;  %v5279_v54 = vpop.f32.mrf.mxu0  ;;  %v4920_v6 = vadd.f32 %v12601_v44, %v12600_v11  ;;  %v12607_v4 = vld [vmem:[#allocation82_spill] sm:$0xff]  ;;  %v12618_v44 = vld [vmem:[#allocation16_spill] sm:$0xff] }
 0x4c6   :  { %5784 = vst [vmem:[%s11762_s6 + $0x78] sm:$0xff] %v5734_v55  ;;  %v5737_v56 = vmax.f32 %v5673_v59, 0.0  ;;  %v5674_v42 = vadd.f32 %v5604_v52, %v5514_v16  ;;  %v5517_v39 = vadd.f32 %v5279_v54, %v4914_v40  ;;  %v5440_v41 = vpop.f32.mrf.mxu1  ;;  %v4919_v50 = vadd.f32 %v12603_v45, %v12602_v9  ;;  %v12609_v40 = vld [vmem:[#allocation133_spill] sm:$0xff]  ;;  %v5624_v45 = vpop.permute.xlu0 %5623 }
 0x4c7   :  { %6290 = vst [vmem:[%s11762_s6 + $0x178] sm:$0xff] %v5736_v0  ;;  %v5739_v51 = vmax.f32 %v5675_v34, 0.0  ;;  %v5676_v5 = vadd.f32 %v5604_v52, %v5516_v60  ;;  %v5519_v14 = vadd.f32 %v5440_v41, %v4916_v53  ;;  %v5281_v31 = vpop.f32.mrf.mxu0  ;;  %v4921_v17 = vadd.f32 %v12605_v30, %v12604_v48  ;;  %v12611_v53 = vld [vmem:[#allocation55_spill] sm:$0xff] }
 0x4c8   :  { %5785 = vst [vmem:[%s11762_s6 + $0x80] sm:$0xff] %v5737_v56  ;;  %v5738_v10 = vmax.f32 %v5674_v42, 0.0  ;;  %v5677_v26 = vadd.f32 %v5609_v62, %v5517_v39  ;;  %v5518_v8 = vadd.f32 %v5281_v31, %v4915_v28  ;;  %v5442_v22 = vpop.f32.mrf.mxu1  ;;  %v4922_v29 = vadd.f32 %v12607_v4, %v12606_v15  ;;  %v12612_v28 = vld [vmem:[#allocation33_spill] sm:$0xff]  ;;  %v12613_v56 = vld [vmem:[#allocation44_spill] sm:$0xff]  ;;  %v12622_v30 = vld [vmem:[#allocation71_spill] sm:$0xff] }
 0x4c9   :  { %6291 = vst [vmem:[%s11762_s6 + $0x180] sm:$0xff] %v5739_v51  ;;  %v5740_v1 = vmax.f32 %v5676_v5, 0.0  ;;  %v5679_v35 = vadd.f32 %v5609_v62, %v5519_v14  ;;  %v5520_v12 = vadd.f32 %v5442_v22, %v4917_v36  ;;  %v5285_v33 = vpop.f32.mrf.mxu0  ;;  %v4924_v55 = vadd.f32 %v12609_v40, %v12608_v61  ;;  %v12615_v36 = vld [vmem:[#allocation83_spill] sm:$0xff]  ;;  %v12624_v4 = vld [vmem:[#allocation128_spill] sm:$0xff] }
 0x4ca   :  { %5786 = vst [vmem:[%s11762_s6 + $0x88] sm:$0xff] %v5738_v10  ;;  %v5741_v18 = vmax.f32 %v5677_v26, 0.0  ;;  %v5678_v27 = vadd.f32 %v5609_v62, %v5518_v8  ;;  %v5521_v38 = vadd.f32 %v5285_v33, %v4918_v2  ;;  %v5446_v7 = vpop.f32.mrf.mxu1  ;;  %v4923_v0 = vadd.f32 %v12611_v53, %v12610_v49  ;;  %v12617_v2 = vld [vmem:[#allocation134_spill] sm:$0xff]  ;;  %v12626_v40 = vld [vmem:[#allocation31_spill] sm:$0xff]  ;;  %v5629_v53 = vpop.permute.xlu1 %5628 }
 0x4cb   :  { %6292 = vst [vmem:[%s11762_s6 + $0x188] sm:$0xff] %v5740_v1  ;;  %v5743_v21 = vmax.f32 %v5679_v35, 0.0  ;;  %v5680_v25 = vadd.f32 %v5609_v62, %v5520_v12  ;;  %v5523_v52 = vadd.f32 %v5446_v7, %v4920_v6  ;;  %v5287_v19 = vpop.f32.mrf.mxu0  ;;  %v4925_v42 = vadd.f32 %v12613_v56, %v12612_v28  ;;  %v12619_v6 = vld [vmem:[#allocation120_spill] sm:$0xff]  ;;  %v12630_v56 = vld [vmem:[#allocation30_spill] sm:$0xff] }
 0x4cc   :  { %5787 = vst [vmem:[%s11762_s6 + $0x90] sm:$0xff] %v5741_v18  ;;  %v5742_v46 = vmax.f32 %v5678_v27, 0.0  ;;  %v5681_v58 = vadd.f32 %v5614_v24, %v5521_v38  ;;  %v5522_v47 = vadd.f32 %v5287_v19, %v4919_v50  ;;  %v5448_v43 = vpop.f32.mrf.mxu1  ;;  %v4926_v51 = vadd.f32 %v12615_v36, %v12614_v37  ;;  %v12620_v50 = vld [vmem:[#allocation40_spill] sm:$0xff]  ;;  %v12621_v18 = vld [vmem:[#allocation105_spill] sm:$0xff]  ;;  %v12632_v36 = vld [vmem:[#allocation107_spill] sm:$0xff] }
 0x4cd   :  { %6293 = vst [vmem:[%s11762_s6 + $0x190] sm:$0xff] %v5743_v21  ;;  %v5744_v59 = vmax.f32 %v5680_v25, 0.0  ;;  %v5683_v16 = vadd.f32 %v5614_v24, %v5523_v52  ;;  %v5524_v3 = vadd.f32 %v5448_v43, %v4921_v17  ;;  %v5291_v23 = vpop.f32.mrf.mxu0  ;;  %v4928_v10 = vadd.f32 %v12617_v2, %v12616_v63  ;;  %v12623_v17 = vld [vmem:[#allocation69_spill] sm:$0xff]  ;;  %v12634_v2 = vld [vmem:[#allocation104_spill] sm:$0xff] }
 0x4ce   :  { %5788 = vst [vmem:[%s11762_s6 + $0x98] sm:$0xff] %v5742_v46  ;;  %v5745_v34 = vmax.f32 %v5681_v58, 0.0  ;;  %v5682_v60 = vadd.f32 %v5614_v24, %v5522_v47  ;;  %v5525_v54 = vadd.f32 %v5291_v23, %v4922_v29  ;;  %v5452_v57 = vpop.f32.mrf.mxu1  ;;  %v4927_v1 = vadd.f32 %v12619_v6, %v12618_v44  ;;  %v12625_v29 = vld [vmem:[#allocation72_spill] sm:$0xff]  ;;  %v5634_v6 = vpop.permute.xlu0 %5633 }
 0x4cf   :  { %6294 = vst [vmem:[%s11762_s6 + $0x198] sm:$0xff] %v5744_v59  ;;  %v5747_v39 = vmax.f32 %v5683_v16, 0.0  ;;  %v5684_v41 = vadd.f32 %v5614_v24, %v5524_v3  ;;  %v5527_v62 = vadd.f32 %v5452_v57, %v4924_v55  ;;  %v5293_v32 = vpop.f32.mrf.mxu0  ;;  %v4929_v27 = vadd.f32 %v12621_v18, %v12620_v50  ;;  %v12627_v55 = vld [vmem:[#allocation86_spill] sm:$0xff]  ;;  %v12638_v18 = vld [vmem:[#allocation47_spill] sm:$0xff] }
 0x4d0   :  { %5789 = vst [vmem:[%s11762_s6 + $0xa0] sm:$0xff] %v5745_v34  ;;  %v5746_v5 = vmax.f32 %v5682_v60, 0.0  ;;  %v5685_v14 = vadd.f32 %v5619_v20, %v5525_v54  ;;  %v5526_v31 = vadd.f32 %v5293_v32, %v4923_v0  ;;  %v5454_v13 = vpop.f32.mrf.mxu1  ;;  %v4930_v21 = vadd.f32 %v12623_v17, %v12622_v30  ;;  %v12628_v0 = vld [vmem:[#allocation41_spill] sm:$0xff]  ;;  %v12629_v34 = vld [vmem:[#allocation138_spill] sm:$0xff] }
 0x4d1   :  { %6295 = vst [vmem:[%s11762_s6 + $0x1a0] sm:$0xff] %v5747_v39  ;;  %v5748_v26 = vmax.f32 %v5684_v41, 0.0  ;;  %v5687_v8 = vadd.f32 %v5619_v20, %v5527_v62  ;;  %v5528_v22 = vadd.f32 %v5454_v13, %v4925_v42  ;;  %v5297_v11 = vpop.f32.mrf.mxu0  ;;  %v4932_v46 = vadd.f32 %v12625_v29, %v12624_v4  ;;  %v12631_v42 = vld [vmem:[#allocation59_spill] sm:$0xff]  ;;  %v12640_v17 = vld [vmem:[#allocation74_spill] sm:$0xff] }
 0x4d2   :  { %5790 = vst [vmem:[%s11762_s6 + $0xa8] sm:$0xff] %v5746_v5  ;;  %v5749_v35 = vmax.f32 %v5685_v14, 0.0  ;;  %v5686_v12 = vadd.f32 %v5619_v20, %v5526_v31  ;;  %v5529_v33 = vadd.f32 %v5297_v11, %v4926_v51  ;;  %v5458_v9 = vpop.f32.mrf.mxu1  ;;  %v4931_v59 = vadd.f32 %v12627_v55, %v12626_v40  ;;  %v12633_v51 = vld [vmem:[#allocation58_spill] sm:$0xff]  ;;  %v12642_v29 = vld [vmem:[#allocation23_spill] sm:$0xff]  ;;  %v5639_v55 = vpop.permute.xlu1 %5638 }
 0x4d3   :  { %6296 = vst [vmem:[%s11762_s6 + $0x1a8] sm:$0xff] %v5748_v26  ;;  %v5751_v38 = vmax.f32 %v5687_v8, 0.0  ;;  %v5688_v7 = vadd.f32 %v5619_v20, %v5528_v22  ;;  %v5531_v24 = vadd.f32 %v5458_v9, %v4928_v10  ;;  %v5299_v48 = vpop.f32.mrf.mxu0  ;;  %v4933_v60 = vadd.f32 %v12629_v34, %v12628_v0  ;;  %v12635_v10 = vld [vmem:[#allocation87_spill] sm:$0xff] }
 0x4d4   :  { %5791 = vst [vmem:[%s11762_s6 + $0xb0] sm:$0xff] %v5749_v35  ;;  %v5750_v25 = vmax.f32 %v5686_v12, 0.0  ;;  %v5689_v52 = vadd.f32 %v5624_v45, %v5529_v33  ;;  %v5530_v19 = vadd.f32 %v5299_v48, %v4927_v1  ;;  %v5460_v15 = vpop.f32.mrf.mxu1  ;;  %v4934_v39 = vadd.f32 %v12631_v42, %v12630_v56  ;;  %v12636_v1 = vld [vmem:[#allocation115_spill] sm:$0xff]  ;;  %v12637_v35 = vld [vmem:[#allocation21_spill] sm:$0xff] }
 0x4d5   :  { %6297 = vst [vmem:[%s11762_s6 + $0x1b0] sm:$0xff] %v5751_v38  ;;  %v5752_v58 = vmax.f32 %v5688_v7, 0.0  ;;  %v5691_v47 = vadd.f32 %v5624_v45, %v5531_v24  ;;  %v5532_v43 = vadd.f32 %v5460_v15, %v4929_v27  ;;  %v5303_v61 = vpop.f32.mrf.mxu0  ;;  %v4936_v5 = vadd.f32 %v12633_v51, %v12632_v36  ;;  %v12639_v27 = vld [vmem:[#allocation122_spill] sm:$0xff] }
 0x4d6   :  { %5792 = vst [vmem:[%s11762_s6 + $0xb8] sm:$0xff] %v5750_v25  ;;  %v5753_v16 = vmax.f32 %v5689_v52, 0.0  ;;  %v5690_v3 = vadd.f32 %v5624_v45, %v5530_v19  ;;  %v5533_v23 = vadd.f32 %v5303_v61, %v4930_v21  ;;  %v5464_v49 = vpop.f32.mrf.mxu1  ;;  %v4935_v26 = vadd.f32 %v12635_v10, %v12634_v2  ;;  %v12641_v21 = vld [vmem:[#allocation121_spill] sm:$0xff] }
 0x4d7   :  { %6298 = vst [vmem:[%s11762_s6 + $0x1b8] sm:$0xff] %v5752_v58  ;;  %v5755_v54 = vmax.f32 %v5691_v47, 0.0  ;;  %v5692_v57 = vadd.f32 %v5624_v45, %v5532_v43  ;;  %v5535_v20 = vadd.f32 %v5464_v49, %v4932_v46  ;;  %v5305_v28 = vpop.f32.mrf.mxu0  ;;  %v4937_v12 = vadd.f32 %v12637_v35, %v12636_v1  ;;  %v12643_v46 = vld [vmem:[#allocation136_spill] sm:$0xff] }
 0x4d8   :  { %5793 = vst [vmem:[%s11762_s6 + $0xc0] sm:$0xff] %v5753_v16  ;;  %v5754_v41 = vmax.f32 %v5690_v3, 0.0  ;;  %v5693_v62 = vadd.f32 %v5629_v53, %v5533_v23  ;;  %v5534_v32 = vadd.f32 %v5305_v28, %v4931_v59  ;;  %v5466_v37 = vpop.f32.mrf.mxu1  ;;  %v4938_v38 = vadd.f32 %v12639_v27, %v12638_v18  ;;  %v12644_v59 = vld [vmem:[#allocation75_spill] sm:$0xff]  ;;  %v12645_v16 = vld [vmem:[#allocation18_spill] sm:$0xff] }
 0x4d9   :  { %6299 = vst [vmem:[%s11762_s6 + $0x1c0] sm:$0xff] %v5755_v54  ;;  %v5756_v14 = vmax.f32 %v5692_v57, 0.0  ;;  %v5695_v31 = vadd.f32 %v5629_v53, %v5535_v20  ;;  %v5536_v13 = vadd.f32 %v5466_v37, %v4933_v60  ;;  %v5309_v63 = vpop.f32.mrf.mxu0  ;;  %v4940_v25 = vadd.f32 %v12641_v21, %v12640_v17 }
 0x4da   :  { %5794 = vst [vmem:[%s11762_s6 + $0xc8] sm:$0xff] %v5754_v41  ;;  %v5757_v8 = vmax.f32 %v5693_v62, 0.0  ;;  %v5694_v22 = vadd.f32 %v5629_v53, %v5534_v32  ;;  %v5537_v11 = vadd.f32 %v5309_v63, %v4934_v39  ;;  %v5470_v44 = vpop.f32.mrf.mxu1  ;;  %v4939_v58 = vadd.f32 %v12643_v46, %v12642_v29 }
 0x4db   :  { %6300 = vst [vmem:[%s11762_s6 + $0x1c8] sm:$0xff] %v5756_v14  ;;  %v5759_v33 = vmax.f32 %v5695_v31, 0.0  ;;  %v5696_v9 = vadd.f32 %v5629_v53, %v5536_v13  ;;  %v5539_v45 = vadd.f32 %v5470_v44, %v4936_v5  ;;  %v5311_v50 = vpop.f32.mrf.mxu0  ;;  %v4941_v3 = vadd.f32 %v12645_v16, %v12644_v59 }
 0x4dc   :  { %5795 = vst [vmem:[%s11762_s6 + $0xd0] sm:$0xff] %v5757_v8  ;;  %v5758_v7 = vmax.f32 %v5694_v22, 0.0  ;;  %v5697_v24 = vadd.f32 %v5634_v6, %v5537_v11  ;;  %v5538_v48 = vadd.f32 %v5311_v50, %v4935_v26  ;;  %v5472_v30 = vpop.f32.mrf.mxu1 }
 0x4dd   :  { %6301 = vst [vmem:[%s11762_s6 + $0x1d0] sm:$0xff] %v5759_v33  ;;  %v5760_v52 = vmax.f32 %v5696_v9, 0.0  ;;  %v5699_v19 = vadd.f32 %v5634_v6, %v5539_v45  ;;  %v5540_v15 = vadd.f32 %v5472_v30, %v4937_v12  ;;  %v5315_v4 = vpop.f32.mrf.mxu0 }
 0x4de   :  { %5796 = vst [vmem:[%s11762_s6 + $0xd8] sm:$0xff] %v5758_v7  ;;  %v5761_v47 = vmax.f32 %v5697_v24, 0.0  ;;  %v5698_v43 = vadd.f32 %v5634_v6, %v5538_v48  ;;  %v5541_v61 = vadd.f32 %v5315_v4, %v4938_v38  ;;  %v5476_v40 = vpop.f32.mrf.mxu1 }
 0x4df   :  { %6302 = vst [vmem:[%s11762_s6 + $0x1d8] sm:$0xff] %v5760_v52  ;;  %v5763_v23 = vmax.f32 %v5699_v19, 0.0  ;;  %v5700_v49 = vadd.f32 %v5634_v6, %v5540_v15  ;;  %v5543_v53 = vadd.f32 %v5476_v40, %v4940_v25  ;;  %v5317_v0 = vpop.f32.mrf.mxu0 }
 0x4e0   :  { %5797 = vst [vmem:[%s11762_s6 + $0xe0] sm:$0xff] %v5761_v47  ;;  %v5762_v34 = vmax.f32 %v5698_v43, 0.0  ;;  %v5701_v60 = vadd.f32 %v5639_v55, %v5541_v61  ;;  %v5542_v54 = vadd.f32 %v5317_v0, %v4939_v58  ;;  %v5478_v57 = vpop.f32.mrf.mxu1 }
 0x4e1   :  { %6303 = vst [vmem:[%s11762_s6 + $0x1e0] sm:$0xff] %v5763_v23  ;;  %v5764_v20 = vmax.f32 %v5700_v49, 0.0  ;;  %v5703_v28 = vadd.f32 %v5639_v55, %v5543_v53  ;;  %v5544_v56 = vadd.f32 %v5478_v57, %v4941_v3 }
 0x4e2   :  { %5798 = vst [vmem:[%s11762_s6 + $0xe8] sm:$0xff] %v5762_v34  ;;  %v5765_v42 = vmax.f32 %v5701_v60, 0.0  ;;  %v5702_v39 = vadd.f32 %v5639_v55, %v5542_v54 }
 0x4e3   :  { %6304 = vst [vmem:[%s11762_s6 + $0x1e8] sm:$0xff] %v5764_v20  ;;  %v5767_v41 = vmax.f32 %v5703_v28, 0.0  ;;  %v5704_v62 = vadd.f32 %v5639_v55, %v5544_v56 }
 0x4e4   :  { %5799 = vst [vmem:[%s11762_s6 + $0xf0] sm:$0xff] %v5765_v42  ;;  %v5766_v32 = vmax.f32 %v5702_v39, 0.0 }
 0x4e5   :  { %6305 = vst [vmem:[%s11762_s6 + $0x1f0] sm:$0xff] %v5767_v41  ;;  %v5768_v37 = vmax.f32 %v5704_v62, 0.0 }
 0x4e6   :  { %5800 = vst [vmem:[%s11762_s6 + $0xf8] sm:$0xff] %v5766_v32 }
 0x4e7   :  { %6306 = vst [vmem:[%s11762_s6 + $0x1f8] sm:$0xff] %v5768_v37 }
 0x4e8   :  { %5838 = vsyncpa [#allocation3], 1 }

</bundles_post_ra>
